<compile_context>
chip_gen: v7x
topology: tpu7x:2x2x1
jax: 0.10.0
libtpu: 0.0.40
codegen_flags: <defaults>
</compile_context>

<pallas_src>
import jax
import jax.numpy as jnp
from jax.experimental import pallas as pl
from jax.experimental.pallas import tpu as pltpu

B_BITS = 4                  # Encoder.B / Decoder.B
H, W = 16, 32               # fixed by the architecture (view(-1, 2, 16, 32))
HW = H * W                  # 512 per-sample spatial size (multiple of 128)
_W_SHIFT = 5                # log2(W)

# 3x3 tap offsets in flattened (row-major) spatial coordinates.
_OFFSETS = tuple(di * W + dj for di in (-1, 0, 1) for dj in (-1, 0, 1))

# Conv layers in execution order: (cin, cout).
_CONV_LAYERS = ((2, 2), (2, 2),
                (2, 8), (8, 16), (16, 2),
                (2, 8), (8, 16), (16, 2),
                (2, 8), (8, 16), (16, 2),
                (2, 2))
_BIAS_COL = 9 * 16          # bias column inside the packed conv array
_CONV_ROW_OFF = []
_r = 0
for _cin, _cout in _CONV_LAYERS:
    _CONV_ROW_OFF.append(_r)
    _r += -(-_cout // 8) * 8            # 8-align each layer's row block
_CONV_ROWS = _r
_CONV_ROW_OFF = tuple(_CONV_ROW_OFF)


# ------------------------------ in-kernel helpers ----------------------------

def _sigmoid(x):
    # Exact divide: used where fidelity matters (quantizer input, final output).
    return 1.0 / (1.0 + jnp.exp(-x))


def _sigmoid_approx(x):
    # exp + approx reciprocal both ride the EUP slot (internal layer only).
    return pl.reciprocal(1.0 + jnp.exp(-x), approx=True)


# --------------------------------- the kernel --------------------------------

def _autoencoder_kernel(x_ref, mask_ref, conv_ref, efc_ref, dfc_ref,
                        o_ref, fcin_ref, cm_ref, col_ref):
    n = x_ref.shape[1]                  # BLOCK_B * HW (lane dense, mult of 128)
    bb = n // HW

    def conv3x3(a, li):
        """3x3 conv (stride 1, pad 1) as ONE GEMM on channel-major a:(cin, n)."""
        cin, cout = _CONV_LAYERS[li]
        r0 = _CONV_ROW_OFF[li]
        # Build the (9*cin, n) im2col block in the VMEM scratch: 9 rolled copies
        # of `a`, boundary taps zeroed by the precomputed (1, n) masks (they
        # also kill any cross-sample / wraparound contamination of the roll).
        for k, off in enumerate(_OFFSETS):
            r = k * cin
            if off == 0:
                col_ref[r:r + cin, :] = a
            else:
                m = k if k < 4 else k - 1
                col_ref[r:r + cin, :] = (
                    pltpu.roll(a, (-off) % n, axis=1) * mask_ref[m:m + 1, :])
        w = conv_ref[r0:r0 + cout, 0:9 * cin]                   # (cout, 9*cin)
        b = conv_ref[r0:r0 + cout, _BIAS_COL:_BIAS_COL + 1]     # (cout, 1)
        return jnp.dot(w, col_ref[0:9 * cin, :],
                       preferred_element_type=jnp.float32) + b

    # ------------------------------- Encoder ---------------------------------
    a = x_ref[...]                                             # (2, n)
    a = jnp.maximum(conv3x3(a, 0), 0.0)
    a = jnp.maximum(conv3x3(a, 1), 0.0)

    # channel-major -> (bb, 2*HW): batch on sublanes so the FC is a real GEMM.
    for s in range(bb):
        fcin_ref[s:s + 1, 0:HW] = a[0:1, s * HW:(s + 1) * HW]
        fcin_ref[s:s + 1, HW:2 * HW] = a[1:2, s * HW:(s + 1) * HW]

    fw = efc_ref[0:2 * HW, :]                                  # (1024, nfb)
    fb = efc_ref[2 * HW:2 * HW + 1, :]                         # (1, nfb)
    z = _sigmoid(jnp.dot(fcin_ref[...], fw,
                         preferred_element_type=jnp.float32) + fb)  # (bb, nfb)

    # quantize -> dequantize: exact Num2Bit/Bit2Num composition (low B bits of
    # the uint8 code, MSB first), including the reference's uint8 wraparound.
    step = float(2 ** B_BITS)
    q = jnp.round(z * step - 0.5).astype(jnp.int32)
    deq = ((q & (2 ** B_BITS - 1)).astype(jnp.float32) + 0.5) / step

    # ------------------------------- Decoder ---------------------------------
    nfb = dfc_ref.shape[0] - 1
    dw = dfc_ref[0:nfb, :]                                     # (nfb, 1024)
    db = dfc_ref[nfb:nfb + 1, :]                               # (1, 1024)
    dec = _sigmoid_approx(jnp.dot(deq, dw,
                                  preferred_element_type=jnp.float32) + db)

    # (bb, 2*HW) -> channel-major (2, n) for the decoder convs.
    for s in range(bb):
        cm_ref[0:1, s * HW:(s + 1) * HW] = dec[s:s + 1, 0:HW]
        cm_ref[1:2, s * HW:(s + 1) * HW] = dec[s:s + 1, HW:2 * HW]
    out = cm_ref[...]                                          # (2, n)

    for i in range(3):                                         # residual blocks
        t = jnp.maximum(conv3x3(out, 2 + 3 * i), 0.0)
        t = jnp.maximum(conv3x3(t, 3 + 3 * i), 0.0)
        t = jnp.maximum(conv3x3(t, 4 + 3 * i), 0.0)
        out = out + t                                          # fused residual

    o_ref[...] = _sigmoid(conv3x3(out, 11)).astype(o_ref.dtype)


# ------------------------------- parameters ----------------------------------

def init_params(feedback_bits, key):
    """Random params packed into the 3 arrays the kernel consumes."""
    assert feedback_bits % B_BITS == 0
    nfb = feedback_bits // B_BITS
    keys = iter(jax.random.split(key, 32))

    conv_pack = jnp.zeros((_CONV_ROWS, _BIAS_COL + 1), jnp.float32)
    for li, (cin, cout) in enumerate(_CONV_LAYERS):
        w = 0.1 * jax.random.normal(next(keys), (cout, cin, 3, 3), jnp.float32)
        b = 0.1 * jax.random.normal(next(keys), (cout,), jnp.float32)
        # PyTorch (cout, cin, kh, kw) -> (cout, (kh, kw, cin)) matching im2col.
        wf = jnp.transpose(w, (0, 2, 3, 1)).reshape(cout, 9 * cin)
        r0 = _CONV_ROW_OFF[li]
        conv_pack = conv_pack.at[r0:r0 + cout, 0:9 * cin].set(wf)
        conv_pack = conv_pack.at[r0:r0 + cout, _BIAS_COL].set(b)

    # encoder fc Linear(1024, nfb): store W^T with bias appended as last row.
    w = 0.1 * jax.random.normal(next(keys), (nfb, 2 * HW), jnp.float32)
    b = 0.1 * jax.random.normal(next(keys), (nfb,), jnp.float32)
    efc = jnp.concatenate([w.T, b.reshape(1, nfb)], axis=0)        # (1025, nfb)

    # decoder fc Linear(nfb, 1024): store W^T with bias appended as last row.
    w = 0.1 * jax.random.normal(next(keys), (2 * HW, nfb), jnp.float32)
    b = 0.1 * jax.random.normal(next(keys), (2 * HW,), jnp.float32)
    dfc = jnp.concatenate([w.T, b.reshape(1, 2 * HW)], axis=0)     # (nfb+1, 1024)

    return [conv_pack, efc, dfc]


# --------------------------------- forward -----------------------------------

def _boundary_masks(n):
    """(8, n) f32 validity masks for the 8 non-center taps (512-periodic)."""
    idx = jnp.arange(n, dtype=jnp.int32)[None, :]
    jj = idx & (W - 1)                       # column within the 16x32 image
    ii = (idx >> _W_SHIFT) & (H - 1)         # row within the 16x32 image
    rows = []
    for di in (-1, 0, 1):
        for dj in (-1, 0, 1):
            if di == 0 and dj == 0:
                continue
            ok = ((ii + di >= 0) & (ii + di <= H - 1) &
                  (jj + dj >= 0) & (jj + dj <= W - 1))
            rows.append(ok.astype(jnp.float32))
    return jnp.concatenate(rows, axis=0)


def _pick_block_b(batch):
    # >= 2 grid steps when the batch permits (v7x: 2 TensorCores per chip);
    # <= 8 samples/step keeps the largest im2col scratch (144, 8*512) f32 at
    # ~2.3 MiB, comfortably inside v5e's 16 MiB default scoped VMEM.
    return max(1, min(8, (batch + 1) // 2))


def autoencoder_forward(x_nchw, params):
    conv_pack, efc, dfc = params
    bn = x_nchw.shape[0]
    bb = _pick_block_b(bn)
    nblk = -(-bn // bb)
    bp = nblk * bb
    if bp != bn:                            # pad batch to whole blocks
        x_nchw = jnp.pad(x_nchw, ((0, bp - bn), (0, 0), (0, 0), (0, 0)))
    n = bb * HW

    # NCHW -> channel-major (2, B*HW): lane-dense (multiple of 128).
    x_cm = jnp.transpose(x_nchw, (1, 0, 2, 3)).reshape(2, bp * HW)
    mask8 = _boundary_masks(n)

    def rep(shape):
        return pl.BlockSpec(shape, lambda b: (0,) * len(shape))

    out_cm = pl.pallas_call(
        _autoencoder_kernel,
        out_shape=jax.ShapeDtypeStruct((2, bp * HW), jnp.float32),
        grid=(nblk,),
        in_specs=[pl.BlockSpec((2, n), lambda b: (0, b)),
                  rep(mask8.shape), rep(conv_pack.shape),
                  rep(efc.shape), rep(dfc.shape)],
        out_specs=pl.BlockSpec((2, n), lambda b: (0, b)),
        scratch_shapes=[pltpu.VMEM((bb, 2 * HW), jnp.float32),   # FC relayout
                        pltpu.VMEM((2, n), jnp.float32),         # dec-FC -> CM
                        pltpu.VMEM((9 * 16, n), jnp.float32)],   # im2col block
        compiler_params=pltpu.CompilerParams(
            dimension_semantics=("parallel",)),
    )(x_cm, mask8, conv_pack, efc, dfc)

    # channel-major -> NCHW (host-side layout glue only), drop batch padding.
    out = jnp.transpose(out_cm.reshape(2, bp, H, W), (1, 0, 2, 3))
    return out[:bn]


# ----------------------------------- main -------------------------------------

if __name__ == "__main__":
    feedback_bits = 128                      # divisible by B=4 -> fc dim = 32
    key = jax.random.PRNGKey(0)
    k_in, k_par = jax.random.split(key)

    params = init_params(feedback_bits, k_par)
    x = jax.random.uniform(k_in, (2, 2, 16, 32), jnp.float32)    # NCHW input

    fwd = jax.jit(autoencoder_forward)
    out = jax.block_until_ready(fwd(x, params))

    assert out.shape == (2, 2, 16, 32), out.shape
    assert out.dtype == jnp.float32
    assert bool(jnp.all(jnp.isfinite(out)))
    assert bool(jnp.all((out >= 0.0) & (out <= 1.0)))            # final sigmoid
    print("KERNEL_OK")
</pallas_src>

<mosaic_0001>
module attributes {stable_mosaic.version = 11 : i64} {
  func.func @_autoencoder_kernel(%arg0: i32, %arg1: memref<2x512xf32, #tpu.memory_space<vmem>>, %arg2: memref<8x512xf32, #tpu.memory_space<vmem>>, %arg3: memref<120x145xf32, #tpu.memory_space<vmem>>, %arg4: memref<1025x32xf32, #tpu.memory_space<vmem>>, %arg5: memref<33x1024xf32, #tpu.memory_space<vmem>>, %arg6: memref<2x512xf32, #tpu.memory_space<vmem>>, %arg7: memref<1x1024xf32, #tpu.memory_space<vmem>>, %arg8: memref<2x512xf32, #tpu.memory_space<vmem>>, %arg9: memref<144x512xf32, #tpu.memory_space<vmem>>) attributes {dimension_semantics = [#tpu.dimension_semantics<parallel>], iteration_bounds = array<i64: 2>, scalar_prefetch = 0 : i64, scratch_operands = 3 : i64, tpu.core_type = #tpu.core_type<tc>, window_params = [{transform_indices = @transform_0, window_bounds = array<i64: 2, 512>}, {pipeline_mode = #tpu.pipeline_mode<synchronous>, transform_indices = @transform_1, window_bounds = array<i64: 8, 512>}, {pipeline_mode = #tpu.pipeline_mode<synchronous>, transform_indices = @transform_2, window_bounds = array<i64: 120, 145>}, {pipeline_mode = #tpu.pipeline_mode<synchronous>, transform_indices = @transform_3, window_bounds = array<i64: 1025, 32>}, {pipeline_mode = #tpu.pipeline_mode<synchronous>, transform_indices = @transform_4, window_bounds = array<i64: 33, 1024>}, {transform_indices = @transform_5, window_bounds = array<i64: 2, 512>}]} {
    %c0 = arith.constant 0 : index
    %c0_0 = arith.constant 0 : index
    %0 = vector.load %arg1[%c0, %c0_0] : memref<2x512xf32, #tpu.memory_space<vmem>>, vector<2x512xf32>
    %c33_i32 = arith.constant 33 : i32
    %1 = tpu.dynamic_rotate %0 by %c33_i32 dim 1 : vector<2x512xf32>, i32 -> vector<2x512xf32>
    %c0_1 = arith.constant 0 : index
    %c0_2 = arith.constant 0 : index
    %2 = vector.load %arg2[%c0_1, %c0_2] : memref<8x512xf32, #tpu.memory_space<vmem>>, vector<1x512xf32>
    %3 = vector.broadcast %2 : vector<1x512xf32> to vector<2x512xf32>
    %4 = arith.mulf %1, %3 : vector<2x512xf32>
    %c0_3 = arith.constant 0 : index
    %c0_4 = arith.constant 0 : index
    %5 = vector.load %arg9[%c0_3, %c0_4] : memref<144x512xf32, #tpu.memory_space<vmem>>, vector<2x512xf32>
    tpu.vector_store %arg9[%c0_3, %c0_4], %4 {strides = array<i32>} : memref<144x512xf32, #tpu.memory_space<vmem>>, vector<2x512xf32>,
    %c32_i32 = arith.constant 32 : i32
    %6 = tpu.dynamic_rotate %0 by %c32_i32 dim 1 : vector<2x512xf32>, i32 -> vector<2x512xf32>
    %c1 = arith.constant 1 : index
    %c0_5 = arith.constant 0 : index
    %7 = vector.load %arg2[%c1, %c0_5] : memref<8x512xf32, #tpu.memory_space<vmem>>, vector<1x512xf32>
    %8 = vector.broadcast %7 : vector<1x512xf32> to vector<2x512xf32>
    %9 = arith.mulf %6, %8 : vector<2x512xf32>
    %c2 = arith.constant 2 : index
    %c0_6 = arith.constant 0 : index
    %10 = vector.load %arg9[%c2, %c0_6] : memref<144x512xf32, #tpu.memory_space<vmem>>, vector<2x512xf32>
    tpu.vector_store %arg9[%c2, %c0_6], %9 {strides = array<i32>} : memref<144x512xf32, #tpu.memory_space<vmem>>, vector<2x512xf32>,
    %c31_i32 = arith.constant 31 : i32
    %11 = tpu.dynamic_rotate %0 by %c31_i32 dim 1 : vector<2x512xf32>, i32 -> vector<2x512xf32>
    %c2_7 = arith.constant 2 : index
    %c0_8 = arith.constant 0 : index
    %12 = vector.load %arg2[%c2_7, %c0_8] : memref<8x512xf32, #tpu.memory_space<vmem>>, vector<1x512xf32>
    %13 = vector.broadcast %12 : vector<1x512xf32> to vector<2x512xf32>
    %14 = arith.mulf %11, %13 : vector<2x512xf32>
    %c4 = arith.constant 4 : index
    %c0_9 = arith.constant 0 : index
    %15 = vector.load %arg9[%c4, %c0_9] : memref<144x512xf32, #tpu.memory_space<vmem>>, vector<2x512xf32>
    tpu.vector_store %arg9[%c4, %c0_9], %14 {strides = array<i32>} : memref<144x512xf32, #tpu.memory_space<vmem>>, vector<2x512xf32>,
    %c1_i32 = arith.constant 1 : i32
    %16 = tpu.dynamic_rotate %0 by %c1_i32 dim 1 : vector<2x512xf32>, i32 -> vector<2x512xf32>
    %c3 = arith.constant 3 : index
    %c0_10 = arith.constant 0 : index
    %17 = vector.load %arg2[%c3, %c0_10] : memref<8x512xf32, #tpu.memory_space<vmem>>, vector<1x512xf32>
    %18 = vector.broadcast %17 : vector<1x512xf32> to vector<2x512xf32>
    %19 = arith.mulf %16, %18 : vector<2x512xf32>
    %c6 = arith.constant 6 : index
    %c0_11 = arith.constant 0 : index
    %20 = vector.load %arg9[%c6, %c0_11] : memref<144x512xf32, #tpu.memory_space<vmem>>, vector<2x512xf32>
    tpu.vector_store %arg9[%c6, %c0_11], %19 {strides = array<i32>} : memref<144x512xf32, #tpu.memory_space<vmem>>, vector<2x512xf32>,
    %c8 = arith.constant 8 : index
    %c0_12 = arith.constant 0 : index
    %21 = vector.load %arg9[%c8, %c0_12] : memref<144x512xf32, #tpu.memory_space<vmem>>, vector<2x512xf32>
    tpu.vector_store %arg9[%c8, %c0_12], %0 {strides = array<i32>} : memref<144x512xf32, #tpu.memory_space<vmem>>, vector<2x512xf32>,
    %c511_i32 = arith.constant 511 : i32
    %22 = tpu.dynamic_rotate %0 by %c511_i32 dim 1 : vector<2x512xf32>, i32 -> vector<2x512xf32>
    %c4_13 = arith.constant 4 : index
    %c0_14 = arith.constant 0 : index
    %23 = vector.load %arg2[%c4_13, %c0_14] : memref<8x512xf32, #tpu.memory_space<vmem>>, vector<1x512xf32>
    %24 = vector.broadcast %23 : vector<1x512xf32> to vector<2x512xf32>
    %25 = arith.mulf %22, %24 : vector<2x512xf32>
    %c10 = arith.constant 10 : index
    %c0_15 = arith.constant 0 : index
    %26 = vector.load %arg9[%c10, %c0_15] : memref<144x512xf32, #tpu.memory_space<vmem>>, vector<2x512xf32>
    tpu.vector_store %arg9[%c10, %c0_15], %25 {strides = array<i32>} : memref<144x512xf32, #tpu.memory_space<vmem>>, vector<2x512xf32>,
    %c481_i32 = arith.constant 481 : i32
    %27 = tpu.dynamic_rotate %0 by %c481_i32 dim 1 : vector<2x512xf32>, i32 -> vector<2x512xf32>
    %c5 = arith.constant 5 : index
    %c0_16 = arith.constant 0 : index
    %28 = vector.load %arg2[%c5, %c0_16] : memref<8x512xf32, #tpu.memory_space<vmem>>, vector<1x512xf32>
    %29 = vector.broadcast %28 : vector<1x512xf32> to vector<2x512xf32>
    %30 = arith.mulf %27, %29 : vector<2x512xf32>
    %c12 = arith.constant 12 : index
    %c0_17 = arith.constant 0 : index
    %31 = vector.load %arg9[%c12, %c0_17] : memref<144x512xf32, #tpu.memory_space<vmem>>, vector<2x512xf32>
    tpu.vector_store %arg9[%c12, %c0_17], %30 {strides = array<i32>} : memref<144x512xf32, #tpu.memory_space<vmem>>, vector<2x512xf32>,
    %c480_i32 = arith.constant 480 : i32
    %32 = tpu.dynamic_rotate %0 by %c480_i32 dim 1 : vector<2x512xf32>, i32 -> vector<2x512xf32>
    %c6_18 = arith.constant 6 : index
    %c0_19 = arith.constant 0 : index
    %33 = vector.load %arg2[%c6_18, %c0_19] : memref<8x512xf32, #tpu.memory_space<vmem>>, vector<1x512xf32>
    %34 = vector.broadcast %33 : vector<1x512xf32> to vector<2x512xf32>
    %35 = arith.mulf %32, %34 : vector<2x512xf32>
    %c14 = arith.constant 14 : index
    %c0_20 = arith.constant 0 : index
    %36 = vector.load %arg9[%c14, %c0_20] : memref<144x512xf32, #tpu.memory_space<vmem>>, vector<2x512xf32>
    tpu.vector_store %arg9[%c14, %c0_20], %35 {strides = array<i32>} : memref<144x512xf32, #tpu.memory_space<vmem>>, vector<2x512xf32>,
    %c479_i32 = arith.constant 479 : i32
    %37 = tpu.dynamic_rotate %0 by %c479_i32 dim 1 : vector<2x512xf32>, i32 -> vector<2x512xf32>
    %c7 = arith.constant 7 : index
    %c0_21 = arith.constant 0 : index
    %38 = vector.load %arg2[%c7, %c0_21] : memref<8x512xf32, #tpu.memory_space<vmem>>, vector<1x512xf32>
    %39 = vector.broadcast %38 : vector<1x512xf32> to vector<2x512xf32>
    %40 = arith.mulf %37, %39 : vector<2x512xf32>
    %c16 = arith.constant 16 : index
    %c0_22 = arith.constant 0 : index
    %41 = vector.load %arg9[%c16, %c0_22] : memref<144x512xf32, #tpu.memory_space<vmem>>, vector<2x512xf32>
    tpu.vector_store %arg9[%c16, %c0_22], %40 {strides = array<i32>} : memref<144x512xf32, #tpu.memory_space<vmem>>, vector<2x512xf32>,
    %c0_23 = arith.constant 0 : index
    %c0_24 = arith.constant 0 : index
    %42 = vector.load %arg3[%c0_23, %c0_24] : memref<120x145xf32, #tpu.memory_space<vmem>>, vector<2x18xf32>
    %c0_25 = arith.constant 0 : index
    %c144 = arith.constant 144 : index
    %43 = vector.load %arg3[%c0_25, %c144] : memref<120x145xf32, #tpu.memory_space<vmem>>, vector<2x1xf32>
    %c0_26 = arith.constant 0 : index
    %c0_27 = arith.constant 0 : index
    %44 = vector.load %arg9[%c0_26, %c0_27] : memref<144x512xf32, #tpu.memory_space<vmem>>, vector<18x512xf32>
    %cst = arith.constant dense<0.000000e+00> : vector<2x512xf32>
    %45 = tpu.matmul %42, %44, %cst {dimension_numbers = #tpu.dot_dimension_numbers<[1], [0], [0], [1], [0, 0, 1, 1], [], []>} : vector<2x18xf32>, vector<18x512xf32>, vector<2x512xf32> -> vector<2x512xf32>
    %46 = vector.broadcast %43 : vector<2x1xf32> to vector<2x512xf32>
    %47 = arith.addf %45, %46 : vector<2x512xf32>
    %cst_28 = arith.constant 0.000000e+00 : f32
    %48 = vector.broadcast %cst_28 : f32 to vector<2x512xf32>
    %49 = arith.maximumf %47, %48 : vector<2x512xf32>
    %c33_i32_29 = arith.constant 33 : i32
    %50 = tpu.dynamic_rotate %49 by %c33_i32_29 dim 1 : vector<2x512xf32>, i32 -> vector<2x512xf32>
    %c0_30 = arith.constant 0 : index
    %c0_31 = arith.constant 0 : index
    %51 = vector.load %arg2[%c0_30, %c0_31] : memref<8x512xf32, #tpu.memory_space<vmem>>, vector<1x512xf32>
    %52 = vector.broadcast %51 : vector<1x512xf32> to vector<2x512xf32>
    %53 = arith.mulf %50, %52 : vector<2x512xf32>
    %c0_32 = arith.constant 0 : index
    %c0_33 = arith.constant 0 : index
    %54 = vector.load %arg9[%c0_32, %c0_33] : memref<144x512xf32, #tpu.memory_space<vmem>>, vector<2x512xf32>
    tpu.vector_store %arg9[%c0_32, %c0_33], %53 {strides = array<i32>} : memref<144x512xf32, #tpu.memory_space<vmem>>, vector<2x512xf32>,
    %c32_i32_34 = arith.constant 32 : i32
    %55 = tpu.dynamic_rotate %49 by %c32_i32_34 dim 1 : vector<2x512xf32>, i32 -> vector<2x512xf32>
    %c1_35 = arith.constant 1 : index
    %c0_36 = arith.constant 0 : index
    %56 = vector.load %arg2[%c1_35, %c0_36] : memref<8x512xf32, #tpu.memory_space<vmem>>, vector<1x512xf32>
    %57 = vector.broadcast %56 : vector<1x512xf32> to vector<2x512xf32>
    %58 = arith.mulf %55, %57 : vector<2x512xf32>
    %c2_37 = arith.constant 2 : index
    %c0_38 = arith.constant 0 : index
    %59 = vector.load %arg9[%c2_37, %c0_38] : memref<144x512xf32, #tpu.memory_space<vmem>>, vector<2x512xf32>
    tpu.vector_store %arg9[%c2_37, %c0_38], %58 {strides = array<i32>} : memref<144x512xf32, #tpu.memory_space<vmem>>, vector<2x512xf32>,
    %c31_i32_39 = arith.constant 31 : i32
    %60 = tpu.dynamic_rotate %49 by %c31_i32_39 dim 1 : vector<2x512xf32>, i32 -> vector<2x512xf32>
    %c2_40 = arith.constant 2 : index
    %c0_41 = arith.constant 0 : index
    %61 = vector.load %arg2[%c2_40, %c0_41] : memref<8x512xf32, #tpu.memory_space<vmem>>, vector<1x512xf32>
    %62 = vector.broadcast %61 : vector<1x512xf32> to vector<2x512xf32>
    %63 = arith.mulf %60, %62 : vector<2x512xf32>
    %c4_42 = arith.constant 4 : index
    %c0_43 = arith.constant 0 : index
    %64 = vector.load %arg9[%c4_42, %c0_43] : memref<144x512xf32, #tpu.memory_space<vmem>>, vector<2x512xf32>
    tpu.vector_store %arg9[%c4_42, %c0_43], %63 {strides = array<i32>} : memref<144x512xf32, #tpu.memory_space<vmem>>, vector<2x512xf32>,
    %c1_i32_44 = arith.constant 1 : i32
    %65 = tpu.dynamic_rotate %49 by %c1_i32_44 dim 1 : vector<2x512xf32>, i32 -> vector<2x512xf32>
    %c3_45 = arith.constant 3 : index
    %c0_46 = arith.constant 0 : index
    %66 = vector.load %arg2[%c3_45, %c0_46] : memref<8x512xf32, #tpu.memory_space<vmem>>, vector<1x512xf32>
    %67 = vector.broadcast %66 : vector<1x512xf32> to vector<2x512xf32>
    %68 = arith.mulf %65, %67 : vector<2x512xf32>
    %c6_47 = arith.constant 6 : index
    %c0_48 = arith.constant 0 : index
    %69 = vector.load %arg9[%c6_47, %c0_48] : memref<144x512xf32, #tpu.memory_space<vmem>>, vector<2x512xf32>
    tpu.vector_store %arg9[%c6_47, %c0_48], %68 {strides = array<i32>} : memref<144x512xf32, #tpu.memory_space<vmem>>, vector<2x512xf32>,
    %c8_49 = arith.constant 8 : index
    %c0_50 = arith.constant 0 : index
    %70 = vector.load %arg9[%c8_49, %c0_50] : memref<144x512xf32, #tpu.memory_space<vmem>>, vector<2x512xf32>
    tpu.vector_store %arg9[%c8_49, %c0_50], %49 {strides = array<i32>} : memref<144x512xf32, #tpu.memory_space<vmem>>, vector<2x512xf32>,
    %c511_i32_51 = arith.constant 511 : i32
    %71 = tpu.dynamic_rotate %49 by %c511_i32_51 dim 1 : vector<2x512xf32>, i32 -> vector<2x512xf32>
    %c4_52 = arith.constant 4 : index
    %c0_53 = arith.constant 0 : index
    %72 = vector.load %arg2[%c4_52, %c0_53] : memref<8x512xf32, #tpu.memory_space<vmem>>, vector<1x512xf32>
    %73 = vector.broadcast %72 : vector<1x512xf32> to vector<2x512xf32>
    %74 = arith.mulf %71, %73 : vector<2x512xf32>
    %c10_54 = arith.constant 10 : index
    %c0_55 = arith.constant 0 : index
    %75 = vector.load %arg9[%c10_54, %c0_55] : memref<144x512xf32, #tpu.memory_space<vmem>>, vector<2x512xf32>
    tpu.vector_store %arg9[%c10_54, %c0_55], %74 {strides = array<i32>} : memref<144x512xf32, #tpu.memory_space<vmem>>, vector<2x512xf32>,
    %c481_i32_56 = arith.constant 481 : i32
    %76 = tpu.dynamic_rotate %49 by %c481_i32_56 dim 1 : vector<2x512xf32>, i32 -> vector<2x512xf32>
    %c5_57 = arith.constant 5 : index
    %c0_58 = arith.constant 0 : index
    %77 = vector.load %arg2[%c5_57, %c0_58] : memref<8x512xf32, #tpu.memory_space<vmem>>, vector<1x512xf32>
    %78 = vector.broadcast %77 : vector<1x512xf32> to vector<2x512xf32>
    %79 = arith.mulf %76, %78 : vector<2x512xf32>
    %c12_59 = arith.constant 12 : index
    %c0_60 = arith.constant 0 : index
    %80 = vector.load %arg9[%c12_59, %c0_60] : memref<144x512xf32, #tpu.memory_space<vmem>>, vector<2x512xf32>
    tpu.vector_store %arg9[%c12_59, %c0_60], %79 {strides = array<i32>} : memref<144x512xf32, #tpu.memory_space<vmem>>, vector<2x512xf32>,
    %c480_i32_61 = arith.constant 480 : i32
    %81 = tpu.dynamic_rotate %49 by %c480_i32_61 dim 1 : vector<2x512xf32>, i32 -> vector<2x512xf32>
    %c6_62 = arith.constant 6 : index
    %c0_63 = arith.constant 0 : index
    %82 = vector.load %arg2[%c6_62, %c0_63] : memref<8x512xf32, #tpu.memory_space<vmem>>, vector<1x512xf32>
    %83 = vector.broadcast %82 : vector<1x512xf32> to vector<2x512xf32>
    %84 = arith.mulf %81, %83 : vector<2x512xf32>
    %c14_64 = arith.constant 14 : index
    %c0_65 = arith.constant 0 : index
    %85 = vector.load %arg9[%c14_64, %c0_65] : memref<144x512xf32, #tpu.memory_space<vmem>>, vector<2x512xf32>
    tpu.vector_store %arg9[%c14_64, %c0_65], %84 {strides = array<i32>} : memref<144x512xf32, #tpu.memory_space<vmem>>, vector<2x512xf32>,
    %c479_i32_66 = arith.constant 479 : i32
    %86 = tpu.dynamic_rotate %49 by %c479_i32_66 dim 1 : vector<2x512xf32>, i32 -> vector<2x512xf32>
    %c7_67 = arith.constant 7 : index
    %c0_68 = arith.constant 0 : index
    %87 = vector.load %arg2[%c7_67, %c0_68] : memref<8x512xf32, #tpu.memory_space<vmem>>, vector<1x512xf32>
    %88 = vector.broadcast %87 : vector<1x512xf32> to vector<2x512xf32>
    %89 = arith.mulf %86, %88 : vector<2x512xf32>
    %c16_69 = arith.constant 16 : index
    %c0_70 = arith.constant 0 : index
    %90 = vector.load %arg9[%c16_69, %c0_70] : memref<144x512xf32, #tpu.memory_space<vmem>>, vector<2x512xf32>
    tpu.vector_store %arg9[%c16_69, %c0_70], %89 {strides = array<i32>} : memref<144x512xf32, #tpu.memory_space<vmem>>, vector<2x512xf32>,
    %c8_71 = arith.constant 8 : index
    %c0_72 = arith.constant 0 : index
    %91 = vector.load %arg3[%c8_71, %c0_72] : memref<120x145xf32, #tpu.memory_space<vmem>>, vector<2x18xf32>
    %c8_73 = arith.constant 8 : index
    %c144_74 = arith.constant 144 : index
    %92 = vector.load %arg3[%c8_73, %c144_74] : memref<120x145xf32, #tpu.memory_space<vmem>>, vector<2x1xf32>
    %c0_75 = arith.constant 0 : index
    %c0_76 = arith.constant 0 : index
    %93 = vector.load %arg9[%c0_75, %c0_76] : memref<144x512xf32, #tpu.memory_space<vmem>>, vector<18x512xf32>
    %cst_77 = arith.constant dense<0.000000e+00> : vector<2x512xf32>
    %94 = tpu.matmul %91, %93, %cst_77 {dimension_numbers = #tpu.dot_dimension_numbers<[1], [0], [0], [1], [0, 0, 1, 1], [], []>} : vector<2x18xf32>, vector<18x512xf32>, vector<2x512xf32> -> vector<2x512xf32>
    %95 = vector.broadcast %92 : vector<2x1xf32> to vector<2x512xf32>
    %96 = arith.addf %94, %95 : vector<2x512xf32>
    %cst_78 = arith.constant 0.000000e+00 : f32
    %97 = vector.broadcast %cst_78 : f32 to vector<2x512xf32>
    %98 = arith.maximumf %96, %97 : vector<2x512xf32>
    %99 = vector.extract_strided_slice %98 {offsets = [0, 0], sizes = [1, 512], strides = [1, 1]} : vector<2x512xf32> to vector<1x512xf32>
    %c0_79 = arith.constant 0 : index
    %c0_80 = arith.constant 0 : index
    %100 = vector.load %arg7[%c0_79, %c0_80] : memref<1x1024xf32, #tpu.memory_space<vmem>>, vector<1x512xf32>
    tpu.vector_store %arg7[%c0_79, %c0_80], %99 {strides = array<i32>} : memref<1x1024xf32, #tpu.memory_space<vmem>>, vector<1x512xf32>,
    %101 = vector.extract_strided_slice %98 {offsets = [1, 0], sizes = [1, 512], strides = [1, 1]} : vector<2x512xf32> to vector<1x512xf32>
    %c0_81 = arith.constant 0 : index
    %c512 = arith.constant 512 : index
    %102 = vector.load %arg7[%c0_81, %c512] : memref<1x1024xf32, #tpu.memory_space<vmem>>, vector<1x512xf32>
    tpu.vector_store %arg7[%c0_81, %c512], %101 {strides = array<i32>} : memref<1x1024xf32, #tpu.memory_space<vmem>>, vector<1x512xf32>,
    %c0_82 = arith.constant 0 : index
    %c0_83 = arith.constant 0 : index
    %103 = vector.load %arg4[%c0_82, %c0_83] : memref<1025x32xf32, #tpu.memory_space<vmem>>, vector<1024x32xf32>
    %c1024 = arith.constant 1024 : index
    %c0_84 = arith.constant 0 : index
    %104 = vector.load %arg4[%c1024, %c0_84] : memref<1025x32xf32, #tpu.memory_space<vmem>>, vector<1x32xf32>
    %c0_85 = arith.constant 0 : index
    %c0_86 = arith.constant 0 : index
    %105 = vector.load %arg7[%c0_85, %c0_86] : memref<1x1024xf32, #tpu.memory_space<vmem>>, vector<1x1024xf32>
    %cst_87 = arith.constant dense<0.000000e+00> : vector<1x32xf32>
    %106 = tpu.matmul %105, %103, %cst_87 {dimension_numbers = #tpu.dot_dimension_numbers<[1], [0], [0], [1], [0, 0, 1, 1], [], []>} : vector<1x1024xf32>, vector<1024x32xf32>, vector<1x32xf32> -> vector<1x32xf32>
    %107 = arith.addf %106, %104 : vector<1x32xf32>
    %cst_88 = arith.constant 0.000000e+00 : f32
    %108 = vector.broadcast %cst_88 : f32 to vector<1x32xf32>
    %109 = arith.subf %108, %107 : vector<1x32xf32>
    %110 = math.exp %109 : vector<1x32xf32>
    %cst_89 = arith.constant 1.000000e+00 : f32
    %111 = vector.broadcast %cst_89 : f32 to vector<1x32xf32>
    %112 = arith.addf %111, %110 : vector<1x32xf32>
    %cst_90 = arith.constant 1.000000e+00 : f32
    %113 = vector.broadcast %cst_90 : f32 to vector<1x32xf32>
    %114 = arith.divf %113, %112 : vector<1x32xf32>
    %cst_91 = arith.constant 1.600000e+01 : f32
    %115 = vector.broadcast %cst_91 : f32 to vector<1x32xf32>
    %116 = arith.mulf %114, %115 : vector<1x32xf32>
    %cst_92 = arith.constant 5.000000e-01 : f32
    %117 = vector.broadcast %cst_92 : f32 to vector<1x32xf32>
    %118 = arith.subf %116, %117 : vector<1x32xf32>
    %119 = math.roundeven %118 : vector<1x32xf32>
    %120 = arith.fptosi %119 : vector<1x32xf32> to vector<1x32xi32>
    %c15_i32 = arith.constant 15 : i32
    %121 = vector.broadcast %c15_i32 : i32 to vector<1x32xi32>
    %122 = arith.andi %120, %121 : vector<1x32xi32>
    %123 = arith.sitofp %122 : vector<1x32xi32> to vector<1x32xf32>
    %cst_93 = arith.constant 5.000000e-01 : f32
    %124 = vector.broadcast %cst_93 : f32 to vector<1x32xf32>
    %125 = arith.addf %123, %124 : vector<1x32xf32>
    %cst_94 = arith.constant 1.600000e+01 : f32
    %126 = vector.broadcast %cst_94 : f32 to vector<1x32xf32>
    %127 = arith.divf %125, %126 : vector<1x32xf32>
    %c0_95 = arith.constant 0 : index
    %c0_96 = arith.constant 0 : index
    %128 = vector.load %arg5[%c0_95, %c0_96] : memref<33x1024xf32, #tpu.memory_space<vmem>>, vector<32x1024xf32>
    %c32 = arith.constant 32 : index
    %c0_97 = arith.constant 0 : index
    %129 = vector.load %arg5[%c32, %c0_97] : memref<33x1024xf32, #tpu.memory_space<vmem>>, vector<1x1024xf32>
    %cst_98 = arith.constant dense<0.000000e+00> : vector<1x1024xf32>
    %130 = tpu.matmul %127, %128, %cst_98 {dimension_numbers = #tpu.dot_dimension_numbers<[1], [0], [0], [1], [0, 0, 1, 1], [], []>} : vector<1x32xf32>, vector<32x1024xf32>, vector<1x1024xf32> -> vector<1x1024xf32>
    %131 = arith.addf %130, %129 : vector<1x1024xf32>
    %cst_99 = arith.constant 0.000000e+00 : f32
    %132 = vector.broadcast %cst_99 : f32 to vector<1x1024xf32>
    %133 = arith.subf %132, %131 : vector<1x1024xf32>
    %134 = math.exp %133 : vector<1x1024xf32>
    %cst_100 = arith.constant 1.000000e+00 : f32
    %135 = vector.broadcast %cst_100 : f32 to vector<1x1024xf32>
    %136 = arith.addf %135, %134 : vector<1x1024xf32>
    %137 = tpu.reciprocal %136 {approx = true} : vector<1x1024xf32> -> vector<1x1024xf32>
    %138 = vector.extract_strided_slice %137 {offsets = [0, 0], sizes = [1, 512], strides = [1, 1]} : vector<1x1024xf32> to vector<1x512xf32>
    %c0_101 = arith.constant 0 : index
    %c0_102 = arith.constant 0 : index
    %139 = vector.load %arg8[%c0_101, %c0_102] : memref<2x512xf32, #tpu.memory_space<vmem>>, vector<1x512xf32>
    tpu.vector_store %arg8[%c0_101, %c0_102], %138 {strides = array<i32>} : memref<2x512xf32, #tpu.memory_space<vmem>>, vector<1x512xf32>,
    %140 = vector.extract_strided_slice %137 {offsets = [0, 512], sizes = [1, 512], strides = [1, 1]} : vector<1x1024xf32> to vector<1x512xf32>
    %c1_103 = arith.constant 1 : index
    %c0_104 = arith.constant 0 : index
    %141 = vector.load %arg8[%c1_103, %c0_104] : memref<2x512xf32, #tpu.memory_space<vmem>>, vector<1x512xf32>
    tpu.vector_store %arg8[%c1_103, %c0_104], %140 {strides = array<i32>} : memref<2x512xf32, #tpu.memory_space<vmem>>, vector<1x512xf32>,
    %c0_105 = arith.constant 0 : index
    %c0_106 = arith.constant 0 : index
    %142 = vector.load %arg8[%c0_105, %c0_106] : memref<2x512xf32, #tpu.memory_space<vmem>>, vector<2x512xf32>
    %c33_i32_107 = arith.constant 33 : i32
    %143 = tpu.dynamic_rotate %142 by %c33_i32_107 dim 1 : vector<2x512xf32>, i32 -> vector<2x512xf32>
    %c0_108 = arith.constant 0 : index
    %c0_109 = arith.constant 0 : index
    %144 = vector.load %arg2[%c0_108, %c0_109] : memref<8x512xf32, #tpu.memory_space<vmem>>, vector<1x512xf32>
    %145 = vector.broadcast %144 : vector<1x512xf32> to vector<2x512xf32>
    %146 = arith.mulf %143, %145 : vector<2x512xf32>
    %c0_110 = arith.constant 0 : index
    %c0_111 = arith.constant 0 : index
    %147 = vector.load %arg9[%c0_110, %c0_111] : memref<144x512xf32, #tpu.memory_space<vmem>>, vector<2x512xf32>
    tpu.vector_store %arg9[%c0_110, %c0_111], %146 {strides = array<i32>} : memref<144x512xf32, #tpu.memory_space<vmem>>, vector<2x512xf32>,
    %c32_i32_112 = arith.constant 32 : i32
    %148 = tpu.dynamic_rotate %142 by %c32_i32_112 dim 1 : vector<2x512xf32>, i32 -> vector<2x512xf32>
    %c1_113 = arith.constant 1 : index
    %c0_114 = arith.constant 0 : index
    %149 = vector.load %arg2[%c1_113, %c0_114] : memref<8x512xf32, #tpu.memory_space<vmem>>, vector<1x512xf32>
    %150 = vector.broadcast %149 : vector<1x512xf32> to vector<2x512xf32>
    %151 = arith.mulf %148, %150 : vector<2x512xf32>
    %c2_115 = arith.constant 2 : index
    %c0_116 = arith.constant 0 : index
    %152 = vector.load %arg9[%c2_115, %c0_116] : memref<144x512xf32, #tpu.memory_space<vmem>>, vector<2x512xf32>
    tpu.vector_store %arg9[%c2_115, %c0_116], %151 {strides = array<i32>} : memref<144x512xf32, #tpu.memory_space<vmem>>, vector<2x512xf32>,
    %c31_i32_117 = arith.constant 31 : i32
    %153 = tpu.dynamic_rotate %142 by %c31_i32_117 dim 1 : vector<2x512xf32>, i32 -> vector<2x512xf32>
    %c2_118 = arith.constant 2 : index
    %c0_119 = arith.constant 0 : index
    %154 = vector.load %arg2[%c2_118, %c0_119] : memref<8x512xf32, #tpu.memory_space<vmem>>, vector<1x512xf32>
    %155 = vector.broadcast %154 : vector<1x512xf32> to vector<2x512xf32>
    %156 = arith.mulf %153, %155 : vector<2x512xf32>
    %c4_120 = arith.constant 4 : index
    %c0_121 = arith.constant 0 : index
    %157 = vector.load %arg9[%c4_120, %c0_121] : memref<144x512xf32, #tpu.memory_space<vmem>>, vector<2x512xf32>
    tpu.vector_store %arg9[%c4_120, %c0_121], %156 {strides = array<i32>} : memref<144x512xf32, #tpu.memory_space<vmem>>, vector<2x512xf32>,
    %c1_i32_122 = arith.constant 1 : i32
    %158 = tpu.dynamic_rotate %142 by %c1_i32_122 dim 1 : vector<2x512xf32>, i32 -> vector<2x512xf32>
    %c3_123 = arith.constant 3 : index
    %c0_124 = arith.constant 0 : index
    %159 = vector.load %arg2[%c3_123, %c0_124] : memref<8x512xf32, #tpu.memory_space<vmem>>, vector<1x512xf32>
    %160 = vector.broadcast %159 : vector<1x512xf32> to vector<2x512xf32>
    %161 = arith.mulf %158, %160 : vector<2x512xf32>
    %c6_125 = arith.constant 6 : index
    %c0_126 = arith.constant 0 : index
    %162 = vector.load %arg9[%c6_125, %c0_126] : memref<144x512xf32, #tpu.memory_space<vmem>>, vector<2x512xf32>
    tpu.vector_store %arg9[%c6_125, %c0_126], %161 {strides = array<i32>} : memref<144x512xf32, #tpu.memory_space<vmem>>, vector<2x512xf32>,
    %c8_127 = arith.constant 8 : index
    %c0_128 = arith.constant 0 : index
    %163 = vector.load %arg9[%c8_127, %c0_128] : memref<144x512xf32, #tpu.memory_space<vmem>>, vector<2x512xf32>
    tpu.vector_store %arg9[%c8_127, %c0_128], %142 {strides = array<i32>} : memref<144x512xf32, #tpu.memory_space<vmem>>, vector<2x512xf32>,
    %c511_i32_129 = arith.constant 511 : i32
    %164 = tpu.dynamic_rotate %142 by %c511_i32_129 dim 1 : vector<2x512xf32>, i32 -> vector<2x512xf32>
    %c4_130 = arith.constant 4 : index
    %c0_131 = arith.constant 0 : index
    %165 = vector.load %arg2[%c4_130, %c0_131] : memref<8x512xf32, #tpu.memory_space<vmem>>, vector<1x512xf32>
    %166 = vector.broadcast %165 : vector<1x512xf32> to vector<2x512xf32>
    %167 = arith.mulf %164, %166 : vector<2x512xf32>
    %c10_132 = arith.constant 10 : index
    %c0_133 = arith.constant 0 : index
    %168 = vector.load %arg9[%c10_132, %c0_133] : memref<144x512xf32, #tpu.memory_space<vmem>>, vector<2x512xf32>
    tpu.vector_store %arg9[%c10_132, %c0_133], %167 {strides = array<i32>} : memref<144x512xf32, #tpu.memory_space<vmem>>, vector<2x512xf32>,
    %c481_i32_134 = arith.constant 481 : i32
    %169 = tpu.dynamic_rotate %142 by %c481_i32_134 dim 1 : vector<2x512xf32>, i32 -> vector<2x512xf32>
    %c5_135 = arith.constant 5 : index
    %c0_136 = arith.constant 0 : index
    %170 = vector.load %arg2[%c5_135, %c0_136] : memref<8x512xf32, #tpu.memory_space<vmem>>, vector<1x512xf32>
    %171 = vector.broadcast %170 : vector<1x512xf32> to vector<2x512xf32>
    %172 = arith.mulf %169, %171 : vector<2x512xf32>
    %c12_137 = arith.constant 12 : index
    %c0_138 = arith.constant 0 : index
    %173 = vector.load %arg9[%c12_137, %c0_138] : memref<144x512xf32, #tpu.memory_space<vmem>>, vector<2x512xf32>
    tpu.vector_store %arg9[%c12_137, %c0_138], %172 {strides = array<i32>} : memref<144x512xf32, #tpu.memory_space<vmem>>, vector<2x512xf32>,
    %c480_i32_139 = arith.constant 480 : i32
    %174 = tpu.dynamic_rotate %142 by %c480_i32_139 dim 1 : vector<2x512xf32>, i32 -> vector<2x512xf32>
    %c6_140 = arith.constant 6 : index
    %c0_141 = arith.constant 0 : index
    %175 = vector.load %arg2[%c6_140, %c0_141] : memref<8x512xf32, #tpu.memory_space<vmem>>, vector<1x512xf32>
    %176 = vector.broadcast %175 : vector<1x512xf32> to vector<2x512xf32>
    %177 = arith.mulf %174, %176 : vector<2x512xf32>
    %c14_142 = arith.constant 14 : index
    %c0_143 = arith.constant 0 : index
    %178 = vector.load %arg9[%c14_142, %c0_143] : memref<144x512xf32, #tpu.memory_space<vmem>>, vector<2x512xf32>
    tpu.vector_store %arg9[%c14_142, %c0_143], %177 {strides = array<i32>} : memref<144x512xf32, #tpu.memory_space<vmem>>, vector<2x512xf32>,
    %c479_i32_144 = arith.constant 479 : i32
    %179 = tpu.dynamic_rotate %142 by %c479_i32_144 dim 1 : vector<2x512xf32>, i32 -> vector<2x512xf32>
    %c7_145 = arith.constant 7 : index
    %c0_146 = arith.constant 0 : index
    %180 = vector.load %arg2[%c7_145, %c0_146] : memref<8x512xf32, #tpu.memory_space<vmem>>, vector<1x512xf32>
    %181 = vector.broadcast %180 : vector<1x512xf32> to vector<2x512xf32>
    %182 = arith.mulf %179, %181 : vector<2x512xf32>
    %c16_147 = arith.constant 16 : index
    %c0_148 = arith.constant 0 : index
    %183 = vector.load %arg9[%c16_147, %c0_148] : memref<144x512xf32, #tpu.memory_space<vmem>>, vector<2x512xf32>
    tpu.vector_store %arg9[%c16_147, %c0_148], %182 {strides = array<i32>} : memref<144x512xf32, #tpu.memory_space<vmem>>, vector<2x512xf32>,
    %c16_149 = arith.constant 16 : index
    %c0_150 = arith.constant 0 : index
    %184 = vector.load %arg3[%c16_149, %c0_150] : memref<120x145xf32, #tpu.memory_space<vmem>>, vector<8x18xf32>
    %c16_151 = arith.constant 16 : index
    %c144_152 = arith.constant 144 : index
    %185 = vector.load %arg3[%c16_151, %c144_152] : memref<120x145xf32, #tpu.memory_space<vmem>>, vector<8x1xf32>
    %c0_153 = arith.constant 0 : index
    %c0_154 = arith.constant 0 : index
    %186 = vector.load %arg9[%c0_153, %c0_154] : memref<144x512xf32, #tpu.memory_space<vmem>>, vector<18x512xf32>
    %cst_155 = arith.constant dense<0.000000e+00> : vector<8x512xf32>
    %187 = tpu.matmul %184, %186, %cst_155 {dimension_numbers = #tpu.dot_dimension_numbers<[1], [0], [0], [1], [0, 0, 1, 1], [], []>} : vector<8x18xf32>, vector<18x512xf32>, vector<8x512xf32> -> vector<8x512xf32>
    %188 = vector.broadcast %185 : vector<8x1xf32> to vector<8x512xf32>
    %189 = arith.addf %187, %188 : vector<8x512xf32>
    %cst_156 = arith.constant 0.000000e+00 : f32
    %190 = vector.broadcast %cst_156 : f32 to vector<8x512xf32>
    %191 = arith.maximumf %189, %190 : vector<8x512xf32>
    %c33_i32_157 = arith.constant 33 : i32
    %192 = tpu.dynamic_rotate %191 by %c33_i32_157 dim 1 : vector<8x512xf32>, i32 -> vector<8x512xf32>
    %c0_158 = arith.constant 0 : index
    %c0_159 = arith.constant 0 : index
    %193 = vector.load %arg2[%c0_158, %c0_159] : memref<8x512xf32, #tpu.memory_space<vmem>>, vector<1x512xf32>
    %194 = vector.broadcast %193 : vector<1x512xf32> to vector<8x512xf32>
    %195 = arith.mulf %192, %194 : vector<8x512xf32>
    %c0_160 = arith.constant 0 : index
    %c0_161 = arith.constant 0 : index
    %196 = vector.load %arg9[%c0_160, %c0_161] : memref<144x512xf32, #tpu.memory_space<vmem>>, vector<8x512xf32>
    tpu.vector_store %arg9[%c0_160, %c0_161], %195 {strides = array<i32>} : memref<144x512xf32, #tpu.memory_space<vmem>>, vector<8x512xf32>,
    %c32_i32_162 = arith.constant 32 : i32
    %197 = tpu.dynamic_rotate %191 by %c32_i32_162 dim 1 : vector<8x512xf32>, i32 -> vector<8x512xf32>
    %c1_163 = arith.constant 1 : index
    %c0_164 = arith.constant 0 : index
    %198 = vector.load %arg2[%c1_163, %c0_164] : memref<8x512xf32, #tpu.memory_space<vmem>>, vector<1x512xf32>
    %199 = vector.broadcast %198 : vector<1x512xf32> to vector<8x512xf32>
    %200 = arith.mulf %197, %199 : vector<8x512xf32>
    %c8_165 = arith.constant 8 : index
    %c0_166 = arith.constant 0 : index
    %201 = vector.load %arg9[%c8_165, %c0_166] : memref<144x512xf32, #tpu.memory_space<vmem>>, vector<8x512xf32>
    tpu.vector_store %arg9[%c8_165, %c0_166], %200 {strides = array<i32>} : memref<144x512xf32, #tpu.memory_space<vmem>>, vector<8x512xf32>,
    %c31_i32_167 = arith.constant 31 : i32
    %202 = tpu.dynamic_rotate %191 by %c31_i32_167 dim 1 : vector<8x512xf32>, i32 -> vector<8x512xf32>
    %c2_168 = arith.constant 2 : index
    %c0_169 = arith.constant 0 : index
    %203 = vector.load %arg2[%c2_168, %c0_169] : memref<8x512xf32, #tpu.memory_space<vmem>>, vector<1x512xf32>
    %204 = vector.broadcast %203 : vector<1x512xf32> to vector<8x512xf32>
    %205 = arith.mulf %202, %204 : vector<8x512xf32>
    %c16_170 = arith.constant 16 : index
    %c0_171 = arith.constant 0 : index
    %206 = vector.load %arg9[%c16_170, %c0_171] : memref<144x512xf32, #tpu.memory_space<vmem>>, vector<8x512xf32>
    tpu.vector_store %arg9[%c16_170, %c0_171], %205 {strides = array<i32>} : memref<144x512xf32, #tpu.memory_space<vmem>>, vector<8x512xf32>,
    %c1_i32_172 = arith.constant 1 : i32
    %207 = tpu.dynamic_rotate %191 by %c1_i32_172 dim 1 : vector<8x512xf32>, i32 -> vector<8x512xf32>
    %c3_173 = arith.constant 3 : index
    %c0_174 = arith.constant 0 : index
    %208 = vector.load %arg2[%c3_173, %c0_174] : memref<8x512xf32, #tpu.memory_space<vmem>>, vector<1x512xf32>
    %209 = vector.broadcast %208 : vector<1x512xf32> to vector<8x512xf32>
    %210 = arith.mulf %207, %209 : vector<8x512xf32>
    %c24 = arith.constant 24 : index
    %c0_175 = arith.constant 0 : index
    %211 = vector.load %arg9[%c24, %c0_175] : memref<144x512xf32, #tpu.memory_space<vmem>>, vector<8x512xf32>
    tpu.vector_store %arg9[%c24, %c0_175], %210 {strides = array<i32>} : memref<144x512xf32, #tpu.memory_space<vmem>>, vector<8x512xf32>,
    %c32_176 = arith.constant 32 : index
    %c0_177 = arith.constant 0 : index
    %212 = vector.load %arg9[%c32_176, %c0_177] : memref<144x512xf32, #tpu.memory_space<vmem>>, vector<8x512xf32>
    tpu.vector_store %arg9[%c32_176, %c0_177], %191 {strides = array<i32>} : memref<144x512xf32, #tpu.memory_space<vmem>>, vector<8x512xf32>,
    %c511_i32_178 = arith.constant 511 : i32
    %213 = tpu.dynamic_rotate %191 by %c511_i32_178 dim 1 : vector<8x512xf32>, i32 -> vector<8x512xf32>
    %c4_179 = arith.constant 4 : index
    %c0_180 = arith.constant 0 : index
    %214 = vector.load %arg2[%c4_179, %c0_180] : memref<8x512xf32, #tpu.memory_space<vmem>>, vector<1x512xf32>
    %215 = vector.broadcast %214 : vector<1x512xf32> to vector<8x512xf32>
    %216 = arith.mulf %213, %215 : vector<8x512xf32>
    %c40 = arith.constant 40 : index
    %c0_181 = arith.constant 0 : index
    %217 = vector.load %arg9[%c40, %c0_181] : memref<144x512xf32, #tpu.memory_space<vmem>>, vector<8x512xf32>
    tpu.vector_store %arg9[%c40, %c0_181], %216 {strides = array<i32>} : memref<144x512xf32, #tpu.memory_space<vmem>>, vector<8x512xf32>,
    %c481_i32_182 = arith.constant 481 : i32
    %218 = tpu.dynamic_rotate %191 by %c481_i32_182 dim 1 : vector<8x512xf32>, i32 -> vector<8x512xf32>
    %c5_183 = arith.constant 5 : index
    %c0_184 = arith.constant 0 : index
    %219 = vector.load %arg2[%c5_183, %c0_184] : memref<8x512xf32, #tpu.memory_space<vmem>>, vector<1x512xf32>
    %220 = vector.broadcast %219 : vector<1x512xf32> to vector<8x512xf32>
    %221 = arith.mulf %218, %220 : vector<8x512xf32>
    %c48 = arith.constant 48 : index
    %c0_185 = arith.constant 0 : index
    %222 = vector.load %arg9[%c48, %c0_185] : memref<144x512xf32, #tpu.memory_space<vmem>>, vector<8x512xf32>
    tpu.vector_store %arg9[%c48, %c0_185], %221 {strides = array<i32>} : memref<144x512xf32, #tpu.memory_space<vmem>>, vector<8x512xf32>,
    %c480_i32_186 = arith.constant 480 : i32
    %223 = tpu.dynamic_rotate %191 by %c480_i32_186 dim 1 : vector<8x512xf32>, i32 -> vector<8x512xf32>
    %c6_187 = arith.constant 6 : index
    %c0_188 = arith.constant 0 : index
    %224 = vector.load %arg2[%c6_187, %c0_188] : memref<8x512xf32, #tpu.memory_space<vmem>>, vector<1x512xf32>
    %225 = vector.broadcast %224 : vector<1x512xf32> to vector<8x512xf32>
    %226 = arith.mulf %223, %225 : vector<8x512xf32>
    %c56 = arith.constant 56 : index
    %c0_189 = arith.constant 0 : index
    %227 = vector.load %arg9[%c56, %c0_189] : memref<144x512xf32, #tpu.memory_space<vmem>>, vector<8x512xf32>
    tpu.vector_store %arg9[%c56, %c0_189], %226 {strides = array<i32>} : memref<144x512xf32, #tpu.memory_space<vmem>>, vector<8x512xf32>,
    %c479_i32_190 = arith.constant 479 : i32
    %228 = tpu.dynamic_rotate %191 by %c479_i32_190 dim 1 : vector<8x512xf32>, i32 -> vector<8x512xf32>
    %c7_191 = arith.constant 7 : index
    %c0_192 = arith.constant 0 : index
    %229 = vector.load %arg2[%c7_191, %c0_192] : memref<8x512xf32, #tpu.memory_space<vmem>>, vector<1x512xf32>
    %230 = vector.broadcast %229 : vector<1x512xf32> to vector<8x512xf32>
    %231 = arith.mulf %228, %230 : vector<8x512xf32>
    %c64 = arith.constant 64 : index
    %c0_193 = arith.constant 0 : index
    %232 = vector.load %arg9[%c64, %c0_193] : memref<144x512xf32, #tpu.memory_space<vmem>>, vector<8x512xf32>
    tpu.vector_store %arg9[%c64, %c0_193], %231 {strides = array<i32>} : memref<144x512xf32, #tpu.memory_space<vmem>>, vector<8x512xf32>,
    %c24_194 = arith.constant 24 : index
    %c0_195 = arith.constant 0 : index
    %233 = vector.load %arg3[%c24_194, %c0_195] : memref<120x145xf32, #tpu.memory_space<vmem>>, vector<16x72xf32>
    %c24_196 = arith.constant 24 : index
    %c144_197 = arith.constant 144 : index
    %234 = vector.load %arg3[%c24_196, %c144_197] : memref<120x145xf32, #tpu.memory_space<vmem>>, vector<16x1xf32>
    %c0_198 = arith.constant 0 : index
    %c0_199 = arith.constant 0 : index
    %235 = vector.load %arg9[%c0_198, %c0_199] : memref<144x512xf32, #tpu.memory_space<vmem>>, vector<72x512xf32>
    %cst_200 = arith.constant dense<0.000000e+00> : vector<16x512xf32>
    %236 = tpu.matmul %233, %235, %cst_200 {dimension_numbers = #tpu.dot_dimension_numbers<[1], [0], [0], [1], [0, 0, 1, 1], [], []>} : vector<16x72xf32>, vector<72x512xf32>, vector<16x512xf32> -> vector<16x512xf32>
    %237 = vector.broadcast %234 : vector<16x1xf32> to vector<16x512xf32>
    %238 = arith.addf %236, %237 : vector<16x512xf32>
    %cst_201 = arith.constant 0.000000e+00 : f32
    %239 = vector.broadcast %cst_201 : f32 to vector<16x512xf32>
    %240 = arith.maximumf %238, %239 : vector<16x512xf32>
    %c33_i32_202 = arith.constant 33 : i32
    %241 = tpu.dynamic_rotate %240 by %c33_i32_202 dim 1 : vector<16x512xf32>, i32 -> vector<16x512xf32>
    %c0_203 = arith.constant 0 : index
    %c0_204 = arith.constant 0 : index
    %242 = vector.load %arg2[%c0_203, %c0_204] : memref<8x512xf32, #tpu.memory_space<vmem>>, vector<1x512xf32>
    %243 = vector.broadcast %242 : vector<1x512xf32> to vector<16x512xf32>
    %244 = arith.mulf %241, %243 : vector<16x512xf32>
    %c0_205 = arith.constant 0 : index
    %c0_206 = arith.constant 0 : index
    %245 = vector.load %arg9[%c0_205, %c0_206] : memref<144x512xf32, #tpu.memory_space<vmem>>, vector<16x512xf32>
    tpu.vector_store %arg9[%c0_205, %c0_206], %244 {strides = array<i32>} : memref<144x512xf32, #tpu.memory_space<vmem>>, vector<16x512xf32>,
    %c32_i32_207 = arith.constant 32 : i32
    %246 = tpu.dynamic_rotate %240 by %c32_i32_207 dim 1 : vector<16x512xf32>, i32 -> vector<16x512xf32>
    %c1_208 = arith.constant 1 : index
    %c0_209 = arith.constant 0 : index
    %247 = vector.load %arg2[%c1_208, %c0_209] : memref<8x512xf32, #tpu.memory_space<vmem>>, vector<1x512xf32>
    %248 = vector.broadcast %247 : vector<1x512xf32> to vector<16x512xf32>
    %249 = arith.mulf %246, %248 : vector<16x512xf32>
    %c16_210 = arith.constant 16 : index
    %c0_211 = arith.constant 0 : index
    %250 = vector.load %arg9[%c16_210, %c0_211] : memref<144x512xf32, #tpu.memory_space<vmem>>, vector<16x512xf32>
    tpu.vector_store %arg9[%c16_210, %c0_211], %249 {strides = array<i32>} : memref<144x512xf32, #tpu.memory_space<vmem>>, vector<16x512xf32>,
    %c31_i32_212 = arith.constant 31 : i32
    %251 = tpu.dynamic_rotate %240 by %c31_i32_212 dim 1 : vector<16x512xf32>, i32 -> vector<16x512xf32>
    %c2_213 = arith.constant 2 : index
    %c0_214 = arith.constant 0 : index
    %252 = vector.load %arg2[%c2_213, %c0_214] : memref<8x512xf32, #tpu.memory_space<vmem>>, vector<1x512xf32>
    %253 = vector.broadcast %252 : vector<1x512xf32> to vector<16x512xf32>
    %254 = arith.mulf %251, %253 : vector<16x512xf32>
    %c32_215 = arith.constant 32 : index
    %c0_216 = arith.constant 0 : index
    %255 = vector.load %arg9[%c32_215, %c0_216] : memref<144x512xf32, #tpu.memory_space<vmem>>, vector<16x512xf32>
    tpu.vector_store %arg9[%c32_215, %c0_216], %254 {strides = array<i32>} : memref<144x512xf32, #tpu.memory_space<vmem>>, vector<16x512xf32>,
    %c1_i32_217 = arith.constant 1 : i32
    %256 = tpu.dynamic_rotate %240 by %c1_i32_217 dim 1 : vector<16x512xf32>, i32 -> vector<16x512xf32>
    %c3_218 = arith.constant 3 : index
    %c0_219 = arith.constant 0 : index
    %257 = vector.load %arg2[%c3_218, %c0_219] : memref<8x512xf32, #tpu.memory_space<vmem>>, vector<1x512xf32>
    %258 = vector.broadcast %257 : vector<1x512xf32> to vector<16x512xf32>
    %259 = arith.mulf %256, %258 : vector<16x512xf32>
    %c48_220 = arith.constant 48 : index
    %c0_221 = arith.constant 0 : index
    %260 = vector.load %arg9[%c48_220, %c0_221] : memref<144x512xf32, #tpu.memory_space<vmem>>, vector<16x512xf32>
    tpu.vector_store %arg9[%c48_220, %c0_221], %259 {strides = array<i32>} : memref<144x512xf32, #tpu.memory_space<vmem>>, vector<16x512xf32>,
    %c64_222 = arith.constant 64 : index
    %c0_223 = arith.constant 0 : index
    %261 = vector.load %arg9[%c64_222, %c0_223] : memref<144x512xf32, #tpu.memory_space<vmem>>, vector<16x512xf32>
    tpu.vector_store %arg9[%c64_222, %c0_223], %240 {strides = array<i32>} : memref<144x512xf32, #tpu.memory_space<vmem>>, vector<16x512xf32>,
    %c511_i32_224 = arith.constant 511 : i32
    %262 = tpu.dynamic_rotate %240 by %c511_i32_224 dim 1 : vector<16x512xf32>, i32 -> vector<16x512xf32>
    %c4_225 = arith.constant 4 : index
    %c0_226 = arith.constant 0 : index
    %263 = vector.load %arg2[%c4_225, %c0_226] : memref<8x512xf32, #tpu.memory_space<vmem>>, vector<1x512xf32>
    %264 = vector.broadcast %263 : vector<1x512xf32> to vector<16x512xf32>
    %265 = arith.mulf %262, %264 : vector<16x512xf32>
    %c80 = arith.constant 80 : index
    %c0_227 = arith.constant 0 : index
    %266 = vector.load %arg9[%c80, %c0_227] : memref<144x512xf32, #tpu.memory_space<vmem>>, vector<16x512xf32>
    tpu.vector_store %arg9[%c80, %c0_227], %265 {strides = array<i32>} : memref<144x512xf32, #tpu.memory_space<vmem>>, vector<16x512xf32>,
    %c481_i32_228 = arith.constant 481 : i32
    %267 = tpu.dynamic_rotate %240 by %c481_i32_228 dim 1 : vector<16x512xf32>, i32 -> vector<16x512xf32>
    %c5_229 = arith.constant 5 : index
    %c0_230 = arith.constant 0 : index
    %268 = vector.load %arg2[%c5_229, %c0_230] : memref<8x512xf32, #tpu.memory_space<vmem>>, vector<1x512xf32>
    %269 = vector.broadcast %268 : vector<1x512xf32> to vector<16x512xf32>
    %270 = arith.mulf %267, %269 : vector<16x512xf32>
    %c96 = arith.constant 96 : index
    %c0_231 = arith.constant 0 : index
    %271 = vector.load %arg9[%c96, %c0_231] : memref<144x512xf32, #tpu.memory_space<vmem>>, vector<16x512xf32>
    tpu.vector_store %arg9[%c96, %c0_231], %270 {strides = array<i32>} : memref<144x512xf32, #tpu.memory_space<vmem>>, vector<16x512xf32>,
    %c480_i32_232 = arith.constant 480 : i32
    %272 = tpu.dynamic_rotate %240 by %c480_i32_232 dim 1 : vector<16x512xf32>, i32 -> vector<16x512xf32>
    %c6_233 = arith.constant 6 : index
    %c0_234 = arith.constant 0 : index
    %273 = vector.load %arg2[%c6_233, %c0_234] : memref<8x512xf32, #tpu.memory_space<vmem>>, vector<1x512xf32>
    %274 = vector.broadcast %273 : vector<1x512xf32> to vector<16x512xf32>
    %275 = arith.mulf %272, %274 : vector<16x512xf32>
    %c112 = arith.constant 112 : index
    %c0_235 = arith.constant 0 : index
    %276 = vector.load %arg9[%c112, %c0_235] : memref<144x512xf32, #tpu.memory_space<vmem>>, vector<16x512xf32>
    tpu.vector_store %arg9[%c112, %c0_235], %275 {strides = array<i32>} : memref<144x512xf32, #tpu.memory_space<vmem>>, vector<16x512xf32>,
    %c479_i32_236 = arith.constant 479 : i32
    %277 = tpu.dynamic_rotate %240 by %c479_i32_236 dim 1 : vector<16x512xf32>, i32 -> vector<16x512xf32>
    %c7_237 = arith.constant 7 : index
    %c0_238 = arith.constant 0 : index
    %278 = vector.load %arg2[%c7_237, %c0_238] : memref<8x512xf32, #tpu.memory_space<vmem>>, vector<1x512xf32>
    %279 = vector.broadcast %278 : vector<1x512xf32> to vector<16x512xf32>
    %280 = arith.mulf %277, %279 : vector<16x512xf32>
    %c128 = arith.constant 128 : index
    %c0_239 = arith.constant 0 : index
    %281 = vector.load %arg9[%c128, %c0_239] : memref<144x512xf32, #tpu.memory_space<vmem>>, vector<16x512xf32>
    tpu.vector_store %arg9[%c128, %c0_239], %280 {strides = array<i32>} : memref<144x512xf32, #tpu.memory_space<vmem>>, vector<16x512xf32>,
    %c40_240 = arith.constant 40 : index
    %c0_241 = arith.constant 0 : index
    %282 = vector.load %arg3[%c40_240, %c0_241] : memref<120x145xf32, #tpu.memory_space<vmem>>, vector<2x144xf32>
    %c40_242 = arith.constant 40 : index
    %c144_243 = arith.constant 144 : index
    %283 = vector.load %arg3[%c40_242, %c144_243] : memref<120x145xf32, #tpu.memory_space<vmem>>, vector<2x1xf32>
    %c0_244 = arith.constant 0 : index
    %c0_245 = arith.constant 0 : index
    %284 = vector.load %arg9[%c0_244, %c0_245] : memref<144x512xf32, #tpu.memory_space<vmem>>, vector<144x512xf32>
    %cst_246 = arith.constant dense<0.000000e+00> : vector<2x512xf32>
    %285 = tpu.matmul %282, %284, %cst_246 {dimension_numbers = #tpu.dot_dimension_numbers<[1], [0], [0], [1], [0, 0, 1, 1], [], []>} : vector<2x144xf32>, vector<144x512xf32>, vector<2x512xf32> -> vector<2x512xf32>
    %286 = vector.broadcast %283 : vector<2x1xf32> to vector<2x512xf32>
    %287 = arith.addf %285, %286 : vector<2x512xf32>
    %cst_247 = arith.constant 0.000000e+00 : f32
    %288 = vector.broadcast %cst_247 : f32 to vector<2x512xf32>
    %289 = arith.maximumf %287, %288 : vector<2x512xf32>
    %290 = arith.addf %142, %289 : vector<2x512xf32>
    %c33_i32_248 = arith.constant 33 : i32
    %291 = tpu.dynamic_rotate %290 by %c33_i32_248 dim 1 : vector<2x512xf32>, i32 -> vector<2x512xf32>
    %c0_249 = arith.constant 0 : index
    %c0_250 = arith.constant 0 : index
    %292 = vector.load %arg2[%c0_249, %c0_250] : memref<8x512xf32, #tpu.memory_space<vmem>>, vector<1x512xf32>
    %293 = vector.broadcast %292 : vector<1x512xf32> to vector<2x512xf32>
    %294 = arith.mulf %291, %293 : vector<2x512xf32>
    %c0_251 = arith.constant 0 : index
    %c0_252 = arith.constant 0 : index
    %295 = vector.load %arg9[%c0_251, %c0_252] : memref<144x512xf32, #tpu.memory_space<vmem>>, vector<2x512xf32>
    tpu.vector_store %arg9[%c0_251, %c0_252], %294 {strides = array<i32>} : memref<144x512xf32, #tpu.memory_space<vmem>>, vector<2x512xf32>,
    %c32_i32_253 = arith.constant 32 : i32
    %296 = tpu.dynamic_rotate %290 by %c32_i32_253 dim 1 : vector<2x512xf32>, i32 -> vector<2x512xf32>
    %c1_254 = arith.constant 1 : index
    %c0_255 = arith.constant 0 : index
    %297 = vector.load %arg2[%c1_254, %c0_255] : memref<8x512xf32, #tpu.memory_space<vmem>>, vector<1x512xf32>
    %298 = vector.broadcast %297 : vector<1x512xf32> to vector<2x512xf32>
    %299 = arith.mulf %296, %298 : vector<2x512xf32>
    %c2_256 = arith.constant 2 : index
    %c0_257 = arith.constant 0 : index
    %300 = vector.load %arg9[%c2_256, %c0_257] : memref<144x512xf32, #tpu.memory_space<vmem>>, vector<2x512xf32>
    tpu.vector_store %arg9[%c2_256, %c0_257], %299 {strides = array<i32>} : memref<144x512xf32, #tpu.memory_space<vmem>>, vector<2x512xf32>,
    %c31_i32_258 = arith.constant 31 : i32
    %301 = tpu.dynamic_rotate %290 by %c31_i32_258 dim 1 : vector<2x512xf32>, i32 -> vector<2x512xf32>
    %c2_259 = arith.constant 2 : index
    %c0_260 = arith.constant 0 : index
    %302 = vector.load %arg2[%c2_259, %c0_260] : memref<8x512xf32, #tpu.memory_space<vmem>>, vector<1x512xf32>
    %303 = vector.broadcast %302 : vector<1x512xf32> to vector<2x512xf32>
    %304 = arith.mulf %301, %303 : vector<2x512xf32>
    %c4_261 = arith.constant 4 : index
    %c0_262 = arith.constant 0 : index
    %305 = vector.load %arg9[%c4_261, %c0_262] : memref<144x512xf32, #tpu.memory_space<vmem>>, vector<2x512xf32>
    tpu.vector_store %arg9[%c4_261, %c0_262], %304 {strides = array<i32>} : memref<144x512xf32, #tpu.memory_space<vmem>>, vector<2x512xf32>,
    %c1_i32_263 = arith.constant 1 : i32
    %306 = tpu.dynamic_rotate %290 by %c1_i32_263 dim 1 : vector<2x512xf32>, i32 -> vector<2x512xf32>
    %c3_264 = arith.constant 3 : index
    %c0_265 = arith.constant 0 : index
    %307 = vector.load %arg2[%c3_264, %c0_265] : memref<8x512xf32, #tpu.memory_space<vmem>>, vector<1x512xf32>
    %308 = vector.broadcast %307 : vector<1x512xf32> to vector<2x512xf32>
    %309 = arith.mulf %306, %308 : vector<2x512xf32>
    %c6_266 = arith.constant 6 : index
    %c0_267 = arith.constant 0 : index
    %310 = vector.load %arg9[%c6_266, %c0_267] : memref<144x512xf32, #tpu.memory_space<vmem>>, vector<2x512xf32>
    tpu.vector_store %arg9[%c6_266, %c0_267], %309 {strides = array<i32>} : memref<144x512xf32, #tpu.memory_space<vmem>>, vector<2x512xf32>,
    %c8_268 = arith.constant 8 : index
    %c0_269 = arith.constant 0 : index
    %311 = vector.load %arg9[%c8_268, %c0_269] : memref<144x512xf32, #tpu.memory_space<vmem>>, vector<2x512xf32>
    tpu.vector_store %arg9[%c8_268, %c0_269], %290 {strides = array<i32>} : memref<144x512xf32, #tpu.memory_space<vmem>>, vector<2x512xf32>,
    %c511_i32_270 = arith.constant 511 : i32
    %312 = tpu.dynamic_rotate %290 by %c511_i32_270 dim 1 : vector<2x512xf32>, i32 -> vector<2x512xf32>
    %c4_271 = arith.constant 4 : index
    %c0_272 = arith.constant 0 : index
    %313 = vector.load %arg2[%c4_271, %c0_272] : memref<8x512xf32, #tpu.memory_space<vmem>>, vector<1x512xf32>
    %314 = vector.broadcast %313 : vector<1x512xf32> to vector<2x512xf32>
    %315 = arith.mulf %312, %314 : vector<2x512xf32>
    %c10_273 = arith.constant 10 : index
    %c0_274 = arith.constant 0 : index
    %316 = vector.load %arg9[%c10_273, %c0_274] : memref<144x512xf32, #tpu.memory_space<vmem>>, vector<2x512xf32>
    tpu.vector_store %arg9[%c10_273, %c0_274], %315 {strides = array<i32>} : memref<144x512xf32, #tpu.memory_space<vmem>>, vector<2x512xf32>,
    %c481_i32_275 = arith.constant 481 : i32
    %317 = tpu.dynamic_rotate %290 by %c481_i32_275 dim 1 : vector<2x512xf32>, i32 -> vector<2x512xf32>
    %c5_276 = arith.constant 5 : index
    %c0_277 = arith.constant 0 : index
    %318 = vector.load %arg2[%c5_276, %c0_277] : memref<8x512xf32, #tpu.memory_space<vmem>>, vector<1x512xf32>
    %319 = vector.broadcast %318 : vector<1x512xf32> to vector<2x512xf32>
    %320 = arith.mulf %317, %319 : vector<2x512xf32>
    %c12_278 = arith.constant 12 : index
    %c0_279 = arith.constant 0 : index
    %321 = vector.load %arg9[%c12_278, %c0_279] : memref<144x512xf32, #tpu.memory_space<vmem>>, vector<2x512xf32>
    tpu.vector_store %arg9[%c12_278, %c0_279], %320 {strides = array<i32>} : memref<144x512xf32, #tpu.memory_space<vmem>>, vector<2x512xf32>,
    %c480_i32_280 = arith.constant 480 : i32
    %322 = tpu.dynamic_rotate %290 by %c480_i32_280 dim 1 : vector<2x512xf32>, i32 -> vector<2x512xf32>
    %c6_281 = arith.constant 6 : index
    %c0_282 = arith.constant 0 : index
    %323 = vector.load %arg2[%c6_281, %c0_282] : memref<8x512xf32, #tpu.memory_space<vmem>>, vector<1x512xf32>
    %324 = vector.broadcast %323 : vector<1x512xf32> to vector<2x512xf32>
    %325 = arith.mulf %322, %324 : vector<2x512xf32>
    %c14_283 = arith.constant 14 : index
    %c0_284 = arith.constant 0 : index
    %326 = vector.load %arg9[%c14_283, %c0_284] : memref<144x512xf32, #tpu.memory_space<vmem>>, vector<2x512xf32>
    tpu.vector_store %arg9[%c14_283, %c0_284], %325 {strides = array<i32>} : memref<144x512xf32, #tpu.memory_space<vmem>>, vector<2x512xf32>,
    %c479_i32_285 = arith.constant 479 : i32
    %327 = tpu.dynamic_rotate %290 by %c479_i32_285 dim 1 : vector<2x512xf32>, i32 -> vector<2x512xf32>
    %c7_286 = arith.constant 7 : index
    %c0_287 = arith.constant 0 : index
    %328 = vector.load %arg2[%c7_286, %c0_287] : memref<8x512xf32, #tpu.memory_space<vmem>>, vector<1x512xf32>
    %329 = vector.broadcast %328 : vector<1x512xf32> to vector<2x512xf32>
    %330 = arith.mulf %327, %329 : vector<2x512xf32>
    %c16_288 = arith.constant 16 : index
    %c0_289 = arith.constant 0 : index
    %331 = vector.load %arg9[%c16_288, %c0_289] : memref<144x512xf32, #tpu.memory_space<vmem>>, vector<2x512xf32>
    tpu.vector_store %arg9[%c16_288, %c0_289], %330 {strides = array<i32>} : memref<144x512xf32, #tpu.memory_space<vmem>>, vector<2x512xf32>,
    %c48_290 = arith.constant 48 : index
    %c0_291 = arith.constant 0 : index
    %332 = vector.load %arg3[%c48_290, %c0_291] : memref<120x145xf32, #tpu.memory_space<vmem>>, vector<8x18xf32>
    %c48_292 = arith.constant 48 : index
    %c144_293 = arith.constant 144 : index
    %333 = vector.load %arg3[%c48_292, %c144_293] : memref<120x145xf32, #tpu.memory_space<vmem>>, vector<8x1xf32>
    %c0_294 = arith.constant 0 : index
    %c0_295 = arith.constant 0 : index
    %334 = vector.load %arg9[%c0_294, %c0_295] : memref<144x512xf32, #tpu.memory_space<vmem>>, vector<18x512xf32>
    %cst_296 = arith.constant dense<0.000000e+00> : vector<8x512xf32>
    %335 = tpu.matmul %332, %334, %cst_296 {dimension_numbers = #tpu.dot_dimension_numbers<[1], [0], [0], [1], [0, 0, 1, 1], [], []>} : vector<8x18xf32>, vector<18x512xf32>, vector<8x512xf32> -> vector<8x512xf32>
    %336 = vector.broadcast %333 : vector<8x1xf32> to vector<8x512xf32>
    %337 = arith.addf %335, %336 : vector<8x512xf32>
    %cst_297 = arith.constant 0.000000e+00 : f32
    %338 = vector.broadcast %cst_297 : f32 to vector<8x512xf32>
    %339 = arith.maximumf %337, %338 : vector<8x512xf32>
    %c33_i32_298 = arith.constant 33 : i32
    %340 = tpu.dynamic_rotate %339 by %c33_i32_298 dim 1 : vector<8x512xf32>, i32 -> vector<8x512xf32>
    %c0_299 = arith.constant 0 : index
    %c0_300 = arith.constant 0 : index
    %341 = vector.load %arg2[%c0_299, %c0_300] : memref<8x512xf32, #tpu.memory_space<vmem>>, vector<1x512xf32>
    %342 = vector.broadcast %341 : vector<1x512xf32> to vector<8x512xf32>
    %343 = arith.mulf %340, %342 : vector<8x512xf32>
    %c0_301 = arith.constant 0 : index
    %c0_302 = arith.constant 0 : index
    %344 = vector.load %arg9[%c0_301, %c0_302] : memref<144x512xf32, #tpu.memory_space<vmem>>, vector<8x512xf32>
    tpu.vector_store %arg9[%c0_301, %c0_302], %343 {strides = array<i32>} : memref<144x512xf32, #tpu.memory_space<vmem>>, vector<8x512xf32>,
    %c32_i32_303 = arith.constant 32 : i32
    %345 = tpu.dynamic_rotate %339 by %c32_i32_303 dim 1 : vector<8x512xf32>, i32 -> vector<8x512xf32>
    %c1_304 = arith.constant 1 : index
    %c0_305 = arith.constant 0 : index
    %346 = vector.load %arg2[%c1_304, %c0_305] : memref<8x512xf32, #tpu.memory_space<vmem>>, vector<1x512xf32>
    %347 = vector.broadcast %346 : vector<1x512xf32> to vector<8x512xf32>
    %348 = arith.mulf %345, %347 : vector<8x512xf32>
    %c8_306 = arith.constant 8 : index
    %c0_307 = arith.constant 0 : index
    %349 = vector.load %arg9[%c8_306, %c0_307] : memref<144x512xf32, #tpu.memory_space<vmem>>, vector<8x512xf32>
    tpu.vector_store %arg9[%c8_306, %c0_307], %348 {strides = array<i32>} : memref<144x512xf32, #tpu.memory_space<vmem>>, vector<8x512xf32>,
    %c31_i32_308 = arith.constant 31 : i32
    %350 = tpu.dynamic_rotate %339 by %c31_i32_308 dim 1 : vector<8x512xf32>, i32 -> vector<8x512xf32>
    %c2_309 = arith.constant 2 : index
    %c0_310 = arith.constant 0 : index
    %351 = vector.load %arg2[%c2_309, %c0_310] : memref<8x512xf32, #tpu.memory_space<vmem>>, vector<1x512xf32>
    %352 = vector.broadcast %351 : vector<1x512xf32> to vector<8x512xf32>
    %353 = arith.mulf %350, %352 : vector<8x512xf32>
    %c16_311 = arith.constant 16 : index
    %c0_312 = arith.constant 0 : index
    %354 = vector.load %arg9[%c16_311, %c0_312] : memref<144x512xf32, #tpu.memory_space<vmem>>, vector<8x512xf32>
    tpu.vector_store %arg9[%c16_311, %c0_312], %353 {strides = array<i32>} : memref<144x512xf32, #tpu.memory_space<vmem>>, vector<8x512xf32>,
    %c1_i32_313 = arith.constant 1 : i32
    %355 = tpu.dynamic_rotate %339 by %c1_i32_313 dim 1 : vector<8x512xf32>, i32 -> vector<8x512xf32>
    %c3_314 = arith.constant 3 : index
    %c0_315 = arith.constant 0 : index
    %356 = vector.load %arg2[%c3_314, %c0_315] : memref<8x512xf32, #tpu.memory_space<vmem>>, vector<1x512xf32>
    %357 = vector.broadcast %356 : vector<1x512xf32> to vector<8x512xf32>
    %358 = arith.mulf %355, %357 : vector<8x512xf32>
    %c24_316 = arith.constant 24 : index
    %c0_317 = arith.constant 0 : index
    %359 = vector.load %arg9[%c24_316, %c0_317] : memref<144x512xf32, #tpu.memory_space<vmem>>, vector<8x512xf32>
    tpu.vector_store %arg9[%c24_316, %c0_317], %358 {strides = array<i32>} : memref<144x512xf32, #tpu.memory_space<vmem>>, vector<8x512xf32>,
    %c32_318 = arith.constant 32 : index
    %c0_319 = arith.constant 0 : index
    %360 = vector.load %arg9[%c32_318, %c0_319] : memref<144x512xf32, #tpu.memory_space<vmem>>, vector<8x512xf32>
    tpu.vector_store %arg9[%c32_318, %c0_319], %339 {strides = array<i32>} : memref<144x512xf32, #tpu.memory_space<vmem>>, vector<8x512xf32>,
    %c511_i32_320 = arith.constant 511 : i32
    %361 = tpu.dynamic_rotate %339 by %c511_i32_320 dim 1 : vector<8x512xf32>, i32 -> vector<8x512xf32>
    %c4_321 = arith.constant 4 : index
    %c0_322 = arith.constant 0 : index
    %362 = vector.load %arg2[%c4_321, %c0_322] : memref<8x512xf32, #tpu.memory_space<vmem>>, vector<1x512xf32>
    %363 = vector.broadcast %362 : vector<1x512xf32> to vector<8x512xf32>
    %364 = arith.mulf %361, %363 : vector<8x512xf32>
    %c40_323 = arith.constant 40 : index
    %c0_324 = arith.constant 0 : index
    %365 = vector.load %arg9[%c40_323, %c0_324] : memref<144x512xf32, #tpu.memory_space<vmem>>, vector<8x512xf32>
    tpu.vector_store %arg9[%c40_323, %c0_324], %364 {strides = array<i32>} : memref<144x512xf32, #tpu.memory_space<vmem>>, vector<8x512xf32>,
    %c481_i32_325 = arith.constant 481 : i32
    %366 = tpu.dynamic_rotate %339 by %c481_i32_325 dim 1 : vector<8x512xf32>, i32 -> vector<8x512xf32>
    %c5_326 = arith.constant 5 : index
    %c0_327 = arith.constant 0 : index
    %367 = vector.load %arg2[%c5_326, %c0_327] : memref<8x512xf32, #tpu.memory_space<vmem>>, vector<1x512xf32>
    %368 = vector.broadcast %367 : vector<1x512xf32> to vector<8x512xf32>
    %369 = arith.mulf %366, %368 : vector<8x512xf32>
    %c48_328 = arith.constant 48 : index
    %c0_329 = arith.constant 0 : index
    %370 = vector.load %arg9[%c48_328, %c0_329] : memref<144x512xf32, #tpu.memory_space<vmem>>, vector<8x512xf32>
    tpu.vector_store %arg9[%c48_328, %c0_329], %369 {strides = array<i32>} : memref<144x512xf32, #tpu.memory_space<vmem>>, vector<8x512xf32>,
    %c480_i32_330 = arith.constant 480 : i32
    %371 = tpu.dynamic_rotate %339 by %c480_i32_330 dim 1 : vector<8x512xf32>, i32 -> vector<8x512xf32>
    %c6_331 = arith.constant 6 : index
    %c0_332 = arith.constant 0 : index
    %372 = vector.load %arg2[%c6_331, %c0_332] : memref<8x512xf32, #tpu.memory_space<vmem>>, vector<1x512xf32>
    %373 = vector.broadcast %372 : vector<1x512xf32> to vector<8x512xf32>
    %374 = arith.mulf %371, %373 : vector<8x512xf32>
    %c56_333 = arith.constant 56 : index
    %c0_334 = arith.constant 0 : index
    %375 = vector.load %arg9[%c56_333, %c0_334] : memref<144x512xf32, #tpu.memory_space<vmem>>, vector<8x512xf32>
    tpu.vector_store %arg9[%c56_333, %c0_334], %374 {strides = array<i32>} : memref<144x512xf32, #tpu.memory_space<vmem>>, vector<8x512xf32>,
    %c479_i32_335 = arith.constant 479 : i32
    %376 = tpu.dynamic_rotate %339 by %c479_i32_335 dim 1 : vector<8x512xf32>, i32 -> vector<8x512xf32>
    %c7_336 = arith.constant 7 : index
    %c0_337 = arith.constant 0 : index
    %377 = vector.load %arg2[%c7_336, %c0_337] : memref<8x512xf32, #tpu.memory_space<vmem>>, vector<1x512xf32>
    %378 = vector.broadcast %377 : vector<1x512xf32> to vector<8x512xf32>
    %379 = arith.mulf %376, %378 : vector<8x512xf32>
    %c64_338 = arith.constant 64 : index
    %c0_339 = arith.constant 0 : index
    %380 = vector.load %arg9[%c64_338, %c0_339] : memref<144x512xf32, #tpu.memory_space<vmem>>, vector<8x512xf32>
    tpu.vector_store %arg9[%c64_338, %c0_339], %379 {strides = array<i32>} : memref<144x512xf32, #tpu.memory_space<vmem>>, vector<8x512xf32>,
    %c56_340 = arith.constant 56 : index
    %c0_341 = arith.constant 0 : index
    %381 = vector.load %arg3[%c56_340, %c0_341] : memref<120x145xf32, #tpu.memory_space<vmem>>, vector<16x72xf32>
    %c56_342 = arith.constant 56 : index
    %c144_343 = arith.constant 144 : index
    %382 = vector.load %arg3[%c56_342, %c144_343] : memref<120x145xf32, #tpu.memory_space<vmem>>, vector<16x1xf32>
    %c0_344 = arith.constant 0 : index
    %c0_345 = arith.constant 0 : index
    %383 = vector.load %arg9[%c0_344, %c0_345] : memref<144x512xf32, #tpu.memory_space<vmem>>, vector<72x512xf32>
    %cst_346 = arith.constant dense<0.000000e+00> : vector<16x512xf32>
    %384 = tpu.matmul %381, %383, %cst_346 {dimension_numbers = #tpu.dot_dimension_numbers<[1], [0], [0], [1], [0, 0, 1, 1], [], []>} : vector<16x72xf32>, vector<72x512xf32>, vector<16x512xf32> -> vector<16x512xf32>
    %385 = vector.broadcast %382 : vector<16x1xf32> to vector<16x512xf32>
    %386 = arith.addf %384, %385 : vector<16x512xf32>
    %cst_347 = arith.constant 0.000000e+00 : f32
    %387 = vector.broadcast %cst_347 : f32 to vector<16x512xf32>
    %388 = arith.maximumf %386, %387 : vector<16x512xf32>
    %c33_i32_348 = arith.constant 33 : i32
    %389 = tpu.dynamic_rotate %388 by %c33_i32_348 dim 1 : vector<16x512xf32>, i32 -> vector<16x512xf32>
    %c0_349 = arith.constant 0 : index
    %c0_350 = arith.constant 0 : index
    %390 = vector.load %arg2[%c0_349, %c0_350] : memref<8x512xf32, #tpu.memory_space<vmem>>, vector<1x512xf32>
    %391 = vector.broadcast %390 : vector<1x512xf32> to vector<16x512xf32>
    %392 = arith.mulf %389, %391 : vector<16x512xf32>
    %c0_351 = arith.constant 0 : index
    %c0_352 = arith.constant 0 : index
    %393 = vector.load %arg9[%c0_351, %c0_352] : memref<144x512xf32, #tpu.memory_space<vmem>>, vector<16x512xf32>
    tpu.vector_store %arg9[%c0_351, %c0_352], %392 {strides = array<i32>} : memref<144x512xf32, #tpu.memory_space<vmem>>, vector<16x512xf32>,
    %c32_i32_353 = arith.constant 32 : i32
    %394 = tpu.dynamic_rotate %388 by %c32_i32_353 dim 1 : vector<16x512xf32>, i32 -> vector<16x512xf32>
    %c1_354 = arith.constant 1 : index
    %c0_355 = arith.constant 0 : index
    %395 = vector.load %arg2[%c1_354, %c0_355] : memref<8x512xf32, #tpu.memory_space<vmem>>, vector<1x512xf32>
    %396 = vector.broadcast %395 : vector<1x512xf32> to vector<16x512xf32>
    %397 = arith.mulf %394, %396 : vector<16x512xf32>
    %c16_356 = arith.constant 16 : index
    %c0_357 = arith.constant 0 : index
    %398 = vector.load %arg9[%c16_356, %c0_357] : memref<144x512xf32, #tpu.memory_space<vmem>>, vector<16x512xf32>
    tpu.vector_store %arg9[%c16_356, %c0_357], %397 {strides = array<i32>} : memref<144x512xf32, #tpu.memory_space<vmem>>, vector<16x512xf32>,
    %c31_i32_358 = arith.constant 31 : i32
    %399 = tpu.dynamic_rotate %388 by %c31_i32_358 dim 1 : vector<16x512xf32>, i32 -> vector<16x512xf32>
    %c2_359 = arith.constant 2 : index
    %c0_360 = arith.constant 0 : index
    %400 = vector.load %arg2[%c2_359, %c0_360] : memref<8x512xf32, #tpu.memory_space<vmem>>, vector<1x512xf32>
    %401 = vector.broadcast %400 : vector<1x512xf32> to vector<16x512xf32>
    %402 = arith.mulf %399, %401 : vector<16x512xf32>
    %c32_361 = arith.constant 32 : index
    %c0_362 = arith.constant 0 : index
    %403 = vector.load %arg9[%c32_361, %c0_362] : memref<144x512xf32, #tpu.memory_space<vmem>>, vector<16x512xf32>
    tpu.vector_store %arg9[%c32_361, %c0_362], %402 {strides = array<i32>} : memref<144x512xf32, #tpu.memory_space<vmem>>, vector<16x512xf32>,
    %c1_i32_363 = arith.constant 1 : i32
    %404 = tpu.dynamic_rotate %388 by %c1_i32_363 dim 1 : vector<16x512xf32>, i32 -> vector<16x512xf32>
    %c3_364 = arith.constant 3 : index
    %c0_365 = arith.constant 0 : index
    %405 = vector.load %arg2[%c3_364, %c0_365] : memref<8x512xf32, #tpu.memory_space<vmem>>, vector<1x512xf32>
    %406 = vector.broadcast %405 : vector<1x512xf32> to vector<16x512xf32>
    %407 = arith.mulf %404, %406 : vector<16x512xf32>
    %c48_366 = arith.constant 48 : index
    %c0_367 = arith.constant 0 : index
    %408 = vector.load %arg9[%c48_366, %c0_367] : memref<144x512xf32, #tpu.memory_space<vmem>>, vector<16x512xf32>
    tpu.vector_store %arg9[%c48_366, %c0_367], %407 {strides = array<i32>} : memref<144x512xf32, #tpu.memory_space<vmem>>, vector<16x512xf32>,
    %c64_368 = arith.constant 64 : index
    %c0_369 = arith.constant 0 : index
    %409 = vector.load %arg9[%c64_368, %c0_369] : memref<144x512xf32, #tpu.memory_space<vmem>>, vector<16x512xf32>
    tpu.vector_store %arg9[%c64_368, %c0_369], %388 {strides = array<i32>} : memref<144x512xf32, #tpu.memory_space<vmem>>, vector<16x512xf32>,
    %c511_i32_370 = arith.constant 511 : i32
    %410 = tpu.dynamic_rotate %388 by %c511_i32_370 dim 1 : vector<16x512xf32>, i32 -> vector<16x512xf32>
    %c4_371 = arith.constant 4 : index
    %c0_372 = arith.constant 0 : index
    %411 = vector.load %arg2[%c4_371, %c0_372] : memref<8x512xf32, #tpu.memory_space<vmem>>, vector<1x512xf32>
    %412 = vector.broadcast %411 : vector<1x512xf32> to vector<16x512xf32>
    %413 = arith.mulf %410, %412 : vector<16x512xf32>
    %c80_373 = arith.constant 80 : index
    %c0_374 = arith.constant 0 : index
    %414 = vector.load %arg9[%c80_373, %c0_374] : memref<144x512xf32, #tpu.memory_space<vmem>>, vector<16x512xf32>
    tpu.vector_store %arg9[%c80_373, %c0_374], %413 {strides = array<i32>} : memref<144x512xf32, #tpu.memory_space<vmem>>, vector<16x512xf32>,
    %c481_i32_375 = arith.constant 481 : i32
    %415 = tpu.dynamic_rotate %388 by %c481_i32_375 dim 1 : vector<16x512xf32>, i32 -> vector<16x512xf32>
    %c5_376 = arith.constant 5 : index
    %c0_377 = arith.constant 0 : index
    %416 = vector.load %arg2[%c5_376, %c0_377] : memref<8x512xf32, #tpu.memory_space<vmem>>, vector<1x512xf32>
    %417 = vector.broadcast %416 : vector<1x512xf32> to vector<16x512xf32>
    %418 = arith.mulf %415, %417 : vector<16x512xf32>
    %c96_378 = arith.constant 96 : index
    %c0_379 = arith.constant 0 : index
    %419 = vector.load %arg9[%c96_378, %c0_379] : memref<144x512xf32, #tpu.memory_space<vmem>>, vector<16x512xf32>
    tpu.vector_store %arg9[%c96_378, %c0_379], %418 {strides = array<i32>} : memref<144x512xf32, #tpu.memory_space<vmem>>, vector<16x512xf32>,
    %c480_i32_380 = arith.constant 480 : i32
    %420 = tpu.dynamic_rotate %388 by %c480_i32_380 dim 1 : vector<16x512xf32>, i32 -> vector<16x512xf32>
    %c6_381 = arith.constant 6 : index
    %c0_382 = arith.constant 0 : index
    %421 = vector.load %arg2[%c6_381, %c0_382] : memref<8x512xf32, #tpu.memory_space<vmem>>, vector<1x512xf32>
    %422 = vector.broadcast %421 : vector<1x512xf32> to vector<16x512xf32>
    %423 = arith.mulf %420, %422 : vector<16x512xf32>
    %c112_383 = arith.constant 112 : index
    %c0_384 = arith.constant 0 : index
    %424 = vector.load %arg9[%c112_383, %c0_384] : memref<144x512xf32, #tpu.memory_space<vmem>>, vector<16x512xf32>
    tpu.vector_store %arg9[%c112_383, %c0_384], %423 {strides = array<i32>} : memref<144x512xf32, #tpu.memory_space<vmem>>, vector<16x512xf32>,
    %c479_i32_385 = arith.constant 479 : i32
    %425 = tpu.dynamic_rotate %388 by %c479_i32_385 dim 1 : vector<16x512xf32>, i32 -> vector<16x512xf32>
    %c7_386 = arith.constant 7 : index
    %c0_387 = arith.constant 0 : index
    %426 = vector.load %arg2[%c7_386, %c0_387] : memref<8x512xf32, #tpu.memory_space<vmem>>, vector<1x512xf32>
    %427 = vector.broadcast %426 : vector<1x512xf32> to vector<16x512xf32>
    %428 = arith.mulf %425, %427 : vector<16x512xf32>
    %c128_388 = arith.constant 128 : index
    %c0_389 = arith.constant 0 : index
    %429 = vector.load %arg9[%c128_388, %c0_389] : memref<144x512xf32, #tpu.memory_space<vmem>>, vector<16x512xf32>
    tpu.vector_store %arg9[%c128_388, %c0_389], %428 {strides = array<i32>} : memref<144x512xf32, #tpu.memory_space<vmem>>, vector<16x512xf32>,
    %c72 = arith.constant 72 : index
    %c0_390 = arith.constant 0 : index
    %430 = vector.load %arg3[%c72, %c0_390] : memref<120x145xf32, #tpu.memory_space<vmem>>, vector<2x144xf32>
    %c72_391 = arith.constant 72 : index
    %c144_392 = arith.constant 144 : index
    %431 = vector.load %arg3[%c72_391, %c144_392] : memref<120x145xf32, #tpu.memory_space<vmem>>, vector<2x1xf32>
    %c0_393 = arith.constant 0 : index
    %c0_394 = arith.constant 0 : index
    %432 = vector.load %arg9[%c0_393, %c0_394] : memref<144x512xf32, #tpu.memory_space<vmem>>, vector<144x512xf32>
    %cst_395 = arith.constant dense<0.000000e+00> : vector<2x512xf32>
    %433 = tpu.matmul %430, %432, %cst_395 {dimension_numbers = #tpu.dot_dimension_numbers<[1], [0], [0], [1], [0, 0, 1, 1], [], []>} : vector<2x144xf32>, vector<144x512xf32>, vector<2x512xf32> -> vector<2x512xf32>
    %434 = vector.broadcast %431 : vector<2x1xf32> to vector<2x512xf32>
    %435 = arith.addf %433, %434 : vector<2x512xf32>
    %cst_396 = arith.constant 0.000000e+00 : f32
    %436 = vector.broadcast %cst_396 : f32 to vector<2x512xf32>
    %437 = arith.maximumf %435, %436 : vector<2x512xf32>
    %438 = arith.addf %290, %437 : vector<2x512xf32>
    %c33_i32_397 = arith.constant 33 : i32
    %439 = tpu.dynamic_rotate %438 by %c33_i32_397 dim 1 : vector<2x512xf32>, i32 -> vector<2x512xf32>
    %c0_398 = arith.constant 0 : index
    %c0_399 = arith.constant 0 : index
    %440 = vector.load %arg2[%c0_398, %c0_399] : memref<8x512xf32, #tpu.memory_space<vmem>>, vector<1x512xf32>
    %441 = vector.broadcast %440 : vector<1x512xf32> to vector<2x512xf32>
    %442 = arith.mulf %439, %441 : vector<2x512xf32>
    %c0_400 = arith.constant 0 : index
    %c0_401 = arith.constant 0 : index
    %443 = vector.load %arg9[%c0_400, %c0_401] : memref<144x512xf32, #tpu.memory_space<vmem>>, vector<2x512xf32>
    tpu.vector_store %arg9[%c0_400, %c0_401], %442 {strides = array<i32>} : memref<144x512xf32, #tpu.memory_space<vmem>>, vector<2x512xf32>,
    %c32_i32_402 = arith.constant 32 : i32
    %444 = tpu.dynamic_rotate %438 by %c32_i32_402 dim 1 : vector<2x512xf32>, i32 -> vector<2x512xf32>
    %c1_403 = arith.constant 1 : index
    %c0_404 = arith.constant 0 : index
    %445 = vector.load %arg2[%c1_403, %c0_404] : memref<8x512xf32, #tpu.memory_space<vmem>>, vector<1x512xf32>
    %446 = vector.broadcast %445 : vector<1x512xf32> to vector<2x512xf32>
    %447 = arith.mulf %444, %446 : vector<2x512xf32>
    %c2_405 = arith.constant 2 : index
    %c0_406 = arith.constant 0 : index
    %448 = vector.load %arg9[%c2_405, %c0_406] : memref<144x512xf32, #tpu.memory_space<vmem>>, vector<2x512xf32>
    tpu.vector_store %arg9[%c2_405, %c0_406], %447 {strides = array<i32>} : memref<144x512xf32, #tpu.memory_space<vmem>>, vector<2x512xf32>,
    %c31_i32_407 = arith.constant 31 : i32
    %449 = tpu.dynamic_rotate %438 by %c31_i32_407 dim 1 : vector<2x512xf32>, i32 -> vector<2x512xf32>
    %c2_408 = arith.constant 2 : index
    %c0_409 = arith.constant 0 : index
    %450 = vector.load %arg2[%c2_408, %c0_409] : memref<8x512xf32, #tpu.memory_space<vmem>>, vector<1x512xf32>
    %451 = vector.broadcast %450 : vector<1x512xf32> to vector<2x512xf32>
    %452 = arith.mulf %449, %451 : vector<2x512xf32>
    %c4_410 = arith.constant 4 : index
    %c0_411 = arith.constant 0 : index
    %453 = vector.load %arg9[%c4_410, %c0_411] : memref<144x512xf32, #tpu.memory_space<vmem>>, vector<2x512xf32>
    tpu.vector_store %arg9[%c4_410, %c0_411], %452 {strides = array<i32>} : memref<144x512xf32, #tpu.memory_space<vmem>>, vector<2x512xf32>,
    %c1_i32_412 = arith.constant 1 : i32
    %454 = tpu.dynamic_rotate %438 by %c1_i32_412 dim 1 : vector<2x512xf32>, i32 -> vector<2x512xf32>
    %c3_413 = arith.constant 3 : index
    %c0_414 = arith.constant 0 : index
    %455 = vector.load %arg2[%c3_413, %c0_414] : memref<8x512xf32, #tpu.memory_space<vmem>>, vector<1x512xf32>
    %456 = vector.broadcast %455 : vector<1x512xf32> to vector<2x512xf32>
    %457 = arith.mulf %454, %456 : vector<2x512xf32>
    %c6_415 = arith.constant 6 : index
    %c0_416 = arith.constant 0 : index
    %458 = vector.load %arg9[%c6_415, %c0_416] : memref<144x512xf32, #tpu.memory_space<vmem>>, vector<2x512xf32>
    tpu.vector_store %arg9[%c6_415, %c0_416], %457 {strides = array<i32>} : memref<144x512xf32, #tpu.memory_space<vmem>>, vector<2x512xf32>,
    %c8_417 = arith.constant 8 : index
    %c0_418 = arith.constant 0 : index
    %459 = vector.load %arg9[%c8_417, %c0_418] : memref<144x512xf32, #tpu.memory_space<vmem>>, vector<2x512xf32>
    tpu.vector_store %arg9[%c8_417, %c0_418], %438 {strides = array<i32>} : memref<144x512xf32, #tpu.memory_space<vmem>>, vector<2x512xf32>,
    %c511_i32_419 = arith.constant 511 : i32
    %460 = tpu.dynamic_rotate %438 by %c511_i32_419 dim 1 : vector<2x512xf32>, i32 -> vector<2x512xf32>
    %c4_420 = arith.constant 4 : index
    %c0_421 = arith.constant 0 : index
    %461 = vector.load %arg2[%c4_420, %c0_421] : memref<8x512xf32, #tpu.memory_space<vmem>>, vector<1x512xf32>
    %462 = vector.broadcast %461 : vector<1x512xf32> to vector<2x512xf32>
    %463 = arith.mulf %460, %462 : vector<2x512xf32>
    %c10_422 = arith.constant 10 : index
    %c0_423 = arith.constant 0 : index
    %464 = vector.load %arg9[%c10_422, %c0_423] : memref<144x512xf32, #tpu.memory_space<vmem>>, vector<2x512xf32>
    tpu.vector_store %arg9[%c10_422, %c0_423], %463 {strides = array<i32>} : memref<144x512xf32, #tpu.memory_space<vmem>>, vector<2x512xf32>,
    %c481_i32_424 = arith.constant 481 : i32
    %465 = tpu.dynamic_rotate %438 by %c481_i32_424 dim 1 : vector<2x512xf32>, i32 -> vector<2x512xf32>
    %c5_425 = arith.constant 5 : index
    %c0_426 = arith.constant 0 : index
    %466 = vector.load %arg2[%c5_425, %c0_426] : memref<8x512xf32, #tpu.memory_space<vmem>>, vector<1x512xf32>
    %467 = vector.broadcast %466 : vector<1x512xf32> to vector<2x512xf32>
    %468 = arith.mulf %465, %467 : vector<2x512xf32>
    %c12_427 = arith.constant 12 : index
    %c0_428 = arith.constant 0 : index
    %469 = vector.load %arg9[%c12_427, %c0_428] : memref<144x512xf32, #tpu.memory_space<vmem>>, vector<2x512xf32>
    tpu.vector_store %arg9[%c12_427, %c0_428], %468 {strides = array<i32>} : memref<144x512xf32, #tpu.memory_space<vmem>>, vector<2x512xf32>,
    %c480_i32_429 = arith.constant 480 : i32
    %470 = tpu.dynamic_rotate %438 by %c480_i32_429 dim 1 : vector<2x512xf32>, i32 -> vector<2x512xf32>
    %c6_430 = arith.constant 6 : index
    %c0_431 = arith.constant 0 : index
    %471 = vector.load %arg2[%c6_430, %c0_431] : memref<8x512xf32, #tpu.memory_space<vmem>>, vector<1x512xf32>
    %472 = vector.broadcast %471 : vector<1x512xf32> to vector<2x512xf32>
    %473 = arith.mulf %470, %472 : vector<2x512xf32>
    %c14_432 = arith.constant 14 : index
    %c0_433 = arith.constant 0 : index
    %474 = vector.load %arg9[%c14_432, %c0_433] : memref<144x512xf32, #tpu.memory_space<vmem>>, vector<2x512xf32>
    tpu.vector_store %arg9[%c14_432, %c0_433], %473 {strides = array<i32>} : memref<144x512xf32, #tpu.memory_space<vmem>>, vector<2x512xf32>,
    %c479_i32_434 = arith.constant 479 : i32
    %475 = tpu.dynamic_rotate %438 by %c479_i32_434 dim 1 : vector<2x512xf32>, i32 -> vector<2x512xf32>
    %c7_435 = arith.constant 7 : index
    %c0_436 = arith.constant 0 : index
    %476 = vector.load %arg2[%c7_435, %c0_436] : memref<8x512xf32, #tpu.memory_space<vmem>>, vector<1x512xf32>
    %477 = vector.broadcast %476 : vector<1x512xf32> to vector<2x512xf32>
    %478 = arith.mulf %475, %477 : vector<2x512xf32>
    %c16_437 = arith.constant 16 : index
    %c0_438 = arith.constant 0 : index
    %479 = vector.load %arg9[%c16_437, %c0_438] : memref<144x512xf32, #tpu.memory_space<vmem>>, vector<2x512xf32>
    tpu.vector_store %arg9[%c16_437, %c0_438], %478 {strides = array<i32>} : memref<144x512xf32, #tpu.memory_space<vmem>>, vector<2x512xf32>,
    %c80_439 = arith.constant 80 : index
    %c0_440 = arith.constant 0 : index
    %480 = vector.load %arg3[%c80_439, %c0_440] : memref<120x145xf32, #tpu.memory_space<vmem>>, vector<8x18xf32>
    %c80_441 = arith.constant 80 : index
    %c144_442 = arith.constant 144 : index
    %481 = vector.load %arg3[%c80_441, %c144_442] : memref<120x145xf32, #tpu.memory_space<vmem>>, vector<8x1xf32>
    %c0_443 = arith.constant 0 : index
    %c0_444 = arith.constant 0 : index
    %482 = vector.load %arg9[%c0_443, %c0_444] : memref<144x512xf32, #tpu.memory_space<vmem>>, vector<18x512xf32>
    %cst_445 = arith.constant dense<0.000000e+00> : vector<8x512xf32>
    %483 = tpu.matmul %480, %482, %cst_445 {dimension_numbers = #tpu.dot_dimension_numbers<[1], [0], [0], [1], [0, 0, 1, 1], [], []>} : vector<8x18xf32>, vector<18x512xf32>, vector<8x512xf32> -> vector<8x512xf32>
    %484 = vector.broadcast %481 : vector<8x1xf32> to vector<8x512xf32>
    %485 = arith.addf %483, %484 : vector<8x512xf32>
    %cst_446 = arith.constant 0.000000e+00 : f32
    %486 = vector.broadcast %cst_446 : f32 to vector<8x512xf32>
    %487 = arith.maximumf %485, %486 : vector<8x512xf32>
    %c33_i32_447 = arith.constant 33 : i32
    %488 = tpu.dynamic_rotate %487 by %c33_i32_447 dim 1 : vector<8x512xf32>, i32 -> vector<8x512xf32>
    %c0_448 = arith.constant 0 : index
    %c0_449 = arith.constant 0 : index
    %489 = vector.load %arg2[%c0_448, %c0_449] : memref<8x512xf32, #tpu.memory_space<vmem>>, vector<1x512xf32>
    %490 = vector.broadcast %489 : vector<1x512xf32> to vector<8x512xf32>
    %491 = arith.mulf %488, %490 : vector<8x512xf32>
    %c0_450 = arith.constant 0 : index
    %c0_451 = arith.constant 0 : index
    %492 = vector.load %arg9[%c0_450, %c0_451] : memref<144x512xf32, #tpu.memory_space<vmem>>, vector<8x512xf32>
    tpu.vector_store %arg9[%c0_450, %c0_451], %491 {strides = array<i32>} : memref<144x512xf32, #tpu.memory_space<vmem>>, vector<8x512xf32>,
    %c32_i32_452 = arith.constant 32 : i32
    %493 = tpu.dynamic_rotate %487 by %c32_i32_452 dim 1 : vector<8x512xf32>, i32 -> vector<8x512xf32>
    %c1_453 = arith.constant 1 : index
    %c0_454 = arith.constant 0 : index
    %494 = vector.load %arg2[%c1_453, %c0_454] : memref<8x512xf32, #tpu.memory_space<vmem>>, vector<1x512xf32>
    %495 = vector.broadcast %494 : vector<1x512xf32> to vector<8x512xf32>
    %496 = arith.mulf %493, %495 : vector<8x512xf32>
    %c8_455 = arith.constant 8 : index
    %c0_456 = arith.constant 0 : index
    %497 = vector.load %arg9[%c8_455, %c0_456] : memref<144x512xf32, #tpu.memory_space<vmem>>, vector<8x512xf32>
    tpu.vector_store %arg9[%c8_455, %c0_456], %496 {strides = array<i32>} : memref<144x512xf32, #tpu.memory_space<vmem>>, vector<8x512xf32>,
    %c31_i32_457 = arith.constant 31 : i32
    %498 = tpu.dynamic_rotate %487 by %c31_i32_457 dim 1 : vector<8x512xf32>, i32 -> vector<8x512xf32>
    %c2_458 = arith.constant 2 : index
    %c0_459 = arith.constant 0 : index
    %499 = vector.load %arg2[%c2_458, %c0_459] : memref<8x512xf32, #tpu.memory_space<vmem>>, vector<1x512xf32>
    %500 = vector.broadcast %499 : vector<1x512xf32> to vector<8x512xf32>
    %501 = arith.mulf %498, %500 : vector<8x512xf32>
    %c16_460 = arith.constant 16 : index
    %c0_461 = arith.constant 0 : index
    %502 = vector.load %arg9[%c16_460, %c0_461] : memref<144x512xf32, #tpu.memory_space<vmem>>, vector<8x512xf32>
    tpu.vector_store %arg9[%c16_460, %c0_461], %501 {strides = array<i32>} : memref<144x512xf32, #tpu.memory_space<vmem>>, vector<8x512xf32>,
    %c1_i32_462 = arith.constant 1 : i32
    %503 = tpu.dynamic_rotate %487 by %c1_i32_462 dim 1 : vector<8x512xf32>, i32 -> vector<8x512xf32>
    %c3_463 = arith.constant 3 : index
    %c0_464 = arith.constant 0 : index
    %504 = vector.load %arg2[%c3_463, %c0_464] : memref<8x512xf32, #tpu.memory_space<vmem>>, vector<1x512xf32>
    %505 = vector.broadcast %504 : vector<1x512xf32> to vector<8x512xf32>
    %506 = arith.mulf %503, %505 : vector<8x512xf32>
    %c24_465 = arith.constant 24 : index
    %c0_466 = arith.constant 0 : index
    %507 = vector.load %arg9[%c24_465, %c0_466] : memref<144x512xf32, #tpu.memory_space<vmem>>, vector<8x512xf32>
    tpu.vector_store %arg9[%c24_465, %c0_466], %506 {strides = array<i32>} : memref<144x512xf32, #tpu.memory_space<vmem>>, vector<8x512xf32>,
    %c32_467 = arith.constant 32 : index
    %c0_468 = arith.constant 0 : index
    %508 = vector.load %arg9[%c32_467, %c0_468] : memref<144x512xf32, #tpu.memory_space<vmem>>, vector<8x512xf32>
    tpu.vector_store %arg9[%c32_467, %c0_468], %487 {strides = array<i32>} : memref<144x512xf32, #tpu.memory_space<vmem>>, vector<8x512xf32>,
    %c511_i32_469 = arith.constant 511 : i32
    %509 = tpu.dynamic_rotate %487 by %c511_i32_469 dim 1 : vector<8x512xf32>, i32 -> vector<8x512xf32>
    %c4_470 = arith.constant 4 : index
    %c0_471 = arith.constant 0 : index
    %510 = vector.load %arg2[%c4_470, %c0_471] : memref<8x512xf32, #tpu.memory_space<vmem>>, vector<1x512xf32>
    %511 = vector.broadcast %510 : vector<1x512xf32> to vector<8x512xf32>
    %512 = arith.mulf %509, %511 : vector<8x512xf32>
    %c40_472 = arith.constant 40 : index
    %c0_473 = arith.constant 0 : index
    %513 = vector.load %arg9[%c40_472, %c0_473] : memref<144x512xf32, #tpu.memory_space<vmem>>, vector<8x512xf32>
    tpu.vector_store %arg9[%c40_472, %c0_473], %512 {strides = array<i32>} : memref<144x512xf32, #tpu.memory_space<vmem>>, vector<8x512xf32>,
    %c481_i32_474 = arith.constant 481 : i32
    %514 = tpu.dynamic_rotate %487 by %c481_i32_474 dim 1 : vector<8x512xf32>, i32 -> vector<8x512xf32>
    %c5_475 = arith.constant 5 : index
    %c0_476 = arith.constant 0 : index
    %515 = vector.load %arg2[%c5_475, %c0_476] : memref<8x512xf32, #tpu.memory_space<vmem>>, vector<1x512xf32>
    %516 = vector.broadcast %515 : vector<1x512xf32> to vector<8x512xf32>
    %517 = arith.mulf %514, %516 : vector<8x512xf32>
    %c48_477 = arith.constant 48 : index
    %c0_478 = arith.constant 0 : index
    %518 = vector.load %arg9[%c48_477, %c0_478] : memref<144x512xf32, #tpu.memory_space<vmem>>, vector<8x512xf32>
    tpu.vector_store %arg9[%c48_477, %c0_478], %517 {strides = array<i32>} : memref<144x512xf32, #tpu.memory_space<vmem>>, vector<8x512xf32>,
    %c480_i32_479 = arith.constant 480 : i32
    %519 = tpu.dynamic_rotate %487 by %c480_i32_479 dim 1 : vector<8x512xf32>, i32 -> vector<8x512xf32>
    %c6_480 = arith.constant 6 : index
    %c0_481 = arith.constant 0 : index
    %520 = vector.load %arg2[%c6_480, %c0_481] : memref<8x512xf32, #tpu.memory_space<vmem>>, vector<1x512xf32>
    %521 = vector.broadcast %520 : vector<1x512xf32> to vector<8x512xf32>
    %522 = arith.mulf %519, %521 : vector<8x512xf32>
    %c56_482 = arith.constant 56 : index
    %c0_483 = arith.constant 0 : index
    %523 = vector.load %arg9[%c56_482, %c0_483] : memref<144x512xf32, #tpu.memory_space<vmem>>, vector<8x512xf32>
    tpu.vector_store %arg9[%c56_482, %c0_483], %522 {strides = array<i32>} : memref<144x512xf32, #tpu.memory_space<vmem>>, vector<8x512xf32>,
    %c479_i32_484 = arith.constant 479 : i32
    %524 = tpu.dynamic_rotate %487 by %c479_i32_484 dim 1 : vector<8x512xf32>, i32 -> vector<8x512xf32>
    %c7_485 = arith.constant 7 : index
    %c0_486 = arith.constant 0 : index
    %525 = vector.load %arg2[%c7_485, %c0_486] : memref<8x512xf32, #tpu.memory_space<vmem>>, vector<1x512xf32>
    %526 = vector.broadcast %525 : vector<1x512xf32> to vector<8x512xf32>
    %527 = arith.mulf %524, %526 : vector<8x512xf32>
    %c64_487 = arith.constant 64 : index
    %c0_488 = arith.constant 0 : index
    %528 = vector.load %arg9[%c64_487, %c0_488] : memref<144x512xf32, #tpu.memory_space<vmem>>, vector<8x512xf32>
    tpu.vector_store %arg9[%c64_487, %c0_488], %527 {strides = array<i32>} : memref<144x512xf32, #tpu.memory_space<vmem>>, vector<8x512xf32>,
    %c88 = arith.constant 88 : index
    %c0_489 = arith.constant 0 : index
    %529 = vector.load %arg3[%c88, %c0_489] : memref<120x145xf32, #tpu.memory_space<vmem>>, vector<16x72xf32>
    %c88_490 = arith.constant 88 : index
    %c144_491 = arith.constant 144 : index
    %530 = vector.load %arg3[%c88_490, %c144_491] : memref<120x145xf32, #tpu.memory_space<vmem>>, vector<16x1xf32>
    %c0_492 = arith.constant 0 : index
    %c0_493 = arith.constant 0 : index
    %531 = vector.load %arg9[%c0_492, %c0_493] : memref<144x512xf32, #tpu.memory_space<vmem>>, vector<72x512xf32>
    %cst_494 = arith.constant dense<0.000000e+00> : vector<16x512xf32>
    %532 = tpu.matmul %529, %531, %cst_494 {dimension_numbers = #tpu.dot_dimension_numbers<[1], [0], [0], [1], [0, 0, 1, 1], [], []>} : vector<16x72xf32>, vector<72x512xf32>, vector<16x512xf32> -> vector<16x512xf32>
    %533 = vector.broadcast %530 : vector<16x1xf32> to vector<16x512xf32>
    %534 = arith.addf %532, %533 : vector<16x512xf32>
    %cst_495 = arith.constant 0.000000e+00 : f32
    %535 = vector.broadcast %cst_495 : f32 to vector<16x512xf32>
    %536 = arith.maximumf %534, %535 : vector<16x512xf32>
    %c33_i32_496 = arith.constant 33 : i32
    %537 = tpu.dynamic_rotate %536 by %c33_i32_496 dim 1 : vector<16x512xf32>, i32 -> vector<16x512xf32>
    %c0_497 = arith.constant 0 : index
    %c0_498 = arith.constant 0 : index
    %538 = vector.load %arg2[%c0_497, %c0_498] : memref<8x512xf32, #tpu.memory_space<vmem>>, vector<1x512xf32>
    %539 = vector.broadcast %538 : vector<1x512xf32> to vector<16x512xf32>
    %540 = arith.mulf %537, %539 : vector<16x512xf32>
    %c0_499 = arith.constant 0 : index
    %c0_500 = arith.constant 0 : index
    %541 = vector.load %arg9[%c0_499, %c0_500] : memref<144x512xf32, #tpu.memory_space<vmem>>, vector<16x512xf32>
    tpu.vector_store %arg9[%c0_499, %c0_500], %540 {strides = array<i32>} : memref<144x512xf32, #tpu.memory_space<vmem>>, vector<16x512xf32>,
    %c32_i32_501 = arith.constant 32 : i32
    %542 = tpu.dynamic_rotate %536 by %c32_i32_501 dim 1 : vector<16x512xf32>, i32 -> vector<16x512xf32>
    %c1_502 = arith.constant 1 : index
    %c0_503 = arith.constant 0 : index
    %543 = vector.load %arg2[%c1_502, %c0_503] : memref<8x512xf32, #tpu.memory_space<vmem>>, vector<1x512xf32>
    %544 = vector.broadcast %543 : vector<1x512xf32> to vector<16x512xf32>
    %545 = arith.mulf %542, %544 : vector<16x512xf32>
    %c16_504 = arith.constant 16 : index
    %c0_505 = arith.constant 0 : index
    %546 = vector.load %arg9[%c16_504, %c0_505] : memref<144x512xf32, #tpu.memory_space<vmem>>, vector<16x512xf32>
    tpu.vector_store %arg9[%c16_504, %c0_505], %545 {strides = array<i32>} : memref<144x512xf32, #tpu.memory_space<vmem>>, vector<16x512xf32>,
    %c31_i32_506 = arith.constant 31 : i32
    %547 = tpu.dynamic_rotate %536 by %c31_i32_506 dim 1 : vector<16x512xf32>, i32 -> vector<16x512xf32>
    %c2_507 = arith.constant 2 : index
    %c0_508 = arith.constant 0 : index
    %548 = vector.load %arg2[%c2_507, %c0_508] : memref<8x512xf32, #tpu.memory_space<vmem>>, vector<1x512xf32>
    %549 = vector.broadcast %548 : vector<1x512xf32> to vector<16x512xf32>
    %550 = arith.mulf %547, %549 : vector<16x512xf32>
    %c32_509 = arith.constant 32 : index
    %c0_510 = arith.constant 0 : index
    %551 = vector.load %arg9[%c32_509, %c0_510] : memref<144x512xf32, #tpu.memory_space<vmem>>, vector<16x512xf32>
    tpu.vector_store %arg9[%c32_509, %c0_510], %550 {strides = array<i32>} : memref<144x512xf32, #tpu.memory_space<vmem>>, vector<16x512xf32>,
    %c1_i32_511 = arith.constant 1 : i32
    %552 = tpu.dynamic_rotate %536 by %c1_i32_511 dim 1 : vector<16x512xf32>, i32 -> vector<16x512xf32>
    %c3_512 = arith.constant 3 : index
    %c0_513 = arith.constant 0 : index
    %553 = vector.load %arg2[%c3_512, %c0_513] : memref<8x512xf32, #tpu.memory_space<vmem>>, vector<1x512xf32>
    %554 = vector.broadcast %553 : vector<1x512xf32> to vector<16x512xf32>
    %555 = arith.mulf %552, %554 : vector<16x512xf32>
    %c48_514 = arith.constant 48 : index
    %c0_515 = arith.constant 0 : index
    %556 = vector.load %arg9[%c48_514, %c0_515] : memref<144x512xf32, #tpu.memory_space<vmem>>, vector<16x512xf32>
    tpu.vector_store %arg9[%c48_514, %c0_515], %555 {strides = array<i32>} : memref<144x512xf32, #tpu.memory_space<vmem>>, vector<16x512xf32>,
    %c64_516 = arith.constant 64 : index
    %c0_517 = arith.constant 0 : index
    %557 = vector.load %arg9[%c64_516, %c0_517] : memref<144x512xf32, #tpu.memory_space<vmem>>, vector<16x512xf32>
    tpu.vector_store %arg9[%c64_516, %c0_517], %536 {strides = array<i32>} : memref<144x512xf32, #tpu.memory_space<vmem>>, vector<16x512xf32>,
    %c511_i32_518 = arith.constant 511 : i32
    %558 = tpu.dynamic_rotate %536 by %c511_i32_518 dim 1 : vector<16x512xf32>, i32 -> vector<16x512xf32>
    %c4_519 = arith.constant 4 : index
    %c0_520 = arith.constant 0 : index
    %559 = vector.load %arg2[%c4_519, %c0_520] : memref<8x512xf32, #tpu.memory_space<vmem>>, vector<1x512xf32>
    %560 = vector.broadcast %559 : vector<1x512xf32> to vector<16x512xf32>
    %561 = arith.mulf %558, %560 : vector<16x512xf32>
    %c80_521 = arith.constant 80 : index
    %c0_522 = arith.constant 0 : index
    %562 = vector.load %arg9[%c80_521, %c0_522] : memref<144x512xf32, #tpu.memory_space<vmem>>, vector<16x512xf32>
    tpu.vector_store %arg9[%c80_521, %c0_522], %561 {strides = array<i32>} : memref<144x512xf32, #tpu.memory_space<vmem>>, vector<16x512xf32>,
    %c481_i32_523 = arith.constant 481 : i32
    %563 = tpu.dynamic_rotate %536 by %c481_i32_523 dim 1 : vector<16x512xf32>, i32 -> vector<16x512xf32>
    %c5_524 = arith.constant 5 : index
    %c0_525 = arith.constant 0 : index
    %564 = vector.load %arg2[%c5_524, %c0_525] : memref<8x512xf32, #tpu.memory_space<vmem>>, vector<1x512xf32>
    %565 = vector.broadcast %564 : vector<1x512xf32> to vector<16x512xf32>
    %566 = arith.mulf %563, %565 : vector<16x512xf32>
    %c96_526 = arith.constant 96 : index
    %c0_527 = arith.constant 0 : index
    %567 = vector.load %arg9[%c96_526, %c0_527] : memref<144x512xf32, #tpu.memory_space<vmem>>, vector<16x512xf32>
    tpu.vector_store %arg9[%c96_526, %c0_527], %566 {strides = array<i32>} : memref<144x512xf32, #tpu.memory_space<vmem>>, vector<16x512xf32>,
    %c480_i32_528 = arith.constant 480 : i32
    %568 = tpu.dynamic_rotate %536 by %c480_i32_528 dim 1 : vector<16x512xf32>, i32 -> vector<16x512xf32>
    %c6_529 = arith.constant 6 : index
    %c0_530 = arith.constant 0 : index
    %569 = vector.load %arg2[%c6_529, %c0_530] : memref<8x512xf32, #tpu.memory_space<vmem>>, vector<1x512xf32>
    %570 = vector.broadcast %569 : vector<1x512xf32> to vector<16x512xf32>
    %571 = arith.mulf %568, %570 : vector<16x512xf32>
    %c112_531 = arith.constant 112 : index
    %c0_532 = arith.constant 0 : index
    %572 = vector.load %arg9[%c112_531, %c0_532] : memref<144x512xf32, #tpu.memory_space<vmem>>, vector<16x512xf32>
    tpu.vector_store %arg9[%c112_531, %c0_532], %571 {strides = array<i32>} : memref<144x512xf32, #tpu.memory_space<vmem>>, vector<16x512xf32>,
    %c479_i32_533 = arith.constant 479 : i32
    %573 = tpu.dynamic_rotate %536 by %c479_i32_533 dim 1 : vector<16x512xf32>, i32 -> vector<16x512xf32>
    %c7_534 = arith.constant 7 : index
    %c0_535 = arith.constant 0 : index
    %574 = vector.load %arg2[%c7_534, %c0_535] : memref<8x512xf32, #tpu.memory_space<vmem>>, vector<1x512xf32>
    %575 = vector.broadcast %574 : vector<1x512xf32> to vector<16x512xf32>
    %576 = arith.mulf %573, %575 : vector<16x512xf32>
    %c128_536 = arith.constant 128 : index
    %c0_537 = arith.constant 0 : index
    %577 = vector.load %arg9[%c128_536, %c0_537] : memref<144x512xf32, #tpu.memory_space<vmem>>, vector<16x512xf32>
    tpu.vector_store %arg9[%c128_536, %c0_537], %576 {strides = array<i32>} : memref<144x512xf32, #tpu.memory_space<vmem>>, vector<16x512xf32>,
    %c104 = arith.constant 104 : index
    %c0_538 = arith.constant 0 : index
    %578 = vector.load %arg3[%c104, %c0_538] : memref<120x145xf32, #tpu.memory_space<vmem>>, vector<2x144xf32>
    %c104_539 = arith.constant 104 : index
    %c144_540 = arith.constant 144 : index
    %579 = vector.load %arg3[%c104_539, %c144_540] : memref<120x145xf32, #tpu.memory_space<vmem>>, vector<2x1xf32>
    %c0_541 = arith.constant 0 : index
    %c0_542 = arith.constant 0 : index
    %580 = vector.load %arg9[%c0_541, %c0_542] : memref<144x512xf32, #tpu.memory_space<vmem>>, vector<144x512xf32>
    %cst_543 = arith.constant dense<0.000000e+00> : vector<2x512xf32>
    %581 = tpu.matmul %578, %580, %cst_543 {dimension_numbers = #tpu.dot_dimension_numbers<[1], [0], [0], [1], [0, 0, 1, 1], [], []>} : vector<2x144xf32>, vector<144x512xf32>, vector<2x512xf32> -> vector<2x512xf32>
    %582 = vector.broadcast %579 : vector<2x1xf32> to vector<2x512xf32>
    %583 = arith.addf %581, %582 : vector<2x512xf32>
    %cst_544 = arith.constant 0.000000e+00 : f32
    %584 = vector.broadcast %cst_544 : f32 to vector<2x512xf32>
    %585 = arith.maximumf %583, %584 : vector<2x512xf32>
    %586 = arith.addf %438, %585 : vector<2x512xf32>
    %c33_i32_545 = arith.constant 33 : i32
    %587 = tpu.dynamic_rotate %586 by %c33_i32_545 dim 1 : vector<2x512xf32>, i32 -> vector<2x512xf32>
    %c0_546 = arith.constant 0 : index
    %c0_547 = arith.constant 0 : index
    %588 = vector.load %arg2[%c0_546, %c0_547] : memref<8x512xf32, #tpu.memory_space<vmem>>, vector<1x512xf32>
    %589 = vector.broadcast %588 : vector<1x512xf32> to vector<2x512xf32>
    %590 = arith.mulf %587, %589 : vector<2x512xf32>
    %c0_548 = arith.constant 0 : index
    %c0_549 = arith.constant 0 : index
    %591 = vector.load %arg9[%c0_548, %c0_549] : memref<144x512xf32, #tpu.memory_space<vmem>>, vector<2x512xf32>
    tpu.vector_store %arg9[%c0_548, %c0_549], %590 {strides = array<i32>} : memref<144x512xf32, #tpu.memory_space<vmem>>, vector<2x512xf32>,
    %c32_i32_550 = arith.constant 32 : i32
    %592 = tpu.dynamic_rotate %586 by %c32_i32_550 dim 1 : vector<2x512xf32>, i32 -> vector<2x512xf32>
    %c1_551 = arith.constant 1 : index
    %c0_552 = arith.constant 0 : index
    %593 = vector.load %arg2[%c1_551, %c0_552] : memref<8x512xf32, #tpu.memory_space<vmem>>, vector<1x512xf32>
    %594 = vector.broadcast %593 : vector<1x512xf32> to vector<2x512xf32>
    %595 = arith.mulf %592, %594 : vector<2x512xf32>
    %c2_553 = arith.constant 2 : index
    %c0_554 = arith.constant 0 : index
    %596 = vector.load %arg9[%c2_553, %c0_554] : memref<144x512xf32, #tpu.memory_space<vmem>>, vector<2x512xf32>
    tpu.vector_store %arg9[%c2_553, %c0_554], %595 {strides = array<i32>} : memref<144x512xf32, #tpu.memory_space<vmem>>, vector<2x512xf32>,
    %c31_i32_555 = arith.constant 31 : i32
    %597 = tpu.dynamic_rotate %586 by %c31_i32_555 dim 1 : vector<2x512xf32>, i32 -> vector<2x512xf32>
    %c2_556 = arith.constant 2 : index
    %c0_557 = arith.constant 0 : index
    %598 = vector.load %arg2[%c2_556, %c0_557] : memref<8x512xf32, #tpu.memory_space<vmem>>, vector<1x512xf32>
    %599 = vector.broadcast %598 : vector<1x512xf32> to vector<2x512xf32>
    %600 = arith.mulf %597, %599 : vector<2x512xf32>
    %c4_558 = arith.constant 4 : index
    %c0_559 = arith.constant 0 : index
    %601 = vector.load %arg9[%c4_558, %c0_559] : memref<144x512xf32, #tpu.memory_space<vmem>>, vector<2x512xf32>
    tpu.vector_store %arg9[%c4_558, %c0_559], %600 {strides = array<i32>} : memref<144x512xf32, #tpu.memory_space<vmem>>, vector<2x512xf32>,
    %c1_i32_560 = arith.constant 1 : i32
    %602 = tpu.dynamic_rotate %586 by %c1_i32_560 dim 1 : vector<2x512xf32>, i32 -> vector<2x512xf32>
    %c3_561 = arith.constant 3 : index
    %c0_562 = arith.constant 0 : index
    %603 = vector.load %arg2[%c3_561, %c0_562] : memref<8x512xf32, #tpu.memory_space<vmem>>, vector<1x512xf32>
    %604 = vector.broadcast %603 : vector<1x512xf32> to vector<2x512xf32>
    %605 = arith.mulf %602, %604 : vector<2x512xf32>
    %c6_563 = arith.constant 6 : index
    %c0_564 = arith.constant 0 : index
    %606 = vector.load %arg9[%c6_563, %c0_564] : memref<144x512xf32, #tpu.memory_space<vmem>>, vector<2x512xf32>
    tpu.vector_store %arg9[%c6_563, %c0_564], %605 {strides = array<i32>} : memref<144x512xf32, #tpu.memory_space<vmem>>, vector<2x512xf32>,
    %c8_565 = arith.constant 8 : index
    %c0_566 = arith.constant 0 : index
    %607 = vector.load %arg9[%c8_565, %c0_566] : memref<144x512xf32, #tpu.memory_space<vmem>>, vector<2x512xf32>
    tpu.vector_store %arg9[%c8_565, %c0_566], %586 {strides = array<i32>} : memref<144x512xf32, #tpu.memory_space<vmem>>, vector<2x512xf32>,
    %c511_i32_567 = arith.constant 511 : i32
    %608 = tpu.dynamic_rotate %586 by %c511_i32_567 dim 1 : vector<2x512xf32>, i32 -> vector<2x512xf32>
    %c4_568 = arith.constant 4 : index
    %c0_569 = arith.constant 0 : index
    %609 = vector.load %arg2[%c4_568, %c0_569] : memref<8x512xf32, #tpu.memory_space<vmem>>, vector<1x512xf32>
    %610 = vector.broadcast %609 : vector<1x512xf32> to vector<2x512xf32>
    %611 = arith.mulf %608, %610 : vector<2x512xf32>
    %c10_570 = arith.constant 10 : index
    %c0_571 = arith.constant 0 : index
    %612 = vector.load %arg9[%c10_570, %c0_571] : memref<144x512xf32, #tpu.memory_space<vmem>>, vector<2x512xf32>
    tpu.vector_store %arg9[%c10_570, %c0_571], %611 {strides = array<i32>} : memref<144x512xf32, #tpu.memory_space<vmem>>, vector<2x512xf32>,
    %c481_i32_572 = arith.constant 481 : i32
    %613 = tpu.dynamic_rotate %586 by %c481_i32_572 dim 1 : vector<2x512xf32>, i32 -> vector<2x512xf32>
    %c5_573 = arith.constant 5 : index
    %c0_574 = arith.constant 0 : index
    %614 = vector.load %arg2[%c5_573, %c0_574] : memref<8x512xf32, #tpu.memory_space<vmem>>, vector<1x512xf32>
    %615 = vector.broadcast %614 : vector<1x512xf32> to vector<2x512xf32>
    %616 = arith.mulf %613, %615 : vector<2x512xf32>
    %c12_575 = arith.constant 12 : index
    %c0_576 = arith.constant 0 : index
    %617 = vector.load %arg9[%c12_575, %c0_576] : memref<144x512xf32, #tpu.memory_space<vmem>>, vector<2x512xf32>
    tpu.vector_store %arg9[%c12_575, %c0_576], %616 {strides = array<i32>} : memref<144x512xf32, #tpu.memory_space<vmem>>, vector<2x512xf32>,
    %c480_i32_577 = arith.constant 480 : i32
    %618 = tpu.dynamic_rotate %586 by %c480_i32_577 dim 1 : vector<2x512xf32>, i32 -> vector<2x512xf32>
    %c6_578 = arith.constant 6 : index
    %c0_579 = arith.constant 0 : index
    %619 = vector.load %arg2[%c6_578, %c0_579] : memref<8x512xf32, #tpu.memory_space<vmem>>, vector<1x512xf32>
    %620 = vector.broadcast %619 : vector<1x512xf32> to vector<2x512xf32>
    %621 = arith.mulf %618, %620 : vector<2x512xf32>
    %c14_580 = arith.constant 14 : index
    %c0_581 = arith.constant 0 : index
    %622 = vector.load %arg9[%c14_580, %c0_581] : memref<144x512xf32, #tpu.memory_space<vmem>>, vector<2x512xf32>
    tpu.vector_store %arg9[%c14_580, %c0_581], %621 {strides = array<i32>} : memref<144x512xf32, #tpu.memory_space<vmem>>, vector<2x512xf32>,
    %c479_i32_582 = arith.constant 479 : i32
    %623 = tpu.dynamic_rotate %586 by %c479_i32_582 dim 1 : vector<2x512xf32>, i32 -> vector<2x512xf32>
    %c7_583 = arith.constant 7 : index
    %c0_584 = arith.constant 0 : index
    %624 = vector.load %arg2[%c7_583, %c0_584] : memref<8x512xf32, #tpu.memory_space<vmem>>, vector<1x512xf32>
    %625 = vector.broadcast %624 : vector<1x512xf32> to vector<2x512xf32>
    %626 = arith.mulf %623, %625 : vector<2x512xf32>
    %c16_585 = arith.constant 16 : index
    %c0_586 = arith.constant 0 : index
    %627 = vector.load %arg9[%c16_585, %c0_586] : memref<144x512xf32, #tpu.memory_space<vmem>>, vector<2x512xf32>
    tpu.vector_store %arg9[%c16_585, %c0_586], %626 {strides = array<i32>} : memref<144x512xf32, #tpu.memory_space<vmem>>, vector<2x512xf32>,
    %c112_587 = arith.constant 112 : index
    %c0_588 = arith.constant 0 : index
    %628 = vector.load %arg3[%c112_587, %c0_588] : memref<120x145xf32, #tpu.memory_space<vmem>>, vector<2x18xf32>
    %c112_589 = arith.constant 112 : index
    %c144_590 = arith.constant 144 : index
    %629 = vector.load %arg3[%c112_589, %c144_590] : memref<120x145xf32, #tpu.memory_space<vmem>>, vector<2x1xf32>
    %c0_591 = arith.constant 0 : index
    %c0_592 = arith.constant 0 : index
    %630 = vector.load %arg9[%c0_591, %c0_592] : memref<144x512xf32, #tpu.memory_space<vmem>>, vector<18x512xf32>
    %cst_593 = arith.constant dense<0.000000e+00> : vector<2x512xf32>
    %631 = tpu.matmul %628, %630, %cst_593 {dimension_numbers = #tpu.dot_dimension_numbers<[1], [0], [0], [1], [0, 0, 1, 1], [], []>} : vector<2x18xf32>, vector<18x512xf32>, vector<2x512xf32> -> vector<2x512xf32>
    %632 = vector.broadcast %629 : vector<2x1xf32> to vector<2x512xf32>
    %633 = arith.addf %631, %632 : vector<2x512xf32>
    %cst_594 = arith.constant 0.000000e+00 : f32
    %634 = vector.broadcast %cst_594 : f32 to vector<2x512xf32>
    %635 = arith.subf %634, %633 : vector<2x512xf32>
    %636 = math.exp %635 : vector<2x512xf32>
    %cst_595 = arith.constant 1.000000e+00 : f32
    %637 = vector.broadcast %cst_595 : f32 to vector<2x512xf32>
    %638 = arith.addf %637, %636 : vector<2x512xf32>
    %cst_596 = arith.constant 1.000000e+00 : f32
    %639 = vector.broadcast %cst_596 : f32 to vector<2x512xf32>
    %640 = arith.divf %639, %638 : vector<2x512xf32>
    %c0_597 = arith.constant 0 : index
    %c0_598 = arith.constant 0 : index
    %641 = vector.load %arg6[%c0_597, %c0_598] : memref<2x512xf32, #tpu.memory_space<vmem>>, vector<2x512xf32>
    tpu.vector_store %arg6[%c0_597, %c0_598], %640 {strides = array<i32>} : memref<2x512xf32, #tpu.memory_space<vmem>>, vector<2x512xf32>,
    return
  }
  func.func @transform_0(%arg0: i32) -> (i32, i32) {
    %c0_i32 = arith.constant 0 : i32
    %c0_i32_0 = arith.constant 0 : i32
    return %c0_i32, %arg0 : i32, i32
  }
  func.func @transform_1(%arg0: i32) -> (i32, i32) {
    %c0_i32 = arith.constant 0 : i32
    %c0_i32_0 = arith.constant 0 : i32
    %c0_i32_1 = arith.constant 0 : i32
    return %c0_i32, %c0_i32_0 : i32, i32
  }
  func.func @transform_2(%arg0: i32) -> (i32, i32) {
    %c0_i32 = arith.constant 0 : i32
    %c0_i32_0 = arith.constant 0 : i32
    %c0_i32_1 = arith.constant 0 : i32
    return %c0_i32, %c0_i32_0 : i32, i32
  }
  func.func @transform_3(%arg0: i32) -> (i32, i32) {
    %c0_i32 = arith.constant 0 : i32
    %c0_i32_0 = arith.constant 0 : i32
    %c0_i32_1 = arith.constant 0 : i32
    return %c0_i32, %c0_i32_0 : i32, i32
  }
  func.func @transform_4(%arg0: i32) -> (i32, i32) {
    %c0_i32 = arith.constant 0 : i32
    %c0_i32_0 = arith.constant 0 : i32
    %c0_i32_1 = arith.constant 0 : i32
    return %c0_i32, %c0_i32_0 : i32, i32
  }
  func.func @transform_5(%arg0: i32) -> (i32, i32) {
    %c0_i32 = arith.constant 0 : i32
    %c0_i32_0 = arith.constant 0 : i32
    return %c0_i32, %arg0 : i32, i32
  }
}

</mosaic_0001>

<bundles_post_ra>
// kernel: autoencoder_forward.1
= control target key start
LH: loop header
LB: loop body
LE: loop exit
PB: predicated region body
PF: predicated region fallthrough
CT: control target
= control target key end

     0   :  { %s9876_s18 = smov 0   ;;  %s14793_s0 = inlined_call_operand.vmem [shape: f32[2,1024], index: 0, kind: input, shape index: {}]   ;;  %s14794_s1 = inlined_call_operand.vmem [shape: f32[8,512], index: 1, kind: input, shape index: {}]   ;;  %s14795_s2 = inlined_call_operand.vmem [shape: f32[120,145], index: 2, kind: input, shape index: {}]   ;;  %s14796_s3 = inlined_call_operand.vmem [shape: f32[1025,32], index: 3, kind: input, shape index: {}]   ;;  %s14797_s4 = inlined_call_operand.vmem [shape: f32[33,1024], index: 4, kind: input, shape index: {}]   ;;  %s14798_s5 = inlined_call_operand.vmem [shape: f32[2,1024], index: 5, kind: output, shape index: {}]  }
   0x1 LB: > { %s8923_s19 = sadd.s32 4294967295, %s9832_s18   ;;  %p8927_p0 = scmp.ge.s32.totalorder %s9832_s18, 1  ;;  %s9832_s18 = sphi %s9876_s18, %s15_s18  }
   0x2   : > { %p188_p1 = scmp.lt.s32.totalorder %s9832_s18, 3 }
   0x4   : > { %p189_p2 = pnand %p8927_p0, %p188_p1 }
   0x6   : > { %192 = sbr.rel (%p189_p2) target bundleno = 5704 (0x1648), region = 40 }
   0xd   : > { %s8928_s20 = sshll.u32 %s8923_s19, 2  ;;  %v234_v0 = vlaneseq  ;;  %v9834_v1 = vmov 1983009808   ;;  %s9835_s25 = smov 32   ;;  %v14799_v12 = vmov 0.0   ;;  %v9844_v14 = vmov 16  }
   0xe   : > { %p217_p3 = scmp.lt.s32.totalorder %s8928_s20, 7  ;;  %v232_v2 = vunpack.c.l.s4 %v9834_v1  ;;  %s9836_s26 = smov 31   ;;  %780 = vmatprep.mubr.f32.mxu0 %v14799_v12  ;;  %851 = vmatprep.mubr.f32.mxu1 %v14799_v12  ;;  %v681_v13 = vld [vmem:[%s14795_s2 + $0x8] sm:$0x3]  ;;  %vm703_vm8 = vcmask 1041408   ;;  %vm699_vm9 = vcmask 146432  }
   0xf   : > { %v9885_v3 = vshrl.u32 %v234_v0, 7  ;;  %s9837_s27 = smov 1   ;;  %s9838_s28 = smov 127   ;;  %9772 = vset.pattern.permute.xlu0 %v9844_v14  ;;  %9773 = vset.pattern.permute.xlu1 %v9844_v14  ;;  %v9938_v15 = vand.u32 127, %v234_v0  ;;  %vm10547_vm10 = vcmp.lt.s32.totalorder %v234_v0, 512  ;;  %v1563_v0 = vld [vmem:[%s14796_s3 + $0x208] sm:$0xff] }
  0x10   : > { %s15152_s20 = smov (!%p217_p3, %s8928_s20), 7  ;;  %v233_v4 = vunpack.c.0.s8 %v232_v2  ;;  %s9839_s29 = smov 97   ;;  %v8933_v18 = vld [vmem:[%s14794_s1 + $0x2] ss:$8 sm:$0xf]  ;;  %vm2040_vm11 = vcmask 261120  }
  0x11   : > { %s8929_s21 = sshll.u32 %s15152_s20, 1  ;;  %s9840_s30 = smov 96   ;;  %v9941_v16 = vsub.s32 1, %v9885_v3  ;;  %v9947_v19 = vsub.s32 2, %v9885_v3  ;;  %v9953_v22 = vsub.s32 0, %v9885_v3  ;;  %v9956_v23 = vsub.s32 3, %v9885_v3 }
  0x12   : > { %v9891_v5 = vsub.s32 %v233_v4, %v9885_v3  ;;  %s220_s24 = scalar_lea.vmem %s14793_s0, %s8929_s21  ;;  %s9841_s6 = smov 33   ;;  %v8932_v21 = vld [vmem:[%s14794_s1 + $0x1] ss:$8 sm:$0xf]  ;;  %vm360_vm0 = vcmp.lt.s32.totalorder %v9938_v15, 31  ;;  %vm304_vm1 = vcmp.lt.s32.totalorder %v9938_v15, 32 }
  0x13   : > { %v228_v6 = vld [vmem:[%s220_s24] sm:$0xff]  ;;  %s9842_s7 = smov 95   ;;  %14912 = vst [vmem:[#allocation6_spill] sm:$0xff] %v9941_v16  ;;  %14913 = vst [vmem:[#allocation7_spill] sm:$0xff] %v9947_v19  ;;  %v375_v25 = vrot.slane %v8933_v18, %v9941_v16  ;;  %v319_v27 = vrot.slane %v8932_v21, %v9941_v16  ;;  %v323_v28 = vrot.slane %v8932_v21, %v9947_v19  ;;  %vm416_vm2 = vcmp.lt.s32.totalorder %v9938_v15, 1 }
  0x14   : > { %14911 = vst [vmem:[#allocation5_spill] sm:$0xff] %v9891_v5  ;;  %v237_v7 = vrot.slane %v228_v6, %v9891_v5  ;;  %8935 = vst.sshfl [vmem:[#allocation4 + $0x20] sm:$0x3 pattern:$0x76325410] %v228_v6  ;;  %v230_v8 = vcombine.high %v228_v6, %v228_v6  ;;  %v315_v32 = vrot.slane %v8932_v21, %v9953_v22  ;;  %vm476_vm3 = vcmp.lt.s32.totalorder %v9938_v15, 127 }
  0x15   : > { %14914 = vst [vmem:[#allocation8_spill] sm:$0xff] %v9953_v22  ;;  %14915 = vst [vmem:[#allocation9_spill] sm:$0xff] %v9956_v23  ;;  %v327_v33 = vrot.slane %v8932_v21, %v9956_v23  ;;  %v379_v40 = vrot.slane %v8933_v18, %v9947_v19  ;;  %v371_v43 = vrot.slane %v8933_v18, %v9953_v22  ;;  %v8934_v51 = vld [vmem:[%s14794_s1 + $0x3] ss:$8 sm:$0xf]  ;;  %vm532_vm4 = vcmp.lt.s32.totalorder %v9938_v15, 97 }
  0x16   : > { %296 = vrot.lane.b32.xlu0 %v237_v7, %s9835_s25  ;;  %v244_v9 = vrot.slane %v230_v8, %v9891_v5  ;;  %8936 = vst.sshfl [vmem:[#allocation4 + $0x30] sm:$0x3 pattern:$0x76325410] %v230_v8  ;;  %v245_v10 = vcombine.high %v237_v7, %v237_v7  ;;  %v383_v44 = vrot.slane %v8933_v18, %v9956_v23  ;;  %vm588_vm5 = vcmp.lt.s32.totalorder %v9938_v15, 96 }
  0x17   : > { %v431_v62 = vrot.slane %v8934_v51, %v9941_v16  ;;  %v435_v4 = vrot.slane %v8934_v51, %v9947_v19  ;;  %vm261_vm6 = vcmp.lt.s32.totalorder %v9938_v15, 33  ;;  %vm644_vm7 = vcmp.lt.s32.totalorder %v9938_v15, 95 }
  0x18   : > { %300 = vrot.lane.b32.xlu1 %v244_v9, %s9835_s25  ;;  %465 = vst [vmem:[#allocation4 + $0x28] sm:$0x3] %v245_v10  ;;  %v246_v11 = vcombine.high %v244_v9, %v244_v9  ;;  %vm3434_vm12 = vcmask 588800   ;;  %vm4186_vm13 = vcmask 130048  }
  0x1a   : > { %352 = vrot.lane.b32.xlu0 %v237_v7, %s9836_s26  ;;  %467 = vst [vmem:[#allocation4 + $0x38] sm:$0x3] %v246_v11 }
  0x1c   : > { %354 = vrot.lane.b32.xlu1 %v245_v10, %s9836_s26 }
  0x1e   : > { %298 = vrot.lane.b32.xlu0 %v245_v10, %s9835_s25 }
  0x20   : > { %302 = vrot.lane.b32.xlu1 %v246_v11, %s9835_s25 }
  0x22   : > { %356 = vrot.lane.b32.xlu0 %v244_v9, %s9836_s26 }
  0x24   : > { %358 = vrot.lane.b32.xlu1 %v246_v11, %s9836_s26 }
  0x26   : > { %408 = vrot.lane.b32.xlu0 %v237_v7, %s9837_s27 }
  0x28   : > { %410 = vrot.lane.b32.xlu1 %v245_v10, %s9837_s27 }
  0x2a   : > { %412 = vrot.lane.b32.xlu0 %v244_v9, %s9837_s27 }
  0x2c   : > { %414 = vrot.lane.b32.xlu1 %v246_v11, %s9837_s27 }
  0x2e   : > { %468 = vrot.lane.b32.xlu0 %v237_v7, %s9838_s28 }
  0x30   : > { %470 = vrot.lane.b32.xlu1 %v245_v10, %s9838_s28 }
  0x32   : > { %472 = vrot.lane.b32.xlu0 %v244_v9, %s9838_s28 }
  0x34   : > { %474 = vrot.lane.b32.xlu1 %v246_v11, %s9838_s28 }
  0x36   : > { %524 = vrot.lane.b32.xlu0 %v237_v7, %s9839_s29 }
  0x38   : > { %526 = vrot.lane.b32.xlu1 %v245_v10, %s9839_s29 }
  0x3a   : > { %528 = vrot.lane.b32.xlu0 %v244_v9, %s9839_s29 }
  0x3c   : > { %530 = vrot.lane.b32.xlu1 %v246_v11, %s9839_s29 }
  0x3e   : > { %580 = vrot.lane.b32.xlu0 %v237_v7, %s9840_s30 }
  0x40   : > { %582 = vrot.lane.b32.xlu1 %v245_v10, %s9840_s30 }
  0x42   : > { %584 = vrot.lane.b32.xlu0 %v244_v9, %s9840_s30 }
  0x44   : > { %586 = vrot.lane.b32.xlu1 %v246_v11, %s9840_s30 }
  0x46   : > { %251 = vrot.lane.b32.xlu0 %v237_v7, %s9841_s6 }
  0x48   : > { %253 = vrot.lane.b32.xlu1 %v245_v10, %s9841_s6 }
  0x4a   : > { %255 = vrot.lane.b32.xlu0 %v244_v9, %s9841_s6 }
  0x4c   : > { %257 = vrot.lane.b32.xlu1 %v246_v11, %s9841_s6 }
  0x4e   : > { %636 = vrot.lane.b32.xlu0 %v237_v7, %s9842_s7 }
  0x50   : > { %638 = vrot.lane.b32.xlu1 %v245_v10, %s9842_s7  ;;  %v439_v10 = vrot.slane %v8934_v51, %v9956_v23 }
  0x52   : > { %640 = vrot.lane.b32.xlu0 %v244_v9, %s9842_s7  ;;  %v427_v9 = vrot.slane %v8934_v51, %v9953_v22 }
  0x54   : > { %642 = vrot.lane.b32.xlu1 %v246_v11, %s9842_s7 }
  0x56   : > { %696 = vperm.xlu0 %9772, %v681_v13   ;;  %v8937_v13 = vld [vmem:[%s14794_s1 + $0x4] ss:$8 sm:$0xf] }
  0x88   : > { %v297_v17 = vpop.permute.xlu0 %296 }
  0x8a   : > { %v301_v20 = vpop.permute.xlu1 %300 }
  0x8c   : > { %v353_v24 = vpop.permute.xlu0 %352 }
  0x8e   : > { %v355_v26 = vpop.permute.xlu1 %354 }
  0x8f   : > { %v363_v29 = vsel %vm360_vm0, %v353_v24, %v355_v26 }
  0x90   : > { %v389_v30 = vmul.f32 %v375_v25, %v363_v29  ;;  %v299_v31 = vpop.permute.xlu0 %298 }
  0x91   : > { %v306_v34 = vsel %vm304_vm1, %v299_v31, %v301_v20  ;;  %v307_v35 = vsel %vm304_vm1, %v297_v17, %v299_v31 }
  0x92   : > { %v397_v36 = vrot.slane %v389_v30, 4  ;;  %v333_v37 = vmul.f32 %v319_v27, %v307_v35  ;;  %v334_v38 = vmul.f32 %v323_v28, %v306_v34  ;;  %v303_v39 = vpop.permute.xlu1 %302  ;;  %v487_v28 = vrot.slane %v8937_v13, %v9953_v22 }
  0x93   : > { %v305_v41 = vsel %vm304_vm1, %v301_v20, %v303_v39  ;;  %v308_v42 = vsel %vm304_vm1, %v303_v39, %v297_v17  ;;  %v8938_v39 = vld [vmem:[%s14794_s1 + $0x5] ss:$8 sm:$0xf] }
  0x94   : > { %405 = vst [vmem:[#allocation4 + $0x8] sm:$0x30] %v397_v36  ;;  %v341_v45 = vrot.slane %v333_v37, 6  ;;  %v342_v46 = vrot.slane %v334_v38, 6  ;;  %v332_v47 = vmul.f32 %v315_v32, %v308_v42  ;;  %v335_v48 = vmul.f32 %v327_v33, %v305_v41  ;;  %v357_v49 = vpop.permute.xlu0 %356 }
  0x95   : > { %v362_v50 = vsel %vm360_vm0, %v355_v26, %v357_v49  ;;  %v491_v32 = vrot.slane %v8937_v13, %v9941_v16  ;;  %v495_v36 = vrot.slane %v8937_v13, %v9947_v19  ;;  %v499_v37 = vrot.slane %v8937_v13, %v9956_v23 }
  0x96   : > { %349 = vst [vmem:[#allocation4 + $0x8] sm:$0xc] %v341_v45  ;;  %350 = vst [vmem:[#allocation4 + $0x10] sm:$0xc] %v342_v46  ;;  %v340_v52 = vrot.slane %v332_v47, 6  ;;  %v343_v53 = vrot.slane %v335_v48, 6  ;;  %v390_v54 = vmul.f32 %v379_v40, %v362_v50  ;;  %v359_v55 = vpop.permute.xlu1 %358 }
  0x97   : > { %v361_v56 = vsel %vm360_vm0, %v357_v49, %v359_v55  ;;  %v364_v57 = vsel %vm360_vm0, %v359_v55, %v353_v24  ;;  %v543_v49 = vrot.slane %v8938_v39, %v9953_v22 }
  0x98   : > { %348 = vst [vmem:[#allocation4] sm:$0xc] %v340_v52  ;;  %351 = vst [vmem:[#allocation4 + $0x18] sm:$0xc] %v343_v53  ;;  %v398_v58 = vrot.slane %v390_v54, 4  ;;  %v388_v59 = vmul.f32 %v371_v43, %v364_v57  ;;  %v391_v60 = vmul.f32 %v383_v44, %v361_v56  ;;  %v409_v61 = vpop.permute.xlu0 %408  ;;  %v547_v53 = vrot.slane %v8938_v39, %v9941_v16 }
  0x99   : > { %v551_v57 = vrot.slane %v8938_v39, %v9947_v19 }
  0x9a   : > { %406 = vst [vmem:[#allocation4 + $0x10] sm:$0x30] %v398_v58  ;;  %v396_v63 = vrot.slane %v388_v59, 4  ;;  %v399_v1 = vrot.slane %v391_v60, 4  ;;  %v411_v2 = vpop.permute.xlu1 %410  ;;  %v555_v58 = vrot.slane %v8938_v39, %v9956_v23 }
  0x9b   : > { %v419_v6 = vsel %vm416_vm2, %v409_v61, %v411_v2  ;;  %v8939_v60 = vld [vmem:[%s14794_s1 + $0x6] ss:$8 sm:$0xf] }
  0x9c   : > { %404 = vst [vmem:[#allocation4] sm:$0x30] %v396_v63  ;;  %407 = vst [vmem:[#allocation4 + $0x18] sm:$0x30] %v399_v1  ;;  %v445_v7 = vmul.f32 %v431_v62, %v419_v6  ;;  %v413_v8 = vpop.permute.xlu0 %412 }
  0x9d   : > { %v418_v11 = vsel %vm416_vm2, %v411_v2, %v413_v8 }
  0x9e   : > { %v453_v14 = vrot.slane %v445_v7, 2  ;;  %v446_v17 = vmul.f32 %v435_v4, %v418_v11  ;;  %v415_v18 = vpop.permute.xlu1 %414 }
  0x9f   : > { %v417_v20 = vsel %vm416_vm2, %v413_v8, %v415_v18  ;;  %v420_v21 = vsel %vm416_vm2, %v415_v18, %v409_v61 }
  0xa0   : > { %461 = vst [vmem:[#allocation4 + $0x8] sm:$0xc0] %v453_v14  ;;  %v454_v24 = vrot.slane %v446_v17, 2  ;;  %v444_v25 = vmul.f32 %v427_v9, %v420_v21  ;;  %v447_v26 = vmul.f32 %v439_v10, %v417_v20  ;;  %v469_v27 = vpop.permute.xlu0 %468  ;;  %v599_v9 = vrot.slane %v8939_v60, %v9953_v22 }
  0xa1   : > { %v603_v14 = vrot.slane %v8939_v60, %v9941_v16  ;;  %v607_v21 = vrot.slane %v8939_v60, %v9947_v19 }
  0xa2   : > { %462 = vst [vmem:[#allocation4 + $0x10] sm:$0xc0] %v454_v24  ;;  %v452_v29 = vrot.slane %v444_v25, 2  ;;  %v455_v30 = vrot.slane %v447_v26, 2  ;;  %v471_v31 = vpop.permute.xlu1 %470  ;;  %v611_v24 = vrot.slane %v8939_v60, %v9956_v23 }
  0xa3   : > { %v479_v33 = vsel %vm476_vm3, %v469_v27, %v471_v31  ;;  %v266_v26 = vld [vmem:[%s14794_s1] ss:$8 sm:$0xf] }
  0xa4   : > { %460 = vst [vmem:[#allocation4] sm:$0xc0] %v452_v29  ;;  %463 = vst [vmem:[#allocation4 + $0x18] sm:$0xc0] %v455_v30  ;;  %v504_v34 = vmul.f32 %v487_v28, %v479_v33  ;;  %v473_v35 = vpop.permute.xlu0 %472 }
  0xa5   : > { %v478_v38 = vsel %vm476_vm3, %v471_v31, %v473_v35 }
  0xa6   : > { %v512_v40 = vrot.slane %v504_v34, 6  ;;  %v505_v41 = vmul.f32 %v491_v32, %v478_v38  ;;  %v475_v42 = vpop.permute.xlu1 %474 }
  0xa7   : > { %v477_v43 = vsel %vm476_vm3, %v473_v35, %v475_v42  ;;  %v480_v44 = vsel %vm476_vm3, %v475_v42, %v469_v27 }
  0xa8   : > { %520 = vst [vmem:[#allocation4 + $0x20] sm:$0xc] %v512_v40  ;;  %v513_v45 = vrot.slane %v505_v41, 6  ;;  %v506_v46 = vmul.f32 %v495_v36, %v477_v43  ;;  %v507_v47 = vmul.f32 %v499_v37, %v480_v44  ;;  %v525_v48 = vpop.permute.xlu0 %524  ;;  %v275_v36 = vrot.slane %v266_v26, %v9941_v16 }
  0xa9   : > { %v279_v40 = vrot.slane %v266_v26, %v9947_v19  ;;  %v271_v44 = vrot.slane %v266_v26, %v9953_v22 }
  0xaa   : > { %521 = vst [vmem:[#allocation4 + $0x28] sm:$0xc] %v513_v45  ;;  %v514_v50 = vrot.slane %v506_v46, 6  ;;  %v515_v51 = vrot.slane %v507_v47, 6  ;;  %v527_v52 = vpop.permute.xlu1 %526  ;;  %v283_v45 = vrot.slane %v266_v26, %v9956_v23 }
  0xab   : > { %v535_v54 = vsel %vm532_vm4, %v525_v48, %v527_v52  ;;  %v8940_v47 = vld [vmem:[%s14794_s1 + $0x7] ss:$8 sm:$0xf] }
  0xac   : > { %522 = vst [vmem:[#allocation4 + $0x30] sm:$0xc] %v514_v50  ;;  %523 = vst [vmem:[#allocation4 + $0x38] sm:$0xc] %v515_v51  ;;  %v560_v55 = vmul.f32 %v543_v49, %v535_v54  ;;  %v529_v56 = vpop.permute.xlu0 %528 }
  0xad   : > { %v534_v59 = vsel %vm532_vm4, %v527_v52, %v529_v56 }
  0xae   : > { %v568_v61 = vrot.slane %v560_v55, 4  ;;  %v561_v62 = vmul.f32 %v547_v53, %v534_v59  ;;  %v531_v63 = vpop.permute.xlu1 %530  ;;  %v655_v55 = vrot.slane %v8940_v47, %v9953_v22 }
  0xaf   : > { %v533_v1 = vsel %vm532_vm4, %v529_v56, %v531_v63  ;;  %v536_v2 = vsel %vm532_vm4, %v531_v63, %v525_v48 }
  0xb0   : > { %576 = vst [vmem:[#allocation4 + $0x20] sm:$0x30] %v568_v61  ;;  %v569_v4 = vrot.slane %v561_v62, 4  ;;  %v562_v6 = vmul.f32 %v551_v57, %v533_v1  ;;  %v563_v7 = vmul.f32 %v555_v58, %v536_v2  ;;  %v581_v8 = vpop.permute.xlu0 %580  ;;  %v659_v57 = vrot.slane %v8940_v47, %v9941_v16 }
  0xb1   : > { %v663_v61 = vrot.slane %v8940_v47, %v9947_v19  ;;  %v667_v62 = vrot.slane %v8940_v47, %v9956_v23 }
  0xb2   : > { %577 = vst [vmem:[#allocation4 + $0x28] sm:$0x30] %v569_v4  ;;  %v570_v10 = vrot.slane %v562_v6, 4  ;;  %v571_v11 = vrot.slane %v563_v7, 4  ;;  %v583_v13 = vpop.permute.xlu1 %582 }
  0xb3   : > { %v591_v17 = vsel %vm588_vm5, %v581_v8, %v583_v13 }
  0xb4   : > { %578 = vst [vmem:[#allocation4 + $0x30] sm:$0x30] %v570_v10  ;;  %579 = vst [vmem:[#allocation4 + $0x38] sm:$0x30] %v571_v11  ;;  %v616_v18 = vmul.f32 %v599_v9, %v591_v17  ;;  %v585_v20 = vpop.permute.xlu0 %584 }
  0xb5   : > { %v590_v25 = vsel %vm588_vm5, %v583_v13, %v585_v20 }
  0xb6   : > { %v624_v27 = vrot.slane %v616_v18, 2  ;;  %v617_v28 = vmul.f32 %v603_v14, %v590_v25  ;;  %v587_v29 = vpop.permute.xlu1 %586 }
  0xb7   : > { %v589_v30 = vsel %vm588_vm5, %v585_v20, %v587_v29  ;;  %v592_v31 = vsel %vm588_vm5, %v587_v29, %v581_v8 }
  0xb8   : > { %632 = vst [vmem:[#allocation4 + $0x20] sm:$0xc0] %v624_v27  ;;  %v625_v32 = vrot.slane %v617_v28, 2  ;;  %v618_v33 = vmul.f32 %v607_v21, %v589_v30  ;;  %v619_v34 = vmul.f32 %v611_v24, %v592_v31  ;;  %v252_v35 = vpop.permute.xlu0 %251  ;;  %v680_v28 = vld [vmem:[%s14795_s2] sm:$0x3] }
  0xba   : > { %633 = vst [vmem:[#allocation4 + $0x28] sm:$0xc0] %v625_v32  ;;  %v626_v37 = vrot.slane %v618_v33, 2  ;;  %v627_v38 = vrot.slane %v619_v34, 2  ;;  %v254_v39 = vpop.permute.xlu1 %253 }
  0xbb   : > { %v264_v41 = vsel %vm261_vm6, %v252_v35, %v254_v39 }
  0xbc   : > { %634 = vst [vmem:[#allocation4 + $0x30] sm:$0xc0] %v626_v37  ;;  %635 = vst [vmem:[#allocation4 + $0x38] sm:$0xc0] %v627_v38  ;;  %v289_v42 = vmul.f32 %v275_v36, %v264_v41  ;;  %v256_v43 = vpop.permute.xlu0 %255 }
  0xbd   : > { %v263_v46 = vsel %vm261_vm6, %v254_v39, %v256_v43 }
  0xbe   : > { %293 = vst [vmem:[#allocation4 + $0x8] sm:$0x3] %v289_v42  ;;  %v290_v48 = vmul.f32 %v279_v40, %v263_v46  ;;  %v258_v49 = vpop.permute.xlu1 %257  ;;  %v10129_v46 = vld [vmem:[%s14794_s1 + $0x1] ss:$8 sm:$0xf] }
  0xbf   : > { %v262_v50 = vsel %vm261_vm6, %v256_v43, %v258_v49  ;;  %v265_v51 = vsel %vm261_vm6, %v258_v49, %v252_v35  ;;  %v686_v13 = vld [vmem:[#allocation4 + $0x20] sm:$0xff]  ;;  %v925_v49 = vrot.slane %v10129_v46, %v9941_v16 }
  0xc0   : > { %294 = vst [vmem:[#allocation4 + $0x10] sm:$0x3] %v290_v48  ;;  %v288_v52 = vmul.f32 %v271_v44, %v265_v51  ;;  %v291_v53 = vmul.f32 %v283_v45, %v262_v50  ;;  %v637_v54 = vpop.permute.xlu0 %636  ;;  %v1275_v45 = vld [vmem:[%s14795_s2 + $0x18] sm:$0x3] }
  0xc1   : > { %v687_v2 = vld [vmem:[#allocation4 + $0x28] sm:$0xff] }
  0xc2   : > { %292 = vst [vmem:[#allocation4] sm:$0x3] %v288_v52  ;;  %295 = vst [vmem:[#allocation4 + $0x18] sm:$0x3] %v291_v53  ;;  %v639_v56 = vpop.permute.xlu1 %638 }
  0xc3   : > { %v647_v58 = vsel %vm644_vm7, %v637_v54, %v639_v56  ;;  %v689_v20 = vld [vmem:[#allocation4 + $0x38] sm:$0xff]  ;;  %v688_v25 = vld [vmem:[#allocation4 + $0x30] sm:$0xff] }
  0xc4   : > { %v672_v59 = vmul.f32 %v655_v55, %v647_v58  ;;  %v641_v60 = vpop.permute.xlu0 %640  ;;  %v10140_v50 = vld [vmem:[%s14794_s1 + $0x2] ss:$8 sm:$0xf] }
  0xc5   : > { %v646_v63 = vsel %vm644_vm7, %v639_v56, %v641_v60  ;;  %v683_v1 = vld [vmem:[#allocation4 + $0x8] sm:$0xff]  ;;  %v979_v55 = vrot.slane %v10140_v50, %v9941_v16 }
  0xc6   : > { %676 = vst [vmem:[#allocation4 + $0x40] sm:$0x3] %v672_v59  ;;  %v673_v4 = vmul.f32 %v659_v57, %v646_v63  ;;  %v643_v6 = vpop.permute.xlu1 %642  ;;  %v9229_v7 = vpack.c.bf16 %v687_v2, %v683_v1  ;;  %v10152_v56 = vld [vmem:[%s14794_s1 + $0x3] ss:$8 sm:$0xf] }
  0xc7   : > { %v645_v8 = vsel %vm644_vm7, %v641_v60, %v643_v6  ;;  %v648_v9 = vsel %vm644_vm7, %v643_v6, %v637_v54  ;;  %v684_v14 = vld [vmem:[#allocation4 + $0x10] sm:$0xff] }
  0xc8   : > { %677 = vst [vmem:[#allocation4 + $0x48] sm:$0x3] %v673_v4  ;;  %v674_v10 = vmul.f32 %v663_v61, %v645_v8  ;;  %v675_v11 = vmul.f32 %v667_v62, %v648_v9  ;;  %9230 = vmatprep.subr.bf16.mxu0 %v9229_v7  ;;  %v9235_v26 = vpack.c.bf16 %v688_v25, %v684_v14  ;;  %v10164_v63 = vld [vmem:[%s14794_s1 + $0x4] ss:$8 sm:$0xf] }
  0xc9   : > { %v682_v17 = vld [vmem:[#allocation4] sm:$0xff]  ;;  %v685_v18 = vld [vmem:[#allocation4 + $0x18] sm:$0xff]  ;;  %v1033_v62 = vrot.slane %v10152_v56, %v9941_v16  ;;  %v1087_v8 = vrot.slane %v10164_v63, %v9953_v22 }
  0xca   : > { %678 = vst [vmem:[#allocation4 + $0x50] sm:$0x3] %v674_v10  ;;  %679 = vst [vmem:[#allocation4 + $0x58] sm:$0x3] %v675_v11  ;;  %v9231_v21 = vpack.c.bf16 %v686_v13, %v682_v17  ;;  %v9233_v24 = vpack.c.bf16 %v689_v20, %v685_v18 }
  0xcb   : > { %v10176_v9 = vld [vmem:[%s14794_s1 + $0x5] ss:$8 sm:$0xf]  ;;  %v10188_v20 = vld [vmem:[%s14794_s1 + $0x6] ss:$8 sm:$0xf] }
  0xcc   : > { %9232 = vmatpush1.bf16.msra.mxu0 %v9231_v21  ;;  %9234 = vmatprep.subr.bf16.mxu1 %v9233_v24  ;;  %v1141_v18 = vrot.slane %v10176_v9, %v9953_v22 }
  0xcd   : > { %9236 = vmatpush1.bf16.msra.mxu1 %v9235_v26  ;;  %v690_v29 = vld [vmem:[#allocation4 + $0x40] sm:$0x3] }
  0xcf   : > { %v691_v27 = vld [vmem:[#allocation4 + $0x48] sm:$0x3] }
  0xd0   : > { %8941 = vmatprep.subr.msk.mxu0 %vm703_vm8, %v691_v27 }
  0xd1   : > { %8942 = vmatpush1.msk.msra.mxu0 %vm703_vm8, %v690_v29  ;;  %v693_v30 = vld [vmem:[#allocation4 + $0x58] sm:$0x3]  ;;  %v692_v31 = vld [vmem:[#allocation4 + $0x50] sm:$0x3]  ;;  %v929_v29 = vrot.slane %v10129_v46, %v9947_v19 }
  0xd2   : > { %8943 = vmatmul.mubr.msk.f32.vlgmr.msra.gmra.mrb[0].mxu0 %vm699_vm9, %v680_v28  ;;  %8944 = vmatprep.subr.msk.mxu1 %vm703_vm8, %v693_v30  ;;  %v10205_v30 = vld [vmem:[%s14794_s1] ss:$8 sm:$0xf] }
  0xd3   : > { %8945 = vmatpush1.msk.msra.mxu1 %vm703_vm8, %v692_v31  ;;  %1372 = vmatprep.mubr.f32.mxu0 %v14799_v12 }
  0xd4   : > { %8946 = vmatmul.mubr.msk.f32.vlgmr.msra.gmra.mrb[0].mxu1 %vm699_vm9, %v680_v28  ;;  %v1195_v28 = vrot.slane %v10188_v20, %v9953_v22 }
  0xd5   : > { %1443 = vmatprep.mubr.f32.mxu1 %v14799_v12  ;;  %v697_v32 = vpop.permute.xlu0 %696 }
 0x1a5   : > { %v782_v33 = vpop.f32.mrb[0].mxu0 }
 0x1a6   : > { %v783_v34 = vadd.f32 %v782_v33, %v697_v32  ;;  %v784_v35 = vpop.f32.mrb[1].mxu0 }
 0x1a7   : > { %v785_v36 = vadd.f32 %v784_v35, %v697_v32  ;;  %v853_v37 = vpop.f32.mrb[0].mxu1 }
 0x1a8   : > { %v858_v38 = vmax.f32 %v783_v34, 0.0  ;;  %v854_v39 = vadd.f32 %v853_v37, %v697_v32  ;;  %v855_v40 = vpop.f32.mrb[1].mxu1 }
 0x1a9   : > { %v859_v41 = vmax.f32 %v785_v36, 0.0  ;;  %v856_v42 = vadd.f32 %v855_v40, %v697_v32 }
 0x1aa   : > { %1066 = vst [vmem:[#allocation4 + $0x20] sm:$0x3] %v858_v38  ;;  %v860_v43 = vmax.f32 %v854_v39, 0.0  ;;  %958 = vrot.lane.b32.xlu0 %v858_v38, %s9836_s26  ;;  %904 = vrot.lane.b32.xlu1 %v858_v38, %s9835_s25  ;;  %v983_v39 = vrot.slane %v10140_v50, %v9947_v19 }
 0x1ab   : > { %1067 = vst [vmem:[#allocation4 + $0x28] sm:$0x3] %v859_v41  ;;  %v861_v44 = vmax.f32 %v856_v42, 0.0 }
 0x1ac   : > { %1068 = vst [vmem:[#allocation4 + $0x30] sm:$0x3] %v860_v43 }
 0x1ad   : > { %1069 = vst [vmem:[#allocation4 + $0x38] sm:$0x3] %v861_v44 }
 0x1ae   : > { %1012 = vrot.lane.b32.xlu0 %v858_v38, %s9837_s27  ;;  %906 = vrot.lane.b32.xlu1 %v859_v41, %s9835_s25 }
 0x1b2   : > { %1070 = vrot.lane.b32.xlu0 %v858_v38, %s9838_s28  ;;  %960 = vrot.lane.b32.xlu1 %v859_v41, %s9836_s26 }
 0x1b6   : > { %1124 = vrot.lane.b32.xlu0 %v858_v38, %s9839_s29  ;;  %1014 = vrot.lane.b32.xlu1 %v859_v41, %s9837_s27 }
 0x1ba   : > { %1178 = vrot.lane.b32.xlu0 %v858_v38, %s9840_s30  ;;  %1072 = vrot.lane.b32.xlu1 %v859_v41, %s9838_s28 }
 0x1be   : > { %862 = vrot.lane.b32.xlu0 %v858_v38, %s9841_s6  ;;  %1126 = vrot.lane.b32.xlu1 %v859_v41, %s9839_s29 }
 0x1c2   : > { %1180 = vrot.lane.b32.xlu1 %v859_v41, %s9840_s30  ;;  %908 = vrot.lane.b32.xlu0 %v860_v43, %s9835_s25 }
 0x1c6   : > { %864 = vrot.lane.b32.xlu1 %v859_v41, %s9841_s6  ;;  %962 = vrot.lane.b32.xlu0 %v860_v43, %s9836_s26 }
 0x1ca   : > { %910 = vrot.lane.b32.xlu1 %v861_v44, %s9835_s25  ;;  %1016 = vrot.lane.b32.xlu0 %v860_v43, %s9837_s27 }
 0x1ce   : > { %964 = vrot.lane.b32.xlu1 %v861_v44, %s9836_s26  ;;  %1074 = vrot.lane.b32.xlu0 %v860_v43, %s9838_s28 }
 0x1d2   : > { %1018 = vrot.lane.b32.xlu1 %v861_v44, %s9837_s27  ;;  %1128 = vrot.lane.b32.xlu0 %v860_v43, %s9839_s29 }
 0x1d6   : > { %1076 = vrot.lane.b32.xlu1 %v861_v44, %s9838_s28  ;;  %1182 = vrot.lane.b32.xlu0 %v860_v43, %s9840_s30 }
 0x1da   : > { %1130 = vrot.lane.b32.xlu1 %v861_v44, %s9839_s29  ;;  %866 = vrot.lane.b32.xlu0 %v860_v43, %s9841_s6 }
 0x1de   : > { %1184 = vrot.lane.b32.xlu1 %v861_v44, %s9840_s30  ;;  %1232 = vrot.lane.b32.xlu0 %v858_v38, %s9842_s7  ;;  %v883_v38 = vrot.slane %v10205_v30, %v9941_v16 }
 0x1e2   : > { %868 = vrot.lane.b32.xlu1 %v861_v44, %s9841_s6  ;;  %1236 = vrot.lane.b32.xlu0 %v860_v43, %s9842_s7 }
 0x1e6   : > { %1234 = vrot.lane.b32.xlu1 %v859_v41, %s9842_s7  ;;  %1290 = vperm.xlu0 %9772, %v1275_v45  }
 0x1ea   : > { %1238 = vrot.lane.b32.xlu1 %v861_v44, %s9842_s7 }
 0x21c   : > { %v10131_v47 = vpop.permute.xlu0 %958  ;;  %v10133_v48 = vpop.permute.xlu1 %904 }
 0x220   : > { %v10142_v51 = vpop.permute.xlu0 %1012  ;;  %v907_v52 = vpop.permute.xlu1 %906 }
 0x221   : > { %v914_v53 = vsel %vm304_vm1, %v10133_v48, %v907_v52 }
 0x222   : > { %v939_v54 = vmul.f32 %v925_v49, %v914_v53  ;;  %v921_v49 = vrot.slane %v10129_v46, %v9953_v22 }
 0x224   : > { %v947_v57 = vrot.slane %v939_v54, 6  ;;  %v10154_v58 = vpop.permute.xlu0 %1070  ;;  %v961_v59 = vpop.permute.xlu1 %960  ;;  %v933_v54 = vrot.slane %v10129_v46, %v9956_v23 }
 0x225   : > { %v968_v60 = vsel %vm360_vm0, %v10131_v47, %v961_v59 }
 0x226   : > { %955 = vst [vmem:[#allocation4 + $0x8] sm:$0xc] %v947_v57  ;;  %v993_v61 = vmul.f32 %v979_v55, %v968_v60  ;;  %v1037_v55 = vrot.slane %v10152_v56, %v9947_v19 }
 0x228   : > { %v1001_v1 = vrot.slane %v993_v61, 4  ;;  %v10166_v2 = vpop.permute.xlu0 %1124  ;;  %v1015_v4 = vpop.permute.xlu1 %1014 }
 0x229   : > { %v1022_v6 = vsel %vm416_vm2, %v10142_v51, %v1015_v4 }
 0x22a   : > { %1009 = vst [vmem:[#allocation4 + $0x8] sm:$0x30] %v1001_v1  ;;  %v1047_v7 = vmul.f32 %v1033_v62, %v1022_v6  ;;  %v987_v6 = vrot.slane %v10140_v50, %v9956_v23 }
 0x22c   : > { %v1055_v10 = vrot.slane %v1047_v7, 2  ;;  %v10178_v11 = vpop.permute.xlu0 %1178  ;;  %v1073_v13 = vpop.permute.xlu1 %1072 }
 0x22d   : > { %v1080_v14 = vsel %vm476_vm3, %v10154_v58, %v1073_v13 }
 0x22e   : > { %1063 = vst [vmem:[#allocation4 + $0x8] sm:$0xc0] %v1055_v10  ;;  %v1104_v17 = vmul.f32 %v1087_v8, %v1080_v14  ;;  %v1091_v14 = vrot.slane %v10164_v63, %v9941_v16 }
 0x230   : > { %v1112_v21 = vrot.slane %v1104_v17, 6  ;;  %v10190_v24 = vpop.permute.xlu0 %862  ;;  %v10192_v25 = vpop.permute.xlu1 %1126 }
 0x231   : > { %v1134_v26 = vsel %vm532_vm4, %v10166_v2, %v10192_v25 }
 0x232   : > { %1120 = vst [vmem:[#allocation4 + $0x20] sm:$0xc] %v1112_v21  ;;  %v1158_v27 = vmul.f32 %v1141_v18, %v1134_v26 }
 0x234   : > { %v1166_v31 = vrot.slane %v1158_v27, 4  ;;  %v10207_v32 = vpop.permute.xlu1 %1180  ;;  %v909_v33 = vpop.permute.xlu0 %908 }
 0x235   : > { %v1188_v34 = vsel %vm588_vm5, %v10178_v11, %v10207_v32  ;;  %v913_v35 = vsel %vm304_vm1, %v907_v52, %v909_v33 }
 0x236   : > { %1174 = vst [vmem:[#allocation4 + $0x20] sm:$0x30] %v1166_v31  ;;  %v1212_v36 = vmul.f32 %v1195_v28, %v1188_v34  ;;  %v940_v37 = vmul.f32 %v929_v29, %v913_v35  ;;  %v1041_v29 = vrot.slane %v10152_v56, %v9956_v23  ;;  %v1145_v35 = vrot.slane %v10176_v9, %v9941_v16 }
 0x238   : > { %v1220_v40 = vrot.slane %v1212_v36, 2  ;;  %v948_v41 = vrot.slane %v940_v37, 6  ;;  %v10219_v42 = vpop.permute.xlu1 %864  ;;  %v963_v43 = vpop.permute.xlu0 %962 }
 0x239   : > { %v872_v44 = vsel %vm261_vm6, %v10190_v24, %v10219_v42  ;;  %v967_v45 = vsel %vm360_vm0, %v961_v59, %v963_v43  ;;  %v975_v59 = vrot.slane %v10140_v50, %v9953_v22 }
 0x23a   : > { %1228 = vst [vmem:[#allocation4 + $0x20] sm:$0xc0] %v1220_v40  ;;  %956 = vst [vmem:[#allocation4 + $0x10] sm:$0xc] %v948_v41  ;;  %v897_v52 = vmul.f32 %v883_v38, %v872_v44  ;;  %v994_v53 = vmul.f32 %v983_v39, %v967_v45 }
 0x23c   : > { %901 = vst [vmem:[#allocation4 + $0x8] sm:$0x3] %v897_v52  ;;  %v1002_v57 = vrot.slane %v994_v53, 4  ;;  %v911_v60 = vpop.permute.xlu1 %910  ;;  %v1017_v61 = vpop.permute.xlu0 %1016  ;;  %v1199_v52 = vrot.slane %v10188_v20, %v9941_v16 }
 0x23d   : > { %v912_v62 = vsel %vm304_vm1, %v909_v33, %v911_v60  ;;  %v915_v1 = vsel %vm304_vm1, %v911_v60, %v10133_v48  ;;  %v1021_v46 = vsel %vm416_vm2, %v1015_v4, %v1017_v61  ;;  %v1029_v48 = vrot.slane %v10152_v56, %v9953_v22 }
 0x23e   : > { %1010 = vst [vmem:[#allocation4 + $0x10] sm:$0x30] %v1002_v57  ;;  %v938_v7 = vmul.f32 %v921_v49, %v915_v1  ;;  %v941_v8 = vmul.f32 %v933_v54, %v912_v62  ;;  %v1048_v10 = vmul.f32 %v1037_v55, %v1021_v46 }
 0x240   : > { %v946_v17 = vrot.slane %v938_v7, 6  ;;  %v949_v18 = vrot.slane %v941_v8, 6  ;;  %v1056_v21 = vrot.slane %v1048_v10, 2  ;;  %v965_v26 = vpop.permute.xlu1 %964  ;;  %v1075_v27 = vpop.permute.xlu0 %1074 }
 0x241   : > { %v966_v4 = vsel %vm360_vm0, %v963_v43, %v965_v26  ;;  %v969_v50 = vsel %vm360_vm0, %v965_v26, %v10131_v47  ;;  %v1079_v28 = vsel %vm476_vm3, %v1073_v13, %v1075_v27  ;;  %v1095_v13 = vrot.slane %v10164_v63, %v9947_v19 }
 0x242   : > { %954 = vst [vmem:[#allocation4] sm:$0xc] %v946_v17  ;;  %957 = vst [vmem:[#allocation4 + $0x18] sm:$0xc] %v949_v18  ;;  %v992_v31 = vmul.f32 %v975_v59, %v969_v50  ;;  %v995_v33 = vmul.f32 %v987_v6, %v966_v4  ;;  %v1105_v34 = vmul.f32 %v1091_v14, %v1079_v28 }
 0x243   : > { %1064 = vst [vmem:[#allocation4 + $0x10] sm:$0xc0] %v1056_v21  ;;  %v1099_v43 = vrot.slane %v10164_v63, %v9956_v23  ;;  %v1153_v59 = vrot.slane %v10176_v9, %v9956_v23  ;;  %v887_v6 = vrot.slane %v10205_v30, %v9947_v19  ;;  %v1203_v18 = vrot.slane %v10188_v20, %v9947_v19 }
 0x244   : > { %v1000_v36 = vrot.slane %v992_v31, 4  ;;  %v1003_v37 = vrot.slane %v995_v33, 4  ;;  %v1113_v38 = vrot.slane %v1105_v34, 6  ;;  %v1019_v39 = vpop.permute.xlu1 %1018  ;;  %v1129_v47 = vpop.permute.xlu0 %1128  ;;  %v879_v34 = vrot.slane %v10205_v30, %v9953_v22 }
 0x245   : > { %v1020_v56 = vsel %vm416_vm2, %v1017_v61, %v1019_v39  ;;  %v1023_v40 = vsel %vm416_vm2, %v1019_v39, %v10142_v51  ;;  %v1133_v41 = vsel %vm532_vm4, %v10192_v25, %v1129_v47  ;;  %v1149_v25 = vrot.slane %v10176_v9, %v9947_v19 }
 0x246   : > { %1008 = vst [vmem:[#allocation4] sm:$0x30] %v1000_v36  ;;  %1011 = vst [vmem:[#allocation4 + $0x18] sm:$0x30] %v1003_v37  ;;  %v1046_v44 = vmul.f32 %v1029_v48, %v1023_v40  ;;  %v1049_v45 = vmul.f32 %v1041_v29, %v1020_v56  ;;  %v1159_v49 = vmul.f32 %v1145_v35, %v1133_v41 }
 0x247   : > { %1121 = vst [vmem:[#allocation4 + $0x28] sm:$0xc] %v1113_v38  ;;  %v1207_v48 = vrot.slane %v10188_v20, %v9956_v23  ;;  %v891_v20 = vrot.slane %v10205_v30, %v9956_v23  ;;  %v8953_v35 = vld [vmem:[%s14794_s1 + $0x7] ss:$8 sm:$0xf] }
 0x248   : > { %v1054_v53 = vrot.slane %v1046_v44, 2  ;;  %v1057_v54 = vrot.slane %v1049_v45, 2  ;;  %v1167_v55 = vrot.slane %v1159_v49, 4  ;;  %v1077_v51 = vpop.permute.xlu1 %1076  ;;  %v1183_v57 = vpop.permute.xlu0 %1182  ;;  %v1253_v41 = vrot.slane %v8953_v35, %v9941_v16 }
 0x249   : > { %v1078_v63 = vsel %vm476_vm3, %v1075_v27, %v1077_v51  ;;  %v1081_v60 = vsel %vm476_vm3, %v1077_v51, %v10154_v58  ;;  %v1187_v61 = vsel %vm588_vm5, %v10207_v32, %v1183_v57 }
 0x24a   : > { %1062 = vst [vmem:[#allocation4] sm:$0xc0] %v1054_v53  ;;  %1065 = vst [vmem:[#allocation4 + $0x18] sm:$0xc0] %v1057_v54  ;;  %v1106_v62 = vmul.f32 %v1095_v13, %v1078_v63  ;;  %v1107_v1 = vmul.f32 %v1099_v43, %v1081_v60  ;;  %v1213_v46 = vmul.f32 %v1199_v52, %v1187_v61  ;;  %v1277_v13 = vld [vmem:[#allocation4 + $0x8] sm:$0xff]  ;;  %v1280_v61 = vld [vmem:[#allocation4 + $0x20] sm:$0xff] }
 0x24b   : > { %1175 = vst [vmem:[#allocation4 + $0x28] sm:$0x30] %v1167_v55  ;;  %v1257_v54 = vrot.slane %v8953_v35, %v9947_v19  ;;  %v1261_v55 = vrot.slane %v8953_v35, %v9956_v23 }
 0x24c   : > { %v1114_v7 = vrot.slane %v1106_v62, 6  ;;  %v1115_v8 = vrot.slane %v1107_v1, 6  ;;  %v1221_v10 = vrot.slane %v1213_v46, 2  ;;  %v1131_v58 = vpop.permute.xlu1 %1130  ;;  %v867_v14 = vpop.permute.xlu0 %866 }
 0x24d   : > { %v1132_v32 = vsel %vm532_vm4, %v1129_v47, %v1131_v58  ;;  %v1135_v9 = vsel %vm532_vm4, %v1131_v58, %v10166_v2  ;;  %v871_v17 = vsel %vm261_vm6, %v10219_v42, %v867_v14  ;;  %v1249_v47 = vrot.slane %v8953_v35, %v9953_v22  ;;  %v1515_v58 = vld [vmem:[%s14796_s3 + $0x88] sm:$0xff] }
 0x24e   : > { %1122 = vst [vmem:[#allocation4 + $0x30] sm:$0xc] %v1114_v7  ;;  %1123 = vst [vmem:[#allocation4 + $0x38] sm:$0xc] %v1115_v8  ;;  %v1160_v21 = vmul.f32 %v1149_v25, %v1132_v32  ;;  %v1161_v26 = vmul.f32 %v1153_v59, %v1135_v9  ;;  %v898_v27 = vmul.f32 %v887_v6, %v871_v17  ;;  %v1498_v32 = vld [vmem:[%s14796_s3] sm:$0xff]  ;;  %v1499_v9 = vld [vmem:[%s14796_s3 + $0x8] sm:$0xff] }
 0x24f   : > { %1229 = vst [vmem:[#allocation4 + $0x28] sm:$0xc0] %v1221_v10  ;;  %v1514_v10 = vld [vmem:[%s14796_s3 + $0x80] sm:$0xff]  ;;  %v1516_v17 = vld [vmem:[%s14796_s3 + $0x90] sm:$0xff] }
 0x250   : > { %v1168_v4 = vrot.slane %v1160_v21, 4  ;;  %v1169_v50 = vrot.slane %v1161_v26, 4  ;;  %902 = vst [vmem:[#allocation4 + $0x10] sm:$0x3] %v898_v27  ;;  %v1185_v2 = vpop.permute.xlu1 %1184  ;;  %v1233_v33 = vpop.permute.xlu0 %1232  ;;  %v9245_v26 = vpack.c.bf16 %v1515_v58, %v1514_v10  ;;  %v1546_v27 = vld [vmem:[%s14796_s3 + $0x180] sm:$0xff]  ;;  %v1523_v10 = vld [vmem:[%s14796_s3 + $0xc8] sm:$0xff] }
 0x251   : > { %v1186_v28 = vsel %vm588_vm5, %v1183_v57, %v1185_v2  ;;  %v1189_v42 = vsel %vm588_vm5, %v1185_v2, %v10178_v11  ;;  %v1530_v2 = vld [vmem:[%s14796_s3 + $0x100] sm:$0xff] }
 0x252   : > { %1176 = vst [vmem:[#allocation4 + $0x30] sm:$0x30] %v1168_v4  ;;  %1177 = vst [vmem:[#allocation4 + $0x38] sm:$0x30] %v1169_v50  ;;  %v1214_v29 = vmul.f32 %v1203_v18, %v1186_v28  ;;  %v1215_v31 = vmul.f32 %v1207_v48, %v1189_v42  ;;  %v1517_v18 = vld [vmem:[%s14796_s3 + $0x98] sm:$0xff]  ;;  %v1547_v48 = vld [vmem:[%s14796_s3 + $0x188] sm:$0xff]  ;;  %v9247_v50 = vpack.c.bf16 %v1499_v9, %v1498_v32 }
 0x253   : > { %v1274_v4 = vld [vmem:[%s14795_s2 + $0x10] sm:$0x3]  ;;  %v1531_v28 = vld [vmem:[%s14796_s3 + $0x108] sm:$0xff]  ;;  %v1554_v58 = vld [vmem:[%s14796_s3 + $0x1c0] sm:$0xff] }
 0x254   : > { %v1222_v36 = vrot.slane %v1214_v29, 2  ;;  %v1223_v37 = vrot.slane %v1215_v31, 2  ;;  %v869_v38 = vpop.permute.xlu1 %868  ;;  %v1237_v44 = vpop.permute.xlu0 %1236  ;;  %v9249_v29 = vpack.c.bf16 %v1517_v18, %v1516_v17  ;;  %v1548_v31 = vld [vmem:[%s14796_s3 + $0x190] sm:$0xff]  ;;  %v1555_v32 = vld [vmem:[%s14796_s3 + $0x1c8] sm:$0xff]  ;;  %v1506_v9 = vld [vmem:[%s14796_s3 + $0x40] sm:$0xff] }
 0x255   : > { %v870_v11 = vsel %vm261_vm6, %v867_v14, %v869_v38  ;;  %v873_v39 = vsel %vm261_vm6, %v869_v38, %v10190_v24  ;;  %v1500_v38 = vld [vmem:[%s14796_s3 + $0x10] sm:$0xff]  ;;  %v1507_v17 = vld [vmem:[%s14796_s3 + $0x48] sm:$0xff]  ;;  %v9293_v18 = vpack.c.bf16 %v1555_v32, %v1554_v58 }
 0x256   : > { %v1281_v56 = vld [vmem:[#allocation4 + $0x28] sm:$0xff]  ;;  %1230 = vst [vmem:[#allocation4 + $0x30] sm:$0xc0] %v1222_v36  ;;  %1231 = vst [vmem:[#allocation4 + $0x38] sm:$0xc0] %v1223_v37  ;;  %v896_v30 = vmul.f32 %v879_v34, %v873_v39  ;;  %v899_v40 = vmul.f32 %v891_v20, %v870_v11  ;;  %v9277_v34 = vpack.c.bf16 %v1547_v48, %v1546_v27  ;;  %v1532_v39 = vld [vmem:[%s14796_s3 + $0x110] sm:$0xff] }
 0x257   : > { %v9237_v43 = vpack.c.bf16 %v1281_v56, %v1277_v13  ;;  %v1278_v8 = vld [vmem:[#allocation4 + $0x10] sm:$0xff]  ;;  %v9279_v36 = vpack.c.bf16 %v1531_v28, %v1530_v2  ;;  %v1501_v11 = vld [vmem:[%s14796_s3 + $0x18] sm:$0xff]  ;;  %v1539_v27 = vld [vmem:[%s14796_s3 + $0x148] sm:$0xff] }
 0x258   : > { %900 = vst [vmem:[#allocation4] sm:$0x3] %v896_v30  ;;  %903 = vst [vmem:[#allocation4 + $0x18] sm:$0x3] %v899_v40  ;;  %v1235_v45 = vpop.permute.xlu1 %1234  ;;  %v1533_v13 = vld [vmem:[%s14796_s3 + $0x118] sm:$0xff]  ;;  %v1518_v30 = vld [vmem:[%s14796_s3 + $0xa0] sm:$0xff] }
 0x259   : > { %9238 = vmatprep.subr.bf16.mxu0 %v9237_v43  ;;  %v1241_v49 = vsel %vm644_vm7, %v1235_v45, %v1237_v44  ;;  %v1242_v24 = vsel %vm644_vm7, %v1233_v33, %v1235_v45  ;;  %v9283_v56 = vpack.c.bf16 %v1533_v13, %v1532_v39  ;;  %v1519_v40 = vld [vmem:[%s14796_s3 + $0xa8] sm:$0xff]  ;;  %v1502_v45 = vld [vmem:[%s14796_s3 + $0x20] sm:$0xff]  ;;  %v1556_v2 = vld [vmem:[%s14796_s3 + $0x1d0] sm:$0xff] }
 0x25a   : > { %v1266_v52 = vmul.f32 %v1249_v47, %v1242_v24  ;;  %v1267_v53 = vmul.f32 %v1253_v41, %v1241_v49  ;;  %v9251_v47 = vpack.c.bf16 %v1501_v11, %v1500_v38  ;;  %v1550_v41 = vld [vmem:[%s14796_s3 + $0x1a0] sm:$0xff]  ;;  %v9253_v43 = vpack.c.bf16 %v1519_v40, %v1518_v30  ;;  %v1503_v49 = vld [vmem:[%s14796_s3 + $0x28] sm:$0xff] }
 0x25b   : > { %v1527_v38 = vld [vmem:[%s14796_s3 + $0xe8] sm:$0xff]  ;;  %v1558_v11 = vld [vmem:[%s14796_s3 + $0x1e0] sm:$0xff] }
 0x25c   : > { %1270 = vst [vmem:[#allocation4 + $0x40] sm:$0x3] %v1266_v52  ;;  %1271 = vst [vmem:[#allocation4 + $0x48] sm:$0x3] %v1267_v53  ;;  %v1239_v51 = vpop.permute.xlu1 %1238  ;;  %v9255_v52 = vpack.c.bf16 %v1503_v49, %v1502_v45  ;;  %v1534_v53 = vld [vmem:[%s14796_s3 + $0x120] sm:$0xff]  ;;  %v1529_v49 = vld [vmem:[%s14796_s3 + $0xf8] sm:$0xff] }
 0x25d   : > { %v1240_v57 = vsel %vm644_vm7, %v1237_v44, %v1239_v51  ;;  %v1243_v25 = vsel %vm644_vm7, %v1239_v51, %v1233_v33  ;;  %v1282_v59 = vld [vmem:[#allocation4 + $0x30] sm:$0xff]  ;;  %v1283_v46 = vld [vmem:[#allocation4 + $0x38] sm:$0xff]  ;;  %v1549_v33 = vld [vmem:[%s14796_s3 + $0x198] sm:$0xff] }
 0x25e   : > { %v1268_v63 = vmul.f32 %v1257_v54, %v1240_v57  ;;  %v1269_v60 = vmul.f32 %v1261_v55, %v1243_v25  ;;  %v9243_v14 = vpack.c.bf16 %v1282_v59, %v1278_v8  ;;  %v9281_v37 = vpack.c.bf16 %v1549_v33, %v1548_v31  ;;  %v1551_v44 = vld [vmem:[%s14796_s3 + $0x1a8] sm:$0xff]  ;;  %v1520_v51 = vld [vmem:[%s14796_s3 + $0xb0] sm:$0xff]  ;;  %v1521_v57 = vld [vmem:[%s14796_s3 + $0xb8] sm:$0xff] }
 0x25f   : > { %v1276_v62 = vld [vmem:[#allocation4] sm:$0xff]  ;;  %v1279_v1 = vld [vmem:[#allocation4 + $0x18] sm:$0xff]  ;;  %v9285_v24 = vpack.c.bf16 %v1551_v44, %v1550_v41  ;;  %v1505_v59 = vld [vmem:[%s14796_s3 + $0x38] sm:$0xff] }
 0x260   : > { %1272 = vst [vmem:[#allocation4 + $0x50] sm:$0x3] %v1268_v63  ;;  %1273 = vst [vmem:[#allocation4 + $0x58] sm:$0x3] %v1269_v60  ;;  %v9239_v6 = vpack.c.bf16 %v1280_v61, %v1276_v62  ;;  %v9241_v7 = vpack.c.bf16 %v1283_v46, %v1279_v1  ;;  %v1535_v54 = vld [vmem:[%s14796_s3 + $0x128] sm:$0xff]  ;;  %v1552_v25 = vld [vmem:[%s14796_s3 + $0x1b0] sm:$0xff]  ;;  %v9257_v63 = vpack.c.bf16 %v1521_v57, %v1520_v51 }
 0x261   : > { %v9287_v55 = vpack.c.bf16 %v1535_v54, %v1534_v53  ;;  %v1553_v60 = vld [vmem:[%s14796_s3 + $0x1b8] sm:$0xff]  ;;  %v1504_v61 = vld [vmem:[%s14796_s3 + $0x30] sm:$0xff]  ;;  %v1522_v8 = vld [vmem:[%s14796_s3 + $0xc0] sm:$0xff] }
 0x262   : > { %9240 = vmatpush1.bf16.msra.mxu0 %v9239_v6  ;;  %9242 = vmatprep.subr.bf16.mxu1 %v9241_v7  ;;  %v9289_v62 = vpack.c.bf16 %v1553_v60, %v1552_v25  ;;  %v9259_v1 = vpack.c.bf16 %v1505_v59, %v1504_v61  ;;  %v1536_v46 = vld [vmem:[%s14796_s3 + $0x130] sm:$0xff]  ;;  %v1537_v6 = vld [vmem:[%s14796_s3 + $0x138] sm:$0xff]  ;;  %v1510_v13 = vld [vmem:[%s14796_s3 + $0x60] sm:$0xff] }
 0x263   : > { %9244 = vmatpush1.bf16.msra.mxu1 %v9243_v14  ;;  %v1285_v21 = vld [vmem:[#allocation4 + $0x48] sm:$0x3]  ;;  %v1284_v42 = vld [vmem:[#allocation4 + $0x40] sm:$0x3]  ;;  %v9291_v7 = vpack.c.bf16 %v1537_v6, %v1536_v46  ;;  %v9261_v14 = vpack.c.bf16 %v1523_v10, %v1522_v8  ;;  %v1542_v41 = vld [vmem:[%s14796_s3 + $0x160] sm:$0xff] }
 0x264   : > { %8954 = vmatprep.subr.msk.mxu0 %vm703_vm8, %v1285_v21  ;;  %v9263_v21 = vpack.c.bf16 %v1507_v17, %v1506_v9  ;;  %v1509_v31 = vld [vmem:[%s14796_s3 + $0x58] sm:$0xff]  ;;  %v1528_v44 = vld [vmem:[%s14796_s3 + $0xf0] sm:$0xff]  ;;  %v1578_v61 = vld [vmem:[%s14796_s3 + $0x280] sm:$0xff] }
 0x265   : > { %v9273_v53 = vpack.c.bf16 %v1529_v49, %v1528_v44  ;;  %v1513_v51 = vld [vmem:[%s14796_s3 + $0x78] sm:$0xff]  ;;  %v1544_v57 = vld [vmem:[%s14796_s3 + $0x170] sm:$0xff]  ;;  %v1579_v59 = vld [vmem:[%s14796_s3 + $0x288] sm:$0xff]  ;;  %v1291_v10 = vpop.permute.xlu0 %1290 }
 0x266   : > { %8955 = vmatpush1.msk.msra.mxu0 %vm703_vm8, %v1284_v42  ;;  %v1557_v42 = vld [vmem:[%s14796_s3 + $0x1d8] sm:$0xff]  ;;  %v1611_v46 = vld [vmem:[%s14796_s3 + $0x388] sm:$0xff]  ;;  %v1612_v44 = vld [vmem:[%s14796_s3 + $0x390] sm:$0xff] }
 0x267   : > { %8956 = vmatmul.mubr.msk.f32.vlgmr.msra.gmra.mrb[2].mxu0 %vm699_vm9, %v1274_v4  ;;  %v1287_v20 = vld [vmem:[#allocation4 + $0x58] sm:$0x3]  ;;  %v1286_v35 = vld [vmem:[#allocation4 + $0x50] sm:$0x3]  ;;  %9246 = vmatprep.subr.bf16.mxu0 %v9245_v26  ;;  %v9297_v33 = vpack.c.bf16 %v1557_v42, %v1556_v2 }
 0x268   : > { %8957 = vmatprep.subr.msk.mxu1 %vm703_vm8, %v1287_v20  ;;  %9248 = vmatpush3.bf16.msra.mxu0 %v9247_v50  ;;  %v1538_v26 = vld [vmem:[%s14796_s3 + $0x140] sm:$0xff]  ;;  %v1525_v50 = vld [vmem:[%s14796_s3 + $0xd8] sm:$0xff]  ;;  %v1540_v20 = vld [vmem:[%s14796_s3 + $0x150] sm:$0xff] }
 0x269   : > { %8958 = vmatpush1.msk.msra.mxu1 %vm703_vm8, %v1286_v35  ;;  %9250 = vmatprep.subr.bf16.mxu0 %v9249_v29  ;;  %v9295_v48 = vpack.c.bf16 %v1539_v27, %v1538_v26  ;;  %v1508_v29 = vld [vmem:[%s14796_s3 + $0x50] sm:$0xff]  ;;  %v1541_v35 = vld [vmem:[%s14796_s3 + $0x158] sm:$0xff] }
 0x26a   : > { %8959 = vmatmul.mubr.msk.f32.vlgmr.msra.gmra.mrb[2].mxu1 %vm699_vm9, %v1274_v4  ;;  %9278 = vmatprep.subr.bf16.mxu1 %v9277_v34  ;;  %v1524_v4 = vld [vmem:[%s14796_s3 + $0xd0] sm:$0xff]  ;;  %v9267_v34 = vpack.c.bf16 %v1509_v31, %v1508_v29 }
 0x26b   : > { %9280 = vmatpush3.bf16.msra.mxu1 %v9279_v36  ;;  %v9265_v28 = vpack.c.bf16 %v1525_v50, %v1524_v4  ;;  %v9299_v36 = vpack.c.bf16 %v1541_v35, %v1540_v20  ;;  %v2865_v35 = vld [vmem:[%s14795_s2 + $0x28] sm:$0xff] }
 0x26c   : > { %9282 = vmatprep.subr.bf16.mxu1 %v9281_v37  ;;  %9252 = vmatpush3.bf16.msra.mxu0 %v9251_v47  ;;  %v1526_v37 = vld [vmem:[%s14796_s3 + $0xe0] sm:$0xff]  ;;  %v1559_v47 = vld [vmem:[%s14796_s3 + $0x1e8] sm:$0xff] }
 0x26d   : > { %9254 = vmatprep.subr.bf16.mxu0 %v9253_v43  ;;  %v9269_v39 = vpack.c.bf16 %v1527_v38, %v1526_v37  ;;  %v9301_v30 = vpack.c.bf16 %v1559_v47, %v1558_v11  ;;  %v1543_v43 = vld [vmem:[%s14796_s3 + $0x168] sm:$0xff]  ;;  %v1562_v38 = vld [vmem:[%s14796_s3 + $0x200] sm:$0xff]  ;;  %v1580_v47 = vld [vmem:[%s14796_s3 + $0x290] sm:$0xff] }
 0x26e   : > { %v9303_v45 = vpack.c.bf16 %v1543_v43, %v1542_v41  ;;  %v1594_v11 = vld [vmem:[%s14796_s3 + $0x300] sm:$0xff]  ;;  %v1651_v41 = vsub.s32 5, %v9885_v3  ;;  %v1659_v43 = vsub.s32 7, %v9885_v3 }
 0x26f   : > { %9284 = vmatpush3.bf16.msra.mxu1 %v9283_v56  ;;  %v1511_v56 = vld [vmem:[%s14796_s3 + $0x68] sm:$0xff] }
 0x270   : > { %9286 = vmatprep.subr.bf16.mxu1 %v9285_v24  ;;  %9256 = vmatpush3.bf16.msra.mxu0 %v9255_v52  ;;  %v9271_v40 = vpack.c.bf16 %v1511_v56, %v1510_v13  ;;  %v1560_v24 = vld [vmem:[%s14796_s3 + $0x1f0] sm:$0xff]  ;;  %v1561_v52 = vld [vmem:[%s14796_s3 + $0x1f8] sm:$0xff] }
 0x271   : > { %9258 = vmatprep.subr.bf16.mxu0 %v9257_v63  ;;  %v9305_v54 = vpack.c.bf16 %v1561_v52, %v1560_v24  ;;  %v1545_v63 = vld [vmem:[%s14796_s3 + $0x178] sm:$0xff] }
 0x272   : > { %v9307_v60 = vpack.c.bf16 %v1545_v63, %v1544_v57  ;;  %v1581_v13 = vld [vmem:[%s14796_s3 + $0x298] sm:$0xff] }
 0x273   : > { %9288 = vmatpush3.bf16.msra.mxu1 %v9287_v55  ;;  %v1512_v55 = vld [vmem:[%s14796_s3 + $0x70] sm:$0xff]  ;;  %v1597_v57 = vld [vmem:[%s14796_s3 + $0x318] sm:$0xff]  ;;  %v9313_v63 = vpack.c.bf16 %v1581_v13, %v1580_v47  ;;  %v1602_v13 = vld [vmem:[%s14796_s3 + $0x340] sm:$0xff] }
 0x274   : > { %9290 = vmatprep.subr.bf16.mxu1 %v9289_v62  ;;  %9260 = vmatpush3.bf16.msra.mxu0 %v9259_v1  ;;  %v9275_v25 = vpack.c.bf16 %v1513_v51, %v1512_v55  ;;  %v1610_v62 = vld [vmem:[%s14796_s3 + $0x380] sm:$0xff]  ;;  %v9309_v1 = vpack.c.bf16 %v1579_v59, %v1578_v61  ;;  %v1565_v55 = vld [vmem:[%s14796_s3 + $0x218] sm:$0xff]  ;;  %v1596_v51 = vld [vmem:[%s14796_s3 + $0x310] sm:$0xff] }
 0x275   : > { %9262 = vmatprep.subr.bf16.mxu0 %v9261_v14  ;;  %v9341_v6 = vpack.c.bf16 %v1611_v46, %v1610_v62  ;;  %v1583_v61 = vld [vmem:[%s14796_s3 + $0x2a8] sm:$0xff]  ;;  %v1614_v59 = vld [vmem:[%s14796_s3 + $0x3a0] sm:$0xff] }
 0x276   : > { %v1615_v62 = vld [vmem:[%s14796_s3 + $0x3a8] sm:$0xff] }
 0x277   : > { %9292 = vmatpush3.bf16.msra.mxu1 %v9291_v7  ;;  %v9845_v7 = vmov 1966171168  }
 0x278   : > { %9294 = vmatprep.subr.bf16.mxu1 %v9293_v18  ;;  %9264 = vmatpush3.bf16.msra.mxu0 %v9263_v21  ;;  %v1461_v8 = vunpack.c.l.s4 %v9845_v7  ;;  %v9347_v7 = vpack.c.bf16 %v1597_v57, %v1596_v51  ;;  %v1604_v57 = vld [vmem:[%s14796_s3 + $0x350] sm:$0xff] }
 0x279   : > { %9266 = vmatprep.subr.bf16.mxu0 %v9265_v28 }
 0x27a   : > { %v1462_v18 = vunpack.c.0.s8 %v1461_v8  ;;  %v1566_v8 = vld [vmem:[%s14796_s3 + $0x220] sm:$0xff] }
 0x27b   : > { %9296 = vmatpush3.bf16.msra.mxu1 %v9295_v48 }
 0x27c   : > { %9298 = vmatprep.subr.bf16.mxu1 %v9297_v33  ;;  %9268 = vmatpush3.bf16.msra.mxu0 %v9267_v34  ;;  %v10542_v28 = vsub.s32 %v1462_v18, %v9885_v3  ;;  %v1585_v18 = vld [vmem:[%s14796_s3 + $0x2b8] sm:$0xff] }
 0x27d   : > { %9270 = vmatprep.subr.bf16.mxu0 %v9269_v39  ;;  %v1595_v39 = vld [vmem:[%s14796_s3 + $0x308] sm:$0xff] }
 0x27f   : > { %9300 = vmatpush3.bf16.msra.mxu1 %v9299_v36 }
 0x280   : > { %9302 = vmatprep.subr.bf16.mxu1 %v9301_v30  ;;  %9272 = vmatpush3.bf16.msra.mxu0 %v9271_v40  ;;  %v9311_v30 = vpack.c.bf16 %v1563_v0, %v1562_v38  ;;  %v9343_v40 = vpack.c.bf16 %v1595_v39, %v1594_v11  ;;  %v1570_v0 = vld [vmem:[%s14796_s3 + $0x240] sm:$0xff]  ;;  %v1571_v11 = vld [vmem:[%s14796_s3 + $0x248] sm:$0xff] }
 0x281   : > { %9274 = vmatprep.subr.bf16.mxu0 %v9273_v53 }
 0x283   : > { %9304 = vmatpush3.bf16.msra.mxu1 %v9303_v45  ;;  %v1613_v45 = vld [vmem:[%s14796_s3 + $0x398] sm:$0xff] }
 0x284   : > { %9306 = vmatprep.subr.bf16.mxu1 %v9305_v54  ;;  %9276 = vmatpush3.bf16.msra.mxu0 %v9275_v25  ;;  %v1564_v54 = vld [vmem:[%s14796_s3 + $0x210] sm:$0xff]  ;;  %v1582_v25 = vld [vmem:[%s14796_s3 + $0x2a0] sm:$0xff] }
 0x285   : > { %9310 = vmatprep.subr.bf16.mxu0 %v9309_v1 }
 0x287   : > { %9308 = vmatpush3.bf16.msra.mxu1 %v9307_v60  ;;  %v9345_v60 = vpack.c.bf16 %v1613_v45, %v1612_v44  ;;  %v1589_v44 = vld [vmem:[%s14796_s3 + $0x2d8] sm:$0xff]  ;;  %v1620_v45 = vld [vmem:[%s14796_s3 + $0x3d0] sm:$0xff] }
 0x288   : > { %9342 = vmatprep.subr.bf16.mxu1 %v9341_v6  ;;  %v9315_v6 = vpack.c.bf16 %v1565_v55, %v1564_v54  ;;  %v1573_v54 = vld [vmem:[%s14796_s3 + $0x258] sm:$0xff] }
 0x33a   : > { %v1374_v58 = vpop.f32.mrb[2].mxu0 }
 0x33b   : > { %v1375_v14 = vadd.f32 %v1374_v58, %v1291_v10  ;;  %v1376_v32 = vpop.f32.mrb[3].mxu0  ;;  %v9317_v58 = vpack.c.bf16 %v1583_v61, %v1582_v25  ;;  %v1605_v25 = vld [vmem:[%s14796_s3 + $0x358] sm:$0xff]  ;;  %v1622_v61 = vld [vmem:[%s14796_s3 + $0x3e0] sm:$0xff] }
 0x33c   : > { %v1377_v9 = vadd.f32 %v1376_v32, %v1291_v10  ;;  %v1598_v32 = vld [vmem:[%s14796_s3 + $0x320] sm:$0xff] }
 0x33d   : > { %v1450_v17 = vmax.f32 %v1375_v14, 0.0  ;;  %v1445_v21 = vpop.f32.mrb[2].mxu1  ;;  %v9349_v14 = vpack.c.bf16 %v1615_v62, %v1614_v59  ;;  %v1623_v59 = vld [vmem:[%s14796_s3 + $0x3e8] sm:$0xff] }
 0x33e   : > { %v1451_v26 = vmax.f32 %v1377_v9, 0.0  ;;  %v1446_v27 = vadd.f32 %v1445_v21, %v1291_v10  ;;  %v1447_v48 = vpop.f32.mrb[3].mxu1  ;;  %v1599_v9 = vld [vmem:[%s14796_s3 + $0x328] sm:$0xff]  ;;  %v1616_v21 = vld [vmem:[%s14796_s3 + $0x3b0] sm:$0xff] }
 0x33f   : > { %v1448_v4 = vadd.f32 %v1447_v48, %v1291_v10  ;;  %v1567_v10 = vld [vmem:[%s14796_s3 + $0x228] sm:$0xff]  ;;  %v9351_v48 = vpack.c.bf16 %v1599_v9, %v1598_v32  ;;  %v1593_v32 = vld [vmem:[%s14796_s3 + $0x2f8] sm:$0xff]  ;;  %v1624_v9 = vld [vmem:[%s14796_s3 + $0x3f0] sm:$0xff] }
 0x340   : > { %v1458_v50 = vcombine.low %v1450_v17, %v1451_v26  ;;  %v1452_v2 = vmax.f32 %v1446_v27, 0.0  ;;  %v1584_v17 = vld [vmem:[%s14796_s3 + $0x2b0] sm:$0xff]  ;;  %v1617_v26 = vld [vmem:[%s14796_s3 + $0x3b8] sm:$0xff]  ;;  %v9319_v27 = vpack.c.bf16 %v1567_v10, %v1566_v8  ;;  %v9365_v8 = vpack.c.bf16 %v1623_v59, %v1622_v61  ;;  %v1606_v10 = vld [vmem:[%s14796_s3 + $0x360] sm:$0xff] }
 0x341   : > { %v1453_v42 = vmax.f32 %v1448_v4, 0.0  ;;  %v1568_v4 = vld [vmem:[%s14796_s3 + $0x230] sm:$0xff]  ;;  %v1976_v59 = vld [vmem:[%s14797_s4 + $0x68] sm:$0xff] }
 0x342   : > { %v1466_v31 = vrot.slane %v1458_v50, %v10542_v28  ;;  %v1569_v50 = vld [vmem:[%s14796_s3 + $0x238] sm:$0xff] }
 0x343   : > { %v1459_v29 = vcombine.low %v1452_v2, %v1453_v42  ;;  %v9321_v2 = vpack.c.bf16 %v1585_v18, %v1584_v17  ;;  %v9353_v42 = vpack.c.bf16 %v1617_v26, %v1616_v21  ;;  %v1625_v17 = vld [vmem:[%s14796_s3 + $0x3f8] sm:$0xff]  ;;  %v1576_v26 = vld [vmem:[%s14796_s3 + $0x270] sm:$0xff] }
 0x345   : > { %v1473_v33 = vrot.slane %v1459_v29, %v10542_v28  ;;  %v1600_v29 = vld [vmem:[%s14796_s3 + $0x330] sm:$0xff] }
 0x347   : > { %v1474_v34 = vcombine.low %v1466_v31, %v1473_v33  ;;  %v1488_v20 = vcombine.high %v1466_v31, %v1473_v33  ;;  %v1601_v31 = vld [vmem:[%s14796_s3 + $0x338] sm:$0xff]  ;;  %v1586_v33 = vld [vmem:[%s14796_s3 + $0x2c0] sm:$0xff] }
 0x348   : > { %v9355_v38 = vpack.c.bf16 %v1601_v31, %v1600_v29  ;;  %v1647_v31 = vsub.s32 4, %v9885_v3 }
 0x349   : > { %v1481_v36 = vrot.slane %v1474_v34, %v10542_v28  ;;  %v1495_v37 = vrot.slane %v1488_v20, %v10542_v28  ;;  %v1587_v34 = vld [vmem:[%s14796_s3 + $0x2c8] sm:$0xff]  ;;  %v1618_v20 = vld [vmem:[%s14796_s3 + $0x3c0] sm:$0xff] }
 0x34a   : > { %v9325_v39 = vpack.c.bf16 %v1587_v34, %v1586_v33  ;;  %v1655_v33 = vsub.s32 6, %v9885_v3 }
 0x34b   : > { %1487 = vst.msk [vmem:[#allocation2] sm:$0xf] %vm10547_vm10, %v1481_v36  ;;  %1497 = vst.msk [vmem:[#allocation2 + $0x4] sm:$0xf] %vm10547_vm10, %v1495_v37  ;;  %v1619_v36 = vld [vmem:[%s14796_s3 + $0x3c8] sm:$0xff]  ;;  %v9323_v37 = vpack.c.bf16 %v1569_v50, %v1568_v4  ;;  %v1577_v4 = vld [vmem:[%s14796_s3 + $0x278] sm:$0xff] }
 0x34c   : > { %v9357_v47 = vpack.c.bf16 %v1619_v36, %v1618_v20  ;;  %v1608_v50 = vld [vmem:[%s14796_s3 + $0x370] sm:$0xff]  ;;  %v1964_v36 = vld [vmem:[%s14797_s4 + $0x8] sm:$0xff] }
 0x352   : > { %v10575_v56 = vld [vmem:[#allocation2] sm:$0xff] }
 0x353   : > { %v1636_v49 = vrot.slane %v10575_v56, %v9941_v16  ;;  %v1644_v24 = vrot.slane %v10575_v56, %v9956_v23  ;;  %v1632_v52 = vrot.slane %v10575_v56, %v9953_v22  ;;  %v1640_v53 = vrot.slane %v10575_v56, %v9947_v19 }
 0x354   : > { %v1652_v1 = vrot.slane %v10575_v56, %v1651_v41  ;;  %v1660_v46 = vrot.slane %v10575_v56, %v1659_v43  ;;  %v1648_v34 = vrot.slane %v10575_v56, %v1647_v31  ;;  %v1656_v20 = vrot.slane %v10575_v56, %v1655_v33  ;;  %v1974_v56 = vld [vmem:[%s14797_s4 + $0x58] sm:$0xff] }
 0x355   : > { %1733 = vmatprep.mubr.f32.mxu0 %v1636_v49  ;;  %1803 = vmatprep.mubr.f32.mxu1 %v1644_v24  ;;  %v1621_v49 = vld [vmem:[%s14796_s3 + $0x3d8] sm:$0xff]  ;;  %v9327_v24 = vpack.c.bf16 %v1571_v11, %v1570_v0  ;;  %v1963_v11 = vld [vmem:[%s14797_s4] sm:$0xff] }
 0x356   : > { %1734 = vmatmul.mubr.f32.vlgmr.msra.gmra.mrb[4].mxu0 %v1632_v52  ;;  %1804 = vmatmul.mubr.f32.vlgmr.msra.gmra.mrb[4].mxu1 %v1640_v53  ;;  %v1572_v53 = vld [vmem:[%s14796_s3 + $0x250] sm:$0xff]  ;;  %v9361_v51 = vpack.c.bf16 %v1621_v49, %v1620_v45  ;;  %v1980_v45 = vld [vmem:[%s14797_s4 + $0x88] sm:$0xff] }
 0x357   : > { %9312 = vmatpush3.bf16.msra.mxu0 %v9311_v30  ;;  %9344 = vmatpush3.bf16.msra.mxu1 %v9343_v40  ;;  %v1603_v30 = vld [vmem:[%s14796_s3 + $0x348] sm:$0xff]  ;;  %v1588_v40 = vld [vmem:[%s14796_s3 + $0x2d0] sm:$0xff]  ;;  %v9331_v62 = vpack.c.bf16 %v1573_v54, %v1572_v53  ;;  %v1990_v53 = vld [vmem:[%s14797_s4 + $0xd8] sm:$0xff] }
 0x358   : > { %1873 = vmatprep.mubr.f32.mxu0 %v1652_v1  ;;  %1943 = vmatprep.mubr.f32.mxu1 %v1660_v46  ;;  %v9359_v52 = vpack.c.bf16 %v1603_v30, %v1602_v13  ;;  %v9329_v55 = vpack.c.bf16 %v1589_v44, %v1588_v40  ;;  %v9363_v1 = vpack.c.bf16 %v1605_v25, %v1604_v57  ;;  %v1574_v46 = vld [vmem:[%s14796_s3 + $0x260] sm:$0xff]  ;;  %v1965_v30 = vld [vmem:[%s14797_s4 + $0x10] sm:$0xff]  ;;  %v1988_v49 = vld [vmem:[%s14797_s4 + $0xc8] sm:$0xff] }
 0x359   : > { %9314 = vmatprep.subr.bf16.mxu0 %v9313_v63  ;;  %9346 = vmatprep.subr.bf16.mxu1 %v9345_v60  ;;  %v1590_v63 = vld [vmem:[%s14796_s3 + $0x2e0] sm:$0xff]  ;;  %v1591_v60 = vld [vmem:[%s14796_s3 + $0x2e8] sm:$0xff]  ;;  %v1973_v40 = vld [vmem:[%s14797_s4 + $0x50] sm:$0xff] }
 0x35a   : > { %v9383_v44 = vpack.c.bf16 %v1973_v40, %v1965_v30  ;;  %v1979_v54 = vld [vmem:[%s14797_s4 + $0x80] sm:$0xff]  ;;  %v1981_v25 = vld [vmem:[%s14797_s4 + $0x90] sm:$0xff] }
 0x35b   : > { %9316 = vmatpush3.bf16.msra.mxu0 %v9315_v6  ;;  %9348 = vmatpush3.bf16.msra.mxu1 %v9347_v7  ;;  %v1575_v6 = vld [vmem:[%s14796_s3 + $0x268] sm:$0xff]  ;;  %v9333_v7 = vpack.c.bf16 %v1591_v60, %v1590_v63  ;;  %v1989_v63 = vld [vmem:[%s14797_s4 + $0xd0] sm:$0xff] }
 0x35c   : > { %9318 = vmatprep.subr.bf16.mxu0 %v9317_v58  ;;  %9350 = vmatprep.subr.bf16.mxu1 %v9349_v14  ;;  %v1607_v58 = vld [vmem:[%s14796_s3 + $0x368] sm:$0xff]  ;;  %v1592_v14 = vld [vmem:[%s14796_s3 + $0x2f0] sm:$0xff]  ;;  %v9335_v18 = vpack.c.bf16 %v1575_v6, %v1574_v46  ;;  %v9387_v61 = vpack.c.bf16 %v1989_v63, %v1981_v25  ;;  %v1991_v63 = vld [vmem:[%s14797_s4 + $0xe0] sm:$0xff] }
 0x35d   : > { %v9367_v21 = vpack.c.bf16 %v1607_v58, %v1606_v10  ;;  %v1968_v60 = vld [vmem:[%s14797_s4 + $0x28] sm:$0xff]  ;;  %v1626_v10 = vld [vmem:[%s14796_s3 + $0x400] sm:$0x1]  ;;  %v1969_v30 = vld [vmem:[%s14797_s4 + $0x30] sm:$0xff] }
 0x35e   : > { %v9389_v46 = vpack.c.bf16 %v1976_v59, %v1968_v60  ;;  %v1977_v40 = vld [vmem:[%s14797_s4 + $0x70] sm:$0xff] }
 0x35f   : > { %9320 = vmatpush3.bf16.msra.mxu0 %v9319_v27  ;;  %9352 = vmatpush3.bf16.msra.mxu1 %v9351_v48  ;;  %v9337_v27 = vpack.c.bf16 %v1593_v32, %v1592_v14  ;;  %v9369_v48 = vpack.c.bf16 %v1625_v17, %v1624_v9  ;;  %v1985_v60 = vld [vmem:[%s14797_s4 + $0xb0] sm:$0xff] }
 0x360   : > { %9322 = vmatprep.subr.bf16.mxu0 %v9321_v2  ;;  %9354 = vmatprep.subr.bf16.mxu1 %v9353_v42  ;;  %v1609_v2 = vld [vmem:[%s14796_s3 + $0x378] sm:$0xff]  ;;  %v9339_v42 = vpack.c.bf16 %v1577_v4, %v1576_v26 }
 0x361   : > { %v9371_v29 = vpack.c.bf16 %v1609_v2, %v1608_v50 }
 0x363   : > { %9324 = vmatpush3.bf16.msra.mxu0 %v9323_v37  ;;  %9356 = vmatpush3.bf16.msra.mxu1 %v9355_v38  ;;  %v1972_v37 = vld [vmem:[%s14797_s4 + $0x48] sm:$0xff]  ;;  %v1966_v38 = vld [vmem:[%s14797_s4 + $0x18] sm:$0xff] }
 0x364   : > { %9326 = vmatprep.subr.bf16.mxu0 %v9325_v39  ;;  %9358 = vmatprep.subr.bf16.mxu1 %v9357_v47  ;;  %v9373_v0 = vpack.c.bf16 %v1972_v37, %v1964_v36  ;;  %v1971_v39 = vld [vmem:[%s14797_s4 + $0x40] sm:$0xff]  ;;  %v9381_v47 = vpack.c.bf16 %v1974_v56, %v1966_v38 }
 0x365   : > { %v9375_v13 = vpack.c.bf16 %v1971_v39, %v1963_v11  ;;  %v1967_v39 = vld [vmem:[%s14797_s4 + $0x20] sm:$0xff] }
 0x367   : > { %9328 = vmatpush3.bf16.msra.mxu0 %v9327_v24  ;;  %9360 = vmatpush3.bf16.msra.mxu1 %v9359_v52  ;;  %v1982_v24 = vld [vmem:[%s14797_s4 + $0x98] sm:$0xff]  ;;  %v9377_v52 = vpack.c.bf16 %v1988_v49, %v1980_v45  ;;  %v1992_v45 = vld [vmem:[%s14797_s4 + $0xe8] sm:$0xff] }
 0x368   : > { %9330 = vmatprep.subr.bf16.mxu0 %v9329_v55  ;;  %9362 = vmatprep.subr.bf16.mxu1 %v9361_v51  ;;  %v1987_v55 = vld [vmem:[%s14797_s4 + $0xc0] sm:$0xff]  ;;  %v9385_v51 = vpack.c.bf16 %v1990_v53, %v1982_v24  ;;  %v1986_v49 = vld [vmem:[%s14797_s4 + $0xb8] sm:$0xff] }
 0x369   : > { %v9379_v57 = vpack.c.bf16 %v1987_v55, %v1979_v54  ;;  %v1994_v24 = vld [vmem:[%s14797_s4 + $0xf8] sm:$0xff]  ;;  %v9399_v54 = vpack.c.bf16 %v1977_v40, %v1969_v30  ;;  %v1983_v55 = vld [vmem:[%s14797_s4 + $0xa0] sm:$0xff] }
 0x36a   : > { %v9401_v25 = vpack.c.bf16 %v1994_v24, %v1986_v49  ;;  %v9395_v59 = vpack.c.bf16 %v1991_v63, %v1983_v55 }
 0x36b   : > { %9332 = vmatpush3.bf16.msra.mxu0 %v9331_v62  ;;  %9364 = vmatpush3.bf16.msra.mxu1 %v9363_v1  ;;  %v1970_v62 = vld [vmem:[%s14797_s4 + $0x38] sm:$0xff] }
 0x36c   : > { %9334 = vmatprep.subr.bf16.mxu0 %v9333_v7  ;;  %9366 = vmatprep.subr.bf16.mxu1 %v9365_v8  ;;  %v1978_v1 = vld [vmem:[%s14797_s4 + $0x78] sm:$0xff] }
 0x36d   : > { %v9397_v6 = vpack.c.bf16 %v1978_v1, %v1970_v62  ;;  %v8961_v1 = vld [vmem:[%s14797_s4 + $0x100] ss:$8 sm:$0xf] }
 0x36f   : > { %9336 = vmatpush3.bf16.msra.mxu0 %v9335_v18  ;;  %9368 = vmatpush3.bf16.msra.mxu1 %v9367_v21 }
 0x370   : > { %9338 = vmatprep.subr.bf16.mxu0 %v9337_v27  ;;  %9370 = vmatprep.subr.bf16.mxu1 %v9369_v48 }
 0x373   : > { %9340 = vmatpush3.bf16.msra.mxu0 %v9339_v42  ;;  %9372 = vmatpush3.bf16.msra.mxu1 %v9371_v29 }
 0x374   : > { %9374 = vmatprep.subr.bf16.mxu0 %v9373_v0  ;;  %9382 = vmatprep.subr.bf16.mxu1 %v9381_v47  ;;  %v1975_v47 = vld [vmem:[%s14797_s4 + $0x60] sm:$0xff] }
 0x375   : > { %v9391_v53 = vpack.c.bf16 %v1975_v47, %v1967_v39 }
 0x376   : > { %1874 = vmatmul.mubr.f32.vlgmr.msra.gmra.mrb[6].mxu0 %v1648_v34  ;;  %1944 = vmatmul.mubr.f32.vlgmr.msra.gmra.mrb[6].mxu1 %v1656_v20 }
 0x377   : > { %2108 = vmatprep.mubr.f32.mxu0 %v14799_v12  ;;  %2179 = vmatprep.mubr.f32.mxu1 %v14799_v12 }
 0x378   : > { %9376 = vmatpush1.bf16.msra.mxu0 %v9375_v13  ;;  %9384 = vmatpush1.bf16.msra.mxu1 %v9383_v44  ;;  %v1984_v44 = vld [vmem:[%s14797_s4 + $0xa8] sm:$0xff] }
 0x379   : > { %9378 = vmatprep.subr.bf16.mxu0 %v9377_v52  ;;  %9386 = vmatprep.subr.bf16.mxu1 %v9385_v51 }
 0x37c   : > { %9380 = vmatpush1.bf16.msra.mxu0 %v9379_v57  ;;  %9388 = vmatpush1.bf16.msra.mxu1 %v9387_v61  ;;  %v9393_v57 = vpack.c.bf16 %v1992_v45, %v1984_v44  ;;  %v1993_v61 = vld [vmem:[%s14797_s4 + $0xf0] sm:$0xff] }
 0x37d   : > { %9390 = vmatprep.subr.bf16.mxu0 %v9389_v46  ;;  %9398 = vmatprep.subr.bf16.mxu1 %v9397_v6  ;;  %v9403_v62 = vpack.c.bf16 %v1993_v61, %v1985_v60  ;;  %v8962_v46 = vld [vmem:[%s14797_s4 + $0x100] ss:$8 sm:$0xf0] }
 0x37e   : > { %v1998_v6 = vor.u32 %v8962_v46, %v8961_v1 }
 0x429   : > { %v9121_v7 = vpop.f32.mrb[4].mxu0  ;;  %v9156_v8 = vpop.f32.mrb[4].mxu1 }
 0x42a   : > { %v9122_v58 = vpop.f32.mrb[5].mxu0  ;;  %v9157_v14 = vpop.f32.mrb[5].mxu1 }
 0x42b   : > { %v9123_v32 = vadd.f32 %v9122_v58, %v9121_v7  ;;  %v9158_v9 = vadd.f32 %v9157_v14, %v9156_v8  ;;  %v2003_v7 = vrot.slane %v1998_v6, %v9953_v22  ;;  %v2011_v8 = vrot.slane %v1998_v6, %v9947_v19 }
 0x42c   : > { %v2015_v58 = vrot.slane %v1998_v6, %v9956_v23 }
 0x42d   : > { %v1736_v17 = vadd.f32 %v9123_v32, %v1626_v10  ;;  %v2007_v10 = vrot.slane %v1998_v6, %v9941_v16 }
 0x42f   : > { %v1806_v18 = vadd.f32 %v9158_v9, %v1736_v17 }
 0x449   : > { %v9191_v21 = vpop.f32.mrb[6].mxu0  ;;  %v9226_v26 = vpop.f32.mrb[6].mxu1 }
 0x44a   : > { %v9192_v27 = vpop.f32.mrb[7].mxu0  ;;  %v9227_v48 = vpop.f32.mrb[7].mxu1 }
 0x44b   : > { %v9193_v4 = vadd.f32 %v9192_v27, %v9191_v21  ;;  %v9228_v50 = vadd.f32 %v9227_v48, %v9226_v26 }
 0x44d   : > { %v1876_v2 = vadd.f32 %v9193_v4, %v1806_v18 }
 0x44f   : > { %v1946_v42 = vadd.f32 %v9228_v50, %v1876_v2 }
 0x451   : > { %v1949_v29 = vsub.f32 0.0, %v1946_v42 }
 0x453   : > { %v1950_v34 = vmul.f32 1.442695, %v1949_v29 }
 0x455   : > { %9774 = vpow2.f32 %v1950_v34  ;;  %v2019_v34 = vrot.slane %v1998_v6, %v1647_v31 }
 0x45f   : > { %v9775_v20 = vpop.eup %9774 }
 0x460   : > { %v1952_v36 = vadd.f32 1.0, %v9775_v20  ;;  %v2027_v20 = vrot.slane %v1998_v6, %v1655_v33 }
 0x462   : > { %9776 = vrcp.f32 %v1952_v36 }
 0x46c   : > { %v9777_v37 = vpop.eup %9776 }
 0x46d   : > { %v1955_v38 = vmul.f32 16.0, %v9777_v37 }
 0x46f   : > { %v8960_v0 = vadd.f32 -0.5, %v1955_v38  ;;  %v2023_v38 = vrot.slane %v1998_v6, %v1651_v41 }
 0x471   : > { %v9751_v56 = vcvt.f32.s32 %v8960_v0  ;;  %v2031_v0 = vrot.slane %v1998_v6, %v1659_v43 }
 0x473   : > { %v1958_v11 = vand.u32 15, %v9751_v56 }
 0x475   : > { %v1959_v13 = vcvt.s32.f32 %v1958_v11 }
 0x477   : > { %v1960_v52 = vadd.f32 0.5, %v1959_v13 }
 0x479   : > { %v1962_v51 = vmul.f32 0.0625, %v1960_v52 }
 0x47b   : > { %8963 = vmatmul.mubr.msk.f32.vlgmr.msra.gmra.mrb[8].mxu0 %vm2040_vm11, %v1962_v51  ;;  %8964 = vmatmul.mubr.msk.f32.vlgmr.msra.gmra.mrb[8].mxu1 %vm2040_vm11, %v1962_v51 }
 0x47c   : > { %9392 = vmatpush1.bf16.msra.mxu0 %v9391_v53  ;;  %9400 = vmatpush1.bf16.msra.mxu1 %v9399_v54 }
 0x47d   : > { %9394 = vmatprep.subr.bf16.mxu0 %v9393_v57  ;;  %9402 = vmatprep.subr.bf16.mxu1 %v9401_v25 }
 0x47e   : > { %2250 = vmatprep.mubr.f32.mxu0 %v14799_v12  ;;  %2321 = vmatprep.mubr.f32.mxu1 %v14799_v12 }
 0x480   : > { %9396 = vmatpush1.bf16.msra.mxu0 %v9395_v59  ;;  %9404 = vmatpush1.bf16.msra.mxu1 %v9403_v62 }
 0x483   : > { %8965 = vmatmul.mubr.msk.f32.vlgmr.msra.gmra.mrb[10].mxu0 %vm2040_vm11, %v1962_v51  ;;  %8966 = vmatmul.mubr.msk.f32.vlgmr.msra.gmra.mrb[10].mxu1 %vm2040_vm11, %v1962_v51 }
 0x484   : > { %2962 = vmatprep.mubr.f32.mxu0 %v14799_v12  ;;  %3033 = vmatprep.mubr.f32.mxu1 %v14799_v12 }
 0x54e   : > { %v2110_v14 = vpop.f32.mrb[8].mxu0  ;;  %v2181_v32 = vpop.f32.mrb[8].mxu1 }
 0x54f   : > { %v2111_v9 = vadd.f32 %v2110_v14, %v2003_v7  ;;  %v2182_v17 = vadd.f32 %v2181_v32, %v2011_v8  ;;  %v2112_v18 = vpop.f32.mrb[9].mxu0  ;;  %v2183_v21 = vpop.f32.mrb[9].mxu1 }
 0x550   : > { %v2113_v26 = vadd.f32 %v2112_v18, %v2007_v10  ;;  %v2184_v27 = vadd.f32 %v2183_v21, %v2015_v58 }
 0x551   : > { %v2328_v48 = vsub.f32 0.0, %v2111_v9  ;;  %v2330_v4 = vsub.f32 0.0, %v2182_v17 }
 0x552   : > { %v2329_v50 = vsub.f32 0.0, %v2113_v26  ;;  %v2331_v2 = vsub.f32 0.0, %v2184_v27 }
 0x553   : > { %v2336_v42 = vmul.f32 1.442695, %v2328_v48  ;;  %v2340_v29 = vmul.f32 1.442695, %v2330_v4 }
 0x554   : > { %v2338_v36 = vmul.f32 1.442695, %v2329_v50  ;;  %v2342_v37 = vmul.f32 1.442695, %v2331_v2 }
 0x555   : > { %9778 = vpow2.f32 %v2336_v42 }
 0x556   : > { %9780 = vpow2.f32 %v2340_v29  ;;  %v2252_v56 = vpop.f32.mrb[10].mxu0  ;;  %v2323_v11 = vpop.f32.mrb[10].mxu1 }
 0x557   : > { %9782 = vpow2.f32 %v2338_v36  ;;  %v2253_v39 = vadd.f32 %v2252_v56, %v2019_v34  ;;  %v2324_v47 = vadd.f32 %v2323_v11, %v2027_v20  ;;  %v2254_v13 = vpop.f32.mrb[11].mxu0  ;;  %v2325_v31 = vpop.f32.mrb[11].mxu1 }
 0x558   : > { %9784 = vpow2.f32 %v2342_v37  ;;  %v2255_v30 = vadd.f32 %v2254_v13, %v2023_v38  ;;  %v2326_v33 = vadd.f32 %v2325_v31, %v2031_v0  ;;  %v10955_v31 = vld [vmem:[%s14794_s1 + $0x2] ss:$8 sm:$0xf] }
 0x559   : > { %v2332_v40 = vsub.f32 0.0, %v2253_v39  ;;  %v2334_v44 = vsub.f32 0.0, %v2324_v47  ;;  %v10946_v39 = vld [vmem:[%s14794_s1 + $0x1] ss:$8 sm:$0xf] }
 0x55a   : > { %v2333_v45 = vsub.f32 0.0, %v2255_v30  ;;  %v2335_v49 = vsub.f32 0.0, %v2326_v33  ;;  %v2515_v13 = vrot.slane %v10946_v39, %v9941_v16 }
 0x55b   : > { %v2344_v41 = vmul.f32 1.442695, %v2332_v40  ;;  %v2348_v24 = vmul.f32 1.442695, %v2334_v44 }
 0x55c   : > { %v2346_v3 = vmul.f32 1.442695, %v2333_v45  ;;  %v2350_v43 = vmul.f32 1.442695, %v2335_v49  ;;  %v2569_v45 = vrot.slane %v10955_v31, %v9941_v16 }
 0x55d   : > { %9786 = vpow2.f32 %v2344_v41  ;;  %v10967_v49 = vld [vmem:[%s14794_s1 + $0x3] ss:$8 sm:$0xf] }
 0x55e   : > { %9788 = vpow2.f32 %v2348_v24 }
 0x55f   : > { %v9779_v52 = vpop.eup %9778  ;;  %9790 = vpow2.f32 %v2346_v3 }
 0x560   : > { %v9781_v53 = vpop.eup %9780  ;;  %v2352_v54 = vadd.f32 1.0, %v9779_v52  ;;  %9792 = vpow2.f32 %v2350_v43 }
 0x561   : > { %v9783_v55 = vpop.eup %9782  ;;  %v2354_v51 = vadd.f32 1.0, %v9781_v53  ;;  %v2623_v53 = vrot.slane %v10967_v49, %v9941_v16 }
 0x562   : > { %v9785_v57 = vpop.eup %9784  ;;  %9794 = vrcp.f32 %v2352_v54  ;;  %v2353_v25 = vadd.f32 1.0, %v9783_v55  ;;  %v10979_v54 = vld [vmem:[%s14794_s1 + $0x4] ss:$8 sm:$0xf] }
 0x563   : > { %9796 = vrcp.f32 %v2354_v51  ;;  %v2355_v63 = vadd.f32 1.0, %v9785_v57 }
 0x564   : > { %9798 = vrcp.f32 %v2353_v25 }
 0x565   : > { %9800 = vrcp.f32 %v2355_v63 }
 0x567   : > { %v9787_v60 = vpop.eup %9786 }
 0x568   : > { %v9789_v61 = vpop.eup %9788  ;;  %v2356_v59 = vadd.f32 1.0, %v9787_v60  ;;  %v2677_v60 = vrot.slane %v10979_v54, %v9953_v22 }
 0x569   : > { %v9791_v62 = vpop.eup %9790  ;;  %v2358_v1 = vadd.f32 1.0, %v9789_v61  ;;  %v10994_v61 = vld [vmem:[%s14794_s1 + $0x5] ss:$8 sm:$0xf] }
 0x56a   : > { %v9793_v46 = vpop.eup %9792  ;;  %9802 = vrcp.f32 %v2356_v59  ;;  %v2357_v6 = vadd.f32 1.0, %v9791_v62 }
 0x56b   : > { %9804 = vrcp.f32 %v2358_v1  ;;  %v2359_v7 = vadd.f32 1.0, %v9793_v46 }
 0x56c   : > { %v9795_v8 = vpop.eup %9794  ;;  %9806 = vrcp.f32 %v2357_v6 }
 0x56d   : > { %v9797_v10 = vpop.eup %9796  ;;  %9808 = vrcp.f32 %v2359_v7  ;;  %v2731_v7 = vrot.slane %v10994_v61, %v9953_v22 }
 0x56e   : > { %v9799_v58 = vpop.eup %9798 }
 0x56f   : > { %v9801_v14 = vpop.eup %9800  ;;  %v2372_v32 = vcombine.low %v9795_v8, %v9799_v58  ;;  %v11009_v8 = vld [vmem:[%s14794_s1 + $0x6] ss:$8 sm:$0xf] }
 0x570   : > { %v2373_v9 = vcombine.low %v9797_v10, %v9801_v14 }
 0x571   : > { %v2380_v17 = vrot.slane %v2372_v32, %v10542_v28 }
 0x572   : > { %v2387_v18 = vrot.slane %v2373_v9, %v10542_v28 }
 0x574   : > { %v9803_v21 = vpop.eup %9802  ;;  %v2388_v26 = vcombine.low %v2380_v17, %v2387_v18  ;;  %v2785_v17 = vrot.slane %v11009_v8, %v9953_v22  ;;  %v11024_v18 = vld [vmem:[%s14794_s1] ss:$8 sm:$0xf] }
 0x575   : > { %v9805_v27 = vpop.eup %9804 }
 0x576   : > { %v9807_v48 = vpop.eup %9806  ;;  %v2395_v4 = vrot.slane %v2388_v26, %v10542_v28 }
 0x577   : > { %v9809_v50 = vpop.eup %9808  ;;  %v2402_v2 = vcombine.low %v9803_v21, %v9807_v48 }
 0x578   : > { %2397 = vst.msk [vmem:[#allocation3] ss:$2 sm:$0xf] %vm10547_vm10, %v2395_v4  ;;  %v2403_v42 = vcombine.low %v9805_v27, %v9809_v50  ;;  %v2473_v50 = vrot.slane %v11024_v18, %v9941_v16 }
 0x579   : > { %v2410_v29 = vrot.slane %v2402_v2, %v10542_v28 }
 0x57a   : > { %v2417_v34 = vrot.slane %v2403_v42, %v10542_v28 }
 0x57c   : > { %v2418_v20 = vcombine.low %v2410_v29, %v2417_v34  ;;  %v2519_v29 = vrot.slane %v10946_v39, %v9947_v19 }
 0x57e   : > { %v2425_v36 = vrot.slane %v2418_v20, %v10542_v28 }
 0x580   : > { %2428 = vst.msk [vmem:[#allocation3 + $0x1] ss:$2 sm:$0xf] %vm10547_vm10, %v2425_v36 }
 0x587   : > { %v10900_v37 = vld [vmem:[#allocation3] sm:$0xff] }
 0x588   : > { %14918 = vst [vmem:[#allocation10_spill] sm:$0xff] %v10900_v37  ;;  %v2438_v38 = vrot.slane %v10900_v37, %v9891_v5  ;;  %8970 = vst.sshfl [vmem:[#allocation4 + $0x20] sm:$0x3 pattern:$0x76325410] %v10900_v37  ;;  %v2431_v0 = vcombine.high %v10900_v37, %v10900_v37 }
 0x589   : > { %v8997_v37 = vld [vmem:[%s14794_s1 + $0x5] ss:$8 sm:$0xf] }
 0x58a   : > { %2494 = vrot.lane.b32.xlu1 %v2438_v38, %s9835_s25  ;;  %v2446_v56 = vcombine.high %v2438_v38, %v2438_v38  ;;  %v2445_v11 = vrot.slane %v2431_v0, %v9891_v5  ;;  %8971 = vst.sshfl [vmem:[#allocation4 + $0x30] sm:$0x3 pattern:$0x76325410] %v2431_v0  ;;  %v2523_v0 = vrot.slane %v10946_v39, %v9956_v23 }
 0x58c   : > { %2496 = vrot.lane.b32.xlu0 %v2446_v56, %s9835_s25  ;;  %2657 = vst [vmem:[#allocation4 + $0x28] sm:$0x3] %v2446_v56  ;;  %v2447_v28 = vcombine.high %v2445_v11, %v2445_v11 }
 0x58e   : > { %2548 = vrot.lane.b32.xlu1 %v2438_v38, %s9836_s26  ;;  %2659 = vst [vmem:[#allocation4 + $0x38] sm:$0x3] %v2447_v28 }
 0x590   : > { %2550 = vrot.lane.b32.xlu0 %v2446_v56, %s9836_s26 }
 0x592   : > { %2602 = vrot.lane.b32.xlu1 %v2438_v38, %s9837_s27 }
 0x594   : > { %2604 = vrot.lane.b32.xlu0 %v2446_v56, %s9837_s27 }
 0x596   : > { %2660 = vrot.lane.b32.xlu1 %v2438_v38, %s9838_s28 }
 0x598   : > { %2662 = vrot.lane.b32.xlu0 %v2446_v56, %s9838_s28 }
 0x59a   : > { %2714 = vrot.lane.b32.xlu1 %v2438_v38, %s9839_s29 }
 0x59c   : > { %2716 = vrot.lane.b32.xlu0 %v2446_v56, %s9839_s29 }
 0x59e   : > { %2768 = vrot.lane.b32.xlu1 %v2438_v38, %s9840_s30 }
 0x5a0   : > { %2770 = vrot.lane.b32.xlu0 %v2446_v56, %s9840_s30 }
 0x5a2   : > { %2452 = vrot.lane.b32.xlu1 %v2438_v38, %s9841_s6 }
 0x5a4   : > { %2454 = vrot.lane.b32.xlu0 %v2446_v56, %s9841_s6 }
 0x5a6   : > { %2498 = vrot.lane.b32.xlu1 %v2445_v11, %s9835_s25 }
 0x5a8   : > { %2500 = vrot.lane.b32.xlu0 %v2447_v28, %s9835_s25 }
 0x5aa   : > { %2552 = vrot.lane.b32.xlu1 %v2445_v11, %s9836_s26 }
 0x5ac   : > { %2554 = vrot.lane.b32.xlu0 %v2447_v28, %s9836_s26 }
 0x5ae   : > { %2606 = vrot.lane.b32.xlu1 %v2445_v11, %s9837_s27 }
 0x5b0   : > { %2608 = vrot.lane.b32.xlu0 %v2447_v28, %s9837_s27 }
 0x5b2   : > { %2664 = vrot.lane.b32.xlu1 %v2445_v11, %s9838_s28 }
 0x5b4   : > { %2666 = vrot.lane.b32.xlu0 %v2447_v28, %s9838_s28 }
 0x5b6   : > { %2718 = vrot.lane.b32.xlu1 %v2445_v11, %s9839_s29 }
 0x5b8   : > { %2720 = vrot.lane.b32.xlu0 %v2447_v28, %s9839_s29 }
 0x5ba   : > { %2772 = vrot.lane.b32.xlu1 %v2445_v11, %s9840_s30 }
 0x5bc   : > { %2774 = vrot.lane.b32.xlu0 %v2447_v28, %s9840_s30 }
 0x5be   : > { %2456 = vrot.lane.b32.xlu1 %v2445_v11, %s9841_s6 }
 0x5c0   : > { %2458 = vrot.lane.b32.xlu0 %v2447_v28, %s9841_s6 }
 0x5c2   : > { %2822 = vrot.lane.b32.xlu1 %v2438_v38, %s9842_s7  ;;  %v2511_v38 = vrot.slane %v10946_v39, %v9953_v22 }
 0x5c4   : > { %2824 = vrot.lane.b32.xlu0 %v2446_v56, %s9842_s7 }
 0x5c6   : > { %2826 = vrot.lane.b32.xlu1 %v2445_v11, %s9842_s7 }
 0x5c8   : > { %2828 = vrot.lane.b32.xlu0 %v2447_v28, %s9842_s7 }
 0x5ca   : > { %2880 = vperm.xlu1 %9773, %v2865_v35   ;;  %v2573_v35 = vrot.slane %v10955_v31, %v9947_v19 }
 0x5fc   : > { %v10948_v47 = vpop.permute.xlu1 %2494 }
 0x5fe   : > { %v2497_v30 = vpop.permute.xlu0 %2496 }
 0x5ff   : > { %v2504_v33 = vsel %vm304_vm1, %v10948_v47, %v2497_v30 }
 0x600   : > { %v2529_v40 = vmul.f32 %v2515_v13, %v2504_v33  ;;  %v10960_v44 = vpop.permute.xlu1 %2548 }
 0x602   : > { %v2537_v41 = vrot.slane %v2529_v40, 6  ;;  %v2551_v24 = vpop.permute.xlu0 %2550  ;;  %v2565_v40 = vrot.slane %v10955_v31, %v9953_v22 }
 0x603   : > { %v2558_v3 = vsel %vm360_vm0, %v10960_v44, %v2551_v24 }
 0x604   : > { %2545 = vst [vmem:[#allocation4 + $0x8] sm:$0xc] %v2537_v41  ;;  %v2583_v43 = vmul.f32 %v2569_v45, %v2558_v3  ;;  %v10972_v52 = vpop.permute.xlu1 %2602  ;;  %v2577_v3 = vrot.slane %v10955_v31, %v9956_v23  ;;  %v2619_v31 = vrot.slane %v10967_v49, %v9953_v22 }
 0x606   : > { %v2591_v55 = vrot.slane %v2583_v43, 4  ;;  %v10981_v51 = vpop.permute.xlu0 %2604 }
 0x607   : > { %v2612_v57 = vsel %vm416_vm2, %v10972_v52, %v10981_v51 }
 0x608   : > { %2599 = vst [vmem:[#allocation4 + $0x8] sm:$0x30] %v2591_v55  ;;  %v2637_v25 = vmul.f32 %v2623_v53, %v2612_v57  ;;  %v10987_v63 = vpop.permute.xlu1 %2660 }
 0x60a   : > { %v2645_v59 = vrot.slane %v2637_v25, 2  ;;  %v10996_v62 = vpop.permute.xlu0 %2662 }
 0x60b   : > { %v2670_v1 = vsel %vm476_vm3, %v10987_v63, %v10996_v62 }
 0x60c   : > { %2653 = vst [vmem:[#allocation4 + $0x8] sm:$0xc0] %v2645_v59  ;;  %v2694_v46 = vmul.f32 %v2677_v60, %v2670_v1  ;;  %v11002_v6 = vpop.permute.xlu1 %2714 }
 0x60e   : > { %v2702_v10 = vrot.slane %v2694_v46, 6  ;;  %v11011_v58 = vpop.permute.xlu0 %2716 }
 0x60f   : > { %v2724_v14 = vsel %vm532_vm4, %v11002_v6, %v11011_v58 }
 0x610   : > { %2710 = vst [vmem:[#allocation4 + $0x20] sm:$0xc] %v2702_v10  ;;  %v2748_v32 = vmul.f32 %v2731_v7, %v2724_v14  ;;  %v11017_v9 = vpop.permute.xlu1 %2768  ;;  %v2631_v10 = vrot.slane %v10967_v49, %v9956_v23 }
 0x612   : > { %v2756_v21 = vrot.slane %v2748_v32, 4  ;;  %v11026_v26 = vpop.permute.xlu0 %2770 }
 0x613   : > { %v2778_v27 = vsel %vm588_vm5, %v11017_v9, %v11026_v26 }
 0x614   : > { %2764 = vst [vmem:[#allocation4 + $0x20] sm:$0x30] %v2756_v21  ;;  %v2802_v48 = vmul.f32 %v2785_v17, %v2778_v27  ;;  %v11032_v4 = vpop.permute.xlu1 %2452  ;;  %v2681_v27 = vrot.slane %v10979_v54, %v9941_v16 }
 0x616   : > { %v2810_v2 = vrot.slane %v2802_v48, 2  ;;  %v11036_v42 = vpop.permute.xlu0 %2454 }
 0x617   : > { %v2462_v34 = vsel %vm261_vm6, %v11032_v4, %v11036_v42 }
 0x618   : > { %2818 = vst [vmem:[#allocation4 + $0x20] sm:$0xc0] %v2810_v2  ;;  %v2487_v20 = vmul.f32 %v2473_v50, %v2462_v34  ;;  %v2499_v36 = vpop.permute.xlu1 %2498 }
 0x619   : > { %v2503_v56 = vsel %vm304_vm1, %v2497_v30, %v2499_v36 }
 0x61a   : > { %2491 = vst [vmem:[#allocation4 + $0x8] sm:$0x3] %v2487_v20  ;;  %v2530_v11 = vmul.f32 %v2519_v29, %v2503_v56  ;;  %v2501_v28 = vpop.permute.xlu0 %2500  ;;  %v2689_v20 = vrot.slane %v10979_v54, %v9956_v23 }
 0x61b   : > { %v2502_v13 = vsel %vm304_vm1, %v2499_v36, %v2501_v28  ;;  %v2505_v33 = vsel %vm304_vm1, %v2501_v28, %v10948_v47  ;;  %v2627_v47 = vrot.slane %v10967_v49, %v9947_v19  ;;  %v2685_v49 = vrot.slane %v10979_v54, %v9947_v19 }
 0x61c   : > { %v2538_v39 = vrot.slane %v2530_v11, 6  ;;  %v2528_v45 = vmul.f32 %v2511_v38, %v2505_v33  ;;  %v2531_v41 = vmul.f32 %v2523_v0, %v2502_v13  ;;  %v2553_v30 = vpop.permute.xlu1 %2552  ;;  %v2735_v11 = vrot.slane %v10994_v61, %v9941_v16 }
 0x61d   : > { %v2557_v43 = vsel %vm360_vm0, %v2551_v24, %v2553_v30  ;;  %v2739_v54 = vrot.slane %v10994_v61, %v9947_v19 }
 0x61e   : > { %2546 = vst [vmem:[#allocation4 + $0x10] sm:$0xc] %v2538_v39  ;;  %v2536_v53 = vrot.slane %v2528_v45, 6  ;;  %v2539_v55 = vrot.slane %v2531_v41, 6  ;;  %v2584_v57 = vmul.f32 %v2573_v35, %v2557_v43  ;;  %v2555_v25 = vpop.permute.xlu0 %2554  ;;  %v2743_v39 = vrot.slane %v10994_v61, %v9956_v23 }
 0x61f   : > { %v2556_v60 = vsel %vm360_vm0, %v2553_v30, %v2555_v25  ;;  %v2559_v59 = vsel %vm360_vm0, %v2555_v25, %v10960_v44  ;;  %v2789_v43 = vrot.slane %v11009_v8, %v9941_v16  ;;  %v2793_v61 = vrot.slane %v11009_v8, %v9947_v19 }
 0x620   : > { %2544 = vst [vmem:[#allocation4] sm:$0xc] %v2536_v53  ;;  %2547 = vst [vmem:[#allocation4 + $0x18] sm:$0xc] %v2539_v55  ;;  %v2592_v24 = vrot.slane %v2584_v57, 4  ;;  %v2582_v1 = vmul.f32 %v2565_v40, %v2559_v59  ;;  %v2585_v46 = vmul.f32 %v2577_v3, %v2556_v60  ;;  %v2607_v7 = vpop.permute.xlu1 %2606  ;;  %v2797_v60 = vrot.slane %v11009_v8, %v9956_v23 }
 0x621   : > { %v2611_v14 = vsel %vm416_vm2, %v10981_v51, %v2607_v7  ;;  %v2469_v8 = vrot.slane %v11024_v18, %v9953_v22 }
 0x622   : > { %2600 = vst [vmem:[#allocation4 + $0x10] sm:$0x30] %v2592_v24  ;;  %v2590_v32 = vrot.slane %v2582_v1, 4  ;;  %v2593_v17 = vrot.slane %v2585_v46, 4  ;;  %v2638_v44 = vmul.f32 %v2627_v47, %v2611_v14  ;;  %v2609_v21 = vpop.permute.xlu0 %2608  ;;  %v2477_v46 = vrot.slane %v11024_v18, %v9947_v19 }
 0x623   : > { %v2610_v48 = vsel %vm416_vm2, %v2607_v7, %v2609_v21  ;;  %v2613_v50 = vsel %vm416_vm2, %v2609_v21, %v10972_v52 }
 0x624   : > { %2598 = vst [vmem:[#allocation4] sm:$0x30] %v2590_v32  ;;  %2601 = vst [vmem:[#allocation4 + $0x18] sm:$0x30] %v2593_v17  ;;  %v2646_v51 = vrot.slane %v2638_v44, 2  ;;  %v2636_v2 = vmul.f32 %v2619_v31, %v2613_v50  ;;  %v2639_v29 = vmul.f32 %v2631_v10, %v2610_v48  ;;  %v2665_v34 = vpop.permute.xlu1 %2664  ;;  %v2481_v44 = vrot.slane %v11024_v18, %v9956_v23 }
 0x625   : > { %v2669_v36 = vsel %vm476_vm3, %v10996_v62, %v2665_v34 }
 0x626   : > { %2654 = vst [vmem:[#allocation4 + $0x10] sm:$0xc0] %v2646_v51  ;;  %v2644_v38 = vrot.slane %v2636_v2, 2  ;;  %v2647_v0 = vrot.slane %v2639_v29, 2  ;;  %v2695_v52 = vmul.f32 %v2681_v27, %v2669_v36  ;;  %v2667_v56 = vpop.permute.xlu0 %2666 }
 0x627   : > { %v2668_v28 = vsel %vm476_vm3, %v2665_v34, %v2667_v56  ;;  %v2671_v35 = vsel %vm476_vm3, %v2667_v56, %v10987_v63 }
 0x628   : > { %2652 = vst [vmem:[#allocation4] sm:$0xc0] %v2644_v38  ;;  %2655 = vst [vmem:[#allocation4 + $0x18] sm:$0xc0] %v2647_v0  ;;  %v2703_v62 = vrot.slane %v2695_v52, 6  ;;  %v2696_v13 = vmul.f32 %v2685_v49, %v2668_v28  ;;  %v2697_v33 = vmul.f32 %v2689_v20, %v2671_v35  ;;  %v2719_v40 = vpop.permute.xlu1 %2718  ;;  %v2867_v28 = vld [vmem:[#allocation4 + $0x8] sm:$0xff] }
 0x629   : > { %v2723_v45 = vsel %vm532_vm4, %v11011_v58, %v2719_v40 }
 0x62a   : > { %2711 = vst [vmem:[#allocation4 + $0x28] sm:$0xc] %v2703_v62  ;;  %v2704_v41 = vrot.slane %v2696_v13, 6  ;;  %v2705_v30 = vrot.slane %v2697_v33, 6  ;;  %v2749_v63 = vmul.f32 %v2735_v11, %v2723_v45  ;;  %v2721_v3 = vpop.permute.xlu0 %2720 }
 0x62b   : > { %v2722_v53 = vsel %vm532_vm4, %v2719_v40, %v2721_v3  ;;  %v2725_v55 = vsel %vm532_vm4, %v2721_v3, %v11002_v6 }
 0x62c   : > { %2712 = vst [vmem:[#allocation4 + $0x30] sm:$0xc] %v2704_v41  ;;  %2713 = vst [vmem:[#allocation4 + $0x38] sm:$0xc] %v2705_v30  ;;  %v2757_v58 = vrot.slane %v2749_v63, 4  ;;  %v2750_v57 = vmul.f32 %v2739_v54, %v2722_v53  ;;  %v2751_v25 = vmul.f32 %v2743_v39, %v2725_v55  ;;  %v2773_v47 = vpop.permute.xlu1 %2772  ;;  %v2870_v41 = vld [vmem:[#allocation4 + $0x20] sm:$0xff] }
 0x62d   : > { %v2777_v59 = vsel %vm588_vm5, %v11026_v26, %v2773_v47 }
 0x62e   : > { %2765 = vst [vmem:[#allocation4 + $0x28] sm:$0x30] %v2757_v58  ;;  %v2758_v31 = vrot.slane %v2750_v57, 4  ;;  %v2759_v24 = vrot.slane %v2751_v25, 4  ;;  %v2803_v6 = vmul.f32 %v2789_v43, %v2777_v59  ;;  %v2775_v1 = vpop.permute.xlu0 %2774  ;;  %v2864_v25 = vld [vmem:[%s14795_s2 + $0x20] sm:$0xff] }
 0x62f   : > { %v2776_v7 = vsel %vm588_vm5, %v2773_v47, %v2775_v1  ;;  %v2779_v10 = vsel %vm588_vm5, %v2775_v1, %v11017_v9  ;;  %v8975_v9 = vld [vmem:[%s14794_s1 + $0x7] ss:$8 sm:$0xf] }
 0x630   : > { %2766 = vst [vmem:[#allocation4 + $0x30] sm:$0x30] %v2758_v31  ;;  %2767 = vst [vmem:[#allocation4 + $0x38] sm:$0x30] %v2759_v24  ;;  %v2811_v26 = vrot.slane %v2803_v6, 2  ;;  %v2804_v14 = vmul.f32 %v2793_v61, %v2776_v7  ;;  %v2805_v32 = vmul.f32 %v2797_v60, %v2779_v10  ;;  %v2457_v17 = vpop.permute.xlu1 %2456  ;;  %v2839_v34 = vrot.slane %v8975_v9, %v9953_v22 }
 0x631   : > { %v2461_v21 = vsel %vm261_vm6, %v11036_v42, %v2457_v17  ;;  %v2843_v36 = vrot.slane %v8975_v9, %v9941_v16  ;;  %v2851_v56 = vrot.slane %v8975_v9, %v9956_v23 }
 0x632   : > { %2819 = vst [vmem:[#allocation4 + $0x28] sm:$0xc0] %v2811_v26  ;;  %v2812_v27 = vrot.slane %v2804_v14, 2  ;;  %v2813_v48 = vrot.slane %v2805_v32, 2  ;;  %v2488_v50 = vmul.f32 %v2477_v46, %v2461_v21  ;;  %v2459_v49 = vpop.permute.xlu0 %2458  ;;  %v3386_v21 = vld [vmem:[%s14795_s2 + $0x38] sm:$0xff] }
 0x633   : > { %v2460_v51 = vsel %vm261_vm6, %v2457_v17, %v2459_v49  ;;  %v2463_v18 = vsel %vm261_vm6, %v2459_v49, %v11032_v4  ;;  %v2847_v4 = vrot.slane %v8975_v9, %v9947_v19  ;;  %v3387_v9 = vld [vmem:[%s14795_s2 + $0x48] sm:$0xff] }
 0x634   : > { %2820 = vst [vmem:[#allocation4 + $0x30] sm:$0xc0] %v2812_v27  ;;  %2821 = vst [vmem:[#allocation4 + $0x38] sm:$0xc0] %v2813_v48  ;;  %v2486_v42 = vmul.f32 %v2469_v8, %v2463_v18  ;;  %v2489_v2 = vmul.f32 %v2481_v44, %v2460_v51  ;;  %v2823_v29 = vpop.permute.xlu1 %2822 }
 0x635   : > { %2492 = vst [vmem:[#allocation4 + $0x10] sm:$0x3] %v2488_v50  ;;  %v3056_v48 = vld [vmem:[%s14794_s1] ss:$8 sm:$0xf] }
 0x636   : > { %2490 = vst [vmem:[#allocation4] sm:$0x3] %v2486_v42  ;;  %2493 = vst [vmem:[#allocation4 + $0x18] sm:$0x3] %v2489_v2  ;;  %v2825_v20 = vpop.permute.xlu0 %2824  ;;  %v3065_v51 = vrot.slane %v3056_v48, %v9941_v16 }
 0x637   : > { %v2832_v38 = vsel %vm644_vm7, %v2823_v29, %v2825_v20  ;;  %v8982_v50 = vld [vmem:[%s14794_s1 + $0x1] ss:$8 sm:$0xf] }
 0x638   : > { %v2856_v0 = vmul.f32 %v2839_v34, %v2832_v38  ;;  %v2827_v52 = vpop.permute.xlu1 %2826  ;;  %v3107_v18 = vrot.slane %v8982_v50, %v9941_v16 }
 0x639   : > { %v2831_v11 = vsel %vm644_vm7, %v2825_v20, %v2827_v52  ;;  %v2871_v35 = vld [vmem:[#allocation4 + $0x28] sm:$0xff] }
 0x63a   : > { %2860 = vst [vmem:[#allocation4 + $0x40] sm:$0x3] %v2856_v0  ;;  %v2857_v54 = vmul.f32 %v2843_v36, %v2831_v11  ;;  %v2829_v62 = vpop.permute.xlu0 %2828  ;;  %v9405_v13 = vpack.c.bf16 %v2871_v35, %v2867_v28 }
 0x63b   : > { %v2830_v33 = vsel %vm644_vm7, %v2827_v52, %v2829_v62  ;;  %v2833_v40 = vsel %vm644_vm7, %v2829_v62, %v2823_v29  ;;  %v2872_v63 = vld [vmem:[#allocation4 + $0x30] sm:$0xff]  ;;  %v2873_v53 = vld [vmem:[#allocation4 + $0x38] sm:$0xff] }
 0x63c   : > { %2861 = vst [vmem:[#allocation4 + $0x48] sm:$0x3] %v2857_v54  ;;  %v2858_v39 = vmul.f32 %v2847_v4, %v2830_v33  ;;  %v2859_v45 = vmul.f32 %v2851_v56, %v2833_v40  ;;  %9406 = vmatprep.subr.bf16.mxu0 %v9405_v13  ;;  %v2868_v30 = vld [vmem:[#allocation4 + $0x10] sm:$0xff] }
 0x63d   : > { %v2866_v3 = vld [vmem:[#allocation4] sm:$0xff]  ;;  %v2869_v43 = vld [vmem:[#allocation4 + $0x18] sm:$0xff]  ;;  %v9411_v58 = vpack.c.bf16 %v2872_v63, %v2868_v30  ;;  %v3061_v30 = vrot.slane %v3056_v48, %v9953_v22  ;;  %v3111_v63 = vrot.slane %v8982_v50, %v9947_v19 }
 0x63e   : > { %2862 = vst [vmem:[#allocation4 + $0x50] sm:$0x3] %v2858_v39  ;;  %2863 = vst [vmem:[#allocation4 + $0x58] sm:$0x3] %v2859_v45  ;;  %v9407_v55 = vpack.c.bf16 %v2870_v41, %v2866_v3  ;;  %v9409_v61 = vpack.c.bf16 %v2873_v53, %v2869_v43  ;;  %v3073_v43 = vrot.slane %v3056_v48, %v9956_v23 }
 0x63f   : > { %v11273_v33 = vld [vmem:[%s14794_s1 + $0x3] ss:$8 sm:$0xf]  ;;  %v11278_v39 = vld [vmem:[%s14794_s1 + $0x2] ss:$8 sm:$0xf]  ;;  %v3103_v53 = vrot.slane %v8982_v50, %v9953_v22 }
 0x640   : > { %9408 = vmatpush1.bf16.msra.mxu0 %v9407_v55  ;;  %9410 = vmatprep.subr.bf16.mxu1 %v9409_v61  ;;  %v3191_v41 = vrot.slane %v11273_v33, %v9941_v16  ;;  %v3115_v55 = vrot.slane %v8982_v50, %v9956_v23  ;;  %v3149_v61 = vrot.slane %v11278_v39, %v9941_v16 }
 0x641   : > { %9412 = vmatpush1.bf16.msra.mxu1 %v9411_v58  ;;  %v2874_v47 = vld [vmem:[#allocation4 + $0x40] sm:$0x3]  ;;  %v3069_v58 = vrot.slane %v3056_v48, %v9947_v19 }
 0x643   : > { %v2875_v57 = vld [vmem:[#allocation4 + $0x48] sm:$0x3] }
 0x644   : > { %8976 = vmatprep.subr.msk.mxu0 %vm703_vm8, %v2875_v57 }
 0x645   : > { %8977 = vmatpush1.msk.msra.mxu0 %vm703_vm8, %v2874_v47  ;;  %v2877_v60 = vld [vmem:[#allocation4 + $0x58] sm:$0x3]  ;;  %v2876_v59 = vld [vmem:[#allocation4 + $0x50] sm:$0x3] }
 0x646   : > { %8978 = vmatmul.mubr.msk.f32.vlgmr.msra.gmra.mrb[12].mxu0 %vm699_vm9, %v2864_v25  ;;  %8979 = vmatprep.subr.msk.mxu1 %vm703_vm8, %v2877_v60 }
 0x647   : > { %8980 = vmatpush1.msk.msra.mxu1 %vm703_vm8, %v2876_v59  ;;  %3505 = vmatprep.mubr.f32.mxu0 %v14799_v12 }
 0x648   : > { %8981 = vmatmul.mubr.msk.f32.vlgmr.msra.gmra.mrb[12].mxu1 %vm699_vm9, %v2864_v25 }
 0x649   : > { %3582 = vmatprep.mubr.f32.mxu1 %v14799_v12  ;;  %v2881_v31 = vpop.permute.xlu1 %2880 }
 0x719   : > { %v2964_v24 = vpop.f32.mrb[12].mxu0 }
 0x71a   : > { %v2965_v6 = vadd.f32 %v2964_v24, %v2881_v31  ;;  %v2966_v1 = vpop.f32.mrb[13].mxu0 }
 0x71b   : > { %v2967_v46 = vadd.f32 %v2966_v1, %v2881_v31  ;;  %v3035_v7 = vpop.f32.mrb[12].mxu1  ;;  %v8985_v1 = vld [vmem:[%s14794_s1 + $0x4] ss:$8 sm:$0xf] }
 0x71c   : > { %v11164_v10 = vmax.f32 %v2965_v6, 0.0  ;;  %v3037_v8 = vpop.f32.mrb[13].mxu1  ;;  %v3036_v14 = vadd.f32 %v3035_v7, %v2881_v31 }
 0x71d   : > { %v11166_v26 = vmax.f32 %v2967_v46, 0.0  ;;  %v3038_v32 = vadd.f32 %v3037_v8, %v2881_v31 }
 0x71e   : > { %3044 = vrot.lane.b32.xlu0 %v11164_v10, %s9841_s6  ;;  %v11196_v17 = vmax.f32 %v3036_v14, 0.0 }
 0x71f   : > { %3046 = vrot.lane.b32.xlu1 %v11166_v26, %s9841_s6  ;;  %v11198_v44 = vmax.f32 %v3038_v32, 0.0 }
 0x722   : > { %3086 = vrot.lane.b32.xlu0 %v11164_v10, %s9835_s25 }
 0x723   : > { %3088 = vrot.lane.b32.xlu1 %v11166_v26, %s9835_s25 }
 0x726   : > { %3128 = vrot.lane.b32.xlu0 %v11164_v10, %s9836_s26 }
 0x727   : > { %3130 = vrot.lane.b32.xlu1 %v11166_v26, %s9836_s26 }
 0x72a   : > { %3170 = vrot.lane.b32.xlu0 %v11164_v10, %s9837_s27 }
 0x72b   : > { %3172 = vrot.lane.b32.xlu1 %v11166_v26, %s9837_s27 }
 0x72e   : > { %3216 = vrot.lane.b32.xlu0 %v11164_v10, %s9838_s28 }
 0x72f   : > { %3218 = vrot.lane.b32.xlu1 %v11166_v26, %s9838_s28 }
 0x732   : > { %3258 = vrot.lane.b32.xlu0 %v11164_v10, %s9839_s29 }
 0x733   : > { %3260 = vrot.lane.b32.xlu1 %v11166_v26, %s9839_s29 }
 0x736   : > { %3300 = vrot.lane.b32.xlu0 %v11164_v10, %s9840_s30 }
 0x737   : > { %3302 = vrot.lane.b32.xlu1 %v11166_v26, %s9840_s30 }
 0x73a   : > { %3048 = vrot.lane.b32.xlu0 %v11196_v17, %s9841_s6 }
 0x73b   : > { %3050 = vrot.lane.b32.xlu1 %v11198_v44, %s9841_s6 }
 0x73e   : > { %3090 = vrot.lane.b32.xlu0 %v11196_v17, %s9835_s25 }
 0x73f   : > { %3092 = vrot.lane.b32.xlu1 %v11198_v44, %s9835_s25 }
 0x742   : > { %3132 = vrot.lane.b32.xlu0 %v11196_v17, %s9836_s26 }
 0x743   : > { %3134 = vrot.lane.b32.xlu1 %v11198_v44, %s9836_s26 }
 0x746   : > { %3174 = vrot.lane.b32.xlu0 %v11196_v17, %s9837_s27 }
 0x747   : > { %3176 = vrot.lane.b32.xlu1 %v11198_v44, %s9837_s27 }
 0x74a   : > { %3220 = vrot.lane.b32.xlu0 %v11196_v17, %s9838_s28 }
 0x74b   : > { %3222 = vrot.lane.b32.xlu1 %v11198_v44, %s9838_s28 }
 0x74e   : > { %3262 = vrot.lane.b32.xlu0 %v11196_v17, %s9839_s29 }
 0x74f   : > { %3264 = vrot.lane.b32.xlu1 %v11198_v44, %s9839_s29 }
 0x752   : > { %3304 = vrot.lane.b32.xlu0 %v11196_v17, %s9840_s30 }
 0x753   : > { %3306 = vrot.lane.b32.xlu1 %v11198_v44, %s9840_s30 }
 0x756   : > { %3342 = vrot.lane.b32.xlu0 %v11164_v10, %s9842_s7 }
 0x757   : > { %3344 = vrot.lane.b32.xlu1 %v11166_v26, %s9842_s7 }
 0x75a   : > { %3346 = vrot.lane.b32.xlu0 %v11196_v17, %s9842_s7 }
 0x75b   : > { %3348 = vrot.lane.b32.xlu1 %v11198_v44, %s9842_s7 }
 0x75e   : > { %3426 = vperm.xlu0 %9772, %v3386_v21  }
 0x75f   : > { %3431 = vperm.xlu1 %9773, %v3387_v9  }
 0x790   : > { %v3045_v27 = vpop.permute.xlu0 %3044 }
 0x791   : > { %v3047_v49 = vpop.permute.xlu1 %3046 }
 0x792   : > { %v3054_v42 = vsel %vm261_vm6, %v3045_v27, %v3047_v49 }
 0x793   : > { %v3079_v20 = vmul.f32 %v3065_v51, %v3054_v42  ;;  %v3153_v51 = vrot.slane %v11278_v39, %v9947_v19 }
 0x794   : > { %v3087_v2 = vpop.permute.xlu0 %3086 }
 0x795   : > { %v3089_v29 = vpop.permute.xlu1 %3088 }
 0x796   : > { %v3096_v34 = vsel %vm304_vm1, %v3087_v2, %v3089_v29 }
 0x797   : > { %v3121_v36 = vmul.f32 %v3107_v18, %v3096_v34  ;;  %v3145_v34 = vrot.slane %v11278_v39, %v9953_v22 }
 0x798   : > { %v3129_v38 = vpop.permute.xlu0 %3128 }
 0x799   : > { %v11254_v0 = vpop.permute.xlu1 %3130  ;;  %v9413_v52 = vpack.c.bf16 %v3121_v36, %v3079_v20 }
 0x79a   : > { %v3138_v60 = vsel %vm360_vm0, %v3129_v38, %v11254_v0 }
 0x79b   : > { %9414 = vmatprep.subr.bf16.mxu0 %v9413_v52  ;;  %v3157_v52 = vrot.slane %v11278_v39, %v9956_v23 }
 0x79c   : > { %v11256_v4 = vpop.permute.xlu0 %3170 }
 0x79d   : > { %v3173_v56 = vpop.permute.xlu1 %3172 }
 0x79e   : > { %v3180_v3 = vsel %vm416_vm2, %v11256_v4, %v3173_v56 }
 0x79f   : > { %v3205_v6 = vmul.f32 %v3191_v41, %v3180_v3  ;;  %v3237_v3 = vrot.slane %v8985_v1, %v9941_v16 }
 0x7a0   : > { %v11258_v11 = vpop.permute.xlu0 %3216 }
 0x7a1   : > { %v11260_v28 = vpop.permute.xlu1 %3218 }
 0x7a4   : > { %v11262_v35 = vpop.permute.xlu0 %3258 }
 0x7a5   : > { %v11264_v54 = vpop.permute.xlu1 %3260 }
 0x7a8   : > { %v11266_v62 = vpop.permute.xlu0 %3300 }
 0x7a9   : > { %v11268_v13 = vpop.permute.xlu1 %3302 }
 0x7ac   : > { %v3049_v40 = vpop.permute.xlu0 %3048 }
 0x7ad   : > { %v3051_v45 = vpop.permute.xlu1 %3050  ;;  %v3053_v59 = vsel %vm261_vm6, %v3047_v49, %v3049_v40  ;;  %v3233_v49 = vrot.slane %v8985_v1, %v9953_v22 }
 0x7ae   : > { %v3052_v57 = vsel %vm261_vm6, %v3049_v40, %v3051_v45  ;;  %v3055_v25 = vsel %vm261_vm6, %v3051_v45, %v3045_v27  ;;  %v3163_v27 = vmul.f32 %v3149_v61, %v3138_v60  ;;  %v3080_v48 = vmul.f32 %v3069_v58, %v3053_v59 }
 0x7af   : > { %v3078_v14 = vmul.f32 %v3061_v30, %v3055_v25  ;;  %v3081_v32 = vmul.f32 %v3073_v43, %v3052_v57  ;;  %v3187_v40 = vrot.slane %v11273_v33, %v9953_v22  ;;  %v3199_v45 = vrot.slane %v11273_v33, %v9956_v23 }
 0x7b0   : > { %v3091_v47 = vpop.permute.xlu0 %3090  ;;  %v9417_v20 = vpack.c.bf16 %v3205_v6, %v3163_v27  ;;  %v8987_v6 = vld [vmem:[%s14794_s1 + $0x6] ss:$8 sm:$0xf] }
 0x7b1   : > { %v3095_v31 = vsel %vm304_vm1, %v3089_v29, %v3091_v47  ;;  %v3093_v24 = vpop.permute.xlu1 %3092 }
 0x7b2   : > { %v3122_v46 = vmul.f32 %v3111_v63, %v3095_v31  ;;  %v3094_v7 = vsel %vm304_vm1, %v3091_v47, %v3093_v24  ;;  %v3097_v8 = vsel %vm304_vm1, %v3093_v24, %v3087_v2  ;;  %v3195_v2 = vrot.slane %v11273_v33, %v9947_v19  ;;  %v8986_v24 = vld [vmem:[%s14794_s1 + $0x5] ss:$8 sm:$0xf] }
 0x7b3   : > { %v3120_v21 = vmul.f32 %v3103_v53, %v3097_v8  ;;  %v3123_v9 = vmul.f32 %v3115_v55, %v3094_v7  ;;  %v3241_v53 = vrot.slane %v8985_v1, %v9947_v19  ;;  %v3245_v55 = vrot.slane %v8985_v1, %v9956_v23 }
 0x7b4   : > { %v3133_v50 = vpop.permute.xlu0 %3132  ;;  %v9431_v36 = vpack.c.bf16 %v3122_v46, %v3080_v48  ;;  %v3275_v48 = vrot.slane %v8986_v24, %v9953_v22 }
 0x7b5   : > { %v3135_v18 = vpop.permute.xlu1 %3134  ;;  %v9415_v42 = vpack.c.bf16 %v3120_v21, %v3078_v14  ;;  %v9429_v29 = vpack.c.bf16 %v3123_v9, %v3081_v32  ;;  %v3137_v39 = vsel %vm360_vm0, %v11254_v0, %v3133_v50 }
 0x7b6   : > { %v3136_v41 = vsel %vm360_vm0, %v3133_v50, %v3135_v18  ;;  %v3139_v30 = vsel %vm360_vm0, %v3135_v18, %v3129_v38  ;;  %v3226_v38 = vsel %vm476_vm3, %v11258_v11, %v11260_v28  ;;  %v3164_v60 = vmul.f32 %v3153_v51, %v3137_v39 }
 0x7b7   : > { %9416 = vmatpush1.bf16.msra.mxu0 %v9415_v42  ;;  %9430 = vmatprep.subr.bf16.mxu1 %v9429_v29  ;;  %v3162_v57 = vmul.f32 %v3145_v34, %v3139_v30  ;;  %v3250_v31 = vmul.f32 %v3233_v49, %v3226_v38  ;;  %v3279_v50 = vrot.slane %v8986_v24, %v9941_v16 }
 0x7b8   : > { %v3175_v63 = vpop.permute.xlu0 %3174  ;;  %9418 = vmatprep.subr.bf16.mxu0 %v9417_v20  ;;  %9432 = vmatpush1.bf16.msra.mxu1 %v9431_v36  ;;  %v3283_v18 = vrot.slane %v8986_v24, %v9947_v19  ;;  %v3310_v20 = vsel %vm588_vm5, %v11266_v62, %v11268_v13  ;;  %v3321_v36 = vrot.slane %v8987_v6, %v9941_v16 }
 0x7b9   : > { %v3179_v33 = vsel %vm416_vm2, %v3173_v56, %v3175_v63  ;;  %v3177_v43 = vpop.permute.xlu1 %3176  ;;  %v3165_v56 = vmul.f32 %v3157_v52, %v3136_v41 }
 0x7ba   : > { %v3206_v61 = vmul.f32 %v3195_v2, %v3179_v33  ;;  %v3178_v58 = vsel %vm416_vm2, %v3175_v63, %v3177_v43  ;;  %v3181_v0 = vsel %vm416_vm2, %v3177_v43, %v11256_v4  ;;  %v3268_v2 = vsel %vm532_vm4, %v11262_v35, %v11264_v54 }
 0x7bb   : > { %v3204_v25 = vmul.f32 %v3187_v40, %v3181_v0  ;;  %v3207_v47 = vmul.f32 %v3199_v45, %v3178_v58  ;;  %v3292_v41 = vmul.f32 %v3275_v48, %v3268_v2  ;;  %v8988_v58 = vld [vmem:[%s14794_s1 + $0x7] ss:$8 sm:$0xf] }
 0x7bc   : > { %v3221_v59 = vpop.permute.xlu0 %3220  ;;  %v9435_v21 = vpack.c.bf16 %v3206_v61, %v3164_v60  ;;  %v3359_v60 = vrot.slane %v8988_v58, %v9953_v22 }
 0x7bd   : > { %v3225_v1 = vsel %vm476_vm3, %v11260_v28, %v3221_v59  ;;  %v3223_v4 = vpop.permute.xlu1 %3222  ;;  %v9419_v46 = vpack.c.bf16 %v3204_v25, %v3162_v57  ;;  %v9433_v7 = vpack.c.bf16 %v3207_v47, %v3165_v56  ;;  %v3317_v28 = vrot.slane %v8987_v6, %v9953_v22 }
 0x7be   : > { %v3251_v8 = vmul.f32 %v3237_v3, %v3225_v1  ;;  %v3224_v14 = vsel %vm476_vm3, %v3221_v59, %v3223_v4  ;;  %v3227_v32 = vsel %vm476_vm3, %v3223_v4, %v11258_v11  ;;  %v9423_v11 = vpack.c.bf16 %v3250_v31, %v11164_v10 }
 0x7bf   : > { %v3252_v9 = vmul.f32 %v3241_v53, %v3224_v14  ;;  %v3253_v27 = vmul.f32 %v3245_v55, %v3227_v32  ;;  %9420 = vmatpush1.bf16.msra.mxu0 %v9419_v46  ;;  %9434 = vmatprep.subr.bf16.mxu1 %v9433_v7  ;;  %v3334_v30 = vmul.f32 %v3317_v28, %v3310_v20 }
 0x7c0   : > { %v3263_v49 = vpop.permute.xlu0 %3262  ;;  %9436 = vmatpush1.bf16.msra.mxu1 %v9435_v21  ;;  %v9421_v51 = vpack.c.bf16 %v3251_v8, %v11166_v26  ;;  %v3287_v26 = vrot.slane %v8986_v24, %v9956_v23  ;;  %v3363_v47 = vrot.slane %v8988_v58, %v9941_v16  ;;  %v3371_v59 = vrot.slane %v8988_v58, %v9956_v23  ;;  %v3384_v21 = vld [vmem:[%s14795_s2 + $0x30] sm:$0xff] }
 0x7c1   : > { %v3265_v42 = vpop.permute.xlu1 %3264  ;;  %v9437_v29 = vpack.c.bf16 %v3253_v27, %v11198_v44  ;;  %v9439_v34 = vpack.c.bf16 %v3252_v9, %v11196_v17  ;;  %v3267_v10 = vsel %vm532_vm4, %v11264_v54, %v3263_v49  ;;  %v3325_v17 = vrot.slane %v8987_v6, %v9947_v19  ;;  %v3385_v9 = vld [vmem:[%s14795_s2 + $0x40] sm:$0xff] }
 0x7c2   : > { %9422 = vmatprep.subr.bf16.mxu0 %v9421_v51  ;;  %v3329_v44 = vrot.slane %v8987_v6, %v9956_v23  ;;  %v3266_v52 = vsel %vm532_vm4, %v3263_v49, %v3265_v42  ;;  %v3269_v40 = vsel %vm532_vm4, %v3265_v42, %v11262_v35  ;;  %v3293_v3 = vmul.f32 %v3279_v50, %v3267_v10 }
 0x7c3   : > { %9424 = vmatpush1.bf16.msra.mxu0 %v9423_v11  ;;  %9438 = vmatprep.subr.bf16.mxu1 %v9437_v29  ;;  %v3294_v53 = vmul.f32 %v3283_v18, %v3266_v52  ;;  %v3295_v35 = vmul.f32 %v3287_v26, %v3269_v40  ;;  %v9427_v57 = vpack.c.bf16 %v3334_v30, %v3292_v41 }
 0x7c4   : > { %v3305_v45 = vpop.permute.xlu0 %3304  ;;  %9440 = vmatpush1.bf16.msra.mxu1 %v9439_v34 }
 0x7c5   : > { %v3309_v54 = vsel %vm588_vm5, %v11268_v13, %v3305_v45  ;;  %v3307_v63 = vpop.permute.xlu1 %3306 }
 0x7c6   : > { %v3335_v39 = vmul.f32 %v3321_v36, %v3309_v54  ;;  %v3308_v33 = vsel %vm588_vm5, %v3305_v45, %v3307_v63  ;;  %v3311_v43 = vsel %vm588_vm5, %v3307_v63, %v11266_v62  ;;  %v3367_v62 = vrot.slane %v8988_v58, %v9947_v19  ;;  %v8996_v36 = vld [vmem:[%s14794_s1 + $0x4] ss:$8 sm:$0xf] }
 0x7c7   : > { %v3336_v55 = vmul.f32 %v3325_v17, %v3308_v33  ;;  %v3337_v38 = vmul.f32 %v3329_v44, %v3311_v43 }
 0x7c8   : > { %v3343_v61 = vpop.permute.xlu0 %3342  ;;  %v9425_v13 = vpack.c.bf16 %v3335_v39, %v3293_v3 }
 0x7c9   : > { %v3345_v0 = vpop.permute.xlu1 %3344  ;;  %v9441_v56 = vpack.c.bf16 %v3337_v38, %v3295_v35  ;;  %v9443_v25 = vpack.c.bf16 %v3336_v55, %v3294_v53  ;;  %v4108_v38 = vld [vmem:[%s14795_s2 + $0x58] sm:$0x3] }
 0x7ca   : > { %9426 = vmatprep.subr.bf16.mxu0 %v9425_v13  ;;  %v3352_v31 = vsel %vm644_vm7, %v3343_v61, %v3345_v0 }
 0x7cb   : > { %9428 = vmatpush1.bf16.msra.mxu0 %v9427_v57  ;;  %9442 = vmatprep.subr.bf16.mxu1 %v9441_v56  ;;  %v3376_v8 = vmul.f32 %v3359_v60, %v3352_v31  ;;  %v11614_v60 = vld [vmem:[%s14794_s1] ss:$8 sm:$0xf] }
 0x7cc   : > { %v3347_v24 = vpop.permute.xlu0 %3346  ;;  %9444 = vmatpush1.bf16.msra.mxu1 %v9443_v25  ;;  %v3636_v31 = vrot.slane %v11614_v60, %v9941_v16 }
 0x7cd   : > { %v3351_v6 = vsel %vm644_vm7, %v3345_v0, %v3347_v24  ;;  %v3349_v1 = vpop.permute.xlu1 %3348 }
 0x7ce   : > { %v3377_v4 = vmul.f32 %v3363_v47, %v3351_v6  ;;  %v3350_v46 = vsel %vm644_vm7, %v3347_v24, %v3349_v1  ;;  %v3353_v7 = vsel %vm644_vm7, %v3349_v1, %v3343_v61 }
 0x7cf   : > { %v3378_v14 = vmul.f32 %v3367_v62, %v3350_v46  ;;  %v3379_v32 = vmul.f32 %v3371_v59, %v3353_v7  ;;  %v3640_v46 = vrot.slane %v11614_v60, %v9947_v19  ;;  %v11632_v7 = vld [vmem:[%s14794_s1 + $0x1] ss:$8 sm:$0xf] }
 0x7d0   : > { %3457 = vmatprep.subr.mxu0 %v3377_v4 }
 0x7d1   : > { %3458 = vmatpush1.msra.mxu0 %v3376_v8  ;;  %3534 = vmatprep.subr.mxu1 %v3379_v32 }
 0x7d2   : > { %8989 = vmatmul.mubr.msk.f32.vlgmr.msra.gmra.mrb[14].mxu0 %vm3434_vm12, %v3384_v21  ;;  %3535 = vmatpush1.msra.mxu1 %v3378_v14 }
 0x7d3   : > { %8991 = vmatmul.mubr.msk.f32.vlgmr.msra.gmra.mrb[14].mxu1 %vm3434_vm12, %v3384_v21  ;;  %3511 = vmatprep.mubr.f32.mxu0 %v14799_v12 }
 0x7d4   : > { %3588 = vmatprep.mubr.f32.mxu1 %v14799_v12  ;;  %v8995_v12 = vld [vmem:[%s14794_s1 + $0x3] ss:$8 sm:$0xf] }
 0x7d6   : > { %8990 = vmatmul.mubr.msk.f32.gmra.mrb[16].mxu0 %vm3434_vm12, %v3385_v9 }
 0x7d7   : > { %8992 = vmatmul.mubr.msk.f32.gmra.mrb[16].mxu1 %vm3434_vm12, %v3385_v9  ;;  %9000 = vmatprep.mubr.msk.f32.mxu0 %vm4186_vm13, %v4108_v38 }
 0x7d8   : > { %9001 = vmatprep.mubr.msk.f32.mxu1 %vm4186_vm13, %v4108_v38 }
 0x7dd   : > { %v11422_v27 = vpop.permute.xlu0 %3426 }
 0x7de   : > { %v11427_v42 = vpop.permute.xlu1 %3431 }
 0x8a5   : > { %v3507_v48 = vpop.f32.mrb[14].mxu0 }
 0x8a6   : > { %v3508_v28 = vadd.f32 %v3507_v48, %v11422_v27  ;;  %v3509_v50 = vpop.f32.mrb[15].mxu0  ;;  %v3584_v49 = vpop.f32.mrb[14].mxu1  ;;  %v11646_v48 = vrot.slane %v11632_v7, %v9941_v16 }
 0x8a7   : > { %v3586_v51 = vpop.f32.mrb[15].mxu1  ;;  %v3510_v10 = vadd.f32 %v3509_v50, %v11422_v27  ;;  %v3585_v44 = vadd.f32 %v3584_v49, %v11422_v27 }
 0x8a8   : > { %v11425_v18 = vmax.f32 %v3508_v28, 0.0  ;;  %v3587_v54 = vadd.f32 %v3586_v51, %v11422_v27 }
 0x8a9   : > { %v3513_v11 = vpop.f32.mrb[16].mxu0  ;;  %v11465_v17 = vmax.f32 %v3510_v10, 0.0  ;;  %v11473_v40 = vmax.f32 %v3585_v44, 0.0 }
 0x8aa   : > { %14919 = vst [vmem:[#allocation11_spill] sm:$0xff] %v11425_v18  ;;  %v3514_v29 = vadd.f32 %v3513_v11, %v11427_v42  ;;  %v3515_v34 = vpop.f32.mrb[17].mxu0  ;;  %3603 = vrot.lane.b32.xlu0 %v11425_v18, %s9841_s6  ;;  %v3590_v2 = vpop.f32.mrb[16].mxu1  ;;  %v11537_v63 = vmax.f32 %v3587_v54, 0.0 }
 0x8ab   : > { %v3592_v20 = vpop.f32.mrb[17].mxu1  ;;  %14921 = vst [vmem:[#allocation13_spill] sm:$0xff] %v11465_v17  ;;  %v3516_v52 = vadd.f32 %v3515_v34, %v11427_v42  ;;  %14922 = vst [vmem:[#allocation14_spill] sm:$0xff] %v11473_v40  ;;  %v3591_v41 = vadd.f32 %v3590_v2, %v11427_v42  ;;  %v11664_v34 = vrot.slane %v11632_v7, %v9947_v19 }
 0x8ac   : > { %v11432_v26 = vmax.f32 %v3514_v29, 0.0  ;;  %14925 = vst [vmem:[#allocation17_spill] sm:$0xff] %v11537_v63  ;;  %v3593_v3 = vadd.f32 %v3592_v20, %v11427_v42 }
 0x8ad   : > { %v11475_v45 = vmax.f32 %v3516_v52, 0.0  ;;  %v11482_v30 = vmax.f32 %v3591_v41, 0.0 }
 0x8ae   : > { %14920 = vst [vmem:[#allocation12_spill] sm:$0xff] %v11432_v26  ;;  %3605 = vrot.lane.b32.xlu1 %v11432_v26, %s9841_s6  ;;  %3665 = vrot.lane.b32.xlu0 %v11425_v18, %s9835_s25  ;;  %v11544_v39 = vmax.f32 %v3593_v3, 0.0 }
 0x8af   : > { %14923 = vst [vmem:[#allocation15_spill] sm:$0xff] %v11475_v45  ;;  %14924 = vst [vmem:[#allocation16_spill] sm:$0xff] %v11482_v30 }
 0x8b0   : > { %14926 = vst [vmem:[#allocation18_spill] sm:$0xff] %v11544_v39 }
 0x8b2   : > { %3667 = vrot.lane.b32.xlu1 %v11432_v26, %s9835_s25  ;;  %3727 = vrot.lane.b32.xlu0 %v11425_v18, %s9836_s26 }
 0x8b6   : > { %3729 = vrot.lane.b32.xlu1 %v11432_v26, %s9836_s26  ;;  %3789 = vrot.lane.b32.xlu0 %v11425_v18, %s9837_s27 }
 0x8ba   : > { %3791 = vrot.lane.b32.xlu1 %v11432_v26, %s9837_s27  ;;  %3859 = vrot.lane.b32.xlu0 %v11425_v18, %s9838_s28 }
 0x8be   : > { %3861 = vrot.lane.b32.xlu1 %v11432_v26, %s9838_s28  ;;  %3921 = vrot.lane.b32.xlu0 %v11425_v18, %s9839_s29 }
 0x8c2   : > { %3923 = vrot.lane.b32.xlu1 %v11432_v26, %s9839_s29  ;;  %3983 = vrot.lane.b32.xlu0 %v11425_v18, %s9840_s30 }
 0x8c6   : > { %3985 = vrot.lane.b32.xlu1 %v11432_v26, %s9840_s30  ;;  %4045 = vrot.lane.b32.xlu0 %v11425_v18, %s9842_s7  ;;  %v11733_v18 = vld [vmem:[%s14794_s1 + $0x7] ss:$8 sm:$0xf] }
 0x8c7   : > { %14938 = vst [vmem:[#allocation30_spill] sm:$0xff] %v11733_v18 }
 0x8ca   : > { %4047 = vrot.lane.b32.xlu1 %v11432_v26, %s9842_s7  ;;  %3607 = vrot.lane.b32.xlu0 %v11465_v17, %s9841_s6  ;;  %v11755_v26 = vrot.slane %v8996_v36, %v9941_v16 }
 0x8ce   : > { %3609 = vrot.lane.b32.xlu1 %v11475_v45, %s9841_s6  ;;  %3611 = vrot.lane.b32.xlu0 %v11473_v40, %s9841_s6 }
 0x8d2   : > { %3613 = vrot.lane.b32.xlu1 %v11482_v30, %s9841_s6  ;;  %3669 = vrot.lane.b32.xlu0 %v11465_v17, %s9835_s25 }
 0x8d6   : > { %3671 = vrot.lane.b32.xlu1 %v11475_v45, %s9835_s25  ;;  %3673 = vrot.lane.b32.xlu0 %v11473_v40, %s9835_s25 }
 0x8da   : > { %3675 = vrot.lane.b32.xlu1 %v11482_v30, %s9835_s25  ;;  %3731 = vrot.lane.b32.xlu0 %v11465_v17, %s9836_s26 }
 0x8de   : > { %3733 = vrot.lane.b32.xlu1 %v11475_v45, %s9836_s26  ;;  %3735 = vrot.lane.b32.xlu0 %v11473_v40, %s9836_s26 }
 0x8e2   : > { %3737 = vrot.lane.b32.xlu1 %v11482_v30, %s9836_s26  ;;  %3793 = vrot.lane.b32.xlu0 %v11465_v17, %s9837_s27 }
 0x8e6   : > { %3795 = vrot.lane.b32.xlu1 %v11475_v45, %s9837_s27  ;;  %3797 = vrot.lane.b32.xlu0 %v11473_v40, %s9837_s27 }
 0x8ea   : > { %3799 = vrot.lane.b32.xlu1 %v11482_v30, %s9837_s27  ;;  %3863 = vrot.lane.b32.xlu0 %v11465_v17, %s9838_s28 }
 0x8ee   : > { %3865 = vrot.lane.b32.xlu1 %v11475_v45, %s9838_s28  ;;  %3867 = vrot.lane.b32.xlu0 %v11473_v40, %s9838_s28 }
 0x8f2   : > { %3869 = vrot.lane.b32.xlu1 %v11482_v30, %s9838_s28  ;;  %3925 = vrot.lane.b32.xlu0 %v11465_v17, %s9839_s29 }
 0x8f6   : > { %3927 = vrot.lane.b32.xlu1 %v11475_v45, %s9839_s29  ;;  %3929 = vrot.lane.b32.xlu0 %v11473_v40, %s9839_s29 }
 0x8fa   : > { %3931 = vrot.lane.b32.xlu1 %v11482_v30, %s9839_s29  ;;  %3987 = vrot.lane.b32.xlu0 %v11465_v17, %s9840_s30 }
 0x8fe   : > { %3989 = vrot.lane.b32.xlu1 %v11475_v45, %s9840_s30  ;;  %3991 = vrot.lane.b32.xlu0 %v11473_v40, %s9840_s30 }
 0x902   : > { %3993 = vrot.lane.b32.xlu1 %v11482_v30, %s9840_s30  ;;  %4049 = vrot.lane.b32.xlu0 %v11465_v17, %s9842_s7 }
 0x906   : > { %4051 = vrot.lane.b32.xlu1 %v11475_v45, %s9842_s7  ;;  %3615 = vrot.lane.b32.xlu0 %v11537_v63, %s9841_s6  ;;  %v3632_v45 = vrot.slane %v11614_v60, %v9953_v22 }
 0x90a   : > { %3617 = vrot.lane.b32.xlu1 %v11544_v39, %s9841_s6  ;;  %3677 = vrot.lane.b32.xlu0 %v11537_v63, %s9835_s25 }
 0x90e   : > { %3679 = vrot.lane.b32.xlu1 %v11544_v39, %s9835_s25  ;;  %3739 = vrot.lane.b32.xlu0 %v11537_v63, %s9836_s26 }
 0x912   : > { %3741 = vrot.lane.b32.xlu1 %v11544_v39, %s9836_s26  ;;  %3801 = vrot.lane.b32.xlu0 %v11537_v63, %s9837_s27 }
 0x916   : > { %3803 = vrot.lane.b32.xlu1 %v11544_v39, %s9837_s27  ;;  %4053 = vrot.lane.b32.xlu0 %v11473_v40, %s9842_s7  ;;  %v11761_v40 = vrot.slane %v8997_v37, %v9941_v16 }
 0x918   : > { %14940 = vst [vmem:[#allocation32_spill] sm:$0xff] %v11761_v40  ;;  %v3644_v40 = vrot.slane %v11614_v60, %v9956_v23  ;;  %v11799_v60 = vrot.slane %v11733_v18, %v9941_v16 }
 0x91a   : > { %4055 = vrot.lane.b32.xlu1 %v11482_v30, %s9842_s7  ;;  %3871 = vrot.lane.b32.xlu0 %v11537_v63, %s9838_s28  ;;  %14946 = vst [vmem:[#allocation38_spill] sm:$0xff] %v11799_v60  ;;  %v11819_v60 = vrot.slane %v8997_v37, %v9956_v23 }
 0x91c   : > { %v11566_v33 = vpop.permute.xlu0 %3603  ;;  %14951 = vst [vmem:[#allocation43_spill] sm:$0xff] %v11819_v60 }
 0x91e   : > { %3873 = vrot.lane.b32.xlu1 %v11544_v39, %s9838_s28  ;;  %3933 = vrot.lane.b32.xlu0 %v11537_v63, %s9839_s29 }
 0x920   : > { %v11572_v43 = vpop.permute.xlu1 %3605  ;;  %v11574_v53 = vpop.permute.xlu0 %3665 }
 0x922   : > { %3935 = vrot.lane.b32.xlu1 %v11544_v39, %s9839_s29  ;;  %3995 = vrot.lane.b32.xlu0 %v11537_v63, %s9840_s30 }
 0x924   : > { %v11580_v35 = vpop.permute.xlu1 %3667  ;;  %v11582_v55 = vpop.permute.xlu0 %3727 }
 0x926   : > { %3997 = vrot.lane.b32.xlu1 %v11544_v39, %s9840_s30  ;;  %4057 = vrot.lane.b32.xlu0 %v11537_v63, %s9842_s7 }
 0x928   : > { %v11593_v61 = vpop.permute.xlu1 %3729  ;;  %v11595_v58 = vpop.permute.xlu0 %3789 }
 0x92a   : > { %4059 = vrot.lane.b32.xlu1 %v11544_v39, %s9842_s7  ;;  %4183 = vperm.xlu0 %9772, %v4108_v38   ;;  %v11773_v39 = vrot.slane %v11733_v18, %v9953_v22 }
 0x92c   : > { %v11599_v13 = vpop.permute.xlu1 %3791  ;;  %v11601_v0 = vpop.permute.xlu0 %3859  ;;  %14944 = vst [vmem:[#allocation36_spill] sm:$0xff] %v11773_v39  ;;  %v11792_v39 = vrot.slane %v8995_v12, %v9953_v22 }
 0x930   : > { %v11603_v57 = vpop.permute.xlu1 %3861  ;;  %v11605_v56 = vpop.permute.xlu0 %3921 }
 0x931   : > { %14927 = vst [vmem:[#allocation19_spill] sm:$0xff] %v11605_v56  ;;  %v11802_v56 = vrot.slane %v8996_v36, %v9947_v19 }
 0x933   : > { %14947 = vst [vmem:[#allocation39_spill] sm:$0xff] %v11802_v56 }
 0x934   : > { %v11607_v25 = vpop.permute.xlu1 %3923  ;;  %v11609_v47 = vpop.permute.xlu0 %3983 }
 0x935   : > { %14928 = vst [vmem:[#allocation20_spill] sm:$0xff] %v11609_v47 }
 0x938   : > { %v11616_v62 = vpop.permute.xlu1 %3985  ;;  %v11618_v59 = vpop.permute.xlu0 %4045 }
 0x939   : > { %14929 = vst [vmem:[#allocation21_spill] sm:$0xff] %v11616_v62  ;;  %14930 = vst [vmem:[#allocation22_spill] sm:$0xff] %v11618_v59  ;;  %v8998_v59 = vld [vmem:[%s14794_s1 + $0x6] ss:$8 sm:$0xf]  ;;  %v11758_v62 = vrot.slane %v8997_v37, %v9953_v22 }
 0x93a   : > { %v11764_v30 = vrot.slane %v8998_v59, %v9953_v22  ;;  %v11839_v56 = vrot.slane %v8998_v59, %v9956_v23 }
 0x93b   : > { %14939 = vst [vmem:[#allocation31_spill] sm:$0xff] %v11758_v62 }
 0x93c   : > { %v11622_v24 = vpop.permute.xlu1 %4047  ;;  %v3608_v6 = vpop.permute.xlu0 %3607  ;;  %14941 = vst [vmem:[#allocation33_spill] sm:$0xff] %v11764_v30  ;;  %v3694_v30 = vrot.slane %v11632_v7, %v9953_v22  ;;  %14953 = vst [vmem:[#allocation45_spill] sm:$0xff] %v11839_v56 }
 0x93d   : > { %14931 = vst [vmem:[#allocation23_spill] sm:$0xff] %v11622_v24  ;;  %v3623_v1 = vsel %vm261_vm6, %v11566_v33, %v3608_v6 }
 0x93e   : > { %v3650_v4 = vmul.f32 %v3636_v31, %v3623_v1 }
 0x940   : > { %3658 = vst [vmem:[#allocation4 + $0x8] sm:$0xff] %v3650_v4  ;;  %v3610_v8 = vpop.permute.xlu1 %3609  ;;  %v11634_v14 = vpop.permute.xlu0 %3611 }
 0x941   : > { %v3624_v32 = vsel %vm261_vm6, %v11572_v43, %v3610_v8  ;;  %v3621_v21 = vsel %vm261_vm6, %v3608_v6, %v11634_v14 }
 0x942   : > { %v3654_v9 = vmul.f32 %v3636_v31, %v3624_v32  ;;  %v11642_v27 = vmul.f32 %v3640_v46, %v3621_v21 }
 0x944   : > { %3662 = vst [vmem:[#allocation4 + $0x28] sm:$0xff] %v3654_v9  ;;  %3659 = vst [vmem:[#allocation4 + $0x10] sm:$0xff] %v11642_v27  ;;  %v11649_v28 = vpop.permute.xlu1 %3613  ;;  %v3670_v50 = vpop.permute.xlu0 %3669  ;;  %v9445_v49 = vpack.c.bf16 %v3654_v9, %v3650_v4 }
 0x945   : > { %v3622_v51 = vsel %vm261_vm6, %v3610_v8, %v11649_v28  ;;  %v3685_v42 = vsel %vm304_vm1, %v11574_v53, %v3670_v50 }
 0x946   : > { %v11657_v11 = vmul.f32 %v3640_v46, %v3622_v51  ;;  %v11660_v29 = vmul.f32 %v11646_v48, %v3685_v42  ;;  %9446 = vmatprep.subr.bf16.mxu0 %v9445_v49 }
 0x948   : > { %3663 = vst [vmem:[#allocation4 + $0x30] sm:$0xff] %v11657_v11  ;;  %3720 = vst [vmem:[#allocation4 + $0x48] sm:$0xff] %v11660_v29  ;;  %v3672_v2 = vpop.permute.xlu1 %3671  ;;  %v11668_v20 = vpop.permute.xlu0 %3673 }
 0x949   : > { %v3683_v10 = vsel %vm304_vm1, %v3670_v50, %v11668_v20 }
 0x94a   : > { %v11674_v44 = vmul.f32 %v11664_v34, %v3683_v10  ;;  %v8994_v10 = vld [vmem:[%s14794_s1 + $0x2] ss:$8 sm:$0xf] }
 0x94b   : > { %v3760_v47 = vrot.slane %v8994_v10, %v9941_v16  ;;  %v11789_v62 = vrot.slane %v8994_v10, %v9956_v23 }
 0x94c   : > { %3721 = vst [vmem:[#allocation4 + $0x50] sm:$0xff] %v11674_v44  ;;  %v11677_v52 = vpop.permute.xlu1 %3675  ;;  %v11679_v41 = vpop.permute.xlu0 %3731 }
 0x950   : > { %v3734_v54 = vpop.permute.xlu1 %3733  ;;  %v11681_v3 = vpop.permute.xlu0 %3735 }
 0x954   : > { %v11683_v38 = vpop.permute.xlu1 %3737  ;;  %v11685_v31 = vpop.permute.xlu0 %3793 }
 0x958   : > { %v11687_v6 = vpop.permute.xlu1 %3795  ;;  %v11689_v1 = vpop.permute.xlu0 %3797 }
 0x95c   : > { %v11691_v4 = vpop.permute.xlu1 %3799  ;;  %v11693_v46 = vpop.permute.xlu0 %3863 }
 0x960   : > { %v11695_v8 = vpop.permute.xlu1 %3865  ;;  %v11697_v32 = vpop.permute.xlu0 %3867 }
 0x964   : > { %v11699_v21 = vpop.permute.xlu1 %3869  ;;  %v11701_v9 = vpop.permute.xlu0 %3925 }
 0x965   : > { %14932 = vst [vmem:[#allocation24_spill] sm:$0xff] %v11701_v9  ;;  %v11808_v9 = vrot.slane %v8997_v37, %v9947_v19 }
 0x967   : > { %14949 = vst [vmem:[#allocation41_spill] sm:$0xff] %v11808_v9  ;;  %v3748_v9 = vsel %vm360_vm0, %v11593_v61, %v3734_v54 }
 0x968   : > { %v11703_v50 = vpop.permute.xlu1 %3927  ;;  %v11705_v49 = vpop.permute.xlu0 %3929 }
 0x969   : > { %14933 = vst [vmem:[#allocation25_spill] sm:$0xff] %v11705_v49  ;;  %v11752_v49 = vrot.slane %v8996_v36, %v9953_v22 }
 0x96c   : > { %v11707_v51 = vpop.permute.xlu1 %3931  ;;  %v11709_v42 = vpop.permute.xlu0 %3987 }
 0x96d   : > { %14934 = vst [vmem:[#allocation26_spill] sm:$0xff] %v11707_v51  ;;  %14935 = vst [vmem:[#allocation27_spill] sm:$0xff] %v11709_v42  ;;  %v11749_v51 = vrot.slane %v8995_v12, %v9947_v19  ;;  %v11767_v42 = vrot.slane %v8998_v59, %v9941_v16 }
 0x96f   : > { %14942 = vst [vmem:[#allocation34_spill] sm:$0xff] %v11767_v42  ;;  %v3706_v42 = vrot.slane %v11632_v7, %v9956_v23  ;;  %v11805_v7 = vrot.slane %v8996_v36, %v9956_v23  ;;  %v11822_v36 = vrot.slane %v8998_v59, %v9947_v19 }
 0x970   : > { %v11723_v5 = vpop.permute.xlu1 %3989  ;;  %v11725_v24 = vpop.permute.xlu0 %3991 }
 0x971   : > { %14936 = vst [vmem:[#allocation28_spill] sm:$0xff] %v11723_v5  ;;  %14937 = vst [vmem:[#allocation29_spill] sm:$0xff] %v11725_v24  ;;  %v11741_v5 = vrot.slane %v8994_v10, %v9947_v19  ;;  %v11744_v24 = vrot.slane %v8995_v12, %v9941_v16 }
 0x972   : > { %14948 = vst [vmem:[#allocation40_spill] sm:$0xff] %v11805_v7  ;;  %14952 = vst [vmem:[#allocation44_spill] sm:$0xff] %v11822_v36  ;;  %v3746_v7 = vsel %vm360_vm0, %v3734_v54, %v11683_v38  ;;  %v9483_v36 = vpack.c.bf16 %v11657_v11, %v11642_v27  ;;  %v3809_v27 = vsel %vm416_vm2, %v11595_v58, %v11685_v31 }
 0x973   : > { %v11856_v59 = vmul.f32 %v11741_v5, %v3746_v7 }
 0x974   : > { %v11769_v63 = vpop.permute.xlu1 %3993  ;;  %v11775_v17 = vpop.permute.xlu0 %4049 }
 0x975   : > { %14943 = vst [vmem:[#allocation35_spill] sm:$0xff] %v11769_v63  ;;  %14945 = vst [vmem:[#allocation37_spill] sm:$0xff] %v11775_v17  ;;  %v11786_v63 = vrot.slane %v8994_v10, %v9953_v22  ;;  %v11795_v17 = vrot.slane %v8995_v12, %v9956_v23  ;;  %v3686_v10 = vsel %vm304_vm1, %v11580_v35, %v3672_v2 }
 0x976   : > { %v3684_v12 = vsel %vm304_vm1, %v3672_v2, %v11677_v52  ;;  %v3716_v18 = vmul.f32 %v11646_v48, %v3686_v10  ;;  %v3810_v48 = vsel %vm416_vm2, %v11599_v13, %v11687_v6 }
 0x977   : > { %v11843_v54 = vmul.f32 %v11664_v34, %v3684_v12  ;;  %v11879_v19 = vmul.f32 %v11744_v24, %v3810_v48 }
 0x978   : > { %v11816_v22 = vpop.permute.xlu1 %4051  ;;  %v3616_v16 = vpop.permute.xlu0 %3615 }
 0x979   : > { %14950 = vst [vmem:[#allocation42_spill] sm:$0xff] %v11816_v22  ;;  %v3619_v2 = vsel %vm261_vm6, %v11634_v14, %v3616_v16  ;;  %v3625_v37 = vsel %vm261_vm6, %v3616_v16, %v11566_v33  ;;  %v3747_v14 = vsel %vm360_vm0, %v11582_v55, %v11679_v41  ;;  %v3745_v16 = vsel %vm360_vm0, %v11679_v41, %v11681_v3 }
 0x97a   : > { %v3649_v60 = vmul.f32 %v3632_v45, %v3625_v37  ;;  %v3652_v22 = vmul.f32 %v3644_v40, %v3619_v2  ;;  %v11853_v33 = vmul.f32 %v3760_v47, %v3748_v9  ;;  %v3774_v23 = vmul.f32 %v3760_v47, %v3747_v14 }
 0x97c   : > { %3657 = vst [vmem:[#allocation4] sm:$0xff] %v3649_v60  ;;  %3660 = vst [vmem:[#allocation4 + $0x18] sm:$0xff] %v3652_v22  ;;  %v3618_v11 = vpop.permute.xlu1 %3617  ;;  %v3678_v34 = vpop.permute.xlu0 %3677 }
 0x97d   : > { %v3620_v41 = vsel %vm261_vm6, %v11649_v28, %v3618_v11  ;;  %v3626_v9 = vsel %vm261_vm6, %v3618_v11, %v11572_v43  ;;  %v3681_v7 = vsel %vm304_vm1, %v11668_v20, %v3678_v34  ;;  %v3687_v10 = vsel %vm304_vm1, %v3678_v34, %v11574_v53 }
 0x97e   : > { %v3653_v12 = vmul.f32 %v3632_v45, %v3626_v9  ;;  %v3656_v2 = vmul.f32 %v3644_v40, %v3620_v41  ;;  %v3711_v37 = vmul.f32 %v3694_v30, %v3687_v10  ;;  %v3714_v56 = vmul.f32 %v3706_v42, %v3681_v7 }
 0x97f   : > { %v9449_v28 = vpack.c.bf16 %v3716_v18, %v11660_v29  ;;  %v9487_v43 = vpack.c.bf16 %v11843_v54, %v11674_v44  ;;  %v11885_v11 = vmul.f32 %v11741_v5, %v3745_v16  ;;  %v3807_v45 = vsel %vm416_vm2, %v11685_v31, %v11689_v1 }
 0x980   : > { %3661 = vst [vmem:[#allocation4 + $0x20] sm:$0xff] %v3653_v12  ;;  %3664 = vst [vmem:[#allocation4 + $0x38] sm:$0xff] %v3656_v2  ;;  %v3680_v40 = vpop.permute.xlu1 %3679  ;;  %v3740_v53 = vpop.permute.xlu0 %3739  ;;  %v9447_v47 = vpack.c.bf16 %v3653_v12, %v3649_v60  ;;  %v9481_v20 = vpack.c.bf16 %v3656_v2, %v3652_v22  ;;  %v3836_v18 = vmul.f32 %v11744_v24, %v3809_v27 }
 0x981   : > { %3719 = vst [vmem:[#allocation4 + $0x40] sm:$0xff] %v3711_v37  ;;  %3722 = vst [vmem:[#allocation4 + $0x58] sm:$0xff] %v3714_v56  ;;  %v3682_v5 = vsel %vm304_vm1, %v11677_v52, %v3680_v40  ;;  %v3688_v29 = vsel %vm304_vm1, %v3680_v40, %v11580_v35  ;;  %v9453_v44 = vpack.c.bf16 %v11853_v33, %v3774_v23 }
 0x982   : > { %v3715_v31 = vmul.f32 %v3694_v30, %v3688_v29  ;;  %v3718_v54 = vmul.f32 %v3706_v42, %v3682_v5  ;;  %v3749_v14 = vsel %vm360_vm0, %v3740_v53, %v11582_v55  ;;  %9448 = vmatpush1.bf16.msra.mxu0 %v9447_v47  ;;  %v9491_v22 = vpack.c.bf16 %v11856_v59, %v11885_v11  ;;  %v14956_v11 = vld [vmem:[#allocation25_spill] sm:$0xff]  ;;  %v14959_v29 = vld [vmem:[#allocation7_spill] sm:$0xff] }
 0x983   : > { %v11905_v24 = vmul.f32 %v11749_v51, %v3807_v45  ;;  %v3743_v52 = vsel %vm360_vm0, %v11681_v3, %v3740_v53  ;;  %9482 = vmatprep.subr.bf16.mxu1 %v9481_v20  ;;  %9450 = vmatprep.subr.bf16.mxu0 %v9449_v28  ;;  %v9457_v23 = vpack.c.bf16 %v11879_v19, %v3836_v18  ;;  %v14954_v28 = vld [vmem:[#allocation24_spill] sm:$0xff]  ;;  %v14958_v45 = vld [vmem:[#allocation26_spill] sm:$0xff] }
 0x984   : > { %v3808_v30 = vsel %vm416_vm2, %v11687_v6, %v11691_v4  ;;  %v3879_v35 = vsel %vm476_vm3, %v11601_v0, %v11693_v46  ;;  %v3742_v55 = vpop.permute.xlu1 %3741  ;;  %v3802_v42 = vpop.permute.xlu0 %3801  ;;  %9484 = vmatpush1.bf16.msra.mxu1 %v9483_v36  ;;  %v9451_v60 = vpack.c.bf16 %v3715_v31, %v3711_v37  ;;  %v9485_v16 = vpack.c.bf16 %v3718_v54, %v3714_v56  ;;  %v14961_v54 = vld [vmem:[#allocation9_spill] sm:$0xff] }
 0x985   : > { %v3880_v19 = vsel %vm476_vm3, %v11603_v57, %v11695_v8  ;;  %v3773_v3 = vmul.f32 %v11786_v63, %v3749_v14  ;;  %v3744_v6 = vsel %vm360_vm0, %v11683_v38, %v3742_v55  ;;  %v3750_v33 = vsel %vm360_vm0, %v3742_v55, %v11593_v61  ;;  %v14964_v55 = vld [vmem:[#allocation13_spill] sm:$0xff] }
 0x986   : > { %v3776_v59 = vmul.f32 %v11789_v62, %v3743_v52  ;;  %v3777_v36 = vmul.f32 %v11786_v63, %v3750_v33  ;;  %v3780_v56 = vmul.f32 %v11789_v62, %v3744_v6  ;;  %v3811_v27 = vsel %vm416_vm2, %v3802_v42, %v11595_v58  ;;  %9452 = vmatpush1.bf16.msra.mxu0 %v9451_v60  ;;  %v14969_v6 = vld [vmem:[#allocation21_spill] sm:$0xff] }
 0x987   : > { %v3841_v48 = vmul.f32 %v11749_v51, %v3808_v30  ;;  %v3877_v38 = vsel %vm476_vm3, %v11693_v46, %v11697_v32  ;;  %v3805_v61 = vsel %vm416_vm2, %v11689_v1, %v3802_v42  ;;  %9486 = vmatprep.subr.bf16.mxu1 %v9485_v16  ;;  %9454 = vmatprep.subr.bf16.mxu0 %v9453_v44  ;;  %v14960_v44 = vld [vmem:[#allocation30_spill] sm:$0xff]  ;;  %v14966_v16 = vld [vmem:[#allocation27_spill] sm:$0xff] }
 0x988   : > { %v11945_v63 = vmul.f32 %v11752_v49, %v3880_v19  ;;  %v3878_v58 = vsel %vm476_vm3, %v11695_v8, %v11699_v21  ;;  %v3804_v62 = vpop.permute.xlu1 %3803  ;;  %v11951_v51 = vpop.permute.xlu0 %4053  ;;  %9488 = vmatpush1.bf16.msra.mxu1 %v9487_v43  ;;  %v9455_v34 = vpack.c.bf16 %v3777_v36, %v3773_v3  ;;  %v9489_v46 = vpack.c.bf16 %v3780_v56, %v3776_v59  ;;  %v14955_v43 = vld [vmem:[#allocation19_spill] sm:$0xff]  ;;  %v14968_v3 = vld [vmem:[#allocation28_spill] sm:$0xff] }
 0x989   : > { %v3942_v1 = vsel %vm532_vm4, %v11607_v25, %v11703_v50  ;;  %v3835_v41 = vmul.f32 %v11792_v39, %v3811_v27  ;;  %v3806_v9 = vsel %vm416_vm2, %v11691_v4, %v3804_v62  ;;  %v3812_v8 = vsel %vm416_vm2, %v3804_v62, %v11599_v13  ;;  %v14970_v59 = vld [vmem:[#allocation35_spill] sm:$0xff] }
 0x98a   : > { %v3838_v7 = vmul.f32 %v11795_v17, %v3805_v61  ;;  %v3839_v10 = vmul.f32 %v11792_v39, %v3812_v8  ;;  %v3842_v12 = vmul.f32 %v11795_v17, %v3806_v9  ;;  %9456 = vmatpush1.bf16.msra.mxu0 %v9455_v34  ;;  %9490 = vmatprep.subr.bf16.mxu1 %v9489_v46  ;;  %v14957_v39 = vld [vmem:[#allocation31_spill] sm:$0xff]  ;;  %v14973_v34 = vld [vmem:[#allocation18_spill] sm:$0xff]  ;;  %v14974_v46 = vld [vmem:[#allocation17_spill] sm:$0xff] }
 0x98b   : > { %v11968_v2 = vmul.f32 %v11752_v49, %v3879_v35  ;;  %v3910_v37 = vmul.f32 %v11755_v26, %v3878_v58  ;;  %v3941_v4 = vsel %vm532_vm4, %v14955_v43, %v14954_v28  ;;  %v3939_v13 = vsel %vm532_vm4, %v14954_v28, %v14956_v11  ;;  %9458 = vmatprep.subr.bf16.mxu0 %v9457_v23  ;;  %v14963_v35 = vld [vmem:[#allocation15_spill] sm:$0xff]  ;;  %v14981_v28 = vld [vmem:[#allocation34_spill] sm:$0xff] }
 0x98c   : > { %v11980_v17 = vmul.f32 %v14957_v39, %v3942_v1  ;;  %v3940_v49 = vsel %vm532_vm4, %v11703_v50, %v14958_v45  ;;  %v11986_v40 = vpop.permute.xlu1 %4055  ;;  %v3872_v53 = vpop.permute.xlu0 %3871  ;;  %9492 = vmatpush1.bf16.msra.mxu1 %v9491_v22  ;;  %v9459_v47 = vpack.c.bf16 %v3839_v10, %v3835_v41  ;;  %v9493_v20 = vpack.c.bf16 %v3842_v12, %v3838_v7  ;;  %v14972_v61 = vld [vmem:[#allocation39_spill] sm:$0xff]  ;;  %v14976_v41 = vld [vmem:[#allocation40_spill] sm:$0xff] }
 0x98d   : > { %v3906_v18 = vmul.f32 %v11755_v26, %v3877_v38  ;;  %v9495_v5 = vpack.c.bf16 %v3841_v48, %v11905_v24  ;;  %v11992_v31 = vrot.slane %v14960_v44, %v14959_v29  ;;  %v11996_v14 = vrot.slane %v14960_v44, %v14961_v54  ;;  %v14962_v24 = vld [vmem:[#allocation32_spill] sm:$0xff]  ;;  %v14971_v48 = vld [vmem:[#allocation29_spill] sm:$0xff] }
 0x98e   : > { %v11999_v50 = vmul.f32 %v14957_v39, %v3941_v4  ;;  %v3875_v22 = vsel %vm476_vm3, %v11697_v32, %v3872_v53  ;;  %9460 = vmatpush1.bf16.msra.mxu0 %v9459_v47  ;;  %9494 = vmatprep.subr.bf16.mxu1 %v9493_v20  ;;  %v9467_v26 = vpack.c.bf16 %v11945_v63, %v11968_v2  ;;  %v14967_v32 = vld [vmem:[#allocation20_spill] sm:$0xff]  ;;  %v14983_v20 = vld [vmem:[#allocation14_spill] sm:$0xff] }
 0x98f   : > { %v3968_v52 = vmul.f32 %v14962_v24, %v3939_v13  ;;  %v3972_v23 = vmul.f32 %v14962_v24, %v3940_v49  ;;  %v3881_v30 = vsel %vm476_vm3, %v3872_v53, %v11601_v0  ;;  %v14965_v42 = vpack.c.bf16 %v14963_v35, %v14964_v55  ;;  %v14977_v12 = vld [vmem:[#allocation12_spill] sm:$0xff] }
 0x990   : > { %v9465_v60 = vpack.c.bf16 %v3910_v37, %v3906_v18  ;;  %v4003_v19 = vsel %vm588_vm5, %v14967_v32, %v14966_v16  ;;  %v4004_v33 = vsel %vm588_vm5, %v14969_v6, %v14968_v3  ;;  %v4002_v0 = vsel %vm588_vm5, %v14968_v3, %v14970_v59  ;;  %v3874_v36 = vpop.permute.xlu1 %3873  ;;  %v3934_v56 = vpop.permute.xlu0 %3933  ;;  %9496 = vmatpush1.bf16.msra.mxu1 %v9495_v5  ;;  %v14980_v37 = vld [vmem:[#allocation33_spill] sm:$0xff]  ;;  %v14982_v47 = vld [vmem:[#allocation16_spill] sm:$0xff] }
 0x991   : > { %9462 = vmatprep.subr.bf16.mxu0 %v14965_v42  ;;  %v9471_v27 = vpack.c.bf16 %v11980_v17, %v11999_v50  ;;  %v4001_v38 = vsel %vm588_vm5, %v14966_v16, %v14971_v48  ;;  %v3907_v63 = vmul.f32 %v14972_v61, %v3875_v22  ;;  %v3876_v58 = vsel %vm476_vm3, %v11699_v21, %v3874_v36  ;;  %v14978_v21 = vld [vmem:[#allocation11_spill] sm:$0xff]  ;;  %v14985_v50 = vld [vmem:[#allocation42_spill] sm:$0xff]  ;;  %v14988_v16 = vld [vmem:[#allocation37_spill] sm:$0xff] }
 0x992   : > { %v3882_v62 = vsel %vm476_vm3, %v3874_v36, %v11603_v57  ;;  %v14975_v1 = vpack.c.bf16 %v14973_v34, %v14974_v46  ;;  %v3908_v9 = vmul.f32 %v14976_v41, %v3881_v30  ;;  %v3911_v8 = vmul.f32 %v14972_v61, %v3876_v58  ;;  %v14987_v30 = vld [vmem:[#allocation43_spill] sm:$0xff]  ;;  %v14991_v61 = vld [vmem:[#allocation38_spill] sm:$0xff]  ;;  %v14993_v46 = vld [vmem:[#allocation45_spill] sm:$0xff] }
 0x993   : > { %v3912_v7 = vmul.f32 %v14976_v41, %v3882_v62  ;;  %v3937_v10 = vsel %vm532_vm4, %v14956_v11, %v3934_v56  ;;  %v14979_v2 = vpack.c.bf16 %v14977_v12, %v14978_v21  ;;  %v4029_v57 = vmul.f32 %v14980_v37, %v4003_v19  ;;  %v14989_v19 = vld [vmem:[#allocation22_spill] sm:$0xff] }
 0x994   : > { %9498 = vmatprep.subr.bf16.mxu1 %v14975_v1  ;;  %v4034_v4 = vmul.f32 %v14981_v28, %v4002_v0  ;;  %v3943_v13 = vsel %vm532_vm4, %v3934_v56, %v14955_v43  ;;  %v9469_v39 = vpack.c.bf16 %v3972_v23, %v3968_v52  ;;  %v4033_v17 = vmul.f32 %v14980_v37, %v4004_v33  ;;  %v3936_v53 = vpop.permute.xlu1 %3935  ;;  %v3996_v11 = vpop.permute.xlu0 %3995  ;;  %v14986_v43 = vld [vmem:[#allocation41_spill] sm:$0xff]  ;;  %v14990_v33 = vld [vmem:[#allocation23_spill] sm:$0xff] }
 0x995   : > { %9464 = vmatpush1.bf16.msra.mxu0 %v14979_v2  ;;  %v4030_v49 = vmul.f32 %v14981_v28, %v4001_v38  ;;  %v14984_v18 = vpack.c.bf16 %v14982_v47, %v14983_v20  ;;  %v9501_v5 = vpack.c.bf16 %v3912_v7, %v3908_v9  ;;  %v9503_v44 = vpack.c.bf16 %v3911_v8, %v3907_v63  ;;  %v14992_v63 = vld [vmem:[#allocation44_spill] sm:$0xff] }
 0x996   : > { %9466 = vmatprep.subr.bf16.mxu0 %v9465_v60  ;;  %v4064_v22 = vsel %vm644_vm7, %v14985_v50, %v11986_v40  ;;  %v3969_v24 = vmul.f32 %v14986_v43, %v3937_v10  ;;  %v3938_v52 = vsel %vm532_vm4, %v14958_v45, %v3936_v53  ;;  %v3944_v23 = vsel %vm532_vm4, %v3936_v53, %v11607_v25  ;;  %v14994_v10 = vld [vmem:[#allocation36_spill] sm:$0xff] }
 0x997   : > { %9500 = vmatpush1.bf16.msra.mxu1 %v14984_v18  ;;  %v3970_v35 = vmul.f32 %v14987_v30, %v3943_v13  ;;  %v3973_v55 = vmul.f32 %v14986_v43, %v3938_v52  ;;  %v3974_v42 = vmul.f32 %v14987_v30, %v3944_v23  ;;  %v3999_v60 = vsel %vm588_vm5, %v14971_v48, %v3996_v11 }
 0x998   : > { %v4065_v45 = vsel %vm644_vm7, %v14989_v19, %v14988_v16  ;;  %v4005_v25 = vsel %vm588_vm5, %v3996_v11, %v14967_v32  ;;  %9502 = vmatprep.subr.bf16.mxu1 %v9501_v5  ;;  %v9473_v3 = vpack.c.bf16 %v4034_v4, %v4030_v49  ;;  %v4066_v0 = vsel %vm644_vm7, %v14990_v33, %v14985_v50  ;;  %v3998_v36 = vpop.permute.xlu1 %3997  ;;  %v4058_v56 = vpop.permute.xlu0 %4057 }
 0x999   : > { %9468 = vmatpush1.bf16.msra.mxu0 %v9467_v26  ;;  %v4063_v26 = vsel %vm644_vm7, %v14988_v16, %v11951_v51  ;;  %v9505_v48 = vpack.c.bf16 %v3974_v42, %v3970_v35  ;;  %v9507_v38 = vpack.c.bf16 %v3973_v55, %v3969_v24  ;;  %v4096_v32 = vmul.f32 %v14991_v61, %v4064_v22  ;;  %v14996_v55 = vld [vmem:[#allocation5_spill] sm:$0xff] }
 0x99a   : > { %9470 = vmatprep.subr.bf16.mxu0 %v9469_v39  ;;  %v4031_v58 = vmul.f32 %v14992_v63, %v3999_v60  ;;  %v4000_v62 = vsel %vm588_vm5, %v14970_v59, %v3998_v36  ;;  %v4006_v34 = vsel %vm588_vm5, %v3998_v36, %v14969_v6  ;;  %v4032_v1 = vmul.f32 %v14993_v46, %v4005_v25 }
 0x99b   : > { %9504 = vmatpush1.bf16.msra.mxu1 %v9503_v44  ;;  %v4035_v41 = vmul.f32 %v14992_v63, %v4000_v62  ;;  %v4036_v9 = vmul.f32 %v14993_v46, %v4006_v34  ;;  %v4061_v8 = vsel %vm644_vm7, %v11951_v51, %v4058_v56  ;;  %v4092_v7 = vmul.f32 %v14991_v61, %v4063_v26  ;;  %v14999_v61 = vld [vmem:[#allocation6_spill] sm:$0xff] }
 0x99c   : > { %v4067_v59 = vsel %vm644_vm7, %v4058_v56, %v14989_v19  ;;  %9506 = vmatprep.subr.bf16.mxu1 %v9505_v48  ;;  %v9475_v6 = vpack.c.bf16 %v4033_v17, %v4029_v57  ;;  %v4091_v12 = vmul.f32 %v14994_v10, %v4065_v45  ;;  %v4095_v21 = vmul.f32 %v14994_v10, %v4066_v0  ;;  %v4060_v2 = vpop.permute.xlu1 %4059  ;;  %v14997_v45 = vld [vmem:[#allocation10_spill] sm:$0xff]  ;;  %v4793_v56 = vld [vmem:[%s14795_s2 + $0x68] sm:$0xff] }
 0x99d   : > { %9472 = vmatpush1.bf16.msra.mxu0 %v9471_v27  ;;  %v9509_v37 = vpack.c.bf16 %v4036_v9, %v4032_v1  ;;  %v9511_v28 = vpack.c.bf16 %v4035_v41, %v4031_v58  ;;  %v4093_v51 = vmul.f32 %v11992_v31, %v4061_v8  ;;  %v4062_v27 = vsel %vm644_vm7, %v11986_v40, %v4060_v2  ;;  %v4107_v40 = vld [vmem:[%s14795_s2 + $0x50] sm:$0x3]  ;;  %v12186_v63 = vld [vmem:[%s14794_s1 + $0x2] ss:$8 sm:$0xf] }
 0x99e   : > { %9474 = vmatprep.subr.bf16.mxu0 %v9473_v3  ;;  %v4068_v4 = vsel %vm644_vm7, %v4060_v2, %v14990_v33  ;;  %v9477_v13 = vpack.c.bf16 %v4096_v32, %v4092_v7  ;;  %v4094_v57 = vmul.f32 %v11996_v14, %v4067_v59  ;;  %v4097_v39 = vmul.f32 %v11992_v31, %v4062_v27  ;;  %v12177_v48 = vld [vmem:[%s14794_s1 + $0x1] ss:$8 sm:$0xf]  ;;  %v12198_v41 = vld [vmem:[%s14794_s1 + $0x3] ss:$8 sm:$0xf] }
 0x99f   : > { %9508 = vmatpush1.bf16.msra.mxu1 %v9507_v38  ;;  %v4098_v17 = vmul.f32 %v11996_v14, %v4068_v4  ;;  %v9479_v49 = vpack.c.bf16 %v4095_v21, %v4091_v12  ;;  %v14995_v47 = vmov 0.0   ;;  %v4443_v32 = vrot.slane %v12177_v48, %v14999_v61  ;;  %v12210_v12 = vld [vmem:[%s14794_s1 + $0x4] ss:$8 sm:$0xf] }
 0x9a0   : > { %9510 = vmatprep.subr.bf16.mxu1 %v9509_v37  ;;  %v9515_v11 = vpack.c.bf16 %v4097_v39, %v4093_v51  ;;  %v4497_v1 = vrot.slane %v12186_v63, %v14999_v61  ;;  %v4551_v10 = vrot.slane %v12198_v41, %v14999_v61  ;;  %v15000_v27 = vld [vmem:[#allocation8_spill] sm:$0xff] }
 0x9a1   : > { %9476 = vmatpush1.bf16.msra.mxu0 %v9475_v6  ;;  %v9513_v53 = vpack.c.bf16 %v4098_v17, %v4094_v57  ;;  %v4605_v4 = vrot.slane %v12210_v12, %v15000_v27 }
 0x9a2   : > { %9478 = vmatprep.subr.bf16.mxu0 %v9477_v13  ;;  %v12225_v13 = vld [vmem:[%s14794_s1 + $0x5] ss:$8 sm:$0xf] }
 0x9a3   : > { %9512 = vmatpush1.bf16.msra.mxu1 %v9511_v28 }
 0x9a4   : > { %9514 = vmatprep.subr.bf16.mxu1 %v9513_v53 }
 0x9a5   : > { %9480 = vmatpush1.bf16.msra.mxu0 %v9479_v49 }
 0x9a7   : > { %9516 = vmatpush1.bf16.msra.mxu1 %v9515_v11  ;;  %v4659_v11 = vrot.slane %v12225_v13, %v15000_v27 }
 0x9a8   : > { %4254 = vmatmul.mubr.f32.vlgmr.msra.gmra.mrb[18].mxu0 %v4107_v40 }
 0x9a9   : > { %4890 = vmatprep.mubr.f32.mxu0 %v14995_v47  ;;  %v4184_v31 = vpop.permute.xlu0 %4183 }
 0x9aa   : > { %4325 = vmatmul.mubr.f32.vlgmr.msra.gmra.mrb[18].mxu1 %v4107_v40  ;;  %v12240_v40 = vld [vmem:[%s14794_s1 + $0x6] ss:$8 sm:$0xf] }
 0x9ab   : > { %4961 = vmatprep.mubr.f32.mxu1 %v14995_v47 }
 0xa7b   : > { %v4255_v14 = vpop.f32.mrb[18].mxu0 }
 0xa7c   : > { %v4256_v20 = vadd.f32 %v4255_v14, %v4184_v31  ;;  %v4257_v18 = vpop.f32.mrb[19].mxu0 }
 0xa7d   : > { %v4258_v5 = vadd.f32 %v4257_v18, %v4184_v31  ;;  %v4326_v44 = vpop.f32.mrb[18].mxu1 }
 0xa7e   : > { %v4331_v50 = vmax.f32 %v4256_v20, 0.0  ;;  %v4327_v22 = vadd.f32 %v4326_v44, %v4184_v31  ;;  %v4328_v43 = vpop.f32.mrb[19].mxu1  ;;  %v4713_v44 = vrot.slane %v12240_v40, %v15000_v27 }
 0xa7f   : > { %v4332_v24 = vmax.f32 %v4258_v5, 0.0  ;;  %v4329_v52 = vadd.f32 %v4328_v43, %v4184_v31 }
 0xa80   : > { %v4333_v23 = vmax.f32 %v4327_v22, 0.0 }
 0xa81   : > { %v4339_v30 = vcombine.low %v4331_v50, %v4332_v24  ;;  %v4334_v35 = vmax.f32 %v4329_v52, 0.0  ;;  %v12255_v50 = vld [vmem:[%s14794_s1] ss:$8 sm:$0xf] }
 0xa83   : > { %v4347_v42 = vrot.slane %v4339_v30, %v14996_v55  ;;  %v4340_v60 = vcombine.low %v4333_v23, %v4334_v35  ;;  %v4401_v30 = vrot.slane %v12255_v50, %v14999_v61 }
 0xa85   : > { %v4354_v16 = vrot.slane %v4340_v60, %v14996_v55  ;;  %v4447_v60 = vrot.slane %v12177_v48, %v14959_v29 }
 0xa87   : > { %v4355_v19 = vcombine.low %v4347_v42, %v4354_v16 }
 0xa89   : > { %v12131_v25 = vadd.f32 %v4355_v19, %v14997_v45 }
 0xa8b   : > { %14998 = vst [vmem:[#allocation24_spill] sm:$0xff] %v12131_v25  ;;  %v4359_v3 = vcombine.high %v12131_v25, %v12131_v25  ;;  %v4366_v33 = vrot.slane %v12131_v25, %v14996_v55  ;;  %9005 = vst.sshfl [vmem:[#allocation4 + $0x20] sm:$0x3 pattern:$0x76325410] %v12131_v25 }
 0xa8c   : > { %v9031_v25 = vld [vmem:[%s14794_s1 + $0x4] ss:$8 sm:$0xf] }
 0xa8d   : > { %v4373_v0 = vrot.slane %v4359_v3, %v14996_v55  ;;  %9006 = vst.sshfl [vmem:[#allocation4 + $0x30] sm:$0x3 pattern:$0x76325410] %v4359_v3  ;;  %4422 = vrot.lane.b32.xlu1 %v4366_v33, %s9835_s25  ;;  %v4374_v26 = vcombine.high %v4366_v33, %v4366_v33  ;;  %v4439_v3 = vrot.slane %v12177_v48, %v15000_v27 }
 0xa8e   : > { %v9032_v55 = vld [vmem:[%s14794_s1 + $0x5] ss:$8 sm:$0xf] }
 0xa8f   : > { %4424 = vrot.lane.b32.xlu0 %v4374_v26, %s9835_s25  ;;  %4585 = vst [vmem:[#allocation4 + $0x28] sm:$0x3] %v4374_v26  ;;  %v4375_v36 = vcombine.high %v4373_v0, %v4373_v0 }
 0xa91   : > { %4476 = vrot.lane.b32.xlu1 %v4366_v33, %s9836_s26  ;;  %4587 = vst [vmem:[#allocation4 + $0x38] sm:$0x3] %v4375_v36 }
 0xa93   : > { %4478 = vrot.lane.b32.xlu0 %v4374_v26, %s9836_s26 }
 0xa95   : > { %4530 = vrot.lane.b32.xlu1 %v4366_v33, %s9837_s27 }
 0xa97   : > { %4532 = vrot.lane.b32.xlu0 %v4374_v26, %s9837_s27 }
 0xa99   : > { %4588 = vrot.lane.b32.xlu1 %v4366_v33, %s9838_s28 }
 0xa9b   : > { %4590 = vrot.lane.b32.xlu0 %v4374_v26, %s9838_s28 }
 0xa9d   : > { %4642 = vrot.lane.b32.xlu1 %v4366_v33, %s9839_s29 }
 0xa9f   : > { %4644 = vrot.lane.b32.xlu0 %v4374_v26, %s9839_s29 }
 0xaa1   : > { %4696 = vrot.lane.b32.xlu1 %v4366_v33, %s9840_s30 }
 0xaa3   : > { %4698 = vrot.lane.b32.xlu0 %v4374_v26, %s9840_s30 }
 0xaa5   : > { %4380 = vrot.lane.b32.xlu1 %v4366_v33, %s9841_s6 }
 0xaa7   : > { %4382 = vrot.lane.b32.xlu0 %v4374_v26, %s9841_s6 }
 0xaa9   : > { %4426 = vrot.lane.b32.xlu1 %v4373_v0, %s9835_s25 }
 0xaab   : > { %4428 = vrot.lane.b32.xlu0 %v4375_v36, %s9835_s25 }
 0xaad   : > { %4480 = vrot.lane.b32.xlu1 %v4373_v0, %s9836_s26 }
 0xaaf   : > { %4482 = vrot.lane.b32.xlu0 %v4375_v36, %s9836_s26 }
 0xab1   : > { %4534 = vrot.lane.b32.xlu1 %v4373_v0, %s9837_s27 }
 0xab3   : > { %4536 = vrot.lane.b32.xlu0 %v4375_v36, %s9837_s27 }
 0xab5   : > { %4592 = vrot.lane.b32.xlu1 %v4373_v0, %s9838_s28 }
 0xab7   : > { %4594 = vrot.lane.b32.xlu0 %v4375_v36, %s9838_s28 }
 0xab9   : > { %4646 = vrot.lane.b32.xlu1 %v4373_v0, %s9839_s29 }
 0xabb   : > { %4648 = vrot.lane.b32.xlu0 %v4375_v36, %s9839_s29 }
 0xabd   : > { %4700 = vrot.lane.b32.xlu1 %v4373_v0, %s9840_s30 }
 0xabf   : > { %4702 = vrot.lane.b32.xlu0 %v4375_v36, %s9840_s30 }
 0xac1   : > { %4384 = vrot.lane.b32.xlu1 %v4373_v0, %s9841_s6 }
 0xac3   : > { %4386 = vrot.lane.b32.xlu0 %v4375_v36, %s9841_s6 }
 0xac5   : > { %4750 = vrot.lane.b32.xlu1 %v4366_v33, %s9842_s7  ;;  %v4451_v33 = vrot.slane %v12177_v48, %v14961_v54 }
 0xac7   : > { %4752 = vrot.lane.b32.xlu0 %v4374_v26, %s9842_s7 }
 0xac9   : > { %4754 = vrot.lane.b32.xlu1 %v4373_v0, %s9842_s7 }
 0xacb   : > { %4756 = vrot.lane.b32.xlu0 %v4375_v36, %s9842_s7 }
 0xacd   : > { %4808 = vperm.xlu1 %9773, %v4793_v56   ;;  %v4501_v56 = vrot.slane %v12186_v63, %v14959_v29 }
 0xaff   : > { %v12179_v38 = vpop.permute.xlu1 %4422 }
 0xb01   : > { %v4425_v58 = vpop.permute.xlu0 %4424 }
 0xb02   : > { %v4432_v62 = vsel %vm304_vm1, %v12179_v38, %v4425_v58 }
 0xb03   : > { %v4457_v34 = vmul.f32 %v4443_v32, %v4432_v62  ;;  %v12191_v46 = vpop.permute.xlu1 %4476 }
 0xb05   : > { %v4465_v9 = vrot.slane %v4457_v34, 6  ;;  %v4479_v8 = vpop.permute.xlu0 %4478  ;;  %v4493_v34 = vrot.slane %v12186_v63, %v15000_v27 }
 0xb06   : > { %v4486_v7 = vsel %vm360_vm0, %v12191_v46, %v4479_v8 }
 0xb07   : > { %4473 = vst [vmem:[#allocation4 + $0x8] sm:$0xc] %v4465_v9  ;;  %v4511_v59 = vmul.f32 %v4497_v1, %v4486_v7  ;;  %v12203_v6 = vpop.permute.xlu1 %4530  ;;  %v4505_v7 = vrot.slane %v12186_v63, %v14961_v54  ;;  %v4547_v63 = vrot.slane %v12198_v41, %v15000_v27 }
 0xb09   : > { %v4519_v21 = vrot.slane %v4511_v59, 4  ;;  %v12212_v2 = vpop.permute.xlu0 %4532 }
 0xb0a   : > { %v4540_v37 = vsel %vm416_vm2, %v12203_v6, %v12212_v2 }
 0xb0b   : > { %4527 = vst [vmem:[#allocation4 + $0x8] sm:$0x30] %v4519_v21  ;;  %v4565_v28 = vmul.f32 %v4551_v10, %v4540_v37  ;;  %v12218_v51 = vpop.permute.xlu1 %4588 }
 0xb0d   : > { %v4573_v57 = vrot.slane %v4565_v28, 2  ;;  %v12227_v39 = vpop.permute.xlu0 %4590 }
 0xb0e   : > { %v4598_v17 = vsel %vm476_vm3, %v12218_v51, %v12227_v39 }
 0xb0f   : > { %4581 = vst [vmem:[#allocation4 + $0x8] sm:$0xc0] %v4573_v57  ;;  %v4622_v49 = vmul.f32 %v4605_v4, %v4598_v17  ;;  %v12233_v53 = vpop.permute.xlu1 %4642 }
 0xb11   : > { %v4630_v31 = vrot.slane %v4622_v49, 6  ;;  %v12242_v14 = vpop.permute.xlu0 %4644 }
 0xb12   : > { %v4652_v20 = vsel %vm532_vm4, %v12233_v53, %v12242_v14 }
 0xb13   : > { %4638 = vst [vmem:[#allocation4 + $0x20] sm:$0xc] %v4630_v31  ;;  %v4676_v18 = vmul.f32 %v4659_v11, %v4652_v20  ;;  %v12248_v5 = vpop.permute.xlu1 %4696  ;;  %v4559_v31 = vrot.slane %v12198_v41, %v14961_v54 }
 0xb15   : > { %v4684_v22 = vrot.slane %v4676_v18, 4  ;;  %v12257_v43 = vpop.permute.xlu0 %4698 }
 0xb16   : > { %v4706_v24 = vsel %vm588_vm5, %v12248_v5, %v12257_v43 }
 0xb17   : > { %4692 = vst [vmem:[#allocation4 + $0x20] sm:$0x30] %v4684_v22  ;;  %v4730_v52 = vmul.f32 %v4713_v44, %v4706_v24  ;;  %v12263_v23 = vpop.permute.xlu1 %4380  ;;  %v4609_v24 = vrot.slane %v12210_v12, %v14999_v61 }
 0xb19   : > { %v4738_v35 = vrot.slane %v4730_v52, 2  ;;  %v12267_v42 = vpop.permute.xlu0 %4382 }
 0xb1a   : > { %v4390_v16 = vsel %vm261_vm6, %v12263_v23, %v12267_v42 }
 0xb1b   : > { %4746 = vst [vmem:[#allocation4 + $0x20] sm:$0xc0] %v4738_v35  ;;  %v4415_v19 = vmul.f32 %v4401_v30, %v4390_v16  ;;  %v4427_v45 = vpop.permute.xlu1 %4426 }
 0xb1c   : > { %v4431_v0 = vsel %vm304_vm1, %v4425_v58, %v4427_v45 }
 0xb1d   : > { %4419 = vst [vmem:[#allocation4 + $0x8] sm:$0x3] %v4415_v19  ;;  %v4458_v26 = vmul.f32 %v4447_v60, %v4431_v0  ;;  %v4429_v36 = vpop.permute.xlu0 %4428  ;;  %v4617_v19 = vrot.slane %v12210_v12, %v14961_v54 }
 0xb1e   : > { %v4430_v32 = vsel %vm304_vm1, %v4427_v45, %v4429_v36  ;;  %v4433_v62 = vsel %vm304_vm1, %v4429_v36, %v12179_v38  ;;  %v4555_v38 = vrot.slane %v12198_v41, %v14959_v29  ;;  %v4613_v41 = vrot.slane %v12210_v12, %v14959_v29 }
 0xb1f   : > { %v4466_v48 = vrot.slane %v4458_v26, 6  ;;  %v4456_v1 = vmul.f32 %v4439_v3, %v4433_v62  ;;  %v4459_v9 = vmul.f32 %v4451_v33, %v4430_v32  ;;  %v4481_v58 = vpop.permute.xlu1 %4480  ;;  %v4663_v26 = vrot.slane %v12225_v13, %v14999_v61 }
 0xb20   : > { %v4485_v59 = vsel %vm360_vm0, %v4479_v8, %v4481_v58  ;;  %v4667_v12 = vrot.slane %v12225_v13, %v14959_v29 }
 0xb21   : > { %4474 = vst [vmem:[#allocation4 + $0x10] sm:$0xc] %v4466_v48  ;;  %v4464_v10 = vrot.slane %v4456_v1, 6  ;;  %v4467_v21 = vrot.slane %v4459_v9, 6  ;;  %v4512_v37 = vmul.f32 %v4501_v56, %v4485_v59  ;;  %v4483_v28 = vpop.permute.xlu0 %4482  ;;  %v4671_v48 = vrot.slane %v12225_v13, %v14961_v54 }
 0xb22   : > { %v4484_v4 = vsel %vm360_vm0, %v4481_v58, %v4483_v28  ;;  %v4487_v57 = vsel %vm360_vm0, %v4483_v28, %v12191_v46  ;;  %v4717_v59 = vrot.slane %v12240_v40, %v14999_v61  ;;  %v4721_v13 = vrot.slane %v12240_v40, %v14959_v29 }
 0xb23   : > { %4472 = vst [vmem:[#allocation4] sm:$0xc] %v4464_v10  ;;  %4475 = vst [vmem:[#allocation4 + $0x18] sm:$0xc] %v4467_v21  ;;  %v4520_v8 = vrot.slane %v4512_v37, 4  ;;  %v4510_v17 = vmul.f32 %v4493_v34, %v4487_v57  ;;  %v4513_v49 = vmul.f32 %v4505_v7, %v4484_v4  ;;  %v4535_v11 = vpop.permute.xlu1 %4534  ;;  %v4725_v4 = vrot.slane %v12240_v40, %v14961_v54 }
 0xb24   : > { %v4539_v20 = vsel %vm416_vm2, %v12212_v2, %v4535_v11  ;;  %v4397_v40 = vrot.slane %v12255_v50, %v15000_v27 }
 0xb25   : > { %4528 = vst [vmem:[#allocation4 + $0x10] sm:$0x30] %v4520_v8  ;;  %v4518_v18 = vrot.slane %v4510_v17, 4  ;;  %v4521_v44 = vrot.slane %v4513_v49, 4  ;;  %v4566_v46 = vmul.f32 %v4555_v38, %v4539_v20  ;;  %v4537_v22 = vpop.permute.xlu0 %4536  ;;  %v4405_v49 = vrot.slane %v12255_v50, %v14959_v29 }
 0xb26   : > { %v4538_v52 = vsel %vm416_vm2, %v4535_v11, %v4537_v22  ;;  %v4541_v30 = vsel %vm416_vm2, %v4537_v22, %v12203_v6 }
 0xb27   : > { %4526 = vst [vmem:[#allocation4] sm:$0x30] %v4518_v18  ;;  %4529 = vst [vmem:[#allocation4 + $0x18] sm:$0x30] %v4521_v44  ;;  %v4574_v2 = vrot.slane %v4566_v46, 2  ;;  %v4564_v35 = vmul.f32 %v4547_v63, %v4541_v30  ;;  %v4567_v60 = vmul.f32 %v4559_v31, %v4538_v52  ;;  %v4593_v16 = vpop.permute.xlu1 %4592  ;;  %v4409_v46 = vrot.slane %v12255_v50, %v14961_v54 }
 0xb28   : > { %v4597_v45 = vsel %vm476_vm3, %v12227_v39, %v4593_v16 }
 0xb29   : > { %4582 = vst [vmem:[#allocation4 + $0x10] sm:$0xc0] %v4574_v2  ;;  %v4572_v3 = vrot.slane %v4564_v35, 2  ;;  %v4575_v33 = vrot.slane %v4567_v60, 2  ;;  %v4623_v6 = vmul.f32 %v4609_v24, %v4597_v45  ;;  %v4595_v0 = vpop.permute.xlu0 %4594 }
 0xb2a   : > { %v4596_v36 = vsel %vm476_vm3, %v4593_v16, %v4595_v0  ;;  %v4599_v56 = vsel %vm476_vm3, %v4595_v0, %v12218_v51 }
 0xb2b   : > { %4580 = vst [vmem:[#allocation4] sm:$0xc0] %v4572_v3  ;;  %4583 = vst [vmem:[#allocation4 + $0x18] sm:$0xc0] %v4575_v33  ;;  %v4631_v39 = vrot.slane %v4623_v6, 6  ;;  %v4624_v32 = vmul.f32 %v4613_v41, %v4596_v36  ;;  %v4625_v62 = vmul.f32 %v4617_v19, %v4599_v56  ;;  %v4647_v34 = vpop.permute.xlu1 %4646  ;;  %v4795_v36 = vld [vmem:[#allocation4 + $0x8] sm:$0xff] }
 0xb2c   : > { %v4651_v1 = vsel %vm532_vm4, %v12242_v14, %v4647_v34 }
 0xb2d   : > { %4639 = vst [vmem:[#allocation4 + $0x28] sm:$0xc] %v4631_v39  ;;  %v4632_v9 = vrot.slane %v4624_v32, 6  ;;  %v4633_v58 = vrot.slane %v4625_v62, 6  ;;  %v4677_v51 = vmul.f32 %v4663_v26, %v4651_v1  ;;  %v4649_v7 = vpop.permute.xlu0 %4648 }
 0xb2e   : > { %v4650_v10 = vsel %vm532_vm4, %v4647_v34, %v4649_v7  ;;  %v4653_v21 = vsel %vm532_vm4, %v4649_v7, %v12233_v53 }
 0xb2f   : > { %4640 = vst [vmem:[#allocation4 + $0x30] sm:$0xc] %v4632_v9  ;;  %4641 = vst [vmem:[#allocation4 + $0x38] sm:$0xc] %v4633_v58  ;;  %v4685_v14 = vrot.slane %v4677_v51, 4  ;;  %v4678_v37 = vmul.f32 %v4667_v12, %v4650_v10  ;;  %v4679_v28 = vmul.f32 %v4671_v48, %v4653_v21  ;;  %v4701_v38 = vpop.permute.xlu1 %4700  ;;  %v4798_v9 = vld [vmem:[#allocation4 + $0x20] sm:$0xff] }
 0xb30   : > { %v4705_v57 = vsel %vm588_vm5, %v12257_v43, %v4701_v38 }
 0xb31   : > { %4693 = vst [vmem:[#allocation4 + $0x28] sm:$0x30] %v4685_v14  ;;  %v4686_v63 = vrot.slane %v4678_v37, 4  ;;  %v4687_v8 = vrot.slane %v4679_v28, 4  ;;  %v4731_v53 = vmul.f32 %v4717_v59, %v4705_v57  ;;  %v4703_v17 = vpop.permute.xlu0 %4702  ;;  %v4792_v28 = vld [vmem:[%s14795_s2 + $0x60] sm:$0xff] }
 0xb32   : > { %v4704_v11 = vsel %vm588_vm5, %v4701_v38, %v4703_v17  ;;  %v4707_v31 = vsel %vm588_vm5, %v4703_v17, %v12248_v5  ;;  %v9010_v5 = vld [vmem:[%s14794_s1 + $0x7] ss:$8 sm:$0xf] }
 0xb33   : > { %4694 = vst [vmem:[#allocation4 + $0x30] sm:$0x30] %v4686_v63  ;;  %4695 = vst [vmem:[#allocation4 + $0x38] sm:$0x30] %v4687_v8  ;;  %v4739_v43 = vrot.slane %v4731_v53, 2  ;;  %v4732_v20 = vmul.f32 %v4721_v13, %v4704_v11  ;;  %v4733_v18 = vmul.f32 %v4725_v4, %v4707_v31  ;;  %v4385_v44 = vpop.permute.xlu1 %4384  ;;  %v4767_v16 = vrot.slane %v9010_v5, %v15000_v27 }
 0xb34   : > { %v4389_v22 = vsel %vm261_vm6, %v12267_v42, %v4385_v44  ;;  %v4771_v45 = vrot.slane %v9010_v5, %v14999_v61  ;;  %v4779_v0 = vrot.slane %v9010_v5, %v14961_v54 }
 0xb35   : > { %4747 = vst [vmem:[#allocation4 + $0x28] sm:$0xc0] %v4739_v43  ;;  %v4740_v24 = vrot.slane %v4732_v20, 2  ;;  %v4741_v52 = vrot.slane %v4733_v18, 2  ;;  %v4416_v30 = vmul.f32 %v4405_v49, %v4389_v22  ;;  %v4387_v41 = vpop.permute.xlu0 %4386  ;;  %v5314_v22 = vld [vmem:[%s14795_s2 + $0x78] sm:$0xff] }
 0xb36   : > { %v4388_v2 = vsel %vm261_vm6, %v4385_v44, %v4387_v41  ;;  %v4391_v50 = vsel %vm261_vm6, %v4387_v41, %v12263_v23  ;;  %v4775_v23 = vrot.slane %v9010_v5, %v14959_v29  ;;  %v5315_v5 = vld [vmem:[%s14795_s2 + $0x88] sm:$0xff] }
 0xb37   : > { %4748 = vst [vmem:[#allocation4 + $0x30] sm:$0xc0] %v4740_v24  ;;  %4749 = vst [vmem:[#allocation4 + $0x38] sm:$0xc0] %v4741_v52  ;;  %v4414_v42 = vmul.f32 %v4397_v40, %v4391_v50  ;;  %v4417_v35 = vmul.f32 %v4409_v46, %v4388_v2  ;;  %v4751_v60 = vpop.permute.xlu1 %4750 }
 0xb38   : > { %4420 = vst [vmem:[#allocation4 + $0x10] sm:$0x3] %v4416_v30  ;;  %v4984_v52 = vld [vmem:[%s14794_s1] ss:$8 sm:$0xf] }
 0xb39   : > { %4418 = vst [vmem:[#allocation4] sm:$0x3] %v4414_v42  ;;  %4421 = vst [vmem:[#allocation4 + $0x18] sm:$0x3] %v4417_v35  ;;  %v4753_v19 = vpop.permute.xlu0 %4752  ;;  %v4993_v2 = vrot.slane %v4984_v52, %v14999_v61 }
 0xb3a   : > { %v4760_v3 = vsel %vm644_vm7, %v4751_v60, %v4753_v19  ;;  %v9017_v30 = vld [vmem:[%s14794_s1 + $0x1] ss:$8 sm:$0xf] }
 0xb3b   : > { %v4784_v33 = vmul.f32 %v4767_v16, %v4760_v3  ;;  %v4755_v6 = vpop.permute.xlu1 %4754  ;;  %v5035_v50 = vrot.slane %v9017_v30, %v14999_v61 }
 0xb3c   : > { %v4759_v26 = vsel %vm644_vm7, %v4753_v19, %v4755_v6  ;;  %v4799_v56 = vld [vmem:[#allocation4 + $0x28] sm:$0xff] }
 0xb3d   : > { %4788 = vst [vmem:[#allocation4 + $0x40] sm:$0x3] %v4784_v33  ;;  %v4785_v12 = vmul.f32 %v4771_v45, %v4759_v26  ;;  %v4757_v39 = vpop.permute.xlu0 %4756  ;;  %v9517_v32 = vpack.c.bf16 %v4799_v56, %v4795_v36 }
 0xb3e   : > { %v4758_v62 = vsel %vm644_vm7, %v4755_v6, %v4757_v39  ;;  %v4761_v34 = vsel %vm644_vm7, %v4757_v39, %v4751_v60  ;;  %v4800_v51 = vld [vmem:[#allocation4 + $0x30] sm:$0xff]  ;;  %v4801_v10 = vld [vmem:[#allocation4 + $0x38] sm:$0xff] }
 0xb3f   : > { %4789 = vst [vmem:[#allocation4 + $0x48] sm:$0x3] %v4785_v12  ;;  %v4786_v48 = vmul.f32 %v4775_v23, %v4758_v62  ;;  %v4787_v1 = vmul.f32 %v4779_v0, %v4761_v34  ;;  %9518 = vmatprep.subr.bf16.mxu0 %v9517_v32  ;;  %v4796_v58 = vld [vmem:[#allocation4 + $0x10] sm:$0xff] }
 0xb40   : > { %v4794_v7 = vld [vmem:[#allocation4] sm:$0xff]  ;;  %v4797_v59 = vld [vmem:[#allocation4 + $0x18] sm:$0xff]  ;;  %v9523_v14 = vpack.c.bf16 %v4800_v51, %v4796_v58  ;;  %v4989_v58 = vrot.slane %v4984_v52, %v15000_v27  ;;  %v5039_v51 = vrot.slane %v9017_v30, %v14959_v29 }
 0xb41   : > { %4790 = vst [vmem:[#allocation4 + $0x50] sm:$0x3] %v4786_v48  ;;  %4791 = vst [vmem:[#allocation4 + $0x58] sm:$0x3] %v4787_v1  ;;  %v9519_v21 = vpack.c.bf16 %v4798_v9, %v4794_v7  ;;  %v9521_v13 = vpack.c.bf16 %v4801_v10, %v4797_v59  ;;  %v5001_v59 = vrot.slane %v4984_v52, %v14961_v54 }
 0xb42   : > { %v12504_v62 = vld [vmem:[%s14794_s1 + $0x3] ss:$8 sm:$0xf]  ;;  %v12509_v48 = vld [vmem:[%s14794_s1 + $0x2] ss:$8 sm:$0xf]  ;;  %v5031_v10 = vrot.slane %v9017_v30, %v15000_v27 }
 0xb43   : > { %9520 = vmatpush1.bf16.msra.mxu0 %v9519_v21  ;;  %9522 = vmatprep.subr.bf16.mxu1 %v9521_v13  ;;  %v5119_v9 = vrot.slane %v12504_v62, %v14999_v61  ;;  %v5043_v21 = vrot.slane %v9017_v30, %v14961_v54  ;;  %v5077_v13 = vrot.slane %v12509_v48, %v14999_v61 }
 0xb44   : > { %9524 = vmatpush1.bf16.msra.mxu1 %v9523_v14  ;;  %v4802_v38 = vld [vmem:[#allocation4 + $0x40] sm:$0x3]  ;;  %v4997_v14 = vrot.slane %v4984_v52, %v14959_v29 }
 0xb46   : > { %v4803_v37 = vld [vmem:[#allocation4 + $0x48] sm:$0x3] }
 0xb47   : > { %9011 = vmatprep.subr.msk.mxu0 %vm703_vm8, %v4803_v37 }
 0xb48   : > { %9012 = vmatpush1.msk.msra.mxu0 %vm703_vm8, %v4802_v38  ;;  %v4805_v4 = vld [vmem:[#allocation4 + $0x58] sm:$0x3]  ;;  %v4804_v57 = vld [vmem:[#allocation4 + $0x50] sm:$0x3] }
 0xb49   : > { %9013 = vmatmul.mubr.msk.f32.vlgmr.msra.gmra.mrb[20].mxu0 %vm699_vm9, %v4792_v28  ;;  %9014 = vmatprep.subr.msk.mxu1 %vm703_vm8, %v4805_v4 }
 0xb4a   : > { %9015 = vmatpush1.msk.msra.mxu1 %vm703_vm8, %v4804_v57  ;;  %5432 = vmatprep.mubr.f32.mxu0 %v14995_v47 }
 0xb4b   : > { %9016 = vmatmul.mubr.msk.f32.vlgmr.msra.gmra.mrb[20].mxu1 %vm699_vm9, %v4792_v28 }
 0xb4c   : > { %5509 = vmatprep.mubr.f32.mxu1 %v14995_v47  ;;  %v4809_v63 = vpop.permute.xlu1 %4808 }
 0xc1c   : > { %v4892_v8 = vpop.f32.mrb[20].mxu0 }
 0xc1d   : > { %v4893_v53 = vadd.f32 %v4892_v8, %v4809_v63  ;;  %v4894_v17 = vpop.f32.mrb[21].mxu0 }
 0xc1e   : > { %v4895_v49 = vadd.f32 %v4894_v17, %v4809_v63  ;;  %v4963_v11 = vpop.f32.mrb[20].mxu1  ;;  %v9020_v17 = vld [vmem:[%s14794_s1 + $0x4] ss:$8 sm:$0xf] }
 0xc1f   : > { %v12395_v31 = vmax.f32 %v4893_v53, 0.0  ;;  %v4965_v40 = vpop.f32.mrb[21].mxu1  ;;  %v4964_v20 = vadd.f32 %v4963_v11, %v4809_v63 }
 0xc20   : > { %v12397_v43 = vmax.f32 %v4895_v49, 0.0  ;;  %v4966_v18 = vadd.f32 %v4965_v40, %v4809_v63 }
 0xc21   : > { %4972 = vrot.lane.b32.xlu0 %v12395_v31, %s9841_s6  ;;  %v12427_v44 = vmax.f32 %v4964_v20, 0.0 }
 0xc22   : > { %4974 = vrot.lane.b32.xlu1 %v12397_v43, %s9841_s6  ;;  %v12429_v46 = vmax.f32 %v4966_v18, 0.0 }
 0xc25   : > { %5014 = vrot.lane.b32.xlu0 %v12395_v31, %s9835_s25 }
 0xc26   : > { %5016 = vrot.lane.b32.xlu1 %v12397_v43, %s9835_s25 }
 0xc29   : > { %5056 = vrot.lane.b32.xlu0 %v12395_v31, %s9836_s26 }
 0xc2a   : > { %5058 = vrot.lane.b32.xlu1 %v12397_v43, %s9836_s26 }
 0xc2d   : > { %5098 = vrot.lane.b32.xlu0 %v12395_v31, %s9837_s27 }
 0xc2e   : > { %5100 = vrot.lane.b32.xlu1 %v12397_v43, %s9837_s27 }
 0xc31   : > { %5144 = vrot.lane.b32.xlu0 %v12395_v31, %s9838_s28 }
 0xc32   : > { %5146 = vrot.lane.b32.xlu1 %v12397_v43, %s9838_s28 }
 0xc35   : > { %5186 = vrot.lane.b32.xlu0 %v12395_v31, %s9839_s29 }
 0xc36   : > { %5188 = vrot.lane.b32.xlu1 %v12397_v43, %s9839_s29 }
 0xc39   : > { %5228 = vrot.lane.b32.xlu0 %v12395_v31, %s9840_s30 }
 0xc3a   : > { %5230 = vrot.lane.b32.xlu1 %v12397_v43, %s9840_s30 }
 0xc3d   : > { %4976 = vrot.lane.b32.xlu0 %v12427_v44, %s9841_s6 }
 0xc3e   : > { %4978 = vrot.lane.b32.xlu1 %v12429_v46, %s9841_s6 }
 0xc41   : > { %5018 = vrot.lane.b32.xlu0 %v12427_v44, %s9835_s25 }
 0xc42   : > { %5020 = vrot.lane.b32.xlu1 %v12429_v46, %s9835_s25 }
 0xc45   : > { %5060 = vrot.lane.b32.xlu0 %v12427_v44, %s9836_s26 }
 0xc46   : > { %5062 = vrot.lane.b32.xlu1 %v12429_v46, %s9836_s26 }
 0xc49   : > { %5102 = vrot.lane.b32.xlu0 %v12427_v44, %s9837_s27 }
 0xc4a   : > { %5104 = vrot.lane.b32.xlu1 %v12429_v46, %s9837_s27 }
 0xc4d   : > { %5148 = vrot.lane.b32.xlu0 %v12427_v44, %s9838_s28 }
 0xc4e   : > { %5150 = vrot.lane.b32.xlu1 %v12429_v46, %s9838_s28 }
 0xc51   : > { %5190 = vrot.lane.b32.xlu0 %v12427_v44, %s9839_s29 }
 0xc52   : > { %5192 = vrot.lane.b32.xlu1 %v12429_v46, %s9839_s29 }
 0xc55   : > { %5232 = vrot.lane.b32.xlu0 %v12427_v44, %s9840_s30 }
 0xc56   : > { %5234 = vrot.lane.b32.xlu1 %v12429_v46, %s9840_s30 }
 0xc59   : > { %5270 = vrot.lane.b32.xlu0 %v12395_v31, %s9842_s7 }
 0xc5a   : > { %5272 = vrot.lane.b32.xlu1 %v12397_v43, %s9842_s7 }
 0xc5d   : > { %5274 = vrot.lane.b32.xlu0 %v12427_v44, %s9842_s7 }
 0xc5e   : > { %5276 = vrot.lane.b32.xlu1 %v12429_v46, %s9842_s7 }
 0xc61   : > { %5354 = vperm.xlu0 %9772, %v5314_v22  }
 0xc62   : > { %5359 = vperm.xlu1 %9773, %v5315_v5  }
 0xc93   : > { %v4973_v24 = vpop.permute.xlu0 %4972 }
 0xc94   : > { %v4975_v41 = vpop.permute.xlu1 %4974 }
 0xc95   : > { %v4982_v42 = vsel %vm261_vm6, %v4973_v24, %v4975_v41 }
 0xc96   : > { %v5007_v19 = vmul.f32 %v4993_v2, %v4982_v42  ;;  %v5081_v2 = vrot.slane %v12509_v48, %v14959_v29 }
 0xc97   : > { %v5015_v35 = vpop.permute.xlu0 %5014 }
 0xc98   : > { %v5017_v60 = vpop.permute.xlu1 %5016 }
 0xc99   : > { %v5024_v16 = vsel %vm304_vm1, %v5015_v35, %v5017_v60 }
 0xc9a   : > { %v5049_v45 = vmul.f32 %v5035_v50, %v5024_v16  ;;  %v5073_v16 = vrot.slane %v12509_v48, %v15000_v27 }
 0xc9b   : > { %v5057_v3 = vpop.permute.xlu0 %5056 }
 0xc9c   : > { %v12485_v33 = vpop.permute.xlu1 %5058  ;;  %v9525_v6 = vpack.c.bf16 %v5049_v45, %v5007_v19 }
 0xc9d   : > { %v5066_v4 = vsel %vm360_vm0, %v5057_v3, %v12485_v33 }
 0xc9e   : > { %9526 = vmatprep.subr.bf16.mxu0 %v9525_v6  ;;  %v5085_v6 = vrot.slane %v12509_v48, %v14961_v54 }
 0xc9f   : > { %v12487_v23 = vpop.permute.xlu0 %5098 }
 0xca0   : > { %v5101_v0 = vpop.permute.xlu1 %5100 }
 0xca1   : > { %v5108_v7 = vsel %vm416_vm2, %v12487_v23, %v5101_v0 }
 0xca2   : > { %v5133_v53 = vmul.f32 %v5119_v9, %v5108_v7  ;;  %v5165_v7 = vrot.slane %v9020_v17, %v14999_v61 }
 0xca3   : > { %v12489_v26 = vpop.permute.xlu0 %5144 }
 0xca4   : > { %v12491_v36 = vpop.permute.xlu1 %5146 }
 0xca7   : > { %v12493_v56 = vpop.permute.xlu0 %5186 }
 0xca8   : > { %v12495_v12 = vpop.permute.xlu1 %5188 }
 0xcab   : > { %v12497_v39 = vpop.permute.xlu0 %5228 }
 0xcac   : > { %v12499_v32 = vpop.permute.xlu1 %5230 }
 0xcaf   : > { %v4977_v34 = vpop.permute.xlu0 %4976 }
 0xcb0   : > { %v4979_v1 = vpop.permute.xlu1 %4978  ;;  %v4981_v57 = vsel %vm261_vm6, %v4975_v41, %v4977_v34  ;;  %v5161_v41 = vrot.slane %v9020_v17, %v15000_v27 }
 0xcb1   : > { %v4980_v37 = vsel %vm261_vm6, %v4977_v34, %v4979_v1  ;;  %v4983_v28 = vsel %vm261_vm6, %v4979_v1, %v4973_v24  ;;  %v5091_v24 = vmul.f32 %v5077_v13, %v5066_v4  ;;  %v5008_v52 = vmul.f32 %v4997_v14, %v4981_v57 }
 0xcb2   : > { %v5006_v20 = vmul.f32 %v4989_v58, %v4983_v28  ;;  %v5009_v18 = vmul.f32 %v5001_v59, %v4980_v37  ;;  %v5115_v34 = vrot.slane %v12504_v62, %v15000_v27  ;;  %v5127_v1 = vrot.slane %v12504_v62, %v14961_v54 }
 0xcb3   : > { %v5019_v38 = vpop.permute.xlu0 %5018  ;;  %v9529_v19 = vpack.c.bf16 %v5133_v53, %v5091_v24  ;;  %v9022_v53 = vld [vmem:[%s14794_s1 + $0x6] ss:$8 sm:$0xf] }
 0xcb4   : > { %v5023_v63 = vsel %vm304_vm1, %v5017_v60, %v5019_v38  ;;  %v5021_v8 = vpop.permute.xlu1 %5020 }
 0xcb5   : > { %v5050_v49 = vmul.f32 %v5039_v51, %v5023_v63  ;;  %v5022_v11 = vsel %vm304_vm1, %v5019_v38, %v5021_v8  ;;  %v5025_v40 = vsel %vm304_vm1, %v5021_v8, %v5015_v35  ;;  %v5123_v35 = vrot.slane %v12504_v62, %v14959_v29  ;;  %v9021_v8 = vld [vmem:[%s14794_s1 + $0x5] ss:$8 sm:$0xf] }
 0xcb6   : > { %v5048_v22 = vmul.f32 %v5031_v10, %v5025_v40  ;;  %v5051_v5 = vmul.f32 %v5043_v21, %v5022_v11  ;;  %v5169_v10 = vrot.slane %v9020_v17, %v14959_v29  ;;  %v5173_v21 = vrot.slane %v9020_v17, %v14961_v54 }
 0xcb7   : > { %v5061_v30 = vpop.permute.xlu0 %5060  ;;  %v9543_v45 = vpack.c.bf16 %v5050_v49, %v5008_v52  ;;  %v5203_v52 = vrot.slane %v9021_v8, %v15000_v27 }
 0xcb8   : > { %v5063_v50 = vpop.permute.xlu1 %5062  ;;  %v9527_v42 = vpack.c.bf16 %v5048_v22, %v5006_v20  ;;  %v9541_v60 = vpack.c.bf16 %v5051_v5, %v5009_v18  ;;  %v5065_v48 = vsel %vm360_vm0, %v12485_v33, %v5061_v30 }
 0xcb9   : > { %v5064_v9 = vsel %vm360_vm0, %v5061_v30, %v5063_v50  ;;  %v5067_v58 = vsel %vm360_vm0, %v5063_v50, %v5057_v3  ;;  %v5154_v3 = vsel %vm476_vm3, %v12489_v26, %v12491_v36  ;;  %v5092_v4 = vmul.f32 %v5081_v2, %v5065_v48 }
 0xcba   : > { %9528 = vmatpush1.bf16.msra.mxu0 %v9527_v42  ;;  %9542 = vmatprep.subr.bf16.mxu1 %v9541_v60  ;;  %v5090_v37 = vmul.f32 %v5073_v16, %v5067_v58  ;;  %v5178_v63 = vmul.f32 %v5161_v41, %v5154_v3  ;;  %v5207_v30 = vrot.slane %v9021_v8, %v14999_v61 }
 0xcbb   : > { %v5103_v51 = vpop.permute.xlu0 %5102  ;;  %9530 = vmatprep.subr.bf16.mxu0 %v9529_v19  ;;  %9544 = vmatpush1.bf16.msra.mxu1 %v9543_v45  ;;  %v5211_v50 = vrot.slane %v9021_v8, %v14959_v29  ;;  %v5238_v19 = vsel %vm588_vm5, %v12497_v39, %v12499_v32  ;;  %v5249_v45 = vrot.slane %v9022_v53, %v14999_v61 }
 0xcbc   : > { %v5107_v62 = vsel %vm416_vm2, %v5101_v0, %v5103_v51  ;;  %v5105_v59 = vpop.permute.xlu1 %5104  ;;  %v5093_v0 = vmul.f32 %v5085_v6, %v5064_v9 }
 0xcbd   : > { %v5134_v13 = vmul.f32 %v5123_v35, %v5107_v62  ;;  %v5106_v14 = vsel %vm416_vm2, %v5103_v51, %v5105_v59  ;;  %v5109_v33 = vsel %vm416_vm2, %v5105_v59, %v12487_v23  ;;  %v5196_v35 = vsel %vm532_vm4, %v12493_v56, %v12495_v12 }
 0xcbe   : > { %v5132_v28 = vmul.f32 %v5115_v34, %v5109_v33  ;;  %v5135_v38 = vmul.f32 %v5127_v1, %v5106_v14  ;;  %v5220_v9 = vmul.f32 %v5203_v52, %v5196_v35  ;;  %v9023_v14 = vld [vmem:[%s14794_s1 + $0x7] ss:$8 sm:$0xf] }
 0xcbf   : > { %v5149_v57 = vpop.permute.xlu0 %5148  ;;  %v9547_v22 = vpack.c.bf16 %v5134_v13, %v5092_v4  ;;  %v5287_v4 = vrot.slane %v9023_v14, %v15000_v27 }
 0xcc0   : > { %v5153_v17 = vsel %vm476_vm3, %v12491_v36, %v5149_v57  ;;  %v5151_v23 = vpop.permute.xlu1 %5150  ;;  %v9531_v49 = vpack.c.bf16 %v5132_v28, %v5090_v37  ;;  %v9545_v11 = vpack.c.bf16 %v5135_v38, %v5093_v0  ;;  %v5245_v36 = vrot.slane %v9022_v53, %v15000_v27 }
 0xcc1   : > { %v5179_v40 = vmul.f32 %v5165_v7, %v5153_v17  ;;  %v5152_v20 = vsel %vm476_vm3, %v5149_v57, %v5151_v23  ;;  %v5155_v18 = vsel %vm476_vm3, %v5151_v23, %v12489_v26  ;;  %v9535_v26 = vpack.c.bf16 %v5178_v63, %v12395_v31 }
 0xcc2   : > { %v5180_v5 = vmul.f32 %v5169_v10, %v5152_v20  ;;  %v5181_v24 = vmul.f32 %v5173_v21, %v5155_v18  ;;  %9532 = vmatpush1.bf16.msra.mxu0 %v9531_v49  ;;  %9546 = vmatprep.subr.bf16.mxu1 %v9545_v11  ;;  %v5262_v58 = vmul.f32 %v5245_v36, %v5238_v19 }
 0xcc3   : > { %v5191_v41 = vpop.permute.xlu0 %5190  ;;  %9548 = vmatpush1.bf16.msra.mxu1 %v9547_v22  ;;  %v9533_v2 = vpack.c.bf16 %v5179_v40, %v12397_v43  ;;  %v5215_v43 = vrot.slane %v9021_v8, %v14961_v54  ;;  %v5291_v38 = vrot.slane %v9023_v14, %v14999_v61  ;;  %v5299_v57 = vrot.slane %v9023_v14, %v14961_v54  ;;  %v5312_v22 = vld [vmem:[%s14795_s2 + $0x70] sm:$0xff] }
 0xcc4   : > { %v5193_v42 = vpop.permute.xlu1 %5192  ;;  %v9549_v60 = vpack.c.bf16 %v5181_v24, %v12429_v46  ;;  %v9551_v16 = vpack.c.bf16 %v5180_v5, %v12427_v44  ;;  %v5195_v31 = vsel %vm532_vm4, %v12495_v12, %v5191_v41  ;;  %v5253_v44 = vrot.slane %v9022_v53, %v14959_v29  ;;  %v5313_v5 = vld [vmem:[%s14795_s2 + $0x80] sm:$0xff] }
 0xcc5   : > { %9534 = vmatprep.subr.bf16.mxu0 %v9533_v2  ;;  %v5257_v46 = vrot.slane %v9022_v53, %v14961_v54  ;;  %v5194_v6 = vsel %vm532_vm4, %v5191_v41, %v5193_v42  ;;  %v5197_v34 = vsel %vm532_vm4, %v5193_v42, %v12493_v56  ;;  %v5221_v7 = vmul.f32 %v5207_v30, %v5195_v31  ;;  %v9030_v31 = vld [vmem:[%s14794_s1 + $0x3] ss:$8 sm:$0xf] }
 0xcc6   : > { %9536 = vmatpush1.bf16.msra.mxu0 %v9535_v26  ;;  %9550 = vmatprep.subr.bf16.mxu1 %v9549_v60  ;;  %v5222_v10 = vmul.f32 %v5211_v50, %v5194_v6  ;;  %v5223_v56 = vmul.f32 %v5215_v43, %v5197_v34  ;;  %v9539_v37 = vpack.c.bf16 %v5262_v58, %v5220_v9  ;;  %v12665_v60 = vld [vmem:[%s14795_s2 + $0x98] sm:$0x3] }
 0xcc7   : > { %v5233_v1 = vpop.permute.xlu0 %5232  ;;  %9552 = vmatpush1.bf16.msra.mxu1 %v9551_v16 }
 0xcc8   : > { %v5237_v12 = vsel %vm588_vm5, %v12499_v32, %v5233_v1  ;;  %v5235_v51 = vpop.permute.xlu1 %5234 }
 0xcc9   : > { %v5263_v48 = vmul.f32 %v5249_v45, %v5237_v12  ;;  %v5236_v62 = vsel %vm588_vm5, %v5233_v1, %v5235_v51  ;;  %v5239_v59 = vsel %vm588_vm5, %v5235_v51, %v12497_v39  ;;  %v5295_v39 = vrot.slane %v9023_v14, %v14959_v29 }
 0xcca   : > { %v5264_v21 = vmul.f32 %v5253_v44, %v5236_v62  ;;  %v5265_v3 = vmul.f32 %v5257_v46, %v5239_v59 }
 0xccb   : > { %v5271_v13 = vpop.permute.xlu0 %5270  ;;  %v9537_v32 = vpack.c.bf16 %v5263_v48, %v5221_v7 }
 0xccc   : > { %v5273_v33 = vpop.permute.xlu1 %5272  ;;  %v9553_v0 = vpack.c.bf16 %v5265_v3, %v5223_v56  ;;  %v9555_v28 = vpack.c.bf16 %v5264_v21, %v5222_v10 }
 0xccd   : > { %9538 = vmatprep.subr.bf16.mxu0 %v9537_v32  ;;  %v5280_v63 = vsel %vm644_vm7, %v5271_v13, %v5273_v33 }
 0xcce   : > { %9540 = vmatpush1.bf16.msra.mxu0 %v9539_v37  ;;  %9554 = vmatprep.subr.bf16.mxu1 %v9553_v0  ;;  %v5304_v40 = vmul.f32 %v5287_v4, %v5280_v63  ;;  %v12853_v4 = vld [vmem:[%s14794_s1] ss:$8 sm:$0xf] }
 0xccf   : > { %v5275_v8 = vpop.permute.xlu0 %5274  ;;  %9556 = vmatpush1.bf16.msra.mxu1 %v9555_v28  ;;  %v5563_v63 = vrot.slane %v12853_v4, %v14999_v61 }
 0xcd0   : > { %v5279_v53 = vsel %vm644_vm7, %v5273_v33, %v5275_v8  ;;  %v5277_v17 = vpop.permute.xlu1 %5276 }
 0xcd1   : > { %v5305_v23 = vmul.f32 %v5291_v38, %v5279_v53  ;;  %v5278_v49 = vsel %vm644_vm7, %v5275_v8, %v5277_v17  ;;  %v5281_v11 = vsel %vm644_vm7, %v5277_v17, %v5271_v13 }
 0xcd2   : > { %v5306_v20 = vmul.f32 %v5295_v39, %v5278_v49  ;;  %v5307_v18 = vmul.f32 %v5299_v57, %v5281_v11  ;;  %v5567_v49 = vrot.slane %v12853_v4, %v14959_v29  ;;  %v12871_v11 = vld [vmem:[%s14794_s1 + $0x1] ss:$8 sm:$0xf] }
 0xcd3   : > { %5384 = vmatprep.subr.mxu0 %v5305_v23 }
 0xcd4   : > { %5385 = vmatpush1.msra.mxu0 %v5304_v40  ;;  %5461 = vmatprep.subr.mxu1 %v5307_v18 }
 0xcd5   : > { %9024 = vmatmul.mubr.msk.f32.vlgmr.msra.gmra.mrb[22].mxu0 %vm3434_vm12, %v5312_v22  ;;  %5462 = vmatpush1.msra.mxu1 %v5306_v20 }
 0xcd6   : > { %9026 = vmatmul.mubr.msk.f32.vlgmr.msra.gmra.mrb[22].mxu1 %vm3434_vm12, %v5312_v22  ;;  %5438 = vmatprep.mubr.f32.mxu0 %v14995_v47 }
 0xcd7   : > { %5515 = vmatprep.mubr.f32.mxu1 %v14995_v47 }
 0xcd9   : > { %9025 = vmatmul.mubr.msk.f32.gmra.mrb[24].mxu0 %vm3434_vm12, %v5313_v5 }
 0xcda   : > { %9027 = vmatmul.mubr.msk.f32.gmra.mrb[24].mxu1 %vm3434_vm12, %v5313_v5  ;;  %9035 = vmatprep.mubr.msk.f32.mxu0 %vm4186_vm13, %v12665_v60 }
 0xcdb   : > { %9036 = vmatprep.mubr.msk.f32.mxu1 %vm4186_vm13, %v12665_v60 }
 0xce0   : > { %v12653_v24 = vpop.permute.xlu0 %5354 }
 0xce1   : > { %v12660_v42 = vpop.permute.xlu1 %5359 }
 0xda8   : > { %v5434_v52 = vpop.f32.mrb[22].mxu0 }
 0xda9   : > { %v5435_v36 = vadd.f32 %v5434_v52, %v12653_v24  ;;  %v5436_v30 = vpop.f32.mrb[23].mxu0  ;;  %v5511_v41 = vpop.f32.mrb[22].mxu1  ;;  %v12885_v52 = vrot.slane %v12871_v11, %v14999_v61 }
 0xdaa   : > { %v12656_v2 = vpop.f32.mrb[23].mxu1  ;;  %v5437_v44 = vadd.f32 %v5436_v30, %v12653_v24  ;;  %v5512_v6 = vadd.f32 %v5511_v41, %v12653_v24 }
 0xdab   : > { %v12658_v50 = vmax.f32 %v5435_v36, 0.0  ;;  %v5514_v51 = vadd.f32 %v12656_v2, %v12653_v24 }
 0xdac   : > { %v5440_v26 = vpop.f32.mrb[24].mxu0  ;;  %v12707_v46 = vmax.f32 %v5437_v44, 0.0  ;;  %v12715_v1 = vmax.f32 %v5512_v6, 0.0 }
 0xdad   : > { %15001 = vst [vmem:[#allocation19_spill] sm:$0xff] %v12658_v50  ;;  %v5441_v16 = vadd.f32 %v5440_v26, %v12660_v42  ;;  %v5442_v35 = vpop.f32.mrb[25].mxu0  ;;  %5530 = vrot.lane.b32.xlu0 %v12658_v50, %s9841_s6  ;;  %v5517_v19 = vpop.f32.mrb[24].mxu1  ;;  %v12780_v7 = vmax.f32 %v5514_v51, 0.0 }
 0xdae   : > { %v5519_v43 = vpop.f32.mrb[25].mxu1  ;;  %15003 = vst [vmem:[#allocation31_spill] sm:$0xff] %v12707_v46  ;;  %v5443_v34 = vadd.f32 %v5442_v35, %v12660_v42  ;;  %15004 = vst [vmem:[#allocation26_spill] sm:$0xff] %v12715_v1  ;;  %v5518_v58 = vadd.f32 %v5517_v19, %v12660_v42 }
 0xdaf   : > { %v12674_v45 = vmax.f32 %v5441_v16, 0.0  ;;  %15007 = vst [vmem:[#allocation15_spill] sm:$0xff] %v12780_v7  ;;  %v5520_v48 = vadd.f32 %v5519_v43, %v12660_v42  ;;  %v12903_v16 = vrot.slane %v12871_v11, %v14959_v29 }
 0xdb0   : > { %v12717_v9 = vmax.f32 %v5443_v34, 0.0  ;;  %v12724_v12 = vmax.f32 %v5518_v58, 0.0 }
 0xdb1   : > { %15002 = vst [vmem:[#allocation25_spill] sm:$0xff] %v12674_v45  ;;  %5532 = vrot.lane.b32.xlu1 %v12674_v45, %s9841_s6  ;;  %5592 = vrot.lane.b32.xlu0 %v12658_v50, %s9835_s25  ;;  %v12787_v62 = vmax.f32 %v5520_v48, 0.0 }
 0xdb2   : > { %15005 = vst [vmem:[#allocation30_spill] sm:$0xff] %v12717_v9  ;;  %15006 = vst [vmem:[#allocation32_spill] sm:$0xff] %v12724_v12 }
 0xdb3   : > { %15008 = vst [vmem:[#allocation13_spill] sm:$0xff] %v12787_v62 }
 0xdb5   : > { %5594 = vrot.lane.b32.xlu1 %v12674_v45, %s9835_s25  ;;  %5654 = vrot.lane.b32.xlu0 %v12658_v50, %s9836_s26 }
 0xdb9   : > { %5656 = vrot.lane.b32.xlu1 %v12674_v45, %s9836_s26  ;;  %5716 = vrot.lane.b32.xlu0 %v12658_v50, %s9837_s27 }
 0xdbd   : > { %5718 = vrot.lane.b32.xlu1 %v12674_v45, %s9837_s27  ;;  %5786 = vrot.lane.b32.xlu0 %v12658_v50, %s9838_s28 }
 0xdc1   : > { %5788 = vrot.lane.b32.xlu1 %v12674_v45, %s9838_s28  ;;  %5848 = vrot.lane.b32.xlu0 %v12658_v50, %s9839_s29 }
 0xdc5   : > { %5850 = vrot.lane.b32.xlu1 %v12674_v45, %s9839_s29  ;;  %5910 = vrot.lane.b32.xlu0 %v12658_v50, %s9840_s30 }
 0xdc9   : > { %5912 = vrot.lane.b32.xlu1 %v12674_v45, %s9840_s30  ;;  %5972 = vrot.lane.b32.xlu0 %v12658_v50, %s9842_s7  ;;  %v12972_v50 = vld [vmem:[%s14794_s1 + $0x7] ss:$8 sm:$0xf] }
 0xdca   : > { %15020 = vst [vmem:[#allocation11_spill] sm:$0xff] %v12972_v50 }
 0xdcd   : > { %5974 = vrot.lane.b32.xlu1 %v12674_v45, %s9842_s7  ;;  %5534 = vrot.lane.b32.xlu0 %v12707_v46, %s9841_s6  ;;  %v12994_v45 = vrot.slane %v9031_v25, %v14999_v61 }
 0xdd1   : > { %5536 = vrot.lane.b32.xlu1 %v12717_v9, %s9841_s6  ;;  %5538 = vrot.lane.b32.xlu0 %v12715_v1, %s9841_s6 }
 0xdd5   : > { %5540 = vrot.lane.b32.xlu1 %v12724_v12, %s9841_s6  ;;  %5596 = vrot.lane.b32.xlu0 %v12707_v46, %s9835_s25 }
 0xdd9   : > { %5598 = vrot.lane.b32.xlu1 %v12717_v9, %s9835_s25  ;;  %5600 = vrot.lane.b32.xlu0 %v12715_v1, %s9835_s25 }
 0xddd   : > { %5602 = vrot.lane.b32.xlu1 %v12724_v12, %s9835_s25  ;;  %5658 = vrot.lane.b32.xlu0 %v12707_v46, %s9836_s26 }
 0xde1   : > { %5660 = vrot.lane.b32.xlu1 %v12717_v9, %s9836_s26  ;;  %5662 = vrot.lane.b32.xlu0 %v12715_v1, %s9836_s26 }
 0xde5   : > { %5664 = vrot.lane.b32.xlu1 %v12724_v12, %s9836_s26  ;;  %5720 = vrot.lane.b32.xlu0 %v12707_v46, %s9837_s27 }
 0xde9   : > { %5722 = vrot.lane.b32.xlu1 %v12717_v9, %s9837_s27  ;;  %5724 = vrot.lane.b32.xlu0 %v12715_v1, %s9837_s27 }
 0xded   : > { %5726 = vrot.lane.b32.xlu1 %v12724_v12, %s9837_s27  ;;  %5790 = vrot.lane.b32.xlu0 %v12707_v46, %s9838_s28 }
 0xdf1   : > { %5792 = vrot.lane.b32.xlu1 %v12717_v9, %s9838_s28  ;;  %5794 = vrot.lane.b32.xlu0 %v12715_v1, %s9838_s28 }
 0xdf5   : > { %5796 = vrot.lane.b32.xlu1 %v12724_v12, %s9838_s28  ;;  %5852 = vrot.lane.b32.xlu0 %v12707_v46, %s9839_s29 }
 0xdf9   : > { %5854 = vrot.lane.b32.xlu1 %v12717_v9, %s9839_s29  ;;  %5856 = vrot.lane.b32.xlu0 %v12715_v1, %s9839_s29 }
 0xdfd   : > { %5858 = vrot.lane.b32.xlu1 %v12724_v12, %s9839_s29  ;;  %5914 = vrot.lane.b32.xlu0 %v12707_v46, %s9840_s30 }
 0xe01   : > { %5916 = vrot.lane.b32.xlu1 %v12717_v9, %s9840_s30  ;;  %5918 = vrot.lane.b32.xlu0 %v12715_v1, %s9840_s30 }
 0xe05   : > { %5920 = vrot.lane.b32.xlu1 %v12724_v12, %s9840_s30  ;;  %5976 = vrot.lane.b32.xlu0 %v12707_v46, %s9842_s7 }
 0xe09   : > { %5978 = vrot.lane.b32.xlu1 %v12717_v9, %s9842_s7  ;;  %5542 = vrot.lane.b32.xlu0 %v12780_v7, %s9841_s6  ;;  %v5559_v9 = vrot.slane %v12853_v4, %v15000_v27 }
 0xe0d   : > { %5544 = vrot.lane.b32.xlu1 %v12787_v62, %s9841_s6  ;;  %5604 = vrot.lane.b32.xlu0 %v12780_v7, %s9835_s25 }
 0xe11   : > { %5606 = vrot.lane.b32.xlu1 %v12787_v62, %s9835_s25  ;;  %5666 = vrot.lane.b32.xlu0 %v12780_v7, %s9836_s26 }
 0xe15   : > { %5668 = vrot.lane.b32.xlu1 %v12787_v62, %s9836_s26  ;;  %5728 = vrot.lane.b32.xlu0 %v12780_v7, %s9837_s27 }
 0xe19   : > { %5730 = vrot.lane.b32.xlu1 %v12787_v62, %s9837_s27  ;;  %5980 = vrot.lane.b32.xlu0 %v12715_v1, %s9842_s7  ;;  %v13000_v1 = vrot.slane %v9032_v55, %v14999_v61 }
 0xe1b   : > { %15022 = vst [vmem:[#allocation34_spill] sm:$0xff] %v13000_v1  ;;  %v5571_v1 = vrot.slane %v12853_v4, %v14961_v54  ;;  %v13038_v4 = vrot.slane %v12972_v50, %v14999_v61 }
 0xe1d   : > { %5982 = vrot.lane.b32.xlu1 %v12724_v12, %s9842_s7  ;;  %5798 = vrot.lane.b32.xlu0 %v12780_v7, %s9838_s28  ;;  %15028 = vst [vmem:[#allocation37_spill] sm:$0xff] %v13038_v4  ;;  %v13058_v4 = vrot.slane %v9032_v55, %v14961_v54 }
 0xe1f   : > { %v12809_v59 = vpop.permute.xlu0 %5530  ;;  %15033 = vst [vmem:[#allocation45_spill] sm:$0xff] %v13058_v4 }
 0xe21   : > { %5800 = vrot.lane.b32.xlu1 %v12787_v62, %s9838_s28  ;;  %5860 = vrot.lane.b32.xlu0 %v12780_v7, %s9839_s29 }
 0xe23   : > { %v12815_v10 = vpop.permute.xlu1 %5532  ;;  %v12817_v56 = vpop.permute.xlu0 %5592 }
 0xe25   : > { %5862 = vrot.lane.b32.xlu1 %v12787_v62, %s9839_s29  ;;  %5922 = vrot.lane.b32.xlu0 %v12780_v7, %s9840_s30 }
 0xe27   : > { %v12823_v21 = vpop.permute.xlu1 %5594  ;;  %v12825_v3 = vpop.permute.xlu0 %5654 }
 0xe29   : > { %5924 = vrot.lane.b32.xlu1 %v12787_v62, %s9840_s30  ;;  %5984 = vrot.lane.b32.xlu0 %v12780_v7, %s9842_s7 }
 0xe2b   : > { %v12831_v13 = vpop.permute.xlu1 %5656  ;;  %v12833_v14 = vpop.permute.xlu0 %5716 }
 0xe2d   : > { %5986 = vrot.lane.b32.xlu1 %v12787_v62, %s9842_s7  ;;  %6110 = vperm.xlu0 %9772, %v12665_v60   ;;  %v13012_v62 = vrot.slane %v12972_v50, %v15000_v27 }
 0xe2f   : > { %v12838_v32 = vpop.permute.xlu1 %5718  ;;  %v12840_v33 = vpop.permute.xlu0 %5786  ;;  %15026 = vst [vmem:[#allocation41_spill] sm:$0xff] %v13012_v62  ;;  %v13031_v62 = vrot.slane %v9030_v31, %v15000_v27 }
 0xe33   : > { %v12842_v37 = vpop.permute.xlu1 %5788  ;;  %v12844_v0 = vpop.permute.xlu0 %5848 }
 0xe34   : > { %15009 = vst [vmem:[#allocation27_spill] sm:$0xff] %v12844_v0  ;;  %v13041_v0 = vrot.slane %v9031_v25, %v14959_v29 }
 0xe36   : > { %15029 = vst [vmem:[#allocation22_spill] sm:$0xff] %v13041_v0 }
 0xe37   : > { %v12846_v28 = vpop.permute.xlu1 %5850  ;;  %v12848_v38 = vpop.permute.xlu0 %5910 }
 0xe38   : > { %15010 = vst [vmem:[#allocation20_spill] sm:$0xff] %v12848_v38 }
 0xe3b   : > { %v12855_v39 = vpop.permute.xlu1 %5912  ;;  %v12857_v57 = vpop.permute.xlu0 %5972 }
 0xe3c   : > { %15011 = vst [vmem:[#allocation28_spill] sm:$0xff] %v12855_v39  ;;  %15012 = vst [vmem:[#allocation21_spill] sm:$0xff] %v12857_v57  ;;  %v9033_v57 = vld [vmem:[%s14794_s1 + $0x6] ss:$8 sm:$0xf]  ;;  %v12997_v39 = vrot.slane %v9032_v55, %v15000_v27 }
 0xe3d   : > { %v13003_v12 = vrot.slane %v9033_v57, %v15000_v27  ;;  %v13078_v0 = vrot.slane %v9033_v57, %v14961_v54 }
 0xe3e   : > { %15021 = vst [vmem:[#allocation33_spill] sm:$0xff] %v12997_v39 }
 0xe3f   : > { %v12861_v8 = vpop.permute.xlu1 %5974  ;;  %v5535_v53 = vpop.permute.xlu0 %5534  ;;  %15023 = vst [vmem:[#allocation16_spill] sm:$0xff] %v13003_v12  ;;  %v5621_v12 = vrot.slane %v12871_v11, %v15000_v27  ;;  %15035 = vst [vmem:[#allocation10_spill] sm:$0xff] %v13078_v0 }
 0xe40   : > { %15013 = vst [vmem:[#allocation35_spill] sm:$0xff] %v12861_v8  ;;  %v5550_v17 = vsel %vm261_vm6, %v12809_v59, %v5535_v53 }
 0xe41   : > { %v5577_v23 = vmul.f32 %v5563_v63, %v5550_v17 }
 0xe43   : > { %5585 = vst [vmem:[#allocation4 + $0x8] sm:$0xff] %v5577_v23  ;;  %v5537_v40 = vpop.permute.xlu1 %5536  ;;  %v12873_v20 = vpop.permute.xlu0 %5538 }
 0xe44   : > { %v5551_v18 = vsel %vm261_vm6, %v12815_v10, %v5537_v40  ;;  %v5548_v22 = vsel %vm261_vm6, %v5535_v53, %v12873_v20 }
 0xe45   : > { %v5581_v5 = vmul.f32 %v5563_v63, %v5551_v18  ;;  %v12881_v24 = vmul.f32 %v5567_v49, %v5548_v22 }
 0xe47   : > { %5589 = vst [vmem:[#allocation4 + $0x28] sm:$0xff] %v5581_v5  ;;  %5586 = vst [vmem:[#allocation4 + $0x10] sm:$0xff] %v12881_v24  ;;  %v12888_v36 = vpop.permute.xlu1 %5540  ;;  %v5597_v30 = vpop.permute.xlu0 %5596  ;;  %v9557_v41 = vpack.c.bf16 %v5581_v5, %v5577_v23 }
 0xe48   : > { %v5549_v2 = vsel %vm261_vm6, %v5537_v40, %v12888_v36  ;;  %v5612_v42 = vsel %vm304_vm1, %v12817_v56, %v5597_v30 }
 0xe49   : > { %v12896_v26 = vmul.f32 %v5567_v49, %v5549_v2  ;;  %v12899_v60 = vmul.f32 %v12885_v52, %v5612_v42  ;;  %9558 = vmatprep.subr.bf16.mxu0 %v9557_v41 }
 0xe4b   : > { %5590 = vst [vmem:[#allocation4 + $0x30] sm:$0xff] %v12896_v26  ;;  %5647 = vst [vmem:[#allocation4 + $0x48] sm:$0xff] %v12899_v60  ;;  %v5599_v35 = vpop.permute.xlu1 %5598  ;;  %v12907_v19 = vpop.permute.xlu0 %5600 }
 0xe4c   : > { %v5610_v43 = vsel %vm304_vm1, %v5597_v30, %v12907_v19 }
 0xe4d   : > { %v12913_v44 = vmul.f32 %v12903_v16, %v5610_v43  ;;  %v9029_v43 = vld [vmem:[%s14794_s1 + $0x2] ss:$8 sm:$0xf] }
 0xe4e   : > { %v5687_v38 = vrot.slane %v9029_v43, %v14999_v61  ;;  %v13028_v39 = vrot.slane %v9029_v43, %v14961_v54 }
 0xe4f   : > { %5648 = vst [vmem:[#allocation4 + $0x50] sm:$0xff] %v12913_v44  ;;  %v12916_v6 = vpop.permute.xlu1 %5602  ;;  %v12918_v34 = vpop.permute.xlu0 %5658 }
 0xe53   : > { %v5661_v58 = vpop.permute.xlu1 %5660  ;;  %v12920_v51 = vpop.permute.xlu0 %5662 }
 0xe57   : > { %v12922_v48 = vpop.permute.xlu1 %5664  ;;  %v12924_v63 = vpop.permute.xlu0 %5720 }
 0xe5b   : > { %v12926_v53 = vpop.permute.xlu1 %5722  ;;  %v12928_v17 = vpop.permute.xlu0 %5724 }
 0xe5f   : > { %v12930_v23 = vpop.permute.xlu1 %5726  ;;  %v12932_v49 = vpop.permute.xlu0 %5790 }
 0xe63   : > { %v12934_v40 = vpop.permute.xlu1 %5792  ;;  %v12936_v18 = vpop.permute.xlu0 %5794 }
 0xe67   : > { %v12938_v22 = vpop.permute.xlu1 %5796  ;;  %v12940_v5 = vpop.permute.xlu0 %5852 }
 0xe68   : > { %15014 = vst [vmem:[#allocation29_spill] sm:$0xff] %v12940_v5  ;;  %v13047_v5 = vrot.slane %v9032_v55, %v14959_v29 }
 0xe6a   : > { %15031 = vst [vmem:[#allocation38_spill] sm:$0xff] %v13047_v5  ;;  %v5675_v5 = vsel %vm360_vm0, %v12831_v13, %v5661_v58 }
 0xe6b   : > { %v12942_v30 = vpop.permute.xlu1 %5854  ;;  %v12944_v41 = vpop.permute.xlu0 %5856 }
 0xe6c   : > { %15015 = vst [vmem:[#allocation39_spill] sm:$0xff] %v12944_v41  ;;  %v12991_v41 = vrot.slane %v9031_v25, %v15000_v27 }
 0xe6f   : > { %v12946_v2 = vpop.permute.xlu1 %5858  ;;  %v12948_v42 = vpop.permute.xlu0 %5914 }
 0xe70   : > { %15016 = vst [vmem:[#allocation18_spill] sm:$0xff] %v12946_v2  ;;  %15017 = vst [vmem:[#allocation17_spill] sm:$0xff] %v12948_v42  ;;  %v12988_v2 = vrot.slane %v9030_v31, %v14959_v29  ;;  %v13006_v42 = vrot.slane %v9033_v57, %v14999_v61 }
 0xe72   : > { %15024 = vst [vmem:[#allocation14_spill] sm:$0xff] %v13006_v42  ;;  %v5633_v42 = vrot.slane %v12871_v11, %v14961_v54  ;;  %v13044_v11 = vrot.slane %v9031_v25, %v14961_v54  ;;  %v13061_v25 = vrot.slane %v9033_v57, %v14959_v29 }
 0xe73   : > { %v12962_v47 = vpop.permute.xlu1 %5916  ;;  %v12964_v8 = vpop.permute.xlu0 %5918 }
 0xe74   : > { %15018 = vst [vmem:[#allocation40_spill] sm:$0xff] %v12962_v47  ;;  %15019 = vst [vmem:[#allocation12_spill] sm:$0xff] %v12964_v8  ;;  %v12980_v47 = vrot.slane %v9029_v43, %v14959_v29  ;;  %v12983_v8 = vrot.slane %v9030_v31, %v14999_v61 }
 0xe75   : > { %15030 = vst [vmem:[#allocation23_spill] sm:$0xff] %v13044_v11  ;;  %15034 = vst [vmem:[#allocation36_spill] sm:$0xff] %v13061_v25  ;;  %v5673_v11 = vsel %vm360_vm0, %v5661_v58, %v12922_v48  ;;  %v9595_v25 = vpack.c.bf16 %v12896_v26, %v12881_v24  ;;  %v5736_v24 = vsel %vm416_vm2, %v12833_v14, %v12924_v63 }
 0xe76   : > { %v13095_v57 = vmul.f32 %v12980_v47, %v5673_v11 }
 0xe77   : > { %v13008_v7 = vpop.permute.xlu1 %5920  ;;  %v13014_v46 = vpop.permute.xlu0 %5976 }
 0xe78   : > { %15025 = vst [vmem:[#allocation42_spill] sm:$0xff] %v13008_v7  ;;  %15027 = vst [vmem:[#allocation43_spill] sm:$0xff] %v13014_v46  ;;  %v13025_v7 = vrot.slane %v9029_v43, %v15000_v27  ;;  %v13034_v46 = vrot.slane %v9030_v31, %v14961_v54  ;;  %v5613_v43 = vsel %vm304_vm1, %v12823_v21, %v5599_v35 }
 0xe79   : > { %v5611_v31 = vsel %vm304_vm1, %v5599_v35, %v12916_v6  ;;  %v5643_v50 = vmul.f32 %v12885_v52, %v5613_v43  ;;  %v5737_v52 = vsel %vm416_vm2, %v12838_v32, %v12926_v53 }
 0xe7a   : > { %v13082_v58 = vmul.f32 %v12903_v16, %v5611_v31  ;;  %v13118_v29 = vmul.f32 %v12983_v8, %v5737_v52 }
 0xe7b   : > { %v13055_v27 = vpop.permute.xlu1 %5978  ;;  %v5543_v61 = vpop.permute.xlu0 %5542 }
 0xe7c   : > { %15032 = vst [vmem:[#allocation44_spill] sm:$0xff] %v13055_v27  ;;  %v5546_v35 = vsel %vm261_vm6, %v12873_v20, %v5543_v61  ;;  %v5552_v55 = vsel %vm261_vm6, %v5543_v61, %v12809_v59  ;;  %v5674_v20 = vsel %vm360_vm0, %v12825_v3, %v12918_v34  ;;  %v5672_v61 = vsel %vm360_vm0, %v12918_v34, %v12920_v51 }
 0xe7d   : > { %v5576_v4 = vmul.f32 %v5559_v9, %v5552_v55  ;;  %v5579_v27 = vmul.f32 %v5571_v1, %v5546_v35  ;;  %v13092_v59 = vmul.f32 %v5687_v38, %v5675_v5  ;;  %v5701_v54 = vmul.f32 %v5687_v38, %v5674_v20 }
 0xe7f   : > { %5584 = vst [vmem:[#allocation4] sm:$0xff] %v5576_v4  ;;  %5587 = vst [vmem:[#allocation4 + $0x18] sm:$0xff] %v5579_v27  ;;  %v5545_v26 = vpop.permute.xlu1 %5544  ;;  %v5605_v16 = vpop.permute.xlu0 %5604 }
 0xe80   : > { %v5547_v34 = vsel %vm261_vm6, %v12888_v36, %v5545_v26  ;;  %v5553_v5 = vsel %vm261_vm6, %v5545_v26, %v12815_v10  ;;  %v5608_v11 = vsel %vm304_vm1, %v12907_v19, %v5605_v16  ;;  %v5614_v43 = vsel %vm304_vm1, %v5605_v16, %v12817_v56 }
 0xe81   : > { %v5580_v31 = vmul.f32 %v5559_v9, %v5553_v5  ;;  %v5583_v35 = vmul.f32 %v5571_v1, %v5547_v34  ;;  %v5638_v55 = vmul.f32 %v5621_v12, %v5614_v43  ;;  %v5641_v0 = vmul.f32 %v5633_v42, %v5608_v11 }
 0xe82   : > { %v9561_v36 = vpack.c.bf16 %v5643_v50, %v12899_v60  ;;  %v9599_v10 = vpack.c.bf16 %v13082_v58, %v12913_v44  ;;  %v13124_v26 = vmul.f32 %v12980_v47, %v5672_v61  ;;  %v5734_v9 = vsel %vm416_vm2, %v12924_v63, %v12928_v17 }
 0xe83   : > { %5588 = vst [vmem:[#allocation4 + $0x20] sm:$0xff] %v5580_v31  ;;  %5591 = vst [vmem:[#allocation4 + $0x38] sm:$0xff] %v5583_v35  ;;  %v5607_v1 = vpop.permute.xlu1 %5606  ;;  %v5667_v56 = vpop.permute.xlu0 %5666  ;;  %v9559_v38 = vpack.c.bf16 %v5580_v31, %v5576_v4  ;;  %v9593_v19 = vpack.c.bf16 %v5583_v35, %v5579_v27  ;;  %v5763_v50 = vmul.f32 %v12983_v8, %v5736_v24 }
 0xe84   : > { %5646 = vst [vmem:[#allocation4 + $0x40] sm:$0xff] %v5638_v55  ;;  %5649 = vst [vmem:[#allocation4 + $0x58] sm:$0xff] %v5641_v0  ;;  %v5609_v47 = vsel %vm304_vm1, %v12916_v6, %v5607_v1  ;;  %v5615_v60 = vsel %vm304_vm1, %v5607_v1, %v12823_v21  ;;  %v9565_v44 = vpack.c.bf16 %v13092_v59, %v5701_v54 }
 0xe85   : > { %v5642_v63 = vmul.f32 %v5621_v12, %v5615_v60  ;;  %v5645_v58 = vmul.f32 %v5633_v42, %v5609_v47  ;;  %v5676_v20 = vsel %vm360_vm0, %v5667_v56, %v12825_v3  ;;  %9560 = vmatpush1.bf16.msra.mxu0 %v9559_v38  ;;  %v9603_v27 = vpack.c.bf16 %v13095_v57, %v13124_v26  ;;  %v15038_v26 = vld [vmem:[#allocation39_spill] sm:$0xff] }
 0xe86   : > { %v13144_v8 = vmul.f32 %v12988_v2, %v5734_v9  ;;  %v5670_v6 = vsel %vm360_vm0, %v12920_v51, %v5667_v56  ;;  %9594 = vmatprep.subr.bf16.mxu1 %v9593_v19  ;;  %9562 = vmatprep.subr.bf16.mxu0 %v9561_v36  ;;  %v9569_v54 = vpack.c.bf16 %v13118_v29, %v5763_v50  ;;  %v15036_v36 = vld [vmem:[#allocation29_spill] sm:$0xff]  ;;  %v15040_v9 = vld [vmem:[#allocation18_spill] sm:$0xff]  ;;  %v15041_v60 = vld [vmem:[#allocation7_spill] sm:$0xff] }
 0xe87   : > { %v5735_v12 = vsel %vm416_vm2, %v12926_v53, %v12930_v23  ;;  %v5806_v21 = vsel %vm476_vm3, %v12840_v33, %v12932_v49  ;;  %v5669_v3 = vpop.permute.xlu1 %5668  ;;  %v5729_v42 = vpop.permute.xlu0 %5728  ;;  %9596 = vmatpush1.bf16.msra.mxu1 %v9595_v25  ;;  %v9563_v4 = vpack.c.bf16 %v5642_v63, %v5638_v55  ;;  %v9597_v61 = vpack.c.bf16 %v5645_v58, %v5641_v0  ;;  %v15043_v58 = vld [vmem:[#allocation9_spill] sm:$0xff] }
 0xe88   : > { %v5807_v29 = vsel %vm476_vm3, %v12842_v37, %v12934_v40  ;;  %v5700_v51 = vmul.f32 %v13025_v7, %v5676_v20  ;;  %v5671_v53 = vsel %vm360_vm0, %v12922_v48, %v5669_v3  ;;  %v5677_v59 = vsel %vm360_vm0, %v5669_v3, %v12831_v13  ;;  %v15046_v3 = vld [vmem:[#allocation31_spill] sm:$0xff] }
 0xe89   : > { %v5703_v57 = vmul.f32 %v13028_v39, %v5670_v6  ;;  %v5704_v25 = vmul.f32 %v13025_v7, %v5677_v59  ;;  %v5707_v0 = vmul.f32 %v13028_v39, %v5671_v53  ;;  %v5738_v24 = vsel %vm416_vm2, %v5729_v42, %v12833_v14  ;;  %9564 = vmatpush1.bf16.msra.mxu0 %v9563_v4  ;;  %v15051_v53 = vld [vmem:[#allocation28_spill] sm:$0xff] }
 0xe8a   : > { %v5768_v52 = vmul.f32 %v12988_v2, %v5735_v12  ;;  %v5804_v48 = vsel %vm476_vm3, %v12932_v49, %v12936_v18  ;;  %v5732_v13 = vsel %vm416_vm2, %v12928_v17, %v5729_v42  ;;  %9598 = vmatprep.subr.bf16.mxu1 %v9597_v61  ;;  %9566 = vmatprep.subr.bf16.mxu0 %v9565_v44  ;;  %v15042_v44 = vld [vmem:[#allocation11_spill] sm:$0xff]  ;;  %v15048_v61 = vld [vmem:[#allocation17_spill] sm:$0xff] }
 0xe8b   : > { %v13184_v7 = vmul.f32 %v12991_v41, %v5807_v29  ;;  %v5805_v14 = vsel %vm476_vm3, %v12934_v40, %v12938_v22  ;;  %v5731_v39 = vpop.permute.xlu1 %5730  ;;  %v13190_v2 = vpop.permute.xlu0 %5980  ;;  %9600 = vmatpush1.bf16.msra.mxu1 %v9599_v10  ;;  %v9567_v16 = vpack.c.bf16 %v5704_v25, %v5700_v51  ;;  %v9601_v49 = vpack.c.bf16 %v5707_v0, %v5703_v57  ;;  %v15037_v10 = vld [vmem:[#allocation27_spill] sm:$0xff]  ;;  %v15050_v51 = vld [vmem:[#allocation40_spill] sm:$0xff]  ;;  %v15052_v57 = vld [vmem:[#allocation42_spill] sm:$0xff] }
 0xe8c   : > { %v5869_v17 = vsel %vm532_vm4, %v12846_v28, %v12942_v30  ;;  %v5762_v34 = vmul.f32 %v13031_v62, %v5738_v24  ;;  %v5733_v5 = vsel %vm416_vm2, %v12930_v23, %v5731_v39  ;;  %v5739_v40 = vsel %vm416_vm2, %v5731_v39, %v12838_v32 }
 0xe8d   : > { %v5765_v11 = vmul.f32 %v13034_v46, %v5732_v13  ;;  %v5766_v43 = vmul.f32 %v13031_v62, %v5739_v40  ;;  %v5769_v31 = vmul.f32 %v13034_v46, %v5733_v5  ;;  %9568 = vmatpush1.bf16.msra.mxu0 %v9567_v16  ;;  %9602 = vmatprep.subr.bf16.mxu1 %v9601_v49  ;;  %v15039_v62 = vld [vmem:[#allocation33_spill] sm:$0xff]  ;;  %v15054_v13 = vld [vmem:[#allocation22_spill] sm:$0xff]  ;;  %v15056_v49 = vld [vmem:[#allocation15_spill] sm:$0xff] }
 0xe8e   : > { %v13207_v35 = vmul.f32 %v12991_v41, %v5806_v21  ;;  %v5837_v55 = vmul.f32 %v12994_v45, %v5805_v14  ;;  %v5868_v23 = vsel %vm532_vm4, %v15037_v10, %v15036_v36  ;;  %v5866_v32 = vsel %vm532_vm4, %v15036_v36, %v15038_v26  ;;  %9570 = vmatprep.subr.bf16.mxu0 %v9569_v54  ;;  %v15045_v21 = vld [vmem:[#allocation30_spill] sm:$0xff]  ;;  %v15055_v16 = vld [vmem:[#allocation13_spill] sm:$0xff] }
 0xe8f   : > { %v13219_v46 = vmul.f32 %v15039_v62, %v5869_v17  ;;  %v5867_v41 = vsel %vm532_vm4, %v12942_v30, %v15040_v9  ;;  %v13225_v1 = vpop.permute.xlu1 %5982  ;;  %v5799_v56 = vpop.permute.xlu0 %5798  ;;  %9604 = vmatpush1.bf16.msra.mxu1 %v9603_v27  ;;  %v9571_v38 = vpack.c.bf16 %v5766_v43, %v5762_v34  ;;  %v9605_v19 = vpack.c.bf16 %v5769_v31, %v5765_v11  ;;  %v15058_v34 = vld [vmem:[#allocation23_spill] sm:$0xff]  ;;  %v15059_v31 = vld [vmem:[#allocation25_spill] sm:$0xff]  ;;  %v15063_v36 = vld [vmem:[#allocation14_spill] sm:$0xff] }
 0xe90   : > { %v5833_v50 = vmul.f32 %v12994_v45, %v5804_v48  ;;  %v9607_v47 = vpack.c.bf16 %v5768_v52, %v13144_v8  ;;  %v13231_v63 = vrot.slane %v15042_v44, %v15041_v60  ;;  %v13235_v20 = vrot.slane %v15042_v44, %v15043_v58  ;;  %v15044_v8 = vld [vmem:[#allocation34_spill] sm:$0xff]  ;;  %v15053_v52 = vld [vmem:[#allocation12_spill] sm:$0xff] }
 0xe91   : > { %v13238_v30 = vmul.f32 %v15039_v62, %v5868_v23  ;;  %v5802_v27 = vsel %vm476_vm3, %v12936_v18, %v5799_v56  ;;  %9572 = vmatpush1.bf16.msra.mxu0 %v9571_v38  ;;  %9606 = vmatprep.subr.bf16.mxu1 %v9605_v19  ;;  %v9579_v45 = vpack.c.bf16 %v13184_v7, %v13207_v35  ;;  %v15049_v18 = vld [vmem:[#allocation20_spill] sm:$0xff]  ;;  %v15065_v19 = vld [vmem:[#allocation26_spill] sm:$0xff] }
 0xe92   : > { %v5895_v6 = vmul.f32 %v15044_v8, %v5866_v32  ;;  %v5899_v54 = vmul.f32 %v15044_v8, %v5867_v41  ;;  %v5808_v12 = vsel %vm476_vm3, %v5799_v56, %v12840_v33  ;;  %v15047_v42 = vpack.c.bf16 %v15045_v21, %v15046_v3  ;;  %v15064_v38 = vld [vmem:[#allocation32_spill] sm:$0xff] }
 0xe93   : > { %v9577_v4 = vpack.c.bf16 %v5837_v55, %v5833_v50  ;;  %v5930_v29 = vsel %vm588_vm5, %v15049_v18, %v15048_v61  ;;  %v5931_v59 = vsel %vm588_vm5, %v15051_v53, %v15050_v51  ;;  %v5929_v33 = vsel %vm588_vm5, %v15050_v51, %v15052_v57  ;;  %v5801_v25 = vpop.permute.xlu1 %5800  ;;  %v5861_v0 = vpop.permute.xlu0 %5860  ;;  %9608 = vmatpush1.bf16.msra.mxu1 %v9607_v47  ;;  %v15062_v55 = vld [vmem:[#allocation16_spill] sm:$0xff] }
 0xe94   : > { %9574 = vmatprep.subr.bf16.mxu0 %v15047_v42  ;;  %v9583_v24 = vpack.c.bf16 %v13219_v46, %v13238_v30  ;;  %v5928_v48 = vsel %vm588_vm5, %v15048_v61, %v15053_v52  ;;  %v5834_v7 = vmul.f32 %v15054_v13, %v5802_v27  ;;  %v5803_v14 = vsel %vm476_vm3, %v12938_v22, %v5801_v25  ;;  %v15060_v22 = vld [vmem:[#allocation19_spill] sm:$0xff]  ;;  %v15067_v30 = vld [vmem:[#allocation44_spill] sm:$0xff] }
 0xe95   : > { %v5809_v39 = vsel %vm476_vm3, %v5801_v25, %v12842_v37  ;;  %v15057_v17 = vpack.c.bf16 %v15055_v16, %v15056_v49  ;;  %v5835_v5 = vmul.f32 %v15058_v34, %v5808_v12  ;;  %v5838_v40 = vmul.f32 %v15054_v13, %v5803_v14  ;;  %v15069_v12 = vld [vmem:[#allocation45_spill] sm:$0xff]  ;;  %v15070_v61 = vld [vmem:[#allocation43_spill] sm:$0xff]  ;;  %v15075_v49 = vld [vmem:[#allocation10_spill] sm:$0xff] }
 0xe96   : > { %v5839_v11 = vmul.f32 %v15058_v34, %v5809_v39  ;;  %v5864_v43 = vsel %vm532_vm4, %v15038_v26, %v5861_v0  ;;  %v15061_v35 = vpack.c.bf16 %v15059_v31, %v15060_v22  ;;  %v5956_v37 = vmul.f32 %v15062_v55, %v5930_v29  ;;  %v15071_v29 = vld [vmem:[#allocation21_spill] sm:$0xff] }
 0xe97   : > { %9610 = vmatprep.subr.bf16.mxu1 %v15057_v17  ;;  %v5961_v23 = vmul.f32 %v15063_v36, %v5929_v33  ;;  %v5870_v32 = vsel %vm532_vm4, %v5861_v0, %v15037_v10  ;;  %v9581_v62 = vpack.c.bf16 %v5899_v54, %v5895_v6  ;;  %v5960_v46 = vmul.f32 %v15062_v55, %v5931_v59  ;;  %v5863_v56 = vpop.permute.xlu1 %5862  ;;  %v5923_v26 = vpop.permute.xlu0 %5922  ;;  %v15068_v10 = vld [vmem:[#allocation38_spill] sm:$0xff]  ;;  %v15072_v59 = vld [vmem:[#allocation35_spill] sm:$0xff]  ;;  %v15073_v13 = vld [vmem:[#allocation37_spill] sm:$0xff] }
 0xe98   : > { %9576 = vmatpush1.bf16.msra.mxu0 %v15061_v35  ;;  %v5957_v41 = vmul.f32 %v15063_v36, %v5928_v48  ;;  %v15066_v50 = vpack.c.bf16 %v15064_v38, %v15065_v19  ;;  %v9613_v47 = vpack.c.bf16 %v5839_v11, %v5835_v5  ;;  %v9615_v44 = vpack.c.bf16 %v5838_v40, %v5834_v7  ;;  %v15074_v7 = vld [vmem:[#allocation36_spill] sm:$0xff] }
 0xe99   : > { %9578 = vmatprep.subr.bf16.mxu0 %v9577_v4  ;;  %v5991_v27 = vsel %vm644_vm7, %v15067_v30, %v13225_v1  ;;  %v5896_v8 = vmul.f32 %v15068_v10, %v5864_v43  ;;  %v5865_v6 = vsel %vm532_vm4, %v15040_v9, %v5863_v56  ;;  %v5871_v54 = vsel %vm532_vm4, %v5863_v56, %v12846_v28  ;;  %v15076_v43 = vld [vmem:[#allocation41_spill] sm:$0xff] }
 0xe9a   : > { %9612 = vmatpush1.bf16.msra.mxu1 %v15066_v50  ;;  %v5897_v21 = vmul.f32 %v15069_v12, %v5870_v32  ;;  %v5900_v3 = vmul.f32 %v15068_v10, %v5865_v6  ;;  %v5901_v42 = vmul.f32 %v15069_v12, %v5871_v54  ;;  %v5926_v4 = vsel %vm588_vm5, %v15053_v52, %v5923_v26 }
 0xe9b   : > { %v5992_v9 = vsel %vm644_vm7, %v15071_v29, %v15070_v61  ;;  %v5932_v28 = vsel %vm588_vm5, %v5923_v26, %v15049_v18  ;;  %9614 = vmatprep.subr.bf16.mxu1 %v9613_v47  ;;  %v9585_v51 = vpack.c.bf16 %v5961_v23, %v5957_v41  ;;  %v5993_v33 = vsel %vm644_vm7, %v15072_v59, %v15067_v30  ;;  %v5925_v25 = vpop.permute.xlu1 %5924  ;;  %v5985_v0 = vpop.permute.xlu0 %5984 }
 0xe9c   : > { %9580 = vmatpush1.bf16.msra.mxu0 %v9579_v45  ;;  %v5990_v45 = vsel %vm644_vm7, %v15070_v61, %v13190_v2  ;;  %v9617_v52 = vpack.c.bf16 %v5901_v42, %v5897_v21  ;;  %v9619_v48 = vpack.c.bf16 %v5900_v3, %v5896_v8  ;;  %v6023_v18 = vmul.f32 %v15073_v13, %v5991_v27  ;;  %v15078_v3 = vld [vmem:[#allocation5_spill] sm:$0xff] }
 0xe9d   : > { %9582 = vmatprep.subr.bf16.mxu0 %v9581_v62  ;;  %v5958_v14 = vmul.f32 %v15074_v7, %v5926_v4  ;;  %v5927_v39 = vsel %vm588_vm5, %v15052_v57, %v5925_v25  ;;  %v5933_v16 = vsel %vm588_vm5, %v5925_v25, %v15051_v53  ;;  %v5959_v17 = vmul.f32 %v15075_v49, %v5932_v28 }
 0xe9e   : > { %9616 = vmatpush1.bf16.msra.mxu1 %v9615_v44  ;;  %v5962_v34 = vmul.f32 %v15074_v7, %v5927_v39  ;;  %v5963_v5 = vmul.f32 %v15075_v49, %v5933_v16  ;;  %v5988_v40 = vsel %vm644_vm7, %v13190_v2, %v5985_v0  ;;  %v6019_v11 = vmul.f32 %v15073_v13, %v5990_v45  ;;  %v15081_v13 = vld [vmem:[#allocation6_spill] sm:$0xff] }
 0xe9f   : > { %v5994_v57 = vsel %vm644_vm7, %v5985_v0, %v15071_v29  ;;  %9618 = vmatprep.subr.bf16.mxu1 %v9617_v52  ;;  %v9587_v53 = vpack.c.bf16 %v5960_v46, %v5956_v37  ;;  %v6018_v31 = vmul.f32 %v15076_v43, %v5992_v9  ;;  %v6022_v22 = vmul.f32 %v15076_v43, %v5993_v33  ;;  %v5987_v35 = vpop.permute.xlu1 %5986  ;;  %v15079_v9 = vld [vmem:[#allocation24_spill] sm:$0xff] }
 0xea0   : > { %9584 = vmatpush1.bf16.msra.mxu0 %v9583_v24  ;;  %v9621_v55 = vpack.c.bf16 %v5963_v5, %v5959_v17  ;;  %v9623_v36 = vpack.c.bf16 %v5962_v34, %v5958_v14  ;;  %v6020_v2 = vmul.f32 %v13231_v63, %v5988_v40  ;;  %v5989_v24 = vsel %vm644_vm7, %v13225_v1, %v5987_v35  ;;  %v6034_v1 = vld [vmem:[%s14795_s2 + $0x90] sm:$0x3]  ;;  %v6719_v0 = vld [vmem:[%s14795_s2 + $0xa8] sm:$0xff] }
 0xea1   : > { %9586 = vmatprep.subr.bf16.mxu0 %v9585_v51  ;;  %v5995_v23 = vsel %vm644_vm7, %v5987_v35, %v15072_v59  ;;  %v9589_v32 = vpack.c.bf16 %v6023_v18, %v6019_v11  ;;  %v6021_v37 = vmul.f32 %v13235_v20, %v5994_v57  ;;  %v6024_v62 = vmul.f32 %v13231_v63, %v5989_v24  ;;  %v13416_v52 = vld [vmem:[%s14794_s1 + $0x1] ss:$8 sm:$0xf]  ;;  %v13425_v7 = vld [vmem:[%s14794_s1 + $0x2] ss:$8 sm:$0xf] }
 0xea2   : > { %9620 = vmatpush1.bf16.msra.mxu1 %v9619_v48  ;;  %v6025_v46 = vmul.f32 %v13235_v20, %v5995_v23  ;;  %v9591_v41 = vpack.c.bf16 %v6022_v22, %v6018_v31  ;;  %v15077_v38 = vmov 0.0   ;;  %v6369_v18 = vrot.slane %v13416_v52, %v15081_v13  ;;  %v13437_v34 = vld [vmem:[%s14794_s1 + $0x3] ss:$8 sm:$0xf] }
 0xea3   : > { %9622 = vmatprep.subr.bf16.mxu1 %v9621_v55  ;;  %v9627_v26 = vpack.c.bf16 %v6024_v62, %v6020_v2  ;;  %v6423_v17 = vrot.slane %v13425_v7, %v15081_v13  ;;  %v6477_v43 = vrot.slane %v13437_v34, %v15081_v13  ;;  %v13449_v31 = vld [vmem:[%s14794_s1 + $0x4] ss:$8 sm:$0xf] }
 0xea4   : > { %9588 = vmatpush1.bf16.msra.mxu0 %v9587_v53  ;;  %v9625_v56 = vpack.c.bf16 %v6025_v46, %v6021_v37  ;;  %v15082_v24 = vld [vmem:[#allocation8_spill] sm:$0xff] }
 0xea5   : > { %9590 = vmatprep.subr.bf16.mxu0 %v9589_v32  ;;  %v6531_v23 = vrot.slane %v13449_v31, %v15082_v24  ;;  %v13464_v32 = vld [vmem:[%s14794_s1 + $0x5] ss:$8 sm:$0xf] }
 0xea6   : > { %9624 = vmatpush1.bf16.msra.mxu1 %v9623_v36 }
 0xea7   : > { %9626 = vmatprep.subr.bf16.mxu1 %v9625_v56 }
 0xea8   : > { %9592 = vmatpush1.bf16.msra.mxu0 %v9591_v41 }
 0xeaa   : > { %9628 = vmatpush1.bf16.msra.mxu1 %v9627_v26  ;;  %v6585_v26 = vrot.slane %v13464_v32, %v15082_v24 }
 0xeab   : > { %6180 = vmatmul.mubr.f32.vlgmr.msra.gmra.mrb[26].mxu0 %v6034_v1 }
 0xeac   : > { %6816 = vmatprep.mubr.f32.mxu0 %v15077_v38  ;;  %v6111_v63 = vpop.permute.xlu0 %6110 }
 0xead   : > { %6251 = vmatmul.mubr.f32.vlgmr.msra.gmra.mrb[26].mxu1 %v6034_v1  ;;  %v13479_v1 = vld [vmem:[%s14794_s1 + $0x6] ss:$8 sm:$0xf] }
 0xeae   : > { %6887 = vmatprep.mubr.f32.mxu1 %v15077_v38 }
 0xf7e   : > { %v6181_v20 = vpop.f32.mrb[26].mxu0 }
 0xf7f   : > { %v6182_v19 = vadd.f32 %v6181_v20, %v6111_v63  ;;  %v6183_v50 = vpop.f32.mrb[27].mxu0 }
 0xf80   : > { %v6184_v47 = vadd.f32 %v6183_v50, %v6111_v63  ;;  %v6252_v44 = vpop.f32.mrb[26].mxu1 }
 0xf81   : > { %v6257_v30 = vmax.f32 %v6182_v19, 0.0  ;;  %v6253_v27 = vadd.f32 %v6252_v44, %v6111_v63  ;;  %v6254_v10 = vpop.f32.mrb[27].mxu1  ;;  %v6639_v44 = vrot.slane %v13479_v1, %v15082_v24 }
 0xf82   : > { %v6258_v8 = vmax.f32 %v6184_v47, 0.0  ;;  %v6255_v6 = vadd.f32 %v6254_v10, %v6111_v63 }
 0xf83   : > { %v6259_v54 = vmax.f32 %v6253_v27, 0.0 }
 0xf84   : > { %v6265_v12 = vcombine.low %v6257_v30, %v6258_v8  ;;  %v6260_v21 = vmax.f32 %v6255_v6, 0.0  ;;  %v13494_v30 = vld [vmem:[%s14794_s1] ss:$8 sm:$0xf] }
 0xf86   : > { %v6273_v42 = vrot.slane %v6265_v12, %v15078_v3  ;;  %v6266_v4 = vcombine.low %v6259_v54, %v6260_v21  ;;  %v6327_v12 = vrot.slane %v13494_v30, %v15081_v13 }
 0xf88   : > { %v6280_v61 = vrot.slane %v6266_v4, %v15078_v3  ;;  %v6373_v4 = vrot.slane %v13416_v52, %v15041_v60 }
 0xf8a   : > { %v6281_v29 = vcombine.low %v6273_v42, %v6280_v61 }
 0xf8c   : > { %v13370_v28 = vadd.f32 %v6281_v29, %v15079_v9 }
 0xf8e   : > { %15080 = vst [vmem:[#allocation29_spill] sm:$0xff] %v13370_v28  ;;  %v6285_v51 = vcombine.high %v13370_v28, %v13370_v28  ;;  %v6292_v59 = vrot.slane %v13370_v28, %v15078_v3  ;;  %9040 = vst.sshfl [vmem:[#allocation4 + $0x20] sm:$0x3 pattern:$0x76325410] %v13370_v28 }
 0xf90   : > { %v6299_v33 = vrot.slane %v6285_v51, %v15078_v3  ;;  %9041 = vst.sshfl [vmem:[#allocation4 + $0x30] sm:$0x3 pattern:$0x76325410] %v6285_v51  ;;  %6348 = vrot.lane.b32.xlu1 %v6292_v59, %s9835_s25  ;;  %v6300_v45 = vcombine.high %v6292_v59, %v6292_v59  ;;  %v6365_v51 = vrot.slane %v13416_v52, %v15082_v24 }
 0xf92   : > { %6350 = vrot.lane.b32.xlu0 %v6300_v45, %s9835_s25  ;;  %6511 = vst [vmem:[#allocation4 + $0x28] sm:$0x3] %v6300_v45  ;;  %v6301_v25 = vcombine.high %v6299_v33, %v6299_v33 }
 0xf94   : > { %6402 = vrot.lane.b32.xlu1 %v6292_v59, %s9836_s26  ;;  %6513 = vst [vmem:[#allocation4 + $0x38] sm:$0x3] %v6301_v25 }
 0xf96   : > { %6404 = vrot.lane.b32.xlu0 %v6300_v45, %s9836_s26 }
 0xf98   : > { %6456 = vrot.lane.b32.xlu1 %v6292_v59, %s9837_s27 }
 0xf9a   : > { %6458 = vrot.lane.b32.xlu0 %v6300_v45, %s9837_s27 }
 0xf9c   : > { %6514 = vrot.lane.b32.xlu1 %v6292_v59, %s9838_s28 }
 0xf9e   : > { %6516 = vrot.lane.b32.xlu0 %v6300_v45, %s9838_s28 }
 0xfa0   : > { %6568 = vrot.lane.b32.xlu1 %v6292_v59, %s9839_s29 }
 0xfa2   : > { %6570 = vrot.lane.b32.xlu0 %v6300_v45, %s9839_s29 }
 0xfa4   : > { %6622 = vrot.lane.b32.xlu1 %v6292_v59, %s9840_s30 }
 0xfa6   : > { %6624 = vrot.lane.b32.xlu0 %v6300_v45, %s9840_s30 }
 0xfa8   : > { %6306 = vrot.lane.b32.xlu1 %v6292_v59, %s9841_s6 }
 0xfaa   : > { %6308 = vrot.lane.b32.xlu0 %v6300_v45, %s9841_s6 }
 0xfac   : > { %6352 = vrot.lane.b32.xlu1 %v6299_v33, %s9835_s25 }
 0xfae   : > { %6354 = vrot.lane.b32.xlu0 %v6301_v25, %s9835_s25 }
 0xfb0   : > { %6406 = vrot.lane.b32.xlu1 %v6299_v33, %s9836_s26 }
 0xfb2   : > { %6408 = vrot.lane.b32.xlu0 %v6301_v25, %s9836_s26 }
 0xfb4   : > { %6460 = vrot.lane.b32.xlu1 %v6299_v33, %s9837_s27 }
 0xfb6   : > { %6462 = vrot.lane.b32.xlu0 %v6301_v25, %s9837_s27 }
 0xfb8   : > { %6518 = vrot.lane.b32.xlu1 %v6299_v33, %s9838_s28 }
 0xfba   : > { %6520 = vrot.lane.b32.xlu0 %v6301_v25, %s9838_s28 }
 0xfbc   : > { %6572 = vrot.lane.b32.xlu1 %v6299_v33, %s9839_s29 }
 0xfbe   : > { %6574 = vrot.lane.b32.xlu0 %v6301_v25, %s9839_s29 }
 0xfc0   : > { %6626 = vrot.lane.b32.xlu1 %v6299_v33, %s9840_s30 }
 0xfc2   : > { %6628 = vrot.lane.b32.xlu0 %v6301_v25, %s9840_s30 }
 0xfc4   : > { %6310 = vrot.lane.b32.xlu1 %v6299_v33, %s9841_s6 }
 0xfc6   : > { %6312 = vrot.lane.b32.xlu0 %v6301_v25, %s9841_s6 }
 0xfc8   : > { %6676 = vrot.lane.b32.xlu1 %v6292_v59, %s9842_s7  ;;  %v6377_v59 = vrot.slane %v13416_v52, %v15043_v58 }
 0xfca   : > { %6678 = vrot.lane.b32.xlu0 %v6300_v45, %s9842_s7 }
 0xfcc   : > { %6680 = vrot.lane.b32.xlu1 %v6299_v33, %s9842_s7 }
 0xfce   : > { %6682 = vrot.lane.b32.xlu0 %v6301_v25, %s9842_s7 }
 0xfd0   : > { %6734 = vperm.xlu1 %9773, %v6719_v0   ;;  %v6427_v0 = vrot.slane %v13425_v7, %v15041_v60 }
0x1002   : > { %v13418_v48 = vpop.permute.xlu1 %6348 }
0x1004   : > { %v6351_v14 = vpop.permute.xlu0 %6350 }
0x1005   : > { %v6358_v39 = vsel %vm304_vm1, %v13418_v48, %v6351_v14 }
0x1006   : > { %v6383_v16 = vmul.f32 %v6369_v18, %v6358_v39  ;;  %v13430_v49 = vpop.permute.xlu1 %6402 }
0x1008   : > { %v6391_v5 = vrot.slane %v6383_v16, 6  ;;  %v6405_v40 = vpop.permute.xlu0 %6404  ;;  %v6419_v16 = vrot.slane %v13425_v7, %v15082_v24 }
0x1009   : > { %v6412_v11 = vsel %vm360_vm0, %v13430_v49, %v6405_v40 }
0x100a   : > { %6399 = vst [vmem:[#allocation4 + $0x8] sm:$0xc] %v6391_v5  ;;  %v6437_v57 = vmul.f32 %v6423_v17, %v6412_v11  ;;  %v13442_v53 = vpop.permute.xlu1 %6456  ;;  %v6431_v11 = vrot.slane %v13425_v7, %v15043_v58  ;;  %v6473_v7 = vrot.slane %v13437_v34, %v15082_v24 }
0x100c   : > { %v6445_v22 = vrot.slane %v6437_v57, 4  ;;  %v13451_v35 = vpop.permute.xlu0 %6458 }
0x100d   : > { %v6466_v55 = vsel %vm416_vm2, %v13442_v53, %v13451_v35 }
0x100e   : > { %6453 = vst [vmem:[#allocation4 + $0x8] sm:$0x30] %v6445_v22  ;;  %v6491_v36 = vmul.f32 %v6477_v43, %v6466_v55  ;;  %v13457_v2 = vpop.permute.xlu1 %6514 }
0x1010   : > { %v6499_v37 = vrot.slane %v6491_v36, 2  ;;  %v13466_v62 = vpop.permute.xlu0 %6516 }
0x1011   : > { %v6524_v46 = vsel %vm476_vm3, %v13457_v2, %v13466_v62 }
0x1012   : > { %6507 = vst [vmem:[#allocation4 + $0x8] sm:$0xc0] %v6499_v37  ;;  %v6548_v41 = vmul.f32 %v6531_v23, %v6524_v46  ;;  %v13472_v56 = vpop.permute.xlu1 %6568 }
0x1014   : > { %v6556_v63 = vrot.slane %v6548_v41, 6  ;;  %v13481_v20 = vpop.permute.xlu0 %6570 }
0x1015   : > { %v6578_v19 = vsel %vm532_vm4, %v13472_v56, %v13481_v20 }
0x1016   : > { %6564 = vst [vmem:[#allocation4 + $0x20] sm:$0xc] %v6556_v63  ;;  %v6602_v50 = vmul.f32 %v6585_v26, %v6578_v19  ;;  %v13487_v47 = vpop.permute.xlu1 %6622  ;;  %v6485_v63 = vrot.slane %v13437_v34, %v15043_v58 }
0x1018   : > { %v6610_v27 = vrot.slane %v6602_v50, 4  ;;  %v13496_v10 = vpop.permute.xlu0 %6624 }
0x1019   : > { %v6632_v8 = vsel %vm588_vm5, %v13487_v47, %v13496_v10 }
0x101a   : > { %6618 = vst [vmem:[#allocation4 + $0x20] sm:$0x30] %v6610_v27  ;;  %v6656_v6 = vmul.f32 %v6639_v44, %v6632_v8  ;;  %v13502_v54 = vpop.permute.xlu1 %6306  ;;  %v6535_v8 = vrot.slane %v13449_v31, %v15081_v13 }
0x101c   : > { %v6664_v21 = vrot.slane %v6656_v6, 2  ;;  %v13506_v42 = vpop.permute.xlu0 %6308 }
0x101d   : > { %v6316_v61 = vsel %vm261_vm6, %v13502_v54, %v13506_v42 }
0x101e   : > { %6672 = vst [vmem:[#allocation4 + $0x20] sm:$0xc0] %v6664_v21  ;;  %v6341_v29 = vmul.f32 %v6327_v12, %v6316_v61  ;;  %v6353_v9 = vpop.permute.xlu1 %6352 }
0x101f   : > { %v6357_v33 = vsel %vm304_vm1, %v6351_v14, %v6353_v9 }
0x1020   : > { %6345 = vst [vmem:[#allocation4 + $0x8] sm:$0x3] %v6341_v29  ;;  %v6384_v45 = vmul.f32 %v6373_v4, %v6357_v33  ;;  %v6355_v25 = vpop.permute.xlu0 %6354  ;;  %v6543_v29 = vrot.slane %v13449_v31, %v15043_v58 }
0x1021   : > { %v6356_v18 = vsel %vm304_vm1, %v6353_v9, %v6355_v25  ;;  %v6359_v39 = vsel %vm304_vm1, %v6355_v25, %v13418_v48  ;;  %v6481_v48 = vrot.slane %v13437_v34, %v15041_v60  ;;  %v6539_v34 = vrot.slane %v13449_v31, %v15041_v60 }
0x1022   : > { %v6392_v52 = vrot.slane %v6384_v45, 6  ;;  %v6382_v17 = vmul.f32 %v6365_v51, %v6359_v39  ;;  %v6385_v5 = vmul.f32 %v6377_v59, %v6356_v18  ;;  %v6407_v14 = vpop.permute.xlu1 %6406  ;;  %v6589_v45 = vrot.slane %v13464_v32, %v15081_v13 }
0x1023   : > { %v6411_v57 = vsel %vm360_vm0, %v6405_v40, %v6407_v14  ;;  %v6593_v31 = vrot.slane %v13464_v32, %v15041_v60 }
0x1024   : > { %6400 = vst [vmem:[#allocation4 + $0x10] sm:$0xc] %v6392_v52  ;;  %v6390_v43 = vrot.slane %v6382_v17, 6  ;;  %v6393_v22 = vrot.slane %v6385_v5, 6  ;;  %v6438_v55 = vmul.f32 %v6427_v0, %v6411_v57  ;;  %v6409_v36 = vpop.permute.xlu0 %6408  ;;  %v6597_v52 = vrot.slane %v13464_v32, %v15043_v58 }
0x1025   : > { %v6410_v23 = vsel %vm360_vm0, %v6407_v14, %v6409_v36  ;;  %v6413_v37 = vsel %vm360_vm0, %v6409_v36, %v13430_v49  ;;  %v6643_v57 = vrot.slane %v13479_v1, %v15081_v13  ;;  %v6647_v32 = vrot.slane %v13479_v1, %v15041_v60 }
0x1026   : > { %6398 = vst [vmem:[#allocation4] sm:$0xc] %v6390_v43  ;;  %6401 = vst [vmem:[#allocation4 + $0x18] sm:$0xc] %v6393_v22  ;;  %v6446_v40 = vrot.slane %v6438_v55, 4  ;;  %v6436_v46 = vmul.f32 %v6419_v16, %v6413_v37  ;;  %v6439_v41 = vmul.f32 %v6431_v11, %v6410_v23  ;;  %v6461_v26 = vpop.permute.xlu1 %6460  ;;  %v6651_v23 = vrot.slane %v13479_v1, %v15043_v58 }
0x1027   : > { %v6465_v19 = vsel %vm416_vm2, %v13451_v35, %v6461_v26  ;;  %v6323_v1 = vrot.slane %v13494_v30, %v15082_v24 }
0x1028   : > { %6454 = vst [vmem:[#allocation4 + $0x10] sm:$0x30] %v6446_v40  ;;  %v6444_v50 = vrot.slane %v6436_v46, 4  ;;  %v6447_v44 = vrot.slane %v6439_v41, 4  ;;  %v6492_v49 = vmul.f32 %v6481_v48, %v6465_v19  ;;  %v6463_v27 = vpop.permute.xlu0 %6462  ;;  %v6331_v41 = vrot.slane %v13494_v30, %v15041_v60 }
0x1029   : > { %v6464_v6 = vsel %vm416_vm2, %v6461_v26, %v6463_v27  ;;  %v6467_v12 = vsel %vm416_vm2, %v6463_v27, %v13442_v53 }
0x102a   : > { %6452 = vst [vmem:[#allocation4] sm:$0x30] %v6444_v50  ;;  %6455 = vst [vmem:[#allocation4 + $0x18] sm:$0x30] %v6447_v44  ;;  %v6500_v35 = vrot.slane %v6492_v49, 2  ;;  %v6490_v21 = vmul.f32 %v6473_v7, %v6467_v12  ;;  %v6493_v4 = vmul.f32 %v6485_v63, %v6464_v6  ;;  %v6519_v61 = vpop.permute.xlu1 %6518  ;;  %v6335_v49 = vrot.slane %v13494_v30, %v15043_v58 }
0x102b   : > { %v6523_v9 = vsel %vm476_vm3, %v13466_v62, %v6519_v61 }
0x102c   : > { %6508 = vst [vmem:[#allocation4 + $0x10] sm:$0xc0] %v6500_v35  ;;  %v6498_v51 = vrot.slane %v6490_v21, 2  ;;  %v6501_v59 = vrot.slane %v6493_v4, 2  ;;  %v6549_v53 = vmul.f32 %v6535_v8, %v6523_v9  ;;  %v6521_v33 = vpop.permute.xlu0 %6520 }
0x102d   : > { %v6522_v25 = vsel %vm476_vm3, %v6519_v61, %v6521_v33  ;;  %v6525_v0 = vsel %vm476_vm3, %v6521_v33, %v13457_v2 }
0x102e   : > { %6506 = vst [vmem:[#allocation4] sm:$0xc0] %v6498_v51  ;;  %6509 = vst [vmem:[#allocation4 + $0x18] sm:$0xc0] %v6501_v59  ;;  %v6557_v62 = vrot.slane %v6549_v53, 6  ;;  %v6550_v18 = vmul.f32 %v6539_v34, %v6522_v25  ;;  %v6551_v39 = vmul.f32 %v6543_v29, %v6525_v0  ;;  %v6573_v16 = vpop.permute.xlu1 %6572  ;;  %v6721_v25 = vld [vmem:[#allocation4 + $0x8] sm:$0xff] }
0x102f   : > { %v6577_v17 = vsel %vm532_vm4, %v13481_v20, %v6573_v16 }
0x1030   : > { %6565 = vst [vmem:[#allocation4 + $0x28] sm:$0xc] %v6557_v62  ;;  %v6558_v5 = vrot.slane %v6550_v18, 6  ;;  %v6559_v14 = vrot.slane %v6551_v39, 6  ;;  %v6603_v2 = vmul.f32 %v6589_v45, %v6577_v17  ;;  %v6575_v11 = vpop.permute.xlu0 %6574 }
0x1031   : > { %v6576_v43 = vsel %vm532_vm4, %v6573_v16, %v6575_v11  ;;  %v6579_v22 = vsel %vm532_vm4, %v6575_v11, %v13472_v56 }
0x1032   : > { %6566 = vst [vmem:[#allocation4 + $0x30] sm:$0xc] %v6558_v5  ;;  %6567 = vst [vmem:[#allocation4 + $0x38] sm:$0xc] %v6559_v14  ;;  %v6611_v20 = vrot.slane %v6603_v2, 4  ;;  %v6604_v55 = vmul.f32 %v6593_v31, %v6576_v43  ;;  %v6605_v36 = vmul.f32 %v6597_v52, %v6579_v22  ;;  %v6627_v48 = vpop.permute.xlu1 %6626  ;;  %v6724_v5 = vld [vmem:[#allocation4 + $0x20] sm:$0xff] }
0x1033   : > { %v6631_v37 = vsel %vm588_vm5, %v13496_v10, %v6627_v48 }
0x1034   : > { %6619 = vst [vmem:[#allocation4 + $0x28] sm:$0x30] %v6611_v20  ;;  %v6612_v7 = vrot.slane %v6604_v55, 4  ;;  %v6613_v40 = vrot.slane %v6605_v36, 4  ;;  %v6657_v56 = vmul.f32 %v6643_v57, %v6631_v37  ;;  %v6629_v46 = vpop.permute.xlu0 %6628  ;;  %v6718_v36 = vld [vmem:[%s14795_s2 + $0xa0] sm:$0xff] }
0x1035   : > { %v6630_v26 = vsel %vm588_vm5, %v6627_v48, %v6629_v46  ;;  %v6633_v63 = vsel %vm588_vm5, %v6629_v46, %v13487_v47  ;;  %v9045_v47 = vld [vmem:[%s14794_s1 + $0x7] ss:$8 sm:$0xf] }
0x1036   : > { %6620 = vst [vmem:[#allocation4 + $0x30] sm:$0x30] %v6612_v7  ;;  %6621 = vst [vmem:[#allocation4 + $0x38] sm:$0x30] %v6613_v40  ;;  %v6665_v10 = vrot.slane %v6657_v56, 2  ;;  %v6658_v19 = vmul.f32 %v6647_v32, %v6630_v26  ;;  %v6659_v50 = vmul.f32 %v6651_v23, %v6633_v63  ;;  %v6311_v44 = vpop.permute.xlu1 %6310  ;;  %v6693_v61 = vrot.slane %v9045_v47, %v15082_v24 }
0x1037   : > { %v6315_v27 = vsel %vm261_vm6, %v13506_v42, %v6311_v44  ;;  %v6697_v9 = vrot.slane %v9045_v47, %v15081_v13  ;;  %v6705_v33 = vrot.slane %v9045_v47, %v15043_v58 }
0x1038   : > { %6673 = vst [vmem:[#allocation4 + $0x28] sm:$0xc0] %v6665_v10  ;;  %v6666_v8 = vrot.slane %v6658_v19, 2  ;;  %v6667_v6 = vrot.slane %v6659_v50, 2  ;;  %v6342_v12 = vmul.f32 %v6331_v41, %v6315_v27  ;;  %v6313_v34 = vpop.permute.xlu0 %6312  ;;  %v7240_v27 = vld [vmem:[%s14795_s2 + $0xb8] sm:$0xff] }
0x1039   : > { %v6314_v35 = vsel %vm261_vm6, %v6311_v44, %v6313_v34  ;;  %v6317_v30 = vsel %vm261_vm6, %v6313_v34, %v13502_v54  ;;  %v6701_v54 = vrot.slane %v9045_v47, %v15041_v60  ;;  %v7241_v47 = vld [vmem:[%s14795_s2 + $0xc8] sm:$0xff] }
0x103a   : > { %6674 = vst [vmem:[#allocation4 + $0x30] sm:$0xc0] %v6666_v8  ;;  %6675 = vst [vmem:[#allocation4 + $0x38] sm:$0xc0] %v6667_v6  ;;  %v6340_v42 = vmul.f32 %v6323_v1, %v6317_v30  ;;  %v6343_v21 = vmul.f32 %v6335_v49, %v6314_v35  ;;  %v6677_v4 = vpop.permute.xlu1 %6676 }
0x103b   : > { %6346 = vst [vmem:[#allocation4 + $0x10] sm:$0x3] %v6342_v12  ;;  %v6910_v6 = vld [vmem:[%s14794_s1] ss:$8 sm:$0xf] }
0x103c   : > { %6344 = vst [vmem:[#allocation4] sm:$0x3] %v6340_v42  ;;  %6347 = vst [vmem:[#allocation4 + $0x18] sm:$0x3] %v6343_v21  ;;  %v6679_v29 = vpop.permute.xlu0 %6678  ;;  %v6919_v35 = vrot.slane %v6910_v6, %v15081_v13 }
0x103d   : > { %v6686_v51 = vsel %vm644_vm7, %v6677_v4, %v6679_v29  ;;  %v9052_v12 = vld [vmem:[%s14794_s1 + $0x1] ss:$8 sm:$0xf] }
0x103e   : > { %v6710_v59 = vmul.f32 %v6693_v61, %v6686_v51  ;;  %v6681_v53 = vpop.permute.xlu1 %6680  ;;  %v6961_v30 = vrot.slane %v9052_v12, %v15081_v13 }
0x103f   : > { %v6685_v45 = vsel %vm644_vm7, %v6679_v29, %v6681_v53  ;;  %v6725_v0 = vld [vmem:[#allocation4 + $0x28] sm:$0xff] }
0x1040   : > { %6714 = vst [vmem:[#allocation4 + $0x40] sm:$0x3] %v6710_v59  ;;  %v6711_v31 = vmul.f32 %v6697_v9, %v6685_v45  ;;  %v6683_v62 = vpop.permute.xlu0 %6682  ;;  %v9629_v18 = vpack.c.bf16 %v6725_v0, %v6721_v25 }
0x1041   : > { %v6684_v39 = vsel %vm644_vm7, %v6681_v53, %v6683_v62  ;;  %v6687_v16 = vsel %vm644_vm7, %v6683_v62, %v6677_v4  ;;  %v6726_v2 = vld [vmem:[#allocation4 + $0x30] sm:$0xff]  ;;  %v6727_v43 = vld [vmem:[#allocation4 + $0x38] sm:$0xff] }
0x1042   : > { %6715 = vst [vmem:[#allocation4 + $0x48] sm:$0x3] %v6711_v31  ;;  %v6712_v52 = vmul.f32 %v6701_v54, %v6684_v39  ;;  %v6713_v17 = vmul.f32 %v6705_v33, %v6687_v16  ;;  %9630 = vmatprep.subr.bf16.mxu0 %v9629_v18  ;;  %v6722_v14 = vld [vmem:[#allocation4 + $0x10] sm:$0xff] }
0x1043   : > { %v6720_v11 = vld [vmem:[#allocation4] sm:$0xff]  ;;  %v6723_v57 = vld [vmem:[#allocation4 + $0x18] sm:$0xff]  ;;  %v9635_v20 = vpack.c.bf16 %v6726_v2, %v6722_v14  ;;  %v6915_v14 = vrot.slane %v6910_v6, %v15082_v24  ;;  %v6965_v2 = vrot.slane %v9052_v12, %v15041_v60 }
0x1044   : > { %6716 = vst [vmem:[#allocation4 + $0x50] sm:$0x3] %v6712_v52  ;;  %6717 = vst [vmem:[#allocation4 + $0x58] sm:$0x3] %v6713_v17  ;;  %v9631_v22 = vpack.c.bf16 %v6724_v5, %v6720_v11  ;;  %v9633_v32 = vpack.c.bf16 %v6727_v43, %v6723_v57  ;;  %v6927_v57 = vrot.slane %v6910_v6, %v15043_v58 }
0x1045   : > { %v13743_v39 = vld [vmem:[%s14794_s1 + $0x3] ss:$8 sm:$0xf]  ;;  %v13748_v52 = vld [vmem:[%s14794_s1 + $0x2] ss:$8 sm:$0xf]  ;;  %v6957_v43 = vrot.slane %v9052_v12, %v15082_v24 }
0x1046   : > { %9632 = vmatpush1.bf16.msra.mxu0 %v9631_v22  ;;  %9634 = vmatprep.subr.bf16.mxu1 %v9633_v32  ;;  %v7045_v5 = vrot.slane %v13743_v39, %v15081_v13  ;;  %v6969_v22 = vrot.slane %v9052_v12, %v15043_v58  ;;  %v7003_v32 = vrot.slane %v13748_v52, %v15081_v13 }
0x1047   : > { %9636 = vmatpush1.bf16.msra.mxu1 %v9635_v20  ;;  %v6728_v48 = vld [vmem:[#allocation4 + $0x40] sm:$0x3]  ;;  %v6923_v20 = vrot.slane %v6910_v6, %v15041_v60 }
0x1049   : > { %v6729_v55 = vld [vmem:[#allocation4 + $0x48] sm:$0x3] }
0x104a   : > { %9046 = vmatprep.subr.msk.mxu0 %vm703_vm8, %v6729_v55 }
0x104b   : > { %9047 = vmatpush1.msk.msra.mxu0 %vm703_vm8, %v6728_v48  ;;  %v6731_v23 = vld [vmem:[#allocation4 + $0x58] sm:$0x3]  ;;  %v6730_v37 = vld [vmem:[#allocation4 + $0x50] sm:$0x3] }
0x104c   : > { %9048 = vmatmul.mubr.msk.f32.vlgmr.msra.gmra.mrb[28].mxu0 %vm699_vm9, %v6718_v36  ;;  %9049 = vmatprep.subr.msk.mxu1 %vm703_vm8, %v6731_v23 }
0x104d   : > { %9050 = vmatpush1.msk.msra.mxu1 %vm703_vm8, %v6730_v37  ;;  %7358 = vmatprep.mubr.f32.mxu0 %v15077_v38 }
0x104e   : > { %9051 = vmatmul.mubr.msk.f32.vlgmr.msra.gmra.mrb[28].mxu1 %vm699_vm9, %v6718_v36 }
0x104f   : > { %7435 = vmatprep.mubr.f32.mxu1 %v15077_v38  ;;  %v6735_v7 = vpop.permute.xlu1 %6734 }
0x111f   : > { %v6818_v40 = vpop.f32.mrb[28].mxu0 }
0x1120   : > { %v6819_v56 = vadd.f32 %v6818_v40, %v6735_v7  ;;  %v6820_v46 = vpop.f32.mrb[29].mxu0 }
0x1121   : > { %v6821_v41 = vadd.f32 %v6820_v46, %v6735_v7  ;;  %v6889_v26 = vpop.f32.mrb[28].mxu1  ;;  %v9055_v46 = vld [vmem:[%s14794_s1 + $0x4] ss:$8 sm:$0xf] }
0x1122   : > { %v13634_v63 = vmax.f32 %v6819_v56, 0.0  ;;  %v6891_v1 = vpop.f32.mrb[29].mxu1  ;;  %v6890_v19 = vadd.f32 %v6889_v26, %v6735_v7 }
0x1123   : > { %v13636_v10 = vmax.f32 %v6821_v41, 0.0  ;;  %v6892_v50 = vadd.f32 %v6891_v1, %v6735_v7 }
0x1124   : > { %6898 = vrot.lane.b32.xlu0 %v13634_v63, %s9841_s6  ;;  %v13666_v44 = vmax.f32 %v6890_v19, 0.0 }
0x1125   : > { %6900 = vrot.lane.b32.xlu1 %v13636_v10, %s9841_s6  ;;  %v13668_v49 = vmax.f32 %v6892_v50, 0.0 }
0x1128   : > { %6940 = vrot.lane.b32.xlu0 %v13634_v63, %s9835_s25 }
0x1129   : > { %6942 = vrot.lane.b32.xlu1 %v13636_v10, %s9835_s25 }
0x112c   : > { %6982 = vrot.lane.b32.xlu0 %v13634_v63, %s9836_s26 }
0x112d   : > { %6984 = vrot.lane.b32.xlu1 %v13636_v10, %s9836_s26 }
0x1130   : > { %7024 = vrot.lane.b32.xlu0 %v13634_v63, %s9837_s27 }
0x1131   : > { %7026 = vrot.lane.b32.xlu1 %v13636_v10, %s9837_s27 }
0x1134   : > { %7070 = vrot.lane.b32.xlu0 %v13634_v63, %s9838_s28 }
0x1135   : > { %7072 = vrot.lane.b32.xlu1 %v13636_v10, %s9838_s28 }
0x1138   : > { %7112 = vrot.lane.b32.xlu0 %v13634_v63, %s9839_s29 }
0x1139   : > { %7114 = vrot.lane.b32.xlu1 %v13636_v10, %s9839_s29 }
0x113c   : > { %7154 = vrot.lane.b32.xlu0 %v13634_v63, %s9840_s30 }
0x113d   : > { %7156 = vrot.lane.b32.xlu1 %v13636_v10, %s9840_s30 }
0x1140   : > { %6902 = vrot.lane.b32.xlu0 %v13666_v44, %s9841_s6 }
0x1141   : > { %6904 = vrot.lane.b32.xlu1 %v13668_v49, %s9841_s6 }
0x1144   : > { %6944 = vrot.lane.b32.xlu0 %v13666_v44, %s9835_s25 }
0x1145   : > { %6946 = vrot.lane.b32.xlu1 %v13668_v49, %s9835_s25 }
0x1148   : > { %6986 = vrot.lane.b32.xlu0 %v13666_v44, %s9836_s26 }
0x1149   : > { %6988 = vrot.lane.b32.xlu1 %v13668_v49, %s9836_s26 }
0x114c   : > { %7028 = vrot.lane.b32.xlu0 %v13666_v44, %s9837_s27 }
0x114d   : > { %7030 = vrot.lane.b32.xlu1 %v13668_v49, %s9837_s27 }
0x1150   : > { %7074 = vrot.lane.b32.xlu0 %v13666_v44, %s9838_s28 }
0x1151   : > { %7076 = vrot.lane.b32.xlu1 %v13668_v49, %s9838_s28 }
0x1154   : > { %7116 = vrot.lane.b32.xlu0 %v13666_v44, %s9839_s29 }
0x1155   : > { %7118 = vrot.lane.b32.xlu1 %v13668_v49, %s9839_s29 }
0x1158   : > { %7158 = vrot.lane.b32.xlu0 %v13666_v44, %s9840_s30 }
0x1159   : > { %7160 = vrot.lane.b32.xlu1 %v13668_v49, %s9840_s30 }
0x115c   : > { %7196 = vrot.lane.b32.xlu0 %v13634_v63, %s9842_s7 }
0x115d   : > { %7198 = vrot.lane.b32.xlu1 %v13636_v10, %s9842_s7 }
0x1160   : > { %7200 = vrot.lane.b32.xlu0 %v13666_v44, %s9842_s7 }
0x1161   : > { %7202 = vrot.lane.b32.xlu1 %v13668_v49, %s9842_s7 }
0x1164   : > { %7280 = vperm.xlu0 %9772, %v7240_v27  }
0x1165   : > { %7285 = vperm.xlu1 %9773, %v7241_v47  }
0x1196   : > { %v6899_v8 = vpop.permute.xlu0 %6898 }
0x1197   : > { %v6901_v34 = vpop.permute.xlu1 %6900 }
0x1198   : > { %v6908_v42 = vsel %vm261_vm6, %v6899_v8, %v6901_v34 }
0x1199   : > { %v6933_v29 = vmul.f32 %v6919_v35, %v6908_v42  ;;  %v7007_v35 = vrot.slane %v13748_v52, %v15041_v60 }
0x119a   : > { %v6941_v21 = vpop.permute.xlu0 %6940 }
0x119b   : > { %v6943_v4 = vpop.permute.xlu1 %6942 }
0x119c   : > { %v6950_v61 = vsel %vm304_vm1, %v6941_v21, %v6943_v4 }
0x119d   : > { %v6975_v9 = vmul.f32 %v6961_v30, %v6950_v61  ;;  %v6999_v61 = vrot.slane %v13748_v52, %v15082_v24 }
0x119e   : > { %v6983_v51 = vpop.permute.xlu0 %6982 }
0x119f   : > { %v13724_v59 = vpop.permute.xlu1 %6984  ;;  %v9637_v53 = vpack.c.bf16 %v6975_v9, %v6933_v29 }
0x11a0   : > { %v6992_v23 = vsel %vm360_vm0, %v6983_v51, %v13724_v59 }
0x11a1   : > { %9638 = vmatprep.subr.bf16.mxu0 %v9637_v53  ;;  %v7011_v53 = vrot.slane %v13748_v52, %v15043_v58 }
0x11a2   : > { %v13726_v54 = vpop.permute.xlu0 %7024 }
0x11a3   : > { %v7027_v33 = vpop.permute.xlu1 %7026 }
0x11a4   : > { %v7034_v11 = vsel %vm416_vm2, %v13726_v54, %v7027_v33 }
0x11a5   : > { %v7059_v56 = vmul.f32 %v7045_v5, %v7034_v11  ;;  %v7091_v11 = vrot.slane %v9055_v46, %v15081_v13 }
0x11a6   : > { %v13728_v45 = vpop.permute.xlu0 %7070 }
0x11a7   : > { %v13730_v25 = vpop.permute.xlu1 %7072 }
0x11aa   : > { %v13732_v0 = vpop.permute.xlu0 %7112 }
0x11ab   : > { %v13734_v31 = vpop.permute.xlu1 %7114 }
0x11ae   : > { %v13736_v62 = vpop.permute.xlu0 %7154 }
0x11af   : > { %v13738_v18 = vpop.permute.xlu1 %7156 }
0x11b2   : > { %v6903_v16 = vpop.permute.xlu0 %6902 }
0x11b3   : > { %v6905_v17 = vpop.permute.xlu1 %6904  ;;  %v6907_v37 = vsel %vm261_vm6, %v6901_v34, %v6903_v16  ;;  %v7087_v34 = vrot.slane %v9055_v46, %v15082_v24 }
0x11b4   : > { %v6906_v55 = vsel %vm261_vm6, %v6903_v16, %v6905_v17  ;;  %v6909_v36 = vsel %vm261_vm6, %v6905_v17, %v6899_v8  ;;  %v7017_v8 = vmul.f32 %v7003_v32, %v6992_v23  ;;  %v6934_v6 = vmul.f32 %v6923_v20, %v6907_v37 }
0x11b5   : > { %v6932_v19 = vmul.f32 %v6915_v14, %v6909_v36  ;;  %v6935_v50 = vmul.f32 %v6927_v57, %v6906_v55  ;;  %v7041_v16 = vrot.slane %v13743_v39, %v15082_v24  ;;  %v7053_v17 = vrot.slane %v13743_v39, %v15043_v58 }
0x11b6   : > { %v6945_v48 = vpop.permute.xlu0 %6944  ;;  %v9641_v29 = vpack.c.bf16 %v7059_v56, %v7017_v8  ;;  %v9057_v56 = vld [vmem:[%s14794_s1 + $0x6] ss:$8 sm:$0xf] }
0x11b7   : > { %v6949_v7 = vsel %vm304_vm1, %v6943_v4, %v6945_v48  ;;  %v6947_v40 = vpop.permute.xlu1 %6946 }
0x11b8   : > { %v6976_v41 = vmul.f32 %v6965_v2, %v6949_v7  ;;  %v6948_v26 = vsel %vm304_vm1, %v6945_v48, %v6947_v40  ;;  %v6951_v1 = vsel %vm304_vm1, %v6947_v40, %v6941_v21  ;;  %v7049_v21 = vrot.slane %v13743_v39, %v15041_v60  ;;  %v9056_v40 = vld [vmem:[%s14794_s1 + $0x5] ss:$8 sm:$0xf] }
0x11b9   : > { %v6974_v27 = vmul.f32 %v6957_v43, %v6951_v1  ;;  %v6977_v47 = vmul.f32 %v6969_v22, %v6948_v26  ;;  %v7095_v43 = vrot.slane %v9055_v46, %v15041_v60  ;;  %v7099_v22 = vrot.slane %v9055_v46, %v15043_v58 }
0x11ba   : > { %v6987_v12 = vpop.permute.xlu0 %6986  ;;  %v9655_v9 = vpack.c.bf16 %v6976_v41, %v6934_v6  ;;  %v7129_v6 = vrot.slane %v9056_v40, %v15082_v24 }
0x11bb   : > { %v6989_v30 = vpop.permute.xlu1 %6988  ;;  %v9639_v42 = vpack.c.bf16 %v6974_v27, %v6932_v19  ;;  %v9653_v4 = vpack.c.bf16 %v6977_v47, %v6935_v50  ;;  %v6991_v52 = vsel %vm360_vm0, %v13724_v59, %v6987_v12 }
0x11bc   : > { %v6990_v5 = vsel %vm360_vm0, %v6987_v12, %v6989_v30  ;;  %v6993_v14 = vsel %vm360_vm0, %v6989_v30, %v6983_v51  ;;  %v7080_v51 = vsel %vm476_vm3, %v13728_v45, %v13730_v25  ;;  %v7018_v23 = vmul.f32 %v7007_v35, %v6991_v52 }
0x11bd   : > { %9640 = vmatpush1.bf16.msra.mxu0 %v9639_v42  ;;  %9654 = vmatprep.subr.bf16.mxu1 %v9653_v4  ;;  %v7016_v55 = vmul.f32 %v6999_v61, %v6993_v14  ;;  %v7104_v7 = vmul.f32 %v7087_v34, %v7080_v51  ;;  %v7133_v12 = vrot.slane %v9056_v40, %v15081_v13 }
0x11be   : > { %v7029_v2 = vpop.permute.xlu0 %7028  ;;  %9642 = vmatprep.subr.bf16.mxu0 %v9641_v29  ;;  %9656 = vmatpush1.bf16.msra.mxu1 %v9655_v9  ;;  %v7137_v30 = vrot.slane %v9056_v40, %v15041_v60  ;;  %v7164_v29 = vsel %vm588_vm5, %v13736_v62, %v13738_v18  ;;  %v7175_v9 = vrot.slane %v9057_v56, %v15081_v13 }
0x11bf   : > { %v7033_v39 = vsel %vm416_vm2, %v7027_v33, %v7029_v2  ;;  %v7031_v57 = vpop.permute.xlu1 %7030  ;;  %v7019_v33 = vmul.f32 %v7011_v53, %v6990_v5 }
0x11c0   : > { %v7060_v32 = vmul.f32 %v7049_v21, %v7033_v39  ;;  %v7032_v20 = vsel %vm416_vm2, %v7029_v2, %v7031_v57  ;;  %v7035_v59 = vsel %vm416_vm2, %v7031_v57, %v13726_v54  ;;  %v7122_v21 = vsel %vm532_vm4, %v13732_v0, %v13734_v31 }
0x11c1   : > { %v7058_v36 = vmul.f32 %v7041_v16, %v7035_v59  ;;  %v7061_v48 = vmul.f32 %v7053_v17, %v7032_v20  ;;  %v7146_v5 = vmul.f32 %v7129_v6, %v7122_v21  ;;  %v9058_v20 = vld [vmem:[%s14794_s1 + $0x7] ss:$8 sm:$0xf] }
0x11c2   : > { %v7075_v37 = vpop.permute.xlu0 %7074  ;;  %v9659_v27 = vpack.c.bf16 %v7060_v32, %v7018_v23  ;;  %v7213_v23 = vrot.slane %v9058_v20, %v15082_v24 }
0x11c3   : > { %v7079_v46 = vsel %vm476_vm3, %v13730_v25, %v7075_v37  ;;  %v7077_v54 = vpop.permute.xlu1 %7076  ;;  %v9643_v41 = vpack.c.bf16 %v7058_v36, %v7016_v55  ;;  %v9657_v26 = vpack.c.bf16 %v7061_v48, %v7019_v33  ;;  %v7171_v25 = vrot.slane %v9057_v56, %v15082_v24 }
0x11c4   : > { %v7105_v1 = vmul.f32 %v7091_v11, %v7079_v46  ;;  %v7078_v19 = vsel %vm476_vm3, %v7075_v37, %v7077_v54  ;;  %v7081_v50 = vsel %vm476_vm3, %v7077_v54, %v13728_v45  ;;  %v9647_v45 = vpack.c.bf16 %v7104_v7, %v13634_v63 }
0x11c5   : > { %v7106_v47 = vmul.f32 %v7095_v43, %v7078_v19  ;;  %v7107_v8 = vmul.f32 %v7099_v22, %v7081_v50  ;;  %9644 = vmatpush1.bf16.msra.mxu0 %v9643_v41  ;;  %9658 = vmatprep.subr.bf16.mxu1 %v9657_v26  ;;  %v7188_v14 = vmul.f32 %v7171_v25, %v7164_v29 }
0x11c6   : > { %v7117_v34 = vpop.permute.xlu0 %7116  ;;  %9660 = vmatpush1.bf16.msra.mxu1 %v9659_v27  ;;  %v9645_v35 = vpack.c.bf16 %v7105_v1, %v13636_v10  ;;  %v7141_v10 = vrot.slane %v9056_v40, %v15043_v58  ;;  %v7217_v48 = vrot.slane %v9058_v20, %v15081_v13  ;;  %v7225_v37 = vrot.slane %v9058_v20, %v15043_v58  ;;  %v7238_v27 = vld [vmem:[%s14795_s2 + $0xb0] sm:$0xff] }
0x11c7   : > { %v7119_v42 = vpop.permute.xlu1 %7118  ;;  %v9661_v4 = vpack.c.bf16 %v7107_v8, %v13668_v49  ;;  %v9663_v61 = vpack.c.bf16 %v7106_v47, %v13666_v44  ;;  %v7121_v63 = vsel %vm532_vm4, %v13734_v31, %v7117_v34  ;;  %v7179_v44 = vrot.slane %v9057_v56, %v15041_v60  ;;  %v7239_v47 = vld [vmem:[%s14795_s2 + $0xc0] sm:$0xff] }
0x11c8   : > { %9646 = vmatprep.subr.bf16.mxu0 %v9645_v35  ;;  %v7183_v49 = vrot.slane %v9057_v56, %v15043_v58  ;;  %v7120_v53 = vsel %vm532_vm4, %v7117_v34, %v7119_v42  ;;  %v7123_v16 = vsel %vm532_vm4, %v7119_v42, %v13732_v0  ;;  %v7147_v11 = vmul.f32 %v7133_v12, %v7121_v63 }
0x11c9   : > { %9648 = vmatpush1.bf16.msra.mxu0 %v9647_v45  ;;  %9662 = vmatprep.subr.bf16.mxu1 %v9661_v4  ;;  %v7148_v43 = vmul.f32 %v7137_v30, %v7120_v53  ;;  %v7149_v0 = vmul.f32 %v7141_v10, %v7123_v16  ;;  %v9651_v55 = vpack.c.bf16 %v7188_v14, %v7146_v5 }
0x11ca   : > { %v7159_v17 = vpop.permute.xlu0 %7158  ;;  %9664 = vmatpush1.bf16.msra.mxu1 %v9663_v61 }
0x11cb   : > { %v7163_v31 = vsel %vm588_vm5, %v13738_v18, %v7159_v17  ;;  %v7161_v2 = vpop.permute.xlu1 %7160 }
0x11cc   : > { %v7189_v52 = vmul.f32 %v7175_v9, %v7163_v31  ;;  %v7162_v39 = vsel %vm588_vm5, %v7159_v17, %v7161_v2  ;;  %v7165_v57 = vsel %vm588_vm5, %v7161_v2, %v13736_v62  ;;  %v7221_v62 = vrot.slane %v9058_v20, %v15041_v60  ;;  %v13901_v9 = vld [vmem:[%s14795_s2 + $0xd8] sm:$0x3] }
0x11cd   : > { %v7190_v22 = vmul.f32 %v7179_v44, %v7162_v39  ;;  %v7191_v51 = vmul.f32 %v7183_v49, %v7165_v57 }
0x11ce   : > { %v7197_v32 = vpop.permute.xlu0 %7196  ;;  %v9649_v18 = vpack.c.bf16 %v7189_v52, %v7147_v11 }
0x11cf   : > { %v7199_v59 = vpop.permute.xlu1 %7198  ;;  %v9665_v33 = vpack.c.bf16 %v7191_v51, %v7149_v0  ;;  %v9667_v36 = vpack.c.bf16 %v7190_v22, %v7148_v43 }
0x11d0   : > { %9650 = vmatprep.subr.bf16.mxu0 %v9649_v18  ;;  %v7206_v7 = vsel %vm644_vm7, %v7197_v32, %v7199_v59 }
0x11d1   : > { %9652 = vmatpush1.bf16.msra.mxu0 %v9651_v55  ;;  %9666 = vmatprep.subr.bf16.mxu1 %v9665_v33  ;;  %v7230_v1 = vmul.f32 %v7213_v23, %v7206_v7  ;;  %v14077_v23 = vld [vmem:[%s14794_s1] ss:$8 sm:$0xf] }
0x11d2   : > { %v7201_v40 = vpop.permute.xlu0 %7200  ;;  %9668 = vmatpush1.bf16.msra.mxu1 %v9667_v36  ;;  %v7489_v7 = vrot.slane %v14077_v23, %v15081_v13 }
0x11d3   : > { %v7205_v56 = vsel %vm644_vm7, %v7199_v59, %v7201_v40  ;;  %v7203_v46 = vpop.permute.xlu1 %7202 }
0x11d4   : > { %v7231_v54 = vmul.f32 %v7217_v48, %v7205_v56  ;;  %v7204_v41 = vsel %vm644_vm7, %v7201_v40, %v7203_v46  ;;  %v7207_v26 = vsel %vm644_vm7, %v7203_v46, %v7197_v32 }
0x11d5   : > { %v7232_v19 = vmul.f32 %v7221_v62, %v7204_v41  ;;  %v7233_v50 = vmul.f32 %v7225_v37, %v7207_v26  ;;  %v7493_v41 = vrot.slane %v14077_v23, %v15041_v60  ;;  %v14095_v26 = vld [vmem:[%s14794_s1 + $0x1] ss:$8 sm:$0xf] }
0x11d6   : > { %7310 = vmatprep.subr.mxu0 %v7231_v54 }
0x11d7   : > { %7311 = vmatpush1.msra.mxu0 %v7230_v1  ;;  %7387 = vmatprep.subr.mxu1 %v7233_v50 }
0x11d8   : > { %9059 = vmatmul.mubr.msk.f32.vlgmr.msra.gmra.mrb[30].mxu0 %vm3434_vm12, %v7238_v27  ;;  %7388 = vmatpush1.msra.mxu1 %v7232_v19 }
0x11d9   : > { %9061 = vmatmul.mubr.msk.f32.vlgmr.msra.gmra.mrb[30].mxu1 %vm3434_vm12, %v7238_v27  ;;  %7364 = vmatprep.mubr.f32.mxu0 %v15077_v38 }
0x11da   : > { %7441 = vmatprep.mubr.f32.mxu1 %v15077_v38 }
0x11dc   : > { %9060 = vmatmul.mubr.msk.f32.gmra.mrb[32].mxu0 %vm3434_vm12, %v7239_v47 }
0x11dd   : > { %9062 = vmatmul.mubr.msk.f32.gmra.mrb[32].mxu1 %vm3434_vm12, %v7239_v47  ;;  %9070 = vmatprep.mubr.msk.f32.mxu0 %vm4186_vm13, %v13901_v9 }
0x11de   : > { %9071 = vmatprep.mubr.msk.f32.mxu1 %vm4186_vm13, %v13901_v9 }
0x11e3   : > { %v7281_v8 = vpop.permute.xlu0 %7280 }
0x11e4   : > { %v7286_v61 = vpop.permute.xlu1 %7285 }
0x12ab   : > { %v7360_v6 = vpop.f32.mrb[30].mxu0 }
0x12ac   : > { %v7361_v25 = vadd.f32 %v7360_v6, %v7281_v8  ;;  %v7362_v12 = vpop.f32.mrb[31].mxu0  ;;  %v7437_v34 = vpop.f32.mrb[30].mxu1  ;;  %v7551_v6 = vrot.slane %v14095_v26, %v15081_v13 }
0x12ad   : > { %v7363_v35 = vadd.f32 %v7362_v12, %v7281_v8  ;;  %v7438_v30 = vadd.f32 %v7437_v34, %v7281_v8  ;;  %v7439_v42 = vpop.f32.mrb[31].mxu1 }
0x12ae   : > { %v13892_v45 = vmax.f32 %v7361_v25, 0.0  ;;  %v7440_v4 = vadd.f32 %v7439_v42, %v7281_v8 }
0x12af   : > { %v13894_v21 = vmax.f32 %v7363_v35, 0.0  ;;  %v13896_v29 = vmax.f32 %v7438_v30, 0.0  ;;  %v7366_v10 = vpop.f32.mrb[32].mxu0 }
0x12b0   : > { %15083 = vst [vmem:[#allocation27_spill] sm:$0xff] %v13892_v45  ;;  %v13903_v63 = vmax.f32 %v7440_v4, 0.0  ;;  %v7367_v44 = vadd.f32 %v7366_v10, %v7286_v61  ;;  %v7368_v49 = vpop.f32.mrb[33].mxu0  ;;  %7456 = vrot.lane.b32.xlu0 %v13892_v45, %s9841_s6  ;;  %v7443_v53 = vpop.f32.mrb[32].mxu1 }
0x12b1   : > { %15084 = vst [vmem:[#allocation39_spill] sm:$0xff] %v13896_v29  ;;  %v7369_v16 = vadd.f32 %v7368_v49, %v7286_v61  ;;  %v7444_v17 = vadd.f32 %v7443_v53, %v7286_v61  ;;  %v7445_v5 = vpop.f32.mrb[33].mxu1  ;;  %v14127_v10 = vld [vmem:[%s14794_s1 + $0x2] ss:$8 sm:$0xf] }
0x12b2   : > { %15085 = vst [vmem:[#allocation33_spill] sm:$0xff] %v13903_v63  ;;  %v13911_v14 = vmax.f32 %v7367_v44, 0.0  ;;  %v7446_v31 = vadd.f32 %v7445_v5, %v7286_v61  ;;  %v7555_v61 = vrot.slane %v14095_v26, %v15041_v60  ;;  %v7613_v5 = vrot.slane %v14127_v10, %v15081_v13 }
0x12b3   : > { %v13913_v2 = vmax.f32 %v7369_v16, 0.0  ;;  %v13915_v11 = vmax.f32 %v7444_v17, 0.0 }
0x12b4   : > { %15086 = vst [vmem:[#allocation18_spill] sm:$0xff] %v13911_v14  ;;  %v13917_v52 = vmax.f32 %v7446_v31, 0.0  ;;  %7458 = vrot.lane.b32.xlu1 %v13911_v14, %s9841_s6  ;;  %7518 = vrot.lane.b32.xlu0 %v13892_v45, %s9835_s25 }
0x12b5   : > { %15087 = vst [vmem:[#allocation7_spill] sm:$0xff] %v13915_v11 }
0x12b6   : > { %15088 = vst [vmem:[#allocation11_spill] sm:$0xff] %v13917_v52 }
0x12b8   : > { %7520 = vrot.lane.b32.xlu1 %v13911_v14, %s9835_s25  ;;  %7580 = vrot.lane.b32.xlu0 %v13892_v45, %s9836_s26 }
0x12bc   : > { %7582 = vrot.lane.b32.xlu1 %v13911_v14, %s9836_s26  ;;  %7642 = vrot.lane.b32.xlu0 %v13892_v45, %s9837_s27 }
0x12c0   : > { %7644 = vrot.lane.b32.xlu1 %v13911_v14, %s9837_s27  ;;  %7712 = vrot.lane.b32.xlu0 %v13892_v45, %s9838_s28 }
0x12c4   : > { %7714 = vrot.lane.b32.xlu1 %v13911_v14, %s9838_s28  ;;  %7774 = vrot.lane.b32.xlu0 %v13892_v45, %s9839_s29 }
0x12c8   : > { %7776 = vrot.lane.b32.xlu1 %v13911_v14, %s9839_s29  ;;  %7836 = vrot.lane.b32.xlu0 %v13892_v45, %s9840_s30 }
0x12cc   : > { %7838 = vrot.lane.b32.xlu1 %v13911_v14, %s9840_s30  ;;  %7898 = vrot.lane.b32.xlu0 %v13892_v45, %s9842_s7 }
0x12d0   : > { %7900 = vrot.lane.b32.xlu1 %v13911_v14, %s9842_s7  ;;  %7460 = vrot.lane.b32.xlu0 %v13894_v21, %s9841_s6 }
0x12d4   : > { %7462 = vrot.lane.b32.xlu1 %v13913_v2, %s9841_s6  ;;  %7464 = vrot.lane.b32.xlu0 %v13896_v29, %s9841_s6 }
0x12d8   : > { %7466 = vrot.lane.b32.xlu1 %v13915_v11, %s9841_s6  ;;  %7522 = vrot.lane.b32.xlu0 %v13894_v21, %s9835_s25 }
0x12dc   : > { %7524 = vrot.lane.b32.xlu1 %v13913_v2, %s9835_s25  ;;  %7526 = vrot.lane.b32.xlu0 %v13896_v29, %s9835_s25 }
0x12e0   : > { %7528 = vrot.lane.b32.xlu1 %v13915_v11, %s9835_s25  ;;  %7584 = vrot.lane.b32.xlu0 %v13894_v21, %s9836_s26 }
0x12e4   : > { %7586 = vrot.lane.b32.xlu1 %v13913_v2, %s9836_s26  ;;  %7588 = vrot.lane.b32.xlu0 %v13896_v29, %s9836_s26 }
0x12e8   : > { %7590 = vrot.lane.b32.xlu1 %v13915_v11, %s9836_s26  ;;  %7646 = vrot.lane.b32.xlu0 %v13894_v21, %s9837_s27 }
0x12ec   : > { %7648 = vrot.lane.b32.xlu1 %v13913_v2, %s9837_s27  ;;  %7650 = vrot.lane.b32.xlu0 %v13896_v29, %s9837_s27 }
0x12f0   : > { %7652 = vrot.lane.b32.xlu1 %v13915_v11, %s9837_s27  ;;  %7716 = vrot.lane.b32.xlu0 %v13894_v21, %s9838_s28 }
0x12f4   : > { %7718 = vrot.lane.b32.xlu1 %v13913_v2, %s9838_s28  ;;  %7720 = vrot.lane.b32.xlu0 %v13896_v29, %s9838_s28 }
0x12f8   : > { %7722 = vrot.lane.b32.xlu1 %v13915_v11, %s9838_s28  ;;  %7778 = vrot.lane.b32.xlu0 %v13894_v21, %s9839_s29 }
0x12fc   : > { %7780 = vrot.lane.b32.xlu1 %v13913_v2, %s9839_s29  ;;  %7782 = vrot.lane.b32.xlu0 %v13896_v29, %s9839_s29 }
0x1300   : > { %7784 = vrot.lane.b32.xlu1 %v13915_v11, %s9839_s29  ;;  %7840 = vrot.lane.b32.xlu0 %v13894_v21, %s9840_s30 }
0x1304   : > { %7842 = vrot.lane.b32.xlu1 %v13913_v2, %s9840_s30  ;;  %7844 = vrot.lane.b32.xlu0 %v13896_v29, %s9840_s30 }
0x1308   : > { %7846 = vrot.lane.b32.xlu1 %v13915_v11, %s9840_s30  ;;  %7902 = vrot.lane.b32.xlu0 %v13894_v21, %s9842_s7 }
0x130c   : > { %7904 = vrot.lane.b32.xlu1 %v13913_v2, %s9842_s7  ;;  %7468 = vrot.lane.b32.xlu0 %v13903_v63, %s9841_s6 }
0x1310   : > { %7470 = vrot.lane.b32.xlu1 %v13917_v52, %s9841_s6  ;;  %7530 = vrot.lane.b32.xlu0 %v13903_v63, %s9835_s25 }
0x1314   : > { %7532 = vrot.lane.b32.xlu1 %v13917_v52, %s9835_s25  ;;  %7592 = vrot.lane.b32.xlu0 %v13903_v63, %s9836_s26 }
0x1318   : > { %7594 = vrot.lane.b32.xlu1 %v13917_v52, %s9836_s26  ;;  %7654 = vrot.lane.b32.xlu0 %v13903_v63, %s9837_s27 }
0x131c   : > { %7656 = vrot.lane.b32.xlu1 %v13917_v52, %s9837_s27  ;;  %7906 = vrot.lane.b32.xlu0 %v13896_v29, %s9842_s7 }
0x1320   : > { %7908 = vrot.lane.b32.xlu1 %v13915_v11, %s9842_s7  ;;  %7724 = vrot.lane.b32.xlu0 %v13903_v63, %s9838_s28 }
0x1322   : > { %v14033_v57 = vpop.permute.xlu0 %7456 }
0x1324   : > { %7726 = vrot.lane.b32.xlu1 %v13917_v52, %s9838_s28  ;;  %7786 = vrot.lane.b32.xlu0 %v13903_v63, %s9839_s29 }
0x1326   : > { %v14039_v43 = vpop.permute.xlu1 %7458  ;;  %v14041_v0 = vpop.permute.xlu0 %7518 }
0x1328   : > { %7788 = vrot.lane.b32.xlu1 %v13917_v52, %s9839_s29  ;;  %7848 = vrot.lane.b32.xlu0 %v13903_v63, %s9840_s30 }
0x132a   : > { %v14047_v22 = vpop.permute.xlu1 %7520  ;;  %v14049_v51 = vpop.permute.xlu0 %7580 }
0x132c   : > { %7850 = vrot.lane.b32.xlu1 %v13917_v52, %s9840_s30  ;;  %7910 = vrot.lane.b32.xlu0 %v13903_v63, %s9842_s7 }
0x132e   : > { %v14055_v32 = vpop.permute.xlu1 %7582  ;;  %v14057_v20 = vpop.permute.xlu0 %7642 }
0x1330   : > { %7912 = vrot.lane.b32.xlu1 %v13917_v52, %s9842_s7  ;;  %8036 = vperm.xlu0 %9772, %v13901_v9  }
0x1332   : > { %v14062_v18 = vpop.permute.xlu1 %7644  ;;  %v14064_v59 = vpop.permute.xlu0 %7712 }
0x1336   : > { %v14066_v55 = vpop.permute.xlu1 %7714  ;;  %v14068_v33 = vpop.permute.xlu0 %7774 }
0x1337   : > { %15089 = vst [vmem:[#allocation9_spill] sm:$0xff] %v14066_v55  ;;  %15090 = vst [vmem:[#allocation34_spill] sm:$0xff] %v14068_v33 }
0x133a   : > { %v14070_v36 = vpop.permute.xlu1 %7776  ;;  %v14072_v48 = vpop.permute.xlu0 %7836 }
0x133b   : > { %15091 = vst [vmem:[#allocation30_spill] sm:$0xff] %v14070_v36  ;;  %15092 = vst [vmem:[#allocation31_spill] sm:$0xff] %v14072_v48 }
0x133e   : > { %v14079_v62 = vpop.permute.xlu1 %7838  ;;  %v14081_v37 = vpop.permute.xlu0 %7898 }
0x133f   : > { %15093 = vst [vmem:[#allocation17_spill] sm:$0xff] %v14079_v62  ;;  %15094 = vst [vmem:[#allocation20_spill] sm:$0xff] %v14081_v37 }
0x1342   : > { %v14085_v40 = vpop.permute.xlu1 %7900  ;;  %v7461_v56 = vpop.permute.xlu0 %7460 }
0x1343   : > { %15095 = vst [vmem:[#allocation40_spill] sm:$0xff] %v14085_v40  ;;  %v7476_v46 = vsel %vm261_vm6, %v14033_v57, %v7461_v56 }
0x1344   : > { %v7503_v54 = vmul.f32 %v7489_v7, %v7476_v46 }
0x1346   : > { %7511 = vst [vmem:[#allocation4 + $0x8] sm:$0xff] %v7503_v54  ;;  %v7463_v1 = vpop.permute.xlu1 %7462  ;;  %v14097_v19 = vpop.permute.xlu0 %7464 }
0x1347   : > { %v7477_v50 = vsel %vm261_vm6, %v14039_v43, %v7463_v1  ;;  %v7474_v27 = vsel %vm261_vm6, %v7461_v56, %v14097_v19 }
0x1348   : > { %v7507_v47 = vmul.f32 %v7489_v7, %v7477_v50  ;;  %v14105_v8 = vmul.f32 %v7493_v41, %v7474_v27  ;;  %v14163_v50 = vld [vmem:[%s14794_s1 + $0x3] ss:$8 sm:$0xf] }
0x134a   : > { %7515 = vst [vmem:[#allocation4 + $0x28] sm:$0xff] %v7507_v47  ;;  %7512 = vst [vmem:[#allocation4 + $0x10] sm:$0xff] %v14105_v8  ;;  %v14110_v25 = vpop.permute.xlu1 %7466  ;;  %v7523_v12 = vpop.permute.xlu0 %7522  ;;  %v9669_v34 = vpack.c.bf16 %v7507_v47, %v7503_v54 }
0x134b   : > { %v7475_v35 = vsel %vm261_vm6, %v7463_v1, %v14110_v25  ;;  %v7538_v30 = vsel %vm304_vm1, %v14041_v0, %v7523_v12  ;;  %v7617_v1 = vrot.slane %v14127_v10, %v15041_v60 }
0x134c   : > { %v14118_v42 = vmul.f32 %v7493_v41, %v7475_v35  ;;  %v14120_v4 = vmul.f32 %v7551_v6, %v7538_v30  ;;  %9670 = vmatprep.subr.bf16.mxu0 %v9669_v34  ;;  %v7675_v30 = vrot.slane %v14163_v50, %v15081_v13 }
0x134e   : > { %7516 = vst [vmem:[#allocation4 + $0x30] sm:$0xff] %v14118_v42  ;;  %7573 = vst [vmem:[#allocation4 + $0x48] sm:$0xff] %v14120_v4  ;;  %v7525_v9 = vpop.permute.xlu1 %7524  ;;  %v14131_v44 = vpop.permute.xlu0 %7526 }
0x134f   : > { %v7539_v49 = vsel %vm304_vm1, %v14047_v22, %v7525_v9  ;;  %v7536_v53 = vsel %vm304_vm1, %v7523_v12, %v14131_v44 }
0x1350   : > { %v14139_v16 = vmul.f32 %v7551_v6, %v7539_v49  ;;  %v14141_v17 = vmul.f32 %v7555_v61, %v7536_v53 }
0x1352   : > { %7574 = vst [vmem:[#allocation4 + $0x50] sm:$0xff] %v14141_v17  ;;  %v14146_v31 = vpop.permute.xlu1 %7528  ;;  %v7585_v7 = vpop.permute.xlu0 %7584 }
0x1353   : > { %v7537_v56 = vsel %vm304_vm1, %v7525_v9, %v14146_v31  ;;  %v7600_v46 = vsel %vm360_vm0, %v14049_v51, %v7585_v7 }
0x1354   : > { %v14154_v54 = vmul.f32 %v7555_v61, %v7537_v56  ;;  %v14156_v41 = vmul.f32 %v7613_v5, %v7600_v46  ;;  %v14196_v46 = vld [vmem:[%s14794_s1 + $0x4] ss:$8 sm:$0xf] }
0x1355   : > { %v7741_v39 = vrot.slane %v14196_v46, %v15082_v24 }
0x1356   : > { %v7587_v27 = vpop.permute.xlu1 %7586  ;;  %v14165_v47 = vpop.permute.xlu0 %7588 }
0x1357   : > { %v7601_v6 = vsel %vm360_vm0, %v14055_v32, %v7587_v27  ;;  %v7598_v12 = vsel %vm360_vm0, %v7585_v7, %v14165_v47  ;;  %v7679_v7 = vrot.slane %v14163_v50, %v15041_v60 }
0x1358   : > { %v14173_v34 = vmul.f32 %v7613_v5, %v7601_v6  ;;  %v14175_v35 = vmul.f32 %v7617_v1, %v7598_v12 }
0x135a   : > { %v14179_v61 = vpop.permute.xlu1 %7590  ;;  %v7647_v9 = vpop.permute.xlu0 %7646 }
0x135b   : > { %v7599_v49 = vsel %vm360_vm0, %v7587_v27, %v14179_v61  ;;  %v7662_v53 = vsel %vm416_vm2, %v14057_v20, %v7647_v9 }
0x135c   : > { %v14187_v56 = vmul.f32 %v7617_v1, %v7599_v49  ;;  %v14189_v5 = vmul.f32 %v7675_v30, %v7662_v53 }
0x135e   : > { %v7649_v6 = vpop.permute.xlu1 %7648  ;;  %v14198_v12 = vpop.permute.xlu0 %7650 }
0x135f   : > { %v7663_v27 = vsel %vm416_vm2, %v14062_v18, %v7649_v6  ;;  %v7660_v1 = vsel %vm416_vm2, %v7647_v9, %v14198_v12  ;;  %v7745_v9 = vrot.slane %v14196_v46, %v15081_v13 }
0x1360   : > { %v14206_v49 = vmul.f32 %v7675_v30, %v7663_v27  ;;  %v14208_v53 = vmul.f32 %v7679_v7, %v7660_v1  ;;  %v14229_v27 = vld [vmem:[%s14794_s1 + $0x5] ss:$8 sm:$0xf] }
0x1362   : > { %v14212_v28 = vpop.permute.xlu1 %7652  ;;  %v7717_v3 = vpop.permute.xlu0 %7716 }
0x1363   : > { %v7661_v38 = vsel %vm416_vm2, %v7649_v6, %v14212_v28  ;;  %v7732_v45 = vsel %vm476_vm3, %v14064_v59, %v7717_v3 }
0x1364   : > { %v14220_v14 = vmul.f32 %v7679_v7, %v7661_v38  ;;  %v14222_v30 = vmul.f32 %v7741_v39, %v7732_v45 }
0x1366   : > { %15096 = vst [vmem:[#allocation28_spill] sm:$0xff] %v14220_v14  ;;  %15097 = vst [vmem:[#allocation42_spill] sm:$0xff] %v14222_v30  ;;  %v7719_v1 = vpop.permute.xlu1 %7718  ;;  %v14231_v11 = vpop.permute.xlu0 %7720  ;;  %v7803_v30 = vrot.slane %v14229_v27, %v15082_v24 }
0x1367   : > { %v7733_v6 = vsel %vm476_vm3, %v14066_v55, %v7719_v1  ;;  %v7730_v38 = vsel %vm476_vm3, %v7717_v3, %v14231_v11 }
0x1368   : > { %v14239_v45 = vmul.f32 %v7741_v39, %v7733_v6  ;;  %v14241_v7 = vmul.f32 %v7745_v9, %v7730_v38  ;;  %v7807_v39 = vrot.slane %v14229_v27, %v15081_v13  ;;  %v14262_v6 = vld [vmem:[%s14794_s1 + $0x6] ss:$8 sm:$0xf] }
0x136a   : > { %15098 = vst [vmem:[#allocation12_spill] sm:$0xff] %v14239_v45  ;;  %15099 = vst [vmem:[#allocation22_spill] sm:$0xff] %v14241_v7  ;;  %v14245_v29 = vpop.permute.xlu1 %7722  ;;  %v7779_v52 = vpop.permute.xlu0 %7778 }
0x136b   : > { %15100 = vst [vmem:[#allocation13_spill] sm:$0xff] %v14245_v29  ;;  %v7731_v63 = vsel %vm476_vm3, %v7719_v1, %v14245_v29  ;;  %v7794_v55 = vsel %vm532_vm4, %v14068_v33, %v7779_v52 }
0x136c   : > { %v14253_v14 = vmul.f32 %v7745_v9, %v7731_v63  ;;  %v14255_v3 = vmul.f32 %v7803_v30, %v7794_v55 }
0x136e   : > { %15101 = vst [vmem:[#allocation15_spill] sm:$0xff] %v14253_v14  ;;  %15102 = vst [vmem:[#allocation23_spill] sm:$0xff] %v14255_v3  ;;  %v7781_v38 = vpop.permute.xlu1 %7780  ;;  %v14264_v45 = vpop.permute.xlu0 %7782  ;;  %v7865_v3 = vrot.slane %v14262_v6, %v15082_v24 }
0x136f   : > { %v7795_v1 = vsel %vm532_vm4, %v14070_v36, %v7781_v38  ;;  %v7792_v63 = vsel %vm532_vm4, %v7779_v52, %v14264_v45 }
0x1370   : > { %v14272_v55 = vmul.f32 %v7803_v30, %v7795_v1  ;;  %v14274_v9 = vmul.f32 %v7807_v39, %v7792_v63  ;;  %v7869_v30 = vrot.slane %v14262_v6, %v15081_v13  ;;  %v14295_v1 = vld [vmem:[%s14794_s1 + $0x7] ss:$8 sm:$0xf] }
0x1372   : > { %15103 = vst [vmem:[#allocation25_spill] sm:$0xff] %v14272_v55  ;;  %15104 = vst [vmem:[#allocation19_spill] sm:$0xff] %v14274_v9  ;;  %v14278_v33 = vpop.permute.xlu1 %7784  ;;  %v7841_v29 = vpop.permute.xlu0 %7840 }
0x1373   : > { %15105 = vst [vmem:[#allocation16_spill] sm:$0xff] %v14278_v33  ;;  %v7793_v14 = vsel %vm532_vm4, %v7781_v38, %v14278_v33  ;;  %v7856_v36 = vsel %vm588_vm5, %v14072_v48, %v7841_v29 }
0x1374   : > { %v14286_v7 = vmul.f32 %v7807_v39, %v7793_v14  ;;  %v14288_v52 = vmul.f32 %v7865_v3, %v7856_v36 }
0x1376   : > { %15106 = vst [vmem:[#allocation14_spill] sm:$0xff] %v14286_v7  ;;  %15107 = vst [vmem:[#allocation32_spill] sm:$0xff] %v14288_v52  ;;  %v7843_v63 = vpop.permute.xlu1 %7842  ;;  %v14297_v55 = vpop.permute.xlu0 %7844  ;;  %v7927_v52 = vrot.slane %v14295_v1, %v15082_v24 }
0x1377   : > { %15108 = vst [vmem:[#allocation26_spill] sm:$0xff] %v14297_v55  ;;  %v7857_v38 = vsel %vm588_vm5, %v14079_v62, %v7843_v63  ;;  %v7854_v14 = vsel %vm588_vm5, %v7841_v29, %v14297_v55  ;;  %v7671_v55 = vrot.slane %v14163_v50, %v15082_v24 }
0x1378   : > { %v14305_v36 = vmul.f32 %v7865_v3, %v7857_v38  ;;  %v14307_v39 = vmul.f32 %v7869_v30, %v7854_v14  ;;  %v7485_v14 = vrot.slane %v14077_v23, %v15082_v24 }
0x137a   : > { %15109 = vst [vmem:[#allocation44_spill] sm:$0xff] %v14305_v36  ;;  %15110 = vst [vmem:[#allocation38_spill] sm:$0xff] %v14307_v39  ;;  %v14311_v48 = vpop.permute.xlu1 %7846  ;;  %v14313_v33 = vpop.permute.xlu0 %7902  ;;  %v7497_v36 = vrot.slane %v14077_v23, %v15043_v58 }
0x137b   : > { %15111 = vst [vmem:[#allocation45_spill] sm:$0xff] %v14311_v48  ;;  %v7855_v7 = vsel %vm588_vm5, %v7843_v63, %v14311_v48  ;;  %v7918_v29 = vsel %vm644_vm7, %v14081_v37, %v14313_v33  ;;  %v7559_v48 = vrot.slane %v14095_v26, %v15043_v58 }
0x137c   : > { %v14322_v3 = vmul.f32 %v7869_v30, %v7855_v7  ;;  %v14324_v38 = vmul.f32 %v7927_v52, %v7918_v29  ;;  %v7547_v29 = vrot.slane %v14095_v26, %v15082_v24 }
0x137e   : > { %15112 = vst [vmem:[#allocation43_spill] sm:$0xff] %v14322_v3  ;;  %15113 = vst [vmem:[#allocation21_spill] sm:$0xff] %v14324_v38  ;;  %v14330_v62 = vpop.permute.xlu1 %7904  ;;  %v7469_v39 = vpop.permute.xlu0 %7468 }
0x137f   : > { %v7919_v63 = vsel %vm644_vm7, %v14085_v40, %v14330_v62  ;;  %v7472_v7 = vsel %vm261_vm6, %v14097_v19, %v7469_v39  ;;  %v7478_v30 = vsel %vm261_vm6, %v7469_v39, %v14033_v57  ;;  %v7609_v19 = vrot.slane %v14127_v10, %v15082_v24 }
0x1380   : > { %v14344_v23 = vmul.f32 %v7927_v52, %v7919_v63  ;;  %v7502_v38 = vmul.f32 %v7485_v14, %v7478_v30  ;;  %v7505_v37 = vmul.f32 %v7497_v36, %v7472_v7  ;;  %v7621_v57 = vrot.slane %v14127_v10, %v15043_v58 }
0x1382   : > { %15114 = vst [vmem:[#allocation35_spill] sm:$0xff] %v14344_v23  ;;  %7510 = vst [vmem:[#allocation4] sm:$0xff] %v7502_v38  ;;  %v7471_v40 = vpop.permute.xlu1 %7470  ;;  %v7531_v3 = vpop.permute.xlu0 %7530 }
0x1383   : > { %7513 = vst [vmem:[#allocation4 + $0x18] sm:$0xff] %v7505_v37  ;;  %v7473_v52 = vsel %vm261_vm6, %v14110_v25, %v7471_v40  ;;  %v7479_v39 = vsel %vm261_vm6, %v7471_v40, %v14039_v43  ;;  %v7534_v26 = vsel %vm304_vm1, %v14131_v44, %v7531_v3  ;;  %v7540_v63 = vsel %vm304_vm1, %v7531_v3, %v14041_v0 }
0x1384   : > { %v7506_v7 = vmul.f32 %v7485_v14, %v7479_v39  ;;  %v7509_v30 = vmul.f32 %v7497_v36, %v7473_v52  ;;  %v7564_v23 = vmul.f32 %v7547_v29, %v7540_v63  ;;  %v7567_v10 = vmul.f32 %v7559_v48, %v7534_v26 }
0x1385   : > { %v7683_v25 = vrot.slane %v14163_v50, %v15043_v58  ;;  %v9673_v0 = vpack.c.bf16 %v14139_v16, %v14120_v4  ;;  %v9707_v36 = vpack.c.bf16 %v14118_v42, %v14105_v8  ;;  %v7931_v42 = vrot.slane %v14295_v1, %v15081_v13 }
0x1386   : > { %7514 = vst [vmem:[#allocation4 + $0x20] sm:$0xff] %v7506_v7  ;;  %7517 = vst [vmem:[#allocation4 + $0x38] sm:$0xff] %v7509_v30  ;;  %v7533_v43 = vpop.permute.xlu1 %7532  ;;  %v7593_v40 = vpop.permute.xlu0 %7592  ;;  %v9671_v44 = vpack.c.bf16 %v7506_v7, %v7502_v38  ;;  %v9705_v9 = vpack.c.bf16 %v7509_v30, %v7505_v37 }
0x1387   : > { %7572 = vst [vmem:[#allocation4 + $0x40] sm:$0xff] %v7564_v23  ;;  %7575 = vst [vmem:[#allocation4 + $0x58] sm:$0xff] %v7567_v10  ;;  %v7535_v3 = vsel %vm304_vm1, %v14146_v31, %v7533_v43  ;;  %v7541_v50 = vsel %vm304_vm1, %v7533_v43, %v14047_v22  ;;  %v7596_v14 = vsel %vm360_vm0, %v14165_v47, %v7593_v40 }
0x1388   : > { %v7602_v37 = vsel %vm360_vm0, %v7593_v40, %v14049_v51  ;;  %v7568_v4 = vmul.f32 %v7547_v29, %v7541_v50  ;;  %v7571_v16 = vmul.f32 %v7559_v48, %v7535_v3  ;;  %v7629_v8 = vmul.f32 %v7621_v57, %v7596_v14  ;;  %9672 = vmatpush1.bf16.msra.mxu0 %v9671_v44  ;;  %v15116_v3 = vld [vmem:[#allocation33_spill] sm:$0xff] }
0x1389   : > { %v7626_v38 = vmul.f32 %v7609_v19, %v7602_v37  ;;  %9706 = vmatprep.subr.bf16.mxu1 %v9705_v9  ;;  %9674 = vmatprep.subr.bf16.mxu0 %v9673_v0  ;;  %v9677_v47 = vpack.c.bf16 %v14173_v34, %v14156_v41  ;;  %v9711_v51 = vpack.c.bf16 %v14154_v54, %v14141_v17 }
0x138a   : > { %v7595_v31 = vpop.permute.xlu1 %7594  ;;  %v7655_v22 = vpop.permute.xlu0 %7654  ;;  %9708 = vmatpush1.bf16.msra.mxu1 %v9707_v36  ;;  %v9675_v52 = vpack.c.bf16 %v7568_v4, %v7564_v23  ;;  %v9709_v39 = vpack.c.bf16 %v7571_v16, %v7567_v10  ;;  %v7749_v54 = vrot.slane %v14196_v46, %v15041_v60  ;;  %v15119_v4 = vld [vmem:[#allocation15_spill] sm:$0xff] }
0x138b   : > { %v7597_v48 = vsel %vm360_vm0, %v14179_v61, %v7595_v31  ;;  %v7603_v9 = vsel %vm360_vm0, %v7595_v31, %v14055_v32  ;;  %v7658_v29 = vsel %vm416_vm2, %v14198_v12, %v7655_v22  ;;  %v7664_v23 = vsel %vm416_vm2, %v7655_v22, %v14057_v20  ;;  %v15122_v31 = vld [vmem:[#allocation13_spill] sm:$0xff] }
0x138c   : > { %v7630_v41 = vmul.f32 %v7609_v19, %v7603_v9  ;;  %v7633_v34 = vmul.f32 %v7621_v57, %v7597_v48  ;;  %v7688_v26 = vmul.f32 %v7671_v55, %v7664_v23  ;;  %v7691_v17 = vmul.f32 %v7683_v25, %v7658_v29  ;;  %9676 = vmatpush1.bf16.msra.mxu0 %v9675_v52  ;;  %v15123_v52 = vld [vmem:[#allocation9_spill] sm:$0xff] }
0x138d   : > { %9710 = vmatprep.subr.bf16.mxu1 %v9709_v39  ;;  %9678 = vmatprep.subr.bf16.mxu0 %v9677_v47  ;;  %v7753_v12 = vrot.slane %v14196_v46, %v15043_v58  ;;  %v9715_v20 = vpack.c.bf16 %v14187_v56, %v14175_v35  ;;  %v9681_v46 = vpack.c.bf16 %v14206_v49, %v14189_v5 }
0x138e   : > { %v7657_v61 = vpop.permute.xlu1 %7656  ;;  %v14404_v32 = vpop.permute.xlu0 %7906  ;;  %9712 = vmatpush1.bf16.msra.mxu1 %v9711_v51  ;;  %v9679_v63 = vpack.c.bf16 %v7630_v41, %v7626_v38  ;;  %v9713_v7 = vpack.c.bf16 %v7633_v34, %v7629_v8  ;;  %v7811_v56 = vrot.slane %v14229_v27, %v15041_v60  ;;  %v15120_v38 = vld [vmem:[#allocation39_spill] sm:$0xff]  ;;  %v15125_v41 = vld [vmem:[#allocation18_spill] sm:$0xff] }
0x138f   : > { %v7659_v19 = vsel %vm416_vm2, %v14212_v28, %v7657_v61  ;;  %v7665_v57 = vsel %vm416_vm2, %v7657_v61, %v14062_v18  ;;  %v7916_v30 = vsel %vm644_vm7, %v14313_v33, %v14404_v32  ;;  %v9685_v28 = vpack.c.bf16 %v13913_v2, %v13894_v21  ;;  %v15121_v8 = vld [vmem:[#allocation7_spill] sm:$0xff] }
0x1390   : > { %v7692_v10 = vmul.f32 %v7671_v55, %v7665_v57  ;;  %v7695_v43 = vmul.f32 %v7683_v25, %v7659_v19  ;;  %v14422_v40 = vmul.f32 %v7931_v42, %v7916_v30  ;;  %9680 = vmatpush1.bf16.msra.mxu0 %v9679_v63  ;;  %9714 = vmatprep.subr.bf16.mxu1 %v9713_v7  ;;  %v15115_v25 = vld [vmem:[#allocation28_spill] sm:$0xff]  ;;  %v15126_v34 = vld [vmem:[#allocation27_spill] sm:$0xff]  ;;  %v15128_v7 = vld [vmem:[#allocation42_spill] sm:$0xff] }
0x1391   : > { %9682 = vmatprep.subr.bf16.mxu0 %v9681_v46  ;;  %v7815_v33 = vrot.slane %v14229_v27, %v15043_v58  ;;  %v9719_v44 = vpack.c.bf16 %v15115_v25, %v14208_v53  ;;  %v15118_v53 = vld [vmem:[#allocation22_spill] sm:$0xff]  ;;  %v7939_v61 = vrot.slane %v14295_v1, %v15043_v58  ;;  %v15130_v19 = vld [vmem:[#allocation19_spill] sm:$0xff] }
0x1392   : > { %v14426_v35 = vpop.permute.xlu1 %7908  ;;  %v7725_v18 = vpop.permute.xlu0 %7724  ;;  %9716 = vmatpush1.bf16.msra.mxu1 %v9715_v20  ;;  %v9683_v5 = vpack.c.bf16 %v7692_v10, %v7688_v26  ;;  %v9717_v49 = vpack.c.bf16 %v7695_v43, %v7691_v17  ;;  %v9689_v16 = vpack.c.bf16 %v15119_v4, %v15118_v53  ;;  %v15127_v26 = vpack.c.bf16 %v15125_v41, %v15126_v34  ;;  %v15129_v20 = vld [vmem:[#allocation12_spill] sm:$0xff]  ;;  %v15131_v57 = vld [vmem:[#allocation14_spill] sm:$0xff]  ;;  %v15139_v53 = vld [vmem:[#allocation43_spill] sm:$0xff] }
0x1393   : > { %v7917_v55 = vsel %vm644_vm7, %v14330_v62, %v14426_v35  ;;  %v7728_v21 = vsel %vm476_vm3, %v14231_v11, %v7725_v18  ;;  %v7734_v2 = vsel %vm476_vm3, %v7725_v18, %v14064_v59  ;;  %v15117_v62 = vld [vmem:[#allocation11_spill] sm:$0xff]  ;;  %v7873_v11 = vrot.slane %v14262_v6, %v15041_v60  ;;  %v15132_v10 = vld [vmem:[#allocation16_spill] sm:$0xff]  ;;  %v15134_v18 = vld [vmem:[#allocation26_spill] sm:$0xff] }
0x1394   : > { %v14444_v27 = vmul.f32 %v7931_v42, %v7917_v55  ;;  %v7760_v0 = vmul.f32 %v7749_v54, %v7728_v21  ;;  %v7761_v36 = vmul.f32 %v7753_v12, %v7734_v2  ;;  %9684 = vmatpush1.bf16.msra.mxu0 %v9683_v5  ;;  %9718 = vmatprep.subr.bf16.mxu1 %v9717_v49  ;;  %v15135_v49 = vld [vmem:[#allocation31_spill] sm:$0xff]  ;;  %v15145_v34 = vld [vmem:[#allocation40_spill] sm:$0xff] }
0x1395   : > { %9686 = vmatprep.subr.bf16.mxu0 %v9685_v28  ;;  %v9721_v50 = vpack.c.bf16 %v15117_v62, %v15116_v3  ;;  %v7877_v59 = vrot.slane %v14262_v6, %v15043_v58  ;;  %v9723_v42 = vpack.c.bf16 %v15121_v8, %v15120_v38  ;;  %v15124_v6 = vld [vmem:[#allocation34_spill] sm:$0xff]  ;;  %v7935_v17 = vrot.slane %v14295_v1, %v15041_v60  ;;  %v15136_v3 = vld [vmem:[#allocation23_spill] sm:$0xff]  ;;  %v15137_v62 = vld [vmem:[#allocation25_spill] sm:$0xff] }
0x1396   : > { %v7727_v14 = vpop.permute.xlu1 %7726  ;;  %v7787_v37 = vpop.permute.xlu0 %7786  ;;  %9720 = vmatpush1.bf16.msra.mxu1 %v9719_v44  ;;  %v9693_v30 = vpack.c.bf16 %v15131_v57, %v15130_v19  ;;  %v15133_v28 = vld [vmem:[#allocation30_spill] sm:$0xff]  ;;  %v15140_v38 = vld [vmem:[#allocation45_spill] sm:$0xff] }
0x1397   : > { %v7729_v22 = vsel %vm476_vm3, %v15122_v31, %v7727_v14  ;;  %v7735_v39 = vsel %vm476_vm3, %v7727_v14, %v15123_v52  ;;  %v7790_v47 = vsel %vm532_vm4, %v14264_v45, %v7787_v37  ;;  %v7796_v51 = vsel %vm532_vm4, %v7787_v37, %v15124_v6  ;;  %9722 = vmatprep.subr.bf16.mxu1 %v9721_v50  ;;  %v15138_v37 = vld [vmem:[#allocation38_spill] sm:$0xff]  ;;  %v15142_v31 = vld [vmem:[#allocation20_spill] sm:$0xff] }
0x1398   : > { %v7764_v48 = vmul.f32 %v7749_v54, %v7729_v22  ;;  %v7765_v9 = vmul.f32 %v7753_v12, %v7735_v39  ;;  %v7822_v29 = vmul.f32 %v7811_v56, %v7790_v47  ;;  %v7823_v23 = vmul.f32 %v7815_v33, %v7796_v51  ;;  %9688 = vmatpush1.bf16.msra.mxu0 %v15127_v26 }
0x1399   : > { %9690 = vmatprep.subr.bf16.mxu0 %v9689_v16  ;;  %v9691_v54 = vpack.c.bf16 %v15129_v20, %v15128_v7  ;;  %v9695_v50 = vpack.c.bf16 %v15137_v62, %v15136_v3  ;;  %v9697_v4 = vpack.c.bf16 %v15139_v53, %v15138_v37  ;;  %v15147_v7 = vld [vmem:[#allocation35_spill] sm:$0xff]  ;;  %v8645_v53 = vld [vmem:[%s14795_s2 + $0xe8] sm:$0x3] }
0x139a   : > { %v7789_v45 = vpop.permute.xlu1 %7788  ;;  %v7849_v63 = vpop.permute.xlu0 %7848  ;;  %9724 = vmatpush1.bf16.msra.mxu1 %v9723_v42  ;;  %v9725_v12 = vpack.c.bf16 %v7765_v9, %v7761_v36  ;;  %v9727_v46 = vpack.c.bf16 %v7764_v48, %v7760_v0  ;;  %v15143_v48 = vld [vmem:[#allocation32_spill] sm:$0xff] }
0x139b   : > { %v7791_v43 = vsel %vm532_vm4, %v15132_v10, %v7789_v45  ;;  %v7797_v1 = vsel %vm532_vm4, %v7789_v45, %v15133_v28  ;;  %v7852_v5 = vsel %vm588_vm5, %v15134_v18, %v7849_v63  ;;  %v7858_v55 = vsel %vm588_vm5, %v7849_v63, %v15135_v49  ;;  %v15144_v9 = vld [vmem:[#allocation44_spill] sm:$0xff]  ;;  %v15146_v63 = vld [vmem:[#allocation21_spill] sm:$0xff] }
0x139c   : > { %v7826_v21 = vmul.f32 %v7811_v56, %v7791_v43  ;;  %v7827_v2 = vmul.f32 %v7815_v33, %v7797_v1  ;;  %v7884_v25 = vmul.f32 %v7873_v11, %v7852_v5  ;;  %v7885_v44 = vmul.f32 %v7877_v59, %v7858_v55  ;;  %9692 = vmatpush1.bf16.msra.mxu0 %v9691_v54  ;;  %v15141_v33 = vld [vmem:[#allocation17_spill] sm:$0xff] }
0x139d   : > { %9726 = vmatprep.subr.bf16.mxu1 %v9725_v12  ;;  %9694 = vmatprep.subr.bf16.mxu0 %v9693_v30  ;;  %v9703_v20 = vpack.c.bf16 %v15147_v7, %v15146_v63  ;;  %v15149_v55 = vld [vmem:[#allocation5_spill] sm:$0xff] }
0x139e   : > { %v7851_v0 = vpop.permute.xlu1 %7850  ;;  %v7911_v36 = vpop.permute.xlu0 %7910  ;;  %9728 = vmatpush1.bf16.msra.mxu1 %v9727_v46  ;;  %v9729_v14 = vpack.c.bf16 %v7827_v2, %v7823_v23  ;;  %v9731_v16 = vpack.c.bf16 %v7826_v21, %v7822_v29  ;;  %v9699_v29 = vpack.c.bf16 %v15144_v9, %v15143_v48 }
0x139f   : > { %v7853_v56 = vsel %vm588_vm5, %v15140_v38, %v7851_v0  ;;  %v7859_v8 = vsel %vm588_vm5, %v7851_v0, %v15141_v33  ;;  %v7914_v42 = vsel %vm644_vm7, %v14404_v32, %v7911_v36  ;;  %v7920_v22 = vsel %vm644_vm7, %v7911_v36, %v15142_v31  ;;  %v15150_v0 = vld [vmem:[#allocation29_spill] sm:$0xff] }
0x13a0   : > { %v7888_v52 = vmul.f32 %v7873_v11, %v7853_v56  ;;  %v7889_v39 = vmul.f32 %v7877_v59, %v7859_v8  ;;  %v7946_v47 = vmul.f32 %v7935_v17, %v7914_v42  ;;  %v7947_v6 = vmul.f32 %v7939_v61, %v7920_v22  ;;  %9696 = vmatpush1.bf16.msra.mxu0 %v9695_v50  ;;  %v14576_v56 = vld [vmem:[%s14794_s1 + $0x2] ss:$8 sm:$0xf] }
0x13a1   : > { %9730 = vmatprep.subr.bf16.mxu1 %v9729_v14  ;;  %9698 = vmatprep.subr.bf16.mxu0 %v9697_v4  ;;  %v9701_v59 = vpack.c.bf16 %v14444_v27, %v14422_v40  ;;  %v15148_v40 = vmov 0.0   ;;  %v14567_v4 = vld [vmem:[%s14794_s1 + $0x1] ss:$8 sm:$0xf]  ;;  %v8349_v22 = vrot.slane %v14576_v56, %v15081_v13 }
0x13a2   : > { %v7913_v51 = vpop.permute.xlu1 %7912  ;;  %9732 = vmatpush1.bf16.msra.mxu1 %v9731_v16  ;;  %v9733_v23 = vpack.c.bf16 %v7889_v39, %v7885_v44  ;;  %v9735_v41 = vpack.c.bf16 %v7888_v52, %v7884_v25  ;;  %v8295_v38 = vrot.slane %v14567_v4, %v15081_v13  ;;  %v14588_v52 = vld [vmem:[%s14794_s1 + $0x3] ss:$8 sm:$0xf] }
0x13a3   : > { %v7915_v32 = vsel %vm644_vm7, %v14426_v35, %v7913_v51  ;;  %v7921_v11 = vsel %vm644_vm7, %v7913_v51, %v15145_v34  ;;  %v7960_v35 = vld [vmem:[%s14795_s2 + $0xd0] sm:$0x3]  ;;  %v8403_v9 = vrot.slane %v14588_v52, %v15081_v13 }
0x13a4   : > { %v7950_v26 = vmul.f32 %v7935_v17, %v7915_v32  ;;  %v7951_v45 = vmul.f32 %v7939_v61, %v7921_v11  ;;  %9700 = vmatpush1.bf16.msra.mxu0 %v9699_v29  ;;  %9734 = vmatprep.subr.bf16.mxu1 %v9733_v23  ;;  %v14600_v29 = vld [vmem:[%s14794_s1 + $0x4] ss:$8 sm:$0xf] }
0x13a5   : > { %9702 = vmatprep.subr.bf16.mxu0 %v9701_v59  ;;  %v8457_v59 = vrot.slane %v14600_v29, %v15082_v24 }
0x13a6   : > { %9736 = vmatpush1.bf16.msra.mxu1 %v9735_v41  ;;  %v9737_v54 = vpack.c.bf16 %v7951_v45, %v7947_v6  ;;  %v9739_v12 = vpack.c.bf16 %v7950_v26, %v7946_v47  ;;  %v14615_v26 = vld [vmem:[%s14794_s1 + $0x5] ss:$8 sm:$0xf] }
0x13a8   : > { %9704 = vmatpush1.bf16.msra.mxu0 %v9703_v20  ;;  %9738 = vmatprep.subr.bf16.mxu1 %v9737_v54 }
0x13aa   : > { %9740 = vmatpush1.bf16.msra.mxu1 %v9739_v12  ;;  %v8511_v12 = vrot.slane %v14615_v26, %v15082_v24 }
0x13ab   : > { %8106 = vmatmul.mubr.f32.vlgmr.msra.gmra.mrb[34].mxu0 %v7960_v35 }
0x13ac   : > { %8742 = vmatprep.mubr.f32.mxu0 %v15148_v40 }
0x13ad   : > { %8177 = vmatmul.mubr.f32.vlgmr.msra.gmra.mrb[34].mxu1 %v7960_v35  ;;  %v14630_v35 = vld [vmem:[%s14794_s1 + $0x6] ss:$8 sm:$0xf] }
0x13ae   : > { %8813 = vmatprep.mubr.f32.mxu1 %v15148_v40 }
0x13af   : > { %v8037_v27 = vpop.permute.xlu0 %8036 }
0x147e   : > { %v8107_v17 = vpop.f32.mrb[34].mxu0 }
0x147f   : > { %v8108_v61 = vadd.f32 %v8107_v17, %v8037_v27  ;;  %v8109_v19 = vpop.f32.mrb[35].mxu0 }
0x1480   : > { %v8110_v57 = vadd.f32 %v8109_v19, %v8037_v27  ;;  %v8178_v30 = vpop.f32.mrb[34].mxu1 }
0x1481   : > { %v8183_v46 = vmax.f32 %v8108_v61, 0.0  ;;  %v8179_v10 = vadd.f32 %v8178_v30, %v8037_v27  ;;  %v8180_v43 = vpop.f32.mrb[35].mxu1  ;;  %v14645_v30 = vld [vmem:[%s14794_s1] ss:$8 sm:$0xf] }
0x1482   : > { %v8184_v28 = vmax.f32 %v8110_v57, 0.0  ;;  %v8181_v1 = vadd.f32 %v8180_v43, %v8037_v27  ;;  %v8565_v57 = vrot.slane %v14630_v35, %v15082_v24 }
0x1483   : > { %v8185_v18 = vmax.f32 %v8179_v10, 0.0 }
0x1484   : > { %v8191_v5 = vcombine.low %v8183_v46, %v8184_v28  ;;  %v8186_v49 = vmax.f32 %v8181_v1, 0.0 }
0x1486   : > { %v8199_v21 = vrot.slane %v8191_v5, %v15149_v55  ;;  %v8192_v2 = vcombine.low %v8185_v18, %v8186_v49  ;;  %v8253_v18 = vrot.slane %v14645_v30, %v15081_v13 }
0x1488   : > { %v8206_v25 = vrot.slane %v8192_v2, %v15149_v55 }
0x148a   : > { %v8207_v44 = vcombine.low %v8199_v21, %v8206_v25  ;;  %v8299_v21 = vrot.slane %v14567_v4, %v15041_v60 }
0x148c   : > { %v8209_v36 = vadd.f32 %v8207_v44, %v15150_v0  ;;  %v8291_v0 = vrot.slane %v14567_v4, %v15082_v24 }
0x148e   : > { %v8211_v3 = vcombine.high %v8209_v36, %v8209_v36  ;;  %v8218_v62 = vrot.slane %v8209_v36, %v15149_v55  ;;  %9075 = vst.sshfl [vmem:[#allocation4 + $0x20] sm:$0x3 pattern:$0x76325410] %v8209_v36  ;;  %v8303_v36 = vrot.slane %v14567_v4, %v15043_v58 }
0x1490   : > { %v8225_v50 = vrot.slane %v8211_v3, %v15149_v55  ;;  %9076 = vst.sshfl [vmem:[#allocation4 + $0x30] sm:$0x3 pattern:$0x76325410] %v8211_v3  ;;  %8274 = vrot.lane.b32.xlu1 %v8218_v62, %s9835_s25  ;;  %v8226_v14 = vcombine.high %v8218_v62, %v8218_v62 }
0x1492   : > { %8276 = vrot.lane.b32.xlu0 %v8226_v14, %s9835_s25  ;;  %8437 = vst [vmem:[#allocation4 + $0x28] sm:$0x3] %v8226_v14  ;;  %v8227_v37 = vcombine.high %v8225_v50, %v8225_v50 }
0x1494   : > { %8328 = vrot.lane.b32.xlu1 %v8218_v62, %s9836_s26  ;;  %8439 = vst [vmem:[#allocation4 + $0x38] sm:$0x3] %v8227_v37 }
0x1496   : > { %8330 = vrot.lane.b32.xlu0 %v8226_v14, %s9836_s26 }
0x1498   : > { %8382 = vrot.lane.b32.xlu1 %v8218_v62, %s9837_s27 }
0x149a   : > { %8384 = vrot.lane.b32.xlu0 %v8226_v14, %s9837_s27 }
0x149c   : > { %8440 = vrot.lane.b32.xlu1 %v8218_v62, %s9838_s28 }
0x149e   : > { %8442 = vrot.lane.b32.xlu0 %v8226_v14, %s9838_s28 }
0x14a0   : > { %8494 = vrot.lane.b32.xlu1 %v8218_v62, %s9839_s29 }
0x14a2   : > { %8496 = vrot.lane.b32.xlu0 %v8226_v14, %s9839_s29 }
0x14a4   : > { %8548 = vrot.lane.b32.xlu1 %v8218_v62, %s9840_s30 }
0x14a6   : > { %8550 = vrot.lane.b32.xlu0 %v8226_v14, %s9840_s30 }
0x14a8   : > { %8232 = vrot.lane.b32.xlu1 %v8218_v62, %s9841_s6 }
0x14aa   : > { %8234 = vrot.lane.b32.xlu0 %v8226_v14, %s9841_s6 }
0x14ac   : > { %8278 = vrot.lane.b32.xlu1 %v8225_v50, %s9835_s25 }
0x14ae   : > { %8280 = vrot.lane.b32.xlu0 %v8227_v37, %s9835_s25  ;;  %s226_s25 = scalar_lea.vmem %s14798_s5, %s8929_s21 }
0x14b0   : > { %8332 = vrot.lane.b32.xlu1 %v8225_v50, %s9836_s26 }
0x14b2   : > { %8334 = vrot.lane.b32.xlu0 %v8227_v37, %s9836_s26 }
0x14b4   : > { %8386 = vrot.lane.b32.xlu1 %v8225_v50, %s9837_s27 }
0x14b6   : > { %8388 = vrot.lane.b32.xlu0 %v8227_v37, %s9837_s27 }
0x14b8   : > { %8444 = vrot.lane.b32.xlu1 %v8225_v50, %s9838_s28 }
0x14ba   : > { %8446 = vrot.lane.b32.xlu0 %v8227_v37, %s9838_s28 }
0x14bc   : > { %8498 = vrot.lane.b32.xlu1 %v8225_v50, %s9839_s29 }
0x14be   : > { %8500 = vrot.lane.b32.xlu0 %v8227_v37, %s9839_s29 }
0x14c0   : > { %8552 = vrot.lane.b32.xlu1 %v8225_v50, %s9840_s30 }
0x14c2   : > { %8554 = vrot.lane.b32.xlu0 %v8227_v37, %s9840_s30 }
0x14c4   : > { %8236 = vrot.lane.b32.xlu1 %v8225_v50, %s9841_s6 }
0x14c6   : > { %8238 = vrot.lane.b32.xlu0 %v8227_v37, %s9841_s6 }
0x14c8   : > { %8602 = vrot.lane.b32.xlu1 %v8218_v62, %s9842_s7 }
0x14ca   : > { %8604 = vrot.lane.b32.xlu0 %v8226_v14, %s9842_s7  ;;  %v8353_v14 = vrot.slane %v14576_v56, %v15041_v60 }
0x14cc   : > { %8606 = vrot.lane.b32.xlu1 %v8225_v50, %s9842_s7 }
0x14ce   : > { %8608 = vrot.lane.b32.xlu0 %v8227_v37, %s9842_s7 }
0x14d0   : > { %8660 = vperm.xlu1 %9773, %v8645_v53  }
0x1502   : > { %v14569_v16 = vpop.permute.xlu1 %8274 }
0x1504   : > { %v8277_v33 = vpop.permute.xlu0 %8276 }
0x1505   : > { %v8284_v8 = vsel %vm304_vm1, %v14569_v16, %v8277_v33 }
0x1506   : > { %v8309_v42 = vmul.f32 %v8295_v38, %v8284_v8  ;;  %v14581_v31 = vpop.permute.xlu1 %8328  ;;  %v8345_v38 = vrot.slane %v14576_v56, %v15082_v24 }
0x1508   : > { %v8317_v39 = vrot.slane %v8309_v42, 6  ;;  %v8331_v47 = vpop.permute.xlu0 %8330 }
0x1509   : > { %v8338_v6 = vsel %vm360_vm0, %v14581_v31, %v8331_v47 }
0x150a   : > { %8325 = vst [vmem:[#allocation4 + $0x8] sm:$0xc] %v8317_v39  ;;  %v8363_v51 = vmul.f32 %v8349_v22, %v8338_v6  ;;  %v14593_v48 = vpop.permute.xlu1 %8382  ;;  %v8357_v22 = vrot.slane %v14576_v56, %v15043_v58  ;;  %v8399_v56 = vrot.slane %v14588_v52, %v15082_v24 }
0x150c   : > { %v8371_v23 = vrot.slane %v8363_v51, 4  ;;  %v14602_v41 = vpop.permute.xlu0 %8384 }
0x150d   : > { %v8392_v32 = vsel %vm416_vm2, %v14593_v48, %v14602_v41 }
0x150e   : > { %8379 = vst [vmem:[#allocation4 + $0x8] sm:$0x30] %v8371_v23  ;;  %v8417_v34 = vmul.f32 %v8403_v9, %v8392_v32  ;;  %v14608_v11 = vpop.permute.xlu1 %8440 }
0x1510   : > { %v8425_v45 = vrot.slane %v8417_v34, 2  ;;  %v14617_v63 = vpop.permute.xlu0 %8442 }
0x1511   : > { %v8450_v7 = vsel %vm476_vm3, %v14608_v11, %v14617_v63 }
0x1512   : > { %8433 = vst [vmem:[#allocation4 + $0x8] sm:$0xc0] %v8425_v45  ;;  %v8474_v20 = vmul.f32 %v8457_v59, %v8450_v7  ;;  %v14623_v54 = vpop.permute.xlu1 %8494 }
0x1514   : > { %v8482_v40 = vrot.slane %v8474_v20, 6  ;;  %v14632_v27 = vpop.permute.xlu0 %8496  ;;  %v8411_v20 = vrot.slane %v14588_v52, %v15043_v58 }
0x1515   : > { %v8504_v17 = vsel %vm532_vm4, %v14623_v54, %v14632_v27 }
0x1516   : > { %8490 = vst [vmem:[#allocation4 + $0x20] sm:$0xc] %v8482_v40  ;;  %v8528_v61 = vmul.f32 %v8511_v12, %v8504_v17  ;;  %v14638_v19 = vpop.permute.xlu1 %8548 }
0x1518   : > { %v8536_v46 = vrot.slane %v8528_v61, 4  ;;  %v14647_v10 = vpop.permute.xlu0 %8550 }
0x1519   : > { %v8558_v43 = vsel %vm588_vm5, %v14638_v19, %v14647_v10 }
0x151a   : > { %8544 = vst [vmem:[#allocation4 + $0x20] sm:$0x30] %v8536_v46  ;;  %v8582_v28 = vmul.f32 %v8565_v57, %v8558_v43  ;;  %v14653_v1 = vpop.permute.xlu1 %8232  ;;  %v8461_v57 = vrot.slane %v14600_v29, %v15081_v13 }
0x151c   : > { %v8590_v5 = vrot.slane %v8582_v28, 2  ;;  %v14657_v49 = vpop.permute.xlu0 %8234 }
0x151d   : > { %v8242_v2 = vsel %vm261_vm6, %v14653_v1, %v14657_v49 }
0x151e   : > { %8598 = vst [vmem:[#allocation4 + $0x20] sm:$0xc0] %v8590_v5  ;;  %v8267_v25 = vmul.f32 %v8253_v18, %v8242_v2  ;;  %v8279_v44 = vpop.permute.xlu1 %8278 }
0x151f   : > { %v8283_v3 = vsel %vm304_vm1, %v8277_v33, %v8279_v44 }
0x1520   : > { %8271 = vst [vmem:[#allocation4 + $0x8] sm:$0x3] %v8267_v25  ;;  %v8310_v62 = vmul.f32 %v8299_v21, %v8283_v3  ;;  %v8281_v50 = vpop.permute.xlu0 %8280  ;;  %v8469_v21 = vrot.slane %v14600_v29, %v15043_v58 }
0x1521   : > { %v8282_v37 = vsel %vm304_vm1, %v8279_v44, %v8281_v50  ;;  %v8285_v53 = vsel %vm304_vm1, %v8281_v50, %v14569_v16  ;;  %v8407_v16 = vrot.slane %v14588_v52, %v15041_v60  ;;  %v8465_v52 = vrot.slane %v14600_v29, %v15041_v60 }
0x1522   : > { %v8318_v4 = vrot.slane %v8310_v62, 6  ;;  %v8308_v8 = vmul.f32 %v8291_v0, %v8285_v53  ;;  %v8311_v42 = vmul.f32 %v8303_v36, %v8282_v37  ;;  %v8333_v33 = vpop.permute.xlu1 %8332  ;;  %v8515_v36 = vrot.slane %v14615_v26, %v15081_v13 }
0x1523   : > { %v8337_v39 = vsel %vm360_vm0, %v8331_v47, %v8333_v33  ;;  %v8519_v29 = vrot.slane %v14615_v26, %v15041_v60  ;;  %v8523_v53 = vrot.slane %v14615_v26, %v15043_v58  ;;  %v8573_v26 = vrot.slane %v14630_v35, %v15041_v60 }
0x1524   : > { %8326 = vst [vmem:[#allocation4 + $0x10] sm:$0xc] %v8318_v4  ;;  %v8316_v6 = vrot.slane %v8308_v8, 6  ;;  %v8319_v51 = vrot.slane %v8311_v42, 6  ;;  %v8364_v9 = vmul.f32 %v8353_v14, %v8337_v39  ;;  %v8335_v23 = vpop.permute.xlu0 %8334 }
0x1525   : > { %v8336_v32 = vsel %vm360_vm0, %v8333_v33, %v8335_v23  ;;  %v8339_v34 = vsel %vm360_vm0, %v8335_v23, %v14581_v31  ;;  %v8569_v33 = vrot.slane %v14630_v35, %v15081_v13  ;;  %v8577_v23 = vrot.slane %v14630_v35, %v15043_v58 }
0x1526   : > { %8324 = vst [vmem:[#allocation4] sm:$0xc] %v8316_v6  ;;  %8327 = vst [vmem:[#allocation4 + $0x18] sm:$0xc] %v8319_v51  ;;  %v8372_v47 = vrot.slane %v8364_v9, 4  ;;  %v8362_v59 = vmul.f32 %v8345_v38, %v8339_v34  ;;  %v8365_v45 = vmul.f32 %v8357_v22, %v8336_v32  ;;  %v8387_v7 = vpop.permute.xlu1 %8386  ;;  %v8249_v35 = vrot.slane %v14645_v30, %v15082_v24 }
0x1527   : > { %v8391_v12 = vsel %vm416_vm2, %v14602_v41, %v8387_v7 }
0x1528   : > { %8380 = vst [vmem:[#allocation4 + $0x10] sm:$0x30] %v8372_v47  ;;  %v8370_v40 = vrot.slane %v8362_v59, 4  ;;  %v8373_v17 = vrot.slane %v8365_v45, 4  ;;  %v8418_v31 = vmul.f32 %v8407_v16, %v8391_v12  ;;  %v8389_v61 = vpop.permute.xlu0 %8388  ;;  %v8257_v47 = vrot.slane %v14645_v30, %v15041_v60 }
0x1529   : > { %v8390_v46 = vsel %vm416_vm2, %v8387_v7, %v8389_v61  ;;  %v8393_v43 = vsel %vm416_vm2, %v8389_v61, %v14593_v48 }
0x152a   : > { %8378 = vst [vmem:[#allocation4] sm:$0x30] %v8370_v40  ;;  %8381 = vst [vmem:[#allocation4 + $0x18] sm:$0x30] %v8373_v17  ;;  %v8426_v41 = vrot.slane %v8418_v31, 2  ;;  %v8416_v28 = vmul.f32 %v8399_v56, %v8393_v43  ;;  %v8419_v18 = vmul.f32 %v8411_v20, %v8390_v46  ;;  %v8445_v5 = vpop.permute.xlu1 %8444  ;;  %v8261_v40 = vrot.slane %v14645_v30, %v15043_v58 }
0x152b   : > { %v8449_v2 = vsel %vm476_vm3, %v14617_v63, %v8445_v5 }
0x152c   : > { %8434 = vst [vmem:[#allocation4 + $0x10] sm:$0xc0] %v8426_v41  ;;  %v8424_v25 = vrot.slane %v8416_v28, 2  ;;  %v8427_v44 = vrot.slane %v8419_v18, 2  ;;  %v8475_v48 = vmul.f32 %v8461_v57, %v8449_v2  ;;  %v8447_v0 = vpop.permute.xlu0 %8446 }
0x152d   : > { %v8448_v3 = vsel %vm476_vm3, %v8445_v5, %v8447_v0  ;;  %v8451_v62 = vsel %vm476_vm3, %v8447_v0, %v14608_v11  ;;  %v8647_v0 = vld [vmem:[#allocation4 + $0x8] sm:$0xff] }
0x152e   : > { %8432 = vst [vmem:[#allocation4] sm:$0xc0] %v8424_v25  ;;  %8435 = vst [vmem:[#allocation4 + $0x18] sm:$0xc0] %v8427_v44  ;;  %v8483_v63 = vrot.slane %v8475_v48, 6  ;;  %v8476_v50 = vmul.f32 %v8465_v52, %v8448_v3  ;;  %v8477_v14 = vmul.f32 %v8469_v21, %v8451_v62  ;;  %v8499_v37 = vpop.permute.xlu1 %8498 }
0x152f   : > { %v8503_v38 = vsel %vm532_vm4, %v14632_v27, %v8499_v37 }
0x1530   : > { %8491 = vst [vmem:[#allocation4 + $0x28] sm:$0xc] %v8483_v63  ;;  %v8484_v4 = vrot.slane %v8476_v50, 6  ;;  %v8485_v8 = vrot.slane %v8477_v14, 6  ;;  %v8529_v11 = vmul.f32 %v8515_v36, %v8503_v38  ;;  %v8501_v42 = vpop.permute.xlu0 %8500 }
0x1531   : > { %v8502_v22 = vsel %vm532_vm4, %v8499_v37, %v8501_v42  ;;  %v8505_v39 = vsel %vm532_vm4, %v8501_v42, %v14623_v54  ;;  %v8644_v42 = vld [vmem:[%s14795_s2 + $0xe0] sm:$0x3] }
0x1532   : > { %8492 = vst [vmem:[#allocation4 + $0x30] sm:$0xc] %v8484_v4  ;;  %8493 = vst [vmem:[#allocation4 + $0x38] sm:$0xc] %v8485_v8  ;;  %v8537_v27 = vrot.slane %v8529_v11, 4  ;;  %v8530_v6 = vmul.f32 %v8519_v29, %v8502_v22  ;;  %v8531_v51 = vmul.f32 %v8523_v53, %v8505_v39  ;;  %v8553_v9 = vpop.permute.xlu1 %8552 }
0x1533   : > { %v8557_v16 = vsel %vm588_vm5, %v14647_v10, %v8553_v9 }
0x1534   : > { %8545 = vst [vmem:[#allocation4 + $0x28] sm:$0x30] %v8537_v27  ;;  %v8538_v32 = vrot.slane %v8530_v6, 4  ;;  %v8539_v34 = vrot.slane %v8531_v51, 4  ;;  %v8583_v54 = vmul.f32 %v8569_v33, %v8557_v16  ;;  %v8555_v56 = vpop.permute.xlu0 %8554 }
0x1535   : > { %v8556_v59 = vsel %vm588_vm5, %v8553_v9, %v8555_v56  ;;  %v8559_v45 = vsel %vm588_vm5, %v8555_v56, %v14638_v19  ;;  %v9080_v19 = vld [vmem:[%s14794_s1 + $0x7] ss:$8 sm:$0xf] }
0x1536   : > { %8546 = vst [vmem:[#allocation4 + $0x30] sm:$0x30] %v8538_v32  ;;  %8547 = vst [vmem:[#allocation4 + $0x38] sm:$0x30] %v8539_v34  ;;  %v8591_v10 = vrot.slane %v8583_v54, 2  ;;  %v8584_v7 = vmul.f32 %v8573_v26, %v8556_v59  ;;  %v8585_v20 = vmul.f32 %v8577_v23, %v8559_v45  ;;  %v8237_v12 = vpop.permute.xlu1 %8236  ;;  %v8619_v28 = vrot.slane %v9080_v19, %v15082_v24 }
0x1537   : > { %v8241_v17 = vsel %vm261_vm6, %v14657_v49, %v8237_v12  ;;  %v8623_v5 = vrot.slane %v9080_v19, %v15081_v13  ;;  %v8631_v44 = vrot.slane %v9080_v19, %v15043_v58  ;;  %v8650_v58 = vld [vmem:[#allocation4 + $0x20] sm:$0xff] }
0x1538   : > { %8599 = vst [vmem:[#allocation4 + $0x28] sm:$0xc0] %v8591_v10  ;;  %v8592_v31 = vrot.slane %v8584_v7, 2  ;;  %v8593_v61 = vrot.slane %v8585_v20, 2  ;;  %v8268_v57 = vmul.f32 %v8257_v47, %v8241_v17  ;;  %v8239_v46 = vpop.permute.xlu0 %8238 }
0x1539   : > { %v8240_v43 = vsel %vm261_vm6, %v8237_v12, %v8239_v46  ;;  %v8243_v30 = vsel %vm261_vm6, %v8239_v46, %v14653_v1  ;;  %v8627_v1 = vrot.slane %v9080_v19, %v15041_v60 }
0x153a   : > { %8600 = vst [vmem:[#allocation4 + $0x30] sm:$0xc0] %v8592_v31  ;;  %8601 = vst [vmem:[#allocation4 + $0x38] sm:$0xc0] %v8593_v61  ;;  %v8266_v49 = vmul.f32 %v8249_v35, %v8243_v30  ;;  %v8269_v52 = vmul.f32 %v8261_v40, %v8240_v43  ;;  %v8603_v41 = vpop.permute.xlu1 %8602 }
0x153b   : > { %8272 = vst [vmem:[#allocation4 + $0x10] sm:$0x3] %v8268_v57 }
0x153c   : > { %8270 = vst [vmem:[#allocation4] sm:$0x3] %v8266_v49  ;;  %8273 = vst [vmem:[#allocation4 + $0x18] sm:$0x3] %v8269_v52  ;;  %v8605_v18 = vpop.permute.xlu0 %8604 }
0x153d   : > { %v8612_v21 = vsel %vm644_vm7, %v8603_v41, %v8605_v18 }
0x153e   : > { %v8636_v2 = vmul.f32 %v8619_v28, %v8612_v21  ;;  %v8607_v25 = vpop.permute.xlu1 %8606 }
0x153f   : > { %v8611_v48 = vsel %vm644_vm7, %v8605_v18, %v8607_v25  ;;  %v8651_v36 = vld [vmem:[#allocation4 + $0x28] sm:$0xff] }
0x1540   : > { %8640 = vst [vmem:[#allocation4 + $0x40] sm:$0x3] %v8636_v2  ;;  %v8637_v24 = vmul.f32 %v8623_v5, %v8611_v48  ;;  %v8609_v3 = vpop.permute.xlu0 %8608  ;;  %v9741_v62 = vpack.c.bf16 %v8651_v36, %v8647_v0 }
0x1541   : > { %v8610_v13 = vsel %vm644_vm7, %v8607_v25, %v8609_v3  ;;  %v8613_v29 = vsel %vm644_vm7, %v8609_v3, %v8603_v41  ;;  %v8652_v14 = vld [vmem:[#allocation4 + $0x30] sm:$0xff]  ;;  %v8653_v38 = vld [vmem:[#allocation4 + $0x38] sm:$0xff] }
0x1542   : > { %8641 = vst [vmem:[#allocation4 + $0x48] sm:$0x3] %v8637_v24  ;;  %v8638_v63 = vmul.f32 %v8627_v1, %v8610_v13  ;;  %v8639_v60 = vmul.f32 %v8631_v44, %v8613_v29  ;;  %9742 = vmatprep.subr.bf16.mxu0 %v9741_v62  ;;  %v8648_v50 = vld [vmem:[#allocation4 + $0x10] sm:$0xff] }
0x1543   : > { %v8646_v37 = vld [vmem:[#allocation4] sm:$0xff]  ;;  %v8649_v53 = vld [vmem:[#allocation4 + $0x18] sm:$0xff]  ;;  %v9747_v11 = vpack.c.bf16 %v8652_v14, %v8648_v50 }
0x1544   : > { %8642 = vst [vmem:[#allocation4 + $0x50] sm:$0x3] %v8638_v63  ;;  %8643 = vst [vmem:[#allocation4 + $0x58] sm:$0x3] %v8639_v60  ;;  %v9743_v4 = vpack.c.bf16 %v8650_v58, %v8646_v37  ;;  %v9745_v8 = vpack.c.bf16 %v8653_v38, %v8649_v53 }
0x1546   : > { %9744 = vmatpush1.bf16.msra.mxu0 %v9743_v4  ;;  %9746 = vmatprep.subr.bf16.mxu1 %v9745_v8 }
0x1547   : > { %9748 = vmatpush1.bf16.msra.mxu1 %v9747_v11  ;;  %v8654_v33 = vld [vmem:[#allocation4 + $0x40] sm:$0x3] }
0x1549   : > { %v8655_v15 = vld [vmem:[#allocation4 + $0x48] sm:$0x3] }
0x154a   : > { %9081 = vmatprep.subr.msk.mxu0 %vm703_vm8, %v8655_v15 }
0x154b   : > { %9082 = vmatpush1.msk.msra.mxu0 %vm703_vm8, %v8654_v33  ;;  %v8657_v22 = vld [vmem:[#allocation4 + $0x58] sm:$0x3]  ;;  %v8656_v39 = vld [vmem:[#allocation4 + $0x50] sm:$0x3] }
0x154c   : > { %9083 = vmatmul.mubr.msk.f32.vlgmr.msra.gmra.mrb[36].mxu0 %vm699_vm9, %v8644_v42  ;;  %9084 = vmatprep.subr.msk.mxu1 %vm703_vm8, %v8657_v22 }
0x154d   : > { %9085 = vmatpush1.msk.msra.mxu1 %vm703_vm8, %v8656_v39 }
0x154e   : > { %9086 = vmatmul.mubr.msk.f32.vlgmr.msra.gmra.mrb[36].mxu1 %vm699_vm9, %v8644_v42 }
0x154f   : > { %v8661_v26 = vpop.permute.xlu1 %8660 }
0x161f   : > { %v8744_v27 = vpop.f32.mrb[36].mxu0 }
0x1620   : > { %v8745_v6 = vadd.f32 %v8744_v27, %v8661_v26  ;;  %v8746_v51 = vpop.f32.mrb[37].mxu0 }
0x1621   : > { %v8747_v9 = vadd.f32 %v8746_v51, %v8661_v26  ;;  %v8815_v23 = vpop.f32.mrb[36].mxu1 }
0x1622   : > { %v8820_v16 = vsub.f32 0.0, %v8745_v6  ;;  %v8816_v32 = vadd.f32 %v8815_v23, %v8661_v26  ;;  %v8817_v34 = vpop.f32.mrb[37].mxu1 }
0x1623   : > { %v8821_v54 = vsub.f32 0.0, %v8747_v9  ;;  %v8818_v56 = vadd.f32 %v8817_v34, %v8661_v26 }
0x1624   : > { %v8824_v47 = vmul.f32 1.442695, %v8820_v16  ;;  %v8822_v59 = vsub.f32 0.0, %v8816_v32 }
0x1625   : > { %v8826_v45 = vmul.f32 1.442695, %v8821_v54  ;;  %v8823_v35 = vsub.f32 0.0, %v8818_v56 }
0x1626   : > { %9810 = vpow2.f32 %v8824_v47  ;;  %v8828_v10 = vmul.f32 1.442695, %v8822_v59 }
0x1627   : > { %9812 = vpow2.f32 %v8826_v45  ;;  %v8830_v7 = vmul.f32 1.442695, %v8823_v35 }
0x1628   : > { %9814 = vpow2.f32 %v8828_v10 }
0x1629   : > { %9816 = vpow2.f32 %v8830_v7 }
0x1630   : > { %v9811_v20 = vpop.eup %9810 }
0x1631   : > { %v9813_v12 = vpop.eup %9812  ;;  %v8832_v40 = vadd.f32 1.0, %v9811_v20 }
0x1632   : > { %v9815_v17 = vpop.eup %9814  ;;  %v8833_v19 = vadd.f32 1.0, %v9813_v12 }
0x1633   : > { %v9817_v31 = vpop.eup %9816  ;;  %9818 = vrcp.f32 %v8832_v40  ;;  %v8834_v61 = vadd.f32 1.0, %v9815_v17 }
0x1634   : > { %9820 = vrcp.f32 %v8833_v19  ;;  %v8835_v57 = vadd.f32 1.0, %v9817_v31 }
0x1635   : > { %9822 = vrcp.f32 %v8834_v61 }
0x1636   : > { %9824 = vrcp.f32 %v8835_v57 }
0x163d   : > { %v9819_v46 = vpop.eup %9818 }
0x163e   : > { %v9821_v43 = vpop.eup %9820 }
0x163f   : > { %v9823_v30 = vpop.eup %9822  ;;  %v8848_v49 = vcombine.low %v9819_v46, %v9821_v43 }
0x1640   : > { %v9825_v52 = vpop.eup %9824 }
0x1641   : > { %v8849_v41 = vcombine.low %v9823_v30, %v9825_v52  ;;  %v8856_v28 = vrot.slane %v8848_v49, %v15149_v55 }
0x1643   : > { %v8863_v18 = vrot.slane %v8849_v41, %v15149_v55 }
0x1645   : > { %v8864_v5 = vcombine.low %v8856_v28, %v8863_v18 }
0x1647   : > { %8866 = vst [vmem:[%s226_s25] sm:$0xff] %v8864_v5 }
0x1648 PF: > { %s15_s18 = sadd.s32 1, %s9832_s18  }
0x1649   : > { %p12_p4 = scmp.ge.s32.totalorder %s15_s18, 4  }
0x164b   :  { %14 = sbr.rel (!%p12_p4) target bundleno = 1 (0x1), region = 79 }

</bundles_post_ra>
